<compile_context>
chip_gen: v7x
topology: tpu7x:2x2x1
jax: 0.10.0
libtpu: 0.0.40
codegen_flags: <defaults>
</compile_context>

<pallas_src>
import math
import jax
import jax.numpy as jnp
from jax.experimental import pallas as pl
from jax.experimental.pallas import tpu as pltpu


# ---------------------------------------------------------------------------
# Fused encoder kernel factory (static T, B, N, channel list, latent dim D).
# ---------------------------------------------------------------------------
def _make_encoder_kernel(T, B, N, channel_list, D):
    BN = B * N
    L = len(channel_list) - 1
    c_total = sum(channel_list[1:])

    def kernel(*refs):
        it = iter(refs)
        xs_ref = next(it)                      # (T*BN, Cin0)
        adj_ref = next(it)                     # (BN, BN) block-diag adjacency
        layer_refs = [tuple(next(it) for _ in range(5)) for _ in range(L)]
        w_head_ref = next(it)                  # (c_total, BN, 2D)
        b_head_ref = next(it)                  # (1, 2D)
        eps_ref = next(it)                     # (B, D)
        z_ref = next(it)
        mu_ref = next(it)
        lv_ref = next(it)
        xp_refs = [next(it) for _ in range(L)]         # (T*BN, 3C_l) scratch
        hseq_refs = [next(it) for _ in range(L - 1)]   # (T*BN, C_l) scratch

        def mm(a, b):
            # Degenerate contraction (K == 1) is just a broadcast multiply.
            if a.shape[1] == 1:
                return a * b
            return jnp.dot(a, b, preferred_element_type=jnp.float32)

        adj = adj_ref[...]                     # loaded once, reused all steps

        h_last = []
        src_ref = xs_ref
        for l in range(L):
            wx_ref, whzr_ref, whh_ref, bzr_ref, bh_ref = layer_refs[l]
            C = channel_list[l + 1]

            # Hoisted, time-parallel input projection: one big matmul.
            xp_refs[l][...] = mm(src_ref[...], wx_ref[...])      # (T*BN, 3C)

            whzr = whzr_ref[...]               # (C, 2C) = [Whz | Whr]
            whh = whh_ref[...]                 # (C, C)
            bzr = bzr_ref[...]                 # (1, 2C) = [bz | br]
            bh = bh_ref[...]                   # (1, C)

            h = jnp.zeros((BN, C), jnp.float32)
            for t in range(T):                 # static unroll; T is small
                xp_t = xp_refs[l][pl.ds(t * BN, BN), :]          # (BN, 3C)
                zr_inner = xp_t[:, : 2 * C] + mm(h, whzr)        # (BN, 2C)
                zr = jax.nn.sigmoid(mm(adj, zr_inner) + bzr)     # fused z|r
                z_g = zr[:, :C]
                r_g = zr[:, C:]
                c_inner = xp_t[:, 2 * C:] + mm(r_g * h, whh)     # (BN, C)
                h_cand = jnp.tanh(mm(adj, c_inner) + bh)
                h = z_g * h + (1.0 - z_g) * h_cand
                if l < L - 1:
                    hseq_refs[l][pl.ds(t * BN, BN), :] = h
            h_last.append(h)
            if l < L - 1:
                src_ref = hseq_refs[l]

        # ----- VAE head (mu/logvar Linears fused into one weight) -----
        # pre[b, d] = sum_{n, c} h_cat[b*N+n, c] * W[n*c_total + c, d] + bias
        # with W rows pre-rearranged wrapper-side into w_head[c, b*N+n, d].
        xs_cat = jnp.concatenate(h_last, axis=1)                 # (BN, c_total)
        acc = jnp.zeros((BN, 2 * D), jnp.float32)
        for c in range(c_total):               # static; c_total is small
            acc = acc + xs_cat[:, c:c + 1] * w_head_ref[c]
        rows = [jnp.sum(acc[b * N:(b + 1) * N, :], axis=0, keepdims=True)
                for b in range(B)]
        pre = jnp.concatenate(rows, axis=0) + b_head_ref[...]    # (B, 2D)

        mu = jax.nn.sigmoid(pre[:, :D])
        lv = jax.nn.sigmoid(pre[:, D:])
        std = jnp.exp(0.5 * lv)
        z_ref[...] = mu + eps_ref[...] * std
        mu_ref[...] = mu
        lv_ref[...] = lv

    return kernel


# ---------------------------------------------------------------------------
# Forward wrapper: weight fusion / layout prep in plain JAX, one pallas_call.
# ---------------------------------------------------------------------------
def encoder_rnn_forward(params, xs_seq, adj, eps_key, sample_number=50):
    T, B, N, cin = xs_seq.shape
    channel_list = [cin] + [p["whh"].shape[0] for p in params["gr_list"]]
    L = len(channel_list) - 1
    c_total = sum(channel_list[1:])
    D = params["w1"].shape[1]
    BN = B * N
    f32 = jnp.float32

    # (T, B, N, Cin) -> (T*B*N, Cin); row index = t*B*N + b*N + n.
    xs2d = xs_seq.astype(f32).reshape(T * BN, cin)
    # Block-diagonal adjacency: applies adj to each batch block of nodes.
    adj_bd = jnp.kron(jnp.eye(B, dtype=f32), adj.astype(f32))     # (BN, BN)

    inputs = [xs2d, adj_bd]
    for p in params["gr_list"]:
        wx = jnp.concatenate([p["wxz"], p["wxr"], p["wxh"]], axis=1)  # (Cin,3C)
        whzr = jnp.concatenate([p["whz"], p["whr"]], axis=1)          # (C, 2C)
        bzr = jnp.concatenate([p["bz"], p["br"]], axis=1)             # (1, 2C)
        inputs += [wx, whzr, p["whh"], bzr, p["bh"]]

    # Fused + rearranged head weights:
    #   w_head[c, b*N + n, :] == concat(w1, w2)[n*c_total + c, :]
    # so the kernel consumes the (B*N, c_total) hidden layout directly and the
    # PyTorch `xs.view(batch, -1)` flatten is absorbed into the weight layout.
    w_cat = jnp.concatenate([params["w1"], params["w2"]], axis=1)     # (N*Ct, 2D)
    w_head = jnp.tile(
        w_cat.reshape(N, c_total, 2 * D).transpose(1, 0, 2), (1, B, 1))
    b_head = jnp.concatenate([params["b1"], params["b2"]], axis=1)    # (1, 2D)

    # eps = mean of `sample_number` standard-normal draws (matches reference).
    eps = jnp.mean(
        jax.random.normal(eps_key, (sample_number, B, D), dtype=f32), axis=0)

    inputs += [w_head, b_head, eps]

    def full(shape):
        nd = len(shape)
        return pl.BlockSpec(tuple(shape), lambda i, _nd=nd: (0,) * _nd)

    scratch = [pltpu.VMEM((T * BN, 3 * channel_list[l + 1]), f32)
               for l in range(L)]
    scratch += [pltpu.VMEM((T * BN, channel_list[l + 1]), f32)
                for l in range(L - 1)]

    kernel = _make_encoder_kernel(T, B, N, channel_list, D)

    z, mu, logvar = pl.pallas_call(
        kernel,
        out_shape=tuple(jax.ShapeDtypeStruct((B, D), f32) for _ in range(3)),
        grid=(1,),
        in_specs=[full(a.shape) for a in inputs],
        out_specs=tuple(full((B, D)) for _ in range(3)),
        scratch_shapes=scratch,
        compiler_params=pltpu.CompilerParams(
            dimension_semantics=("arbitrary",)),
    )(*inputs)
    return z, mu, logvar


# ---------------------------------------------------------------------------
# Parameter init (deterministic, PyTorch-Linear-style uniform bounds).
# ---------------------------------------------------------------------------
def _uniform(key, shape, fan_in):
    bound = 1.0 / math.sqrt(max(fan_in, 1))
    return jax.random.uniform(key, shape, jnp.float32, -bound, bound)


def init_gcgru_params(key, cin, cout):
    ks = jax.random.split(key, 9)
    return {
        "wxz": _uniform(ks[0], (cin, cout), cin),
        "whz": _uniform(ks[1], (cout, cout), cout),
        "bz": _uniform(ks[2], (1, cout), cout),
        "wxr": _uniform(ks[3], (cin, cout), cin),
        "whr": _uniform(ks[4], (cout, cout), cout),
        "br": _uniform(ks[5], (1, cout), cout),
        "wxh": _uniform(ks[6], (cin, cout), cin),
        "whh": _uniform(ks[7], (cout, cout), cout),
        "bh": _uniform(ks[8], (1, cout), cout),
    }


def init_encoder_params(key, channel_num_list, dense_num_list):
    keys = jax.random.split(key, len(channel_num_list) - 1 + 4)
    gr_params = [
        init_gcgru_params(keys[i], channel_num_list[i], channel_num_list[i + 1])
        for i in range(len(channel_num_list) - 1)
    ]
    f_in, f_out = dense_num_list[0], dense_num_list[-1]
    ko = keys[len(channel_num_list) - 1:]
    return {
        "gr_list": gr_params,
        "w1": _uniform(ko[0], (f_in, f_out), f_in),
        "b1": _uniform(ko[1], (1, f_out), f_in),
        "w2": _uniform(ko[2], (f_in, f_out), f_in),
        "b2": _uniform(ko[3], (1, f_out), f_in),
    }


# ---------------------------------------------------------------------------
# Pure-JAX reference of the same forward pass (for correctness checking).
# ---------------------------------------------------------------------------
def _reference_forward(params, xs_seq, adj, eps_key, sample_number=50):
    inp = xs_seq.astype(jnp.float32)
    adj = adj.astype(jnp.float32)
    last = []
    for p in params["gr_list"]:
        T, B, N, _ = inp.shape
        C = p["whh"].shape[0]
        h = jnp.zeros((B, N, C), jnp.float32)

        def gc(m, w):
            return jnp.einsum("nm,bmk->bnk", adj, m @ w)

        outs = []
        for t in range(T):
            x = inp[t]
            z = jax.nn.sigmoid(gc(x, p["wxz"]) + gc(h, p["whz"]) + p["bz"])
            r = jax.nn.sigmoid(gc(x, p["wxr"]) + gc(h, p["whr"]) + p["br"])
            hc = jnp.tanh(gc(x, p["wxh"]) + gc(r * h, p["whh"]) + p["bh"])
            h = z * h + (1.0 - z) * hc
            outs.append(h)
        inp = jnp.stack(outs, axis=0)
        last.append(h)

    xs = jnp.concatenate(last, axis=2)
    B = xs.shape[0]
    xs = xs.reshape(B, -1)
    D = params["w1"].shape[1]
    mu = jax.nn.sigmoid(xs @ params["w1"] + params["b1"])
    lv = jax.nn.sigmoid(xs @ params["w2"] + params["b2"])
    eps = jnp.mean(jax.random.normal(eps_key, (sample_number, B, D),
                                     jnp.float32), axis=0)
    z = mu + eps * jnp.exp(0.5 * lv)
    return z, mu, lv


# ---------------------------------------------------------------------------
if __name__ == "__main__":
    key = jax.random.PRNGKey(0)
    k_param, k_x, k_adj, k_eps = jax.random.split(key, 4)

    channel_num_list = [1, 4, 8]
    nodes_nums = 24
    dense_num_list = [sum(channel_num_list[1:]) * nodes_nums, 5]   # [288, 5]
    T, B, N = 8, 2, nodes_nums

    # Deterministic inputs.
    xs_seq = jax.random.normal(k_x, (T, B, N, channel_num_list[0]),
                               dtype=jnp.float32)
    a = jax.random.uniform(k_adj, (N, N), jnp.float32)
    a = 0.5 * (a + a.T) + jnp.eye(N, dtype=jnp.float32)
    adj = a / jnp.sum(a, axis=1, keepdims=True)    # row-normalized adjacency

    params = init_encoder_params(k_param, channel_num_list, dense_num_list)

    fwd = jax.jit(lambda p, x, ad, k: encoder_rnn_forward(p, x, ad, k))
    z, mu, logvar = fwd(params, xs_seq, adj, k_eps)
    jax.block_until_ready((z, mu, logvar))

    assert z.shape == (B, dense_num_list[-1])
    assert mu.shape == (B, dense_num_list[-1])
    assert logvar.shape == (B, dense_num_list[-1])

    # Numerical check against the pure-JAX reference.
    z_r, mu_r, lv_r = _reference_forward(params, xs_seq, adj, k_eps)
    ok = (jnp.allclose(z, z_r, atol=1e-3, rtol=1e-3)
          and jnp.allclose(mu, mu_r, atol=1e-3, rtol=1e-3)
          and jnp.allclose(logvar, lv_r, atol=1e-3, rtol=1e-3))
    assert bool(ok), "Pallas kernel output mismatch vs pure-JAX reference"

    print("KERNEL_OK")
</pallas_src>

<mosaic_0001>
module attributes {stable_mosaic.version = 11 : i64} {
  func.func @kernel(%arg0: i32, %arg1: memref<384x1xf32, #tpu.memory_space<vmem>>, %arg2: memref<48x48xf32, #tpu.memory_space<vmem>>, %arg3: memref<1x12xf32, #tpu.memory_space<vmem>>, %arg4: memref<4x8xf32, #tpu.memory_space<vmem>>, %arg5: memref<4x4xf32, #tpu.memory_space<vmem>>, %arg6: memref<1x8xf32, #tpu.memory_space<vmem>>, %arg7: memref<1x4xf32, #tpu.memory_space<vmem>>, %arg8: memref<4x24xf32, #tpu.memory_space<vmem>>, %arg9: memref<8x16xf32, #tpu.memory_space<vmem>>, %arg10: memref<8x8xf32, #tpu.memory_space<vmem>>, %arg11: memref<1x16xf32, #tpu.memory_space<vmem>>, %arg12: memref<1x8xf32, #tpu.memory_space<vmem>>, %arg13: memref<12x48x10xf32, #tpu.memory_space<vmem>>, %arg14: memref<1x10xf32, #tpu.memory_space<vmem>>, %arg15: memref<2x5xf32, #tpu.memory_space<vmem>>, %arg16: memref<2x5xf32, #tpu.memory_space<vmem>>, %arg17: memref<2x5xf32, #tpu.memory_space<vmem>>, %arg18: memref<2x5xf32, #tpu.memory_space<vmem>>, %arg19: memref<384x12xf32, #tpu.memory_space<vmem>>, %arg20: memref<384x24xf32, #tpu.memory_space<vmem>>, %arg21: memref<384x4xf32, #tpu.memory_space<vmem>>) attributes {dimension_semantics = [#tpu.dimension_semantics<arbitrary>], iteration_bounds = array<i64: 1>, scalar_prefetch = 0 : i64, scratch_operands = 3 : i64, tpu.core_type = #tpu.core_type<tc>, window_params = [{pipeline_mode = #tpu.pipeline_mode<synchronous>, transform_indices = @transform_0, window_bounds = array<i64: 384, 1>}, {pipeline_mode = #tpu.pipeline_mode<synchronous>, transform_indices = @transform_1, window_bounds = array<i64: 48, 48>}, {pipeline_mode = #tpu.pipeline_mode<synchronous>, transform_indices = @transform_2, window_bounds = array<i64: 1, 12>}, {pipeline_mode = #tpu.pipeline_mode<synchronous>, transform_indices = @transform_3, window_bounds = array<i64: 4, 8>}, {pipeline_mode = #tpu.pipeline_mode<synchronous>, transform_indices = @transform_4, window_bounds = array<i64: 4, 4>}, {pipeline_mode = #tpu.pipeline_mode<synchronous>, transform_indices = @transform_5, window_bounds = array<i64: 1, 8>}, {pipeline_mode = #tpu.pipeline_mode<synchronous>, transform_indices = @transform_6, window_bounds = array<i64: 1, 4>}, {pipeline_mode = #tpu.pipeline_mode<synchronous>, transform_indices = @transform_7, window_bounds = array<i64: 4, 24>}, {pipeline_mode = #tpu.pipeline_mode<synchronous>, transform_indices = @transform_8, window_bounds = array<i64: 8, 16>}, {pipeline_mode = #tpu.pipeline_mode<synchronous>, transform_indices = @transform_9, window_bounds = array<i64: 8, 8>}, {pipeline_mode = #tpu.pipeline_mode<synchronous>, transform_indices = @transform_10, window_bounds = array<i64: 1, 16>}, {pipeline_mode = #tpu.pipeline_mode<synchronous>, transform_indices = @transform_11, window_bounds = array<i64: 1, 8>}, {pipeline_mode = #tpu.pipeline_mode<synchronous>, transform_indices = @transform_12, window_bounds = array<i64: 12, 48, 10>}, {pipeline_mode = #tpu.pipeline_mode<synchronous>, transform_indices = @transform_13, window_bounds = array<i64: 1, 10>}, {pipeline_mode = #tpu.pipeline_mode<synchronous>, transform_indices = @transform_14, window_bounds = array<i64: 2, 5>}, {pipeline_mode = #tpu.pipeline_mode<synchronous>, transform_indices = @transform_15, window_bounds = array<i64: 2, 5>}, {pipeline_mode = #tpu.pipeline_mode<synchronous>, transform_indices = @transform_16, window_bounds = array<i64: 2, 5>}, {pipeline_mode = #tpu.pipeline_mode<synchronous>, transform_indices = @transform_17, window_bounds = array<i64: 2, 5>}]} {
    %c0 = arith.constant 0 : index
    %c0_0 = arith.constant 0 : index
    %0 = vector.load %arg2[%c0, %c0_0] : memref<48x48xf32, #tpu.memory_space<vmem>>, vector<48x48xf32>
    %c0_1 = arith.constant 0 : index
    %c0_2 = arith.constant 0 : index
    %1 = vector.load %arg1[%c0_1, %c0_2] : memref<384x1xf32, #tpu.memory_space<vmem>>, vector<384x1xf32>
    %c0_3 = arith.constant 0 : index
    %c0_4 = arith.constant 0 : index
    %2 = vector.load %arg3[%c0_3, %c0_4] : memref<1x12xf32, #tpu.memory_space<vmem>>, vector<1x12xf32>
    %3 = vector.broadcast %1 : vector<384x1xf32> to vector<384x12xf32>
    %4 = vector.broadcast %2 : vector<1x12xf32> to vector<384x12xf32>
    %5 = arith.mulf %3, %4 : vector<384x12xf32>
    %c0_5 = arith.constant 0 : index
    %c0_6 = arith.constant 0 : index
    %6 = vector.load %arg19[%c0_5, %c0_6] : memref<384x12xf32, #tpu.memory_space<vmem>>, vector<384x12xf32>
    tpu.vector_store %arg19[%c0_5, %c0_6], %5 {strides = array<i32>} : memref<384x12xf32, #tpu.memory_space<vmem>>, vector<384x12xf32>,
    %c0_7 = arith.constant 0 : index
    %c0_8 = arith.constant 0 : index
    %7 = vector.load %arg4[%c0_7, %c0_8] : memref<4x8xf32, #tpu.memory_space<vmem>>, vector<4x8xf32>
    %c0_9 = arith.constant 0 : index
    %c0_10 = arith.constant 0 : index
    %8 = vector.load %arg5[%c0_9, %c0_10] : memref<4x4xf32, #tpu.memory_space<vmem>>, vector<4x4xf32>
    %c0_11 = arith.constant 0 : index
    %c0_12 = arith.constant 0 : index
    %9 = vector.load %arg6[%c0_11, %c0_12] : memref<1x8xf32, #tpu.memory_space<vmem>>, vector<1x8xf32>
    %c0_13 = arith.constant 0 : index
    %c0_14 = arith.constant 0 : index
    %10 = vector.load %arg7[%c0_13, %c0_14] : memref<1x4xf32, #tpu.memory_space<vmem>>, vector<1x4xf32>
    %cst = arith.constant 0.000000e+00 : f32
    %11 = vector.broadcast %cst : f32 to vector<48x4xf32>
    %c0_15 = arith.constant 0 : index
    %c0_16 = arith.constant 0 : index
    %12 = vector.load %arg19[%c0_15, %c0_16] : memref<384x12xf32, #tpu.memory_space<vmem>>, vector<48x12xf32>
    %13 = vector.extract_strided_slice %12 {offsets = [0, 0], sizes = [48, 8], strides = [1, 1]} : vector<48x12xf32> to vector<48x8xf32>
    %cst_17 = arith.constant dense<0.000000e+00> : vector<48x8xf32>
    %14 = tpu.matmul %11, %7, %cst_17 {dimension_numbers = #tpu.dot_dimension_numbers<[1], [0], [0], [1], [0, 0, 1, 1], [], []>} : vector<48x4xf32>, vector<4x8xf32>, vector<48x8xf32> -> vector<48x8xf32>
    %15 = arith.addf %13, %14 : vector<48x8xf32>
    %cst_18 = arith.constant dense<0.000000e+00> : vector<48x8xf32>
    %16 = tpu.matmul %0, %15, %cst_18 {dimension_numbers = #tpu.dot_dimension_numbers<[1], [0], [0], [1], [0, 0, 1, 1], [], []>} : vector<48x48xf32>, vector<48x8xf32>, vector<48x8xf32> -> vector<48x8xf32>
    %17 = vector.broadcast %9 : vector<1x8xf32> to vector<48x8xf32>
    %18 = arith.addf %16, %17 : vector<48x8xf32>
    %19 = arith.negf %18 : vector<48x8xf32>
    %20 = math.exp %19 : vector<48x8xf32>
    %cst_19 = arith.constant 1.000000e+00 : f32
    %21 = vector.broadcast %cst_19 : f32 to vector<48x8xf32>
    %22 = arith.addf %21, %20 : vector<48x8xf32>
    %23 = arith.divf %21, %22 : vector<48x8xf32>
    %24 = vector.extract_strided_slice %23 {offsets = [0, 0], sizes = [48, 4], strides = [1, 1]} : vector<48x8xf32> to vector<48x4xf32>
    %25 = vector.extract_strided_slice %23 {offsets = [0, 4], sizes = [48, 4], strides = [1, 1]} : vector<48x8xf32> to vector<48x4xf32>
    %26 = vector.extract_strided_slice %12 {offsets = [0, 8], sizes = [48, 4], strides = [1, 1]} : vector<48x12xf32> to vector<48x4xf32>
    %27 = arith.mulf %25, %11 : vector<48x4xf32>
    %cst_20 = arith.constant dense<0.000000e+00> : vector<48x4xf32>
    %28 = tpu.matmul %27, %8, %cst_20 {dimension_numbers = #tpu.dot_dimension_numbers<[1], [0], [0], [1], [0, 0, 1, 1], [], []>} : vector<48x4xf32>, vector<4x4xf32>, vector<48x4xf32> -> vector<48x4xf32>
    %29 = arith.addf %26, %28 : vector<48x4xf32>
    %cst_21 = arith.constant dense<0.000000e+00> : vector<48x4xf32>
    %30 = tpu.matmul %0, %29, %cst_21 {dimension_numbers = #tpu.dot_dimension_numbers<[1], [0], [0], [1], [0, 0, 1, 1], [], []>} : vector<48x48xf32>, vector<48x4xf32>, vector<48x4xf32> -> vector<48x4xf32>
    %31 = vector.broadcast %10 : vector<1x4xf32> to vector<48x4xf32>
    %32 = arith.addf %30, %31 : vector<48x4xf32>
    %33 = math.tanh %32 : vector<48x4xf32>
    %34 = arith.mulf %24, %11 : vector<48x4xf32>
    %cst_22 = arith.constant 1.000000e+00 : f32
    %35 = vector.broadcast %cst_22 : f32 to vector<48x4xf32>
    %36 = arith.subf %35, %24 : vector<48x4xf32>
    %37 = arith.mulf %36, %33 : vector<48x4xf32>
    %38 = arith.addf %34, %37 : vector<48x4xf32>
    %c0_23 = arith.constant 0 : index
    %c0_24 = arith.constant 0 : index
    %39 = vector.load %arg21[%c0_23, %c0_24] : memref<384x4xf32, #tpu.memory_space<vmem>>, vector<48x4xf32>
    tpu.vector_store %arg21[%c0_23, %c0_24], %38 {strides = array<i32>} : memref<384x4xf32, #tpu.memory_space<vmem>>, vector<48x4xf32>,
    %c48 = arith.constant 48 : index
    %c0_25 = arith.constant 0 : index
    %40 = vector.load %arg19[%c48, %c0_25] : memref<384x12xf32, #tpu.memory_space<vmem>>, vector<48x12xf32>
    %41 = vector.extract_strided_slice %40 {offsets = [0, 0], sizes = [48, 8], strides = [1, 1]} : vector<48x12xf32> to vector<48x8xf32>
    %cst_26 = arith.constant dense<0.000000e+00> : vector<48x8xf32>
    %42 = tpu.matmul %38, %7, %cst_26 {dimension_numbers = #tpu.dot_dimension_numbers<[1], [0], [0], [1], [0, 0, 1, 1], [], []>} : vector<48x4xf32>, vector<4x8xf32>, vector<48x8xf32> -> vector<48x8xf32>
    %43 = arith.addf %41, %42 : vector<48x8xf32>
    %cst_27 = arith.constant dense<0.000000e+00> : vector<48x8xf32>
    %44 = tpu.matmul %0, %43, %cst_27 {dimension_numbers = #tpu.dot_dimension_numbers<[1], [0], [0], [1], [0, 0, 1, 1], [], []>} : vector<48x48xf32>, vector<48x8xf32>, vector<48x8xf32> -> vector<48x8xf32>
    %45 = vector.broadcast %9 : vector<1x8xf32> to vector<48x8xf32>
    %46 = arith.addf %44, %45 : vector<48x8xf32>
    %47 = arith.negf %46 : vector<48x8xf32>
    %48 = math.exp %47 : vector<48x8xf32>
    %cst_28 = arith.constant 1.000000e+00 : f32
    %49 = vector.broadcast %cst_28 : f32 to vector<48x8xf32>
    %50 = arith.addf %49, %48 : vector<48x8xf32>
    %51 = arith.divf %49, %50 : vector<48x8xf32>
    %52 = vector.extract_strided_slice %51 {offsets = [0, 0], sizes = [48, 4], strides = [1, 1]} : vector<48x8xf32> to vector<48x4xf32>
    %53 = vector.extract_strided_slice %51 {offsets = [0, 4], sizes = [48, 4], strides = [1, 1]} : vector<48x8xf32> to vector<48x4xf32>
    %54 = vector.extract_strided_slice %40 {offsets = [0, 8], sizes = [48, 4], strides = [1, 1]} : vector<48x12xf32> to vector<48x4xf32>
    %55 = arith.mulf %53, %38 : vector<48x4xf32>
    %cst_29 = arith.constant dense<0.000000e+00> : vector<48x4xf32>
    %56 = tpu.matmul %55, %8, %cst_29 {dimension_numbers = #tpu.dot_dimension_numbers<[1], [0], [0], [1], [0, 0, 1, 1], [], []>} : vector<48x4xf32>, vector<4x4xf32>, vector<48x4xf32> -> vector<48x4xf32>
    %57 = arith.addf %54, %56 : vector<48x4xf32>
    %cst_30 = arith.constant dense<0.000000e+00> : vector<48x4xf32>
    %58 = tpu.matmul %0, %57, %cst_30 {dimension_numbers = #tpu.dot_dimension_numbers<[1], [0], [0], [1], [0, 0, 1, 1], [], []>} : vector<48x48xf32>, vector<48x4xf32>, vector<48x4xf32> -> vector<48x4xf32>
    %59 = vector.broadcast %10 : vector<1x4xf32> to vector<48x4xf32>
    %60 = arith.addf %58, %59 : vector<48x4xf32>
    %61 = math.tanh %60 : vector<48x4xf32>
    %62 = arith.mulf %52, %38 : vector<48x4xf32>
    %cst_31 = arith.constant 1.000000e+00 : f32
    %63 = vector.broadcast %cst_31 : f32 to vector<48x4xf32>
    %64 = arith.subf %63, %52 : vector<48x4xf32>
    %65 = arith.mulf %64, %61 : vector<48x4xf32>
    %66 = arith.addf %62, %65 : vector<48x4xf32>
    %c48_32 = arith.constant 48 : index
    %c0_33 = arith.constant 0 : index
    %67 = vector.load %arg21[%c48_32, %c0_33] : memref<384x4xf32, #tpu.memory_space<vmem>>, vector<48x4xf32>
    tpu.vector_store %arg21[%c48_32, %c0_33], %66 {strides = array<i32>} : memref<384x4xf32, #tpu.memory_space<vmem>>, vector<48x4xf32>,
    %c96 = arith.constant 96 : index
    %c0_34 = arith.constant 0 : index
    %68 = vector.load %arg19[%c96, %c0_34] : memref<384x12xf32, #tpu.memory_space<vmem>>, vector<48x12xf32>
    %69 = vector.extract_strided_slice %68 {offsets = [0, 0], sizes = [48, 8], strides = [1, 1]} : vector<48x12xf32> to vector<48x8xf32>
    %cst_35 = arith.constant dense<0.000000e+00> : vector<48x8xf32>
    %70 = tpu.matmul %66, %7, %cst_35 {dimension_numbers = #tpu.dot_dimension_numbers<[1], [0], [0], [1], [0, 0, 1, 1], [], []>} : vector<48x4xf32>, vector<4x8xf32>, vector<48x8xf32> -> vector<48x8xf32>
    %71 = arith.addf %69, %70 : vector<48x8xf32>
    %cst_36 = arith.constant dense<0.000000e+00> : vector<48x8xf32>
    %72 = tpu.matmul %0, %71, %cst_36 {dimension_numbers = #tpu.dot_dimension_numbers<[1], [0], [0], [1], [0, 0, 1, 1], [], []>} : vector<48x48xf32>, vector<48x8xf32>, vector<48x8xf32> -> vector<48x8xf32>
    %73 = vector.broadcast %9 : vector<1x8xf32> to vector<48x8xf32>
    %74 = arith.addf %72, %73 : vector<48x8xf32>
    %75 = arith.negf %74 : vector<48x8xf32>
    %76 = math.exp %75 : vector<48x8xf32>
    %cst_37 = arith.constant 1.000000e+00 : f32
    %77 = vector.broadcast %cst_37 : f32 to vector<48x8xf32>
    %78 = arith.addf %77, %76 : vector<48x8xf32>
    %79 = arith.divf %77, %78 : vector<48x8xf32>
    %80 = vector.extract_strided_slice %79 {offsets = [0, 0], sizes = [48, 4], strides = [1, 1]} : vector<48x8xf32> to vector<48x4xf32>
    %81 = vector.extract_strided_slice %79 {offsets = [0, 4], sizes = [48, 4], strides = [1, 1]} : vector<48x8xf32> to vector<48x4xf32>
    %82 = vector.extract_strided_slice %68 {offsets = [0, 8], sizes = [48, 4], strides = [1, 1]} : vector<48x12xf32> to vector<48x4xf32>
    %83 = arith.mulf %81, %66 : vector<48x4xf32>
    %cst_38 = arith.constant dense<0.000000e+00> : vector<48x4xf32>
    %84 = tpu.matmul %83, %8, %cst_38 {dimension_numbers = #tpu.dot_dimension_numbers<[1], [0], [0], [1], [0, 0, 1, 1], [], []>} : vector<48x4xf32>, vector<4x4xf32>, vector<48x4xf32> -> vector<48x4xf32>
    %85 = arith.addf %82, %84 : vector<48x4xf32>
    %cst_39 = arith.constant dense<0.000000e+00> : vector<48x4xf32>
    %86 = tpu.matmul %0, %85, %cst_39 {dimension_numbers = #tpu.dot_dimension_numbers<[1], [0], [0], [1], [0, 0, 1, 1], [], []>} : vector<48x48xf32>, vector<48x4xf32>, vector<48x4xf32> -> vector<48x4xf32>
    %87 = vector.broadcast %10 : vector<1x4xf32> to vector<48x4xf32>
    %88 = arith.addf %86, %87 : vector<48x4xf32>
    %89 = math.tanh %88 : vector<48x4xf32>
    %90 = arith.mulf %80, %66 : vector<48x4xf32>
    %cst_40 = arith.constant 1.000000e+00 : f32
    %91 = vector.broadcast %cst_40 : f32 to vector<48x4xf32>
    %92 = arith.subf %91, %80 : vector<48x4xf32>
    %93 = arith.mulf %92, %89 : vector<48x4xf32>
    %94 = arith.addf %90, %93 : vector<48x4xf32>
    %c96_41 = arith.constant 96 : index
    %c0_42 = arith.constant 0 : index
    %95 = vector.load %arg21[%c96_41, %c0_42] : memref<384x4xf32, #tpu.memory_space<vmem>>, vector<48x4xf32>
    tpu.vector_store %arg21[%c96_41, %c0_42], %94 {strides = array<i32>} : memref<384x4xf32, #tpu.memory_space<vmem>>, vector<48x4xf32>,
    %c144 = arith.constant 144 : index
    %c0_43 = arith.constant 0 : index
    %96 = vector.load %arg19[%c144, %c0_43] : memref<384x12xf32, #tpu.memory_space<vmem>>, vector<48x12xf32>
    %97 = vector.extract_strided_slice %96 {offsets = [0, 0], sizes = [48, 8], strides = [1, 1]} : vector<48x12xf32> to vector<48x8xf32>
    %cst_44 = arith.constant dense<0.000000e+00> : vector<48x8xf32>
    %98 = tpu.matmul %94, %7, %cst_44 {dimension_numbers = #tpu.dot_dimension_numbers<[1], [0], [0], [1], [0, 0, 1, 1], [], []>} : vector<48x4xf32>, vector<4x8xf32>, vector<48x8xf32> -> vector<48x8xf32>
    %99 = arith.addf %97, %98 : vector<48x8xf32>
    %cst_45 = arith.constant dense<0.000000e+00> : vector<48x8xf32>
    %100 = tpu.matmul %0, %99, %cst_45 {dimension_numbers = #tpu.dot_dimension_numbers<[1], [0], [0], [1], [0, 0, 1, 1], [], []>} : vector<48x48xf32>, vector<48x8xf32>, vector<48x8xf32> -> vector<48x8xf32>
    %101 = vector.broadcast %9 : vector<1x8xf32> to vector<48x8xf32>
    %102 = arith.addf %100, %101 : vector<48x8xf32>
    %103 = arith.negf %102 : vector<48x8xf32>
    %104 = math.exp %103 : vector<48x8xf32>
    %cst_46 = arith.constant 1.000000e+00 : f32
    %105 = vector.broadcast %cst_46 : f32 to vector<48x8xf32>
    %106 = arith.addf %105, %104 : vector<48x8xf32>
    %107 = arith.divf %105, %106 : vector<48x8xf32>
    %108 = vector.extract_strided_slice %107 {offsets = [0, 0], sizes = [48, 4], strides = [1, 1]} : vector<48x8xf32> to vector<48x4xf32>
    %109 = vector.extract_strided_slice %107 {offsets = [0, 4], sizes = [48, 4], strides = [1, 1]} : vector<48x8xf32> to vector<48x4xf32>
    %110 = vector.extract_strided_slice %96 {offsets = [0, 8], sizes = [48, 4], strides = [1, 1]} : vector<48x12xf32> to vector<48x4xf32>
    %111 = arith.mulf %109, %94 : vector<48x4xf32>
    %cst_47 = arith.constant dense<0.000000e+00> : vector<48x4xf32>
    %112 = tpu.matmul %111, %8, %cst_47 {dimension_numbers = #tpu.dot_dimension_numbers<[1], [0], [0], [1], [0, 0, 1, 1], [], []>} : vector<48x4xf32>, vector<4x4xf32>, vector<48x4xf32> -> vector<48x4xf32>
    %113 = arith.addf %110, %112 : vector<48x4xf32>
    %cst_48 = arith.constant dense<0.000000e+00> : vector<48x4xf32>
    %114 = tpu.matmul %0, %113, %cst_48 {dimension_numbers = #tpu.dot_dimension_numbers<[1], [0], [0], [1], [0, 0, 1, 1], [], []>} : vector<48x48xf32>, vector<48x4xf32>, vector<48x4xf32> -> vector<48x4xf32>
    %115 = vector.broadcast %10 : vector<1x4xf32> to vector<48x4xf32>
    %116 = arith.addf %114, %115 : vector<48x4xf32>
    %117 = math.tanh %116 : vector<48x4xf32>
    %118 = arith.mulf %108, %94 : vector<48x4xf32>
    %cst_49 = arith.constant 1.000000e+00 : f32
    %119 = vector.broadcast %cst_49 : f32 to vector<48x4xf32>
    %120 = arith.subf %119, %108 : vector<48x4xf32>
    %121 = arith.mulf %120, %117 : vector<48x4xf32>
    %122 = arith.addf %118, %121 : vector<48x4xf32>
    %c144_50 = arith.constant 144 : index
    %c0_51 = arith.constant 0 : index
    %123 = vector.load %arg21[%c144_50, %c0_51] : memref<384x4xf32, #tpu.memory_space<vmem>>, vector<48x4xf32>
    tpu.vector_store %arg21[%c144_50, %c0_51], %122 {strides = array<i32>} : memref<384x4xf32, #tpu.memory_space<vmem>>, vector<48x4xf32>,
    %c192 = arith.constant 192 : index
    %c0_52 = arith.constant 0 : index
    %124 = vector.load %arg19[%c192, %c0_52] : memref<384x12xf32, #tpu.memory_space<vmem>>, vector<48x12xf32>
    %125 = vector.extract_strided_slice %124 {offsets = [0, 0], sizes = [48, 8], strides = [1, 1]} : vector<48x12xf32> to vector<48x8xf32>
    %cst_53 = arith.constant dense<0.000000e+00> : vector<48x8xf32>
    %126 = tpu.matmul %122, %7, %cst_53 {dimension_numbers = #tpu.dot_dimension_numbers<[1], [0], [0], [1], [0, 0, 1, 1], [], []>} : vector<48x4xf32>, vector<4x8xf32>, vector<48x8xf32> -> vector<48x8xf32>
    %127 = arith.addf %125, %126 : vector<48x8xf32>
    %cst_54 = arith.constant dense<0.000000e+00> : vector<48x8xf32>
    %128 = tpu.matmul %0, %127, %cst_54 {dimension_numbers = #tpu.dot_dimension_numbers<[1], [0], [0], [1], [0, 0, 1, 1], [], []>} : vector<48x48xf32>, vector<48x8xf32>, vector<48x8xf32> -> vector<48x8xf32>
    %129 = vector.broadcast %9 : vector<1x8xf32> to vector<48x8xf32>
    %130 = arith.addf %128, %129 : vector<48x8xf32>
    %131 = arith.negf %130 : vector<48x8xf32>
    %132 = math.exp %131 : vector<48x8xf32>
    %cst_55 = arith.constant 1.000000e+00 : f32
    %133 = vector.broadcast %cst_55 : f32 to vector<48x8xf32>
    %134 = arith.addf %133, %132 : vector<48x8xf32>
    %135 = arith.divf %133, %134 : vector<48x8xf32>
    %136 = vector.extract_strided_slice %135 {offsets = [0, 0], sizes = [48, 4], strides = [1, 1]} : vector<48x8xf32> to vector<48x4xf32>
    %137 = vector.extract_strided_slice %135 {offsets = [0, 4], sizes = [48, 4], strides = [1, 1]} : vector<48x8xf32> to vector<48x4xf32>
    %138 = vector.extract_strided_slice %124 {offsets = [0, 8], sizes = [48, 4], strides = [1, 1]} : vector<48x12xf32> to vector<48x4xf32>
    %139 = arith.mulf %137, %122 : vector<48x4xf32>
    %cst_56 = arith.constant dense<0.000000e+00> : vector<48x4xf32>
    %140 = tpu.matmul %139, %8, %cst_56 {dimension_numbers = #tpu.dot_dimension_numbers<[1], [0], [0], [1], [0, 0, 1, 1], [], []>} : vector<48x4xf32>, vector<4x4xf32>, vector<48x4xf32> -> vector<48x4xf32>
    %141 = arith.addf %138, %140 : vector<48x4xf32>
    %cst_57 = arith.constant dense<0.000000e+00> : vector<48x4xf32>
    %142 = tpu.matmul %0, %141, %cst_57 {dimension_numbers = #tpu.dot_dimension_numbers<[1], [0], [0], [1], [0, 0, 1, 1], [], []>} : vector<48x48xf32>, vector<48x4xf32>, vector<48x4xf32> -> vector<48x4xf32>
    %143 = vector.broadcast %10 : vector<1x4xf32> to vector<48x4xf32>
    %144 = arith.addf %142, %143 : vector<48x4xf32>
    %145 = math.tanh %144 : vector<48x4xf32>
    %146 = arith.mulf %136, %122 : vector<48x4xf32>
    %cst_58 = arith.constant 1.000000e+00 : f32
    %147 = vector.broadcast %cst_58 : f32 to vector<48x4xf32>
    %148 = arith.subf %147, %136 : vector<48x4xf32>
    %149 = arith.mulf %148, %145 : vector<48x4xf32>
    %150 = arith.addf %146, %149 : vector<48x4xf32>
    %c192_59 = arith.constant 192 : index
    %c0_60 = arith.constant 0 : index
    %151 = vector.load %arg21[%c192_59, %c0_60] : memref<384x4xf32, #tpu.memory_space<vmem>>, vector<48x4xf32>
    tpu.vector_store %arg21[%c192_59, %c0_60], %150 {strides = array<i32>} : memref<384x4xf32, #tpu.memory_space<vmem>>, vector<48x4xf32>,
    %c240 = arith.constant 240 : index
    %c0_61 = arith.constant 0 : index
    %152 = vector.load %arg19[%c240, %c0_61] : memref<384x12xf32, #tpu.memory_space<vmem>>, vector<48x12xf32>
    %153 = vector.extract_strided_slice %152 {offsets = [0, 0], sizes = [48, 8], strides = [1, 1]} : vector<48x12xf32> to vector<48x8xf32>
    %cst_62 = arith.constant dense<0.000000e+00> : vector<48x8xf32>
    %154 = tpu.matmul %150, %7, %cst_62 {dimension_numbers = #tpu.dot_dimension_numbers<[1], [0], [0], [1], [0, 0, 1, 1], [], []>} : vector<48x4xf32>, vector<4x8xf32>, vector<48x8xf32> -> vector<48x8xf32>
    %155 = arith.addf %153, %154 : vector<48x8xf32>
    %cst_63 = arith.constant dense<0.000000e+00> : vector<48x8xf32>
    %156 = tpu.matmul %0, %155, %cst_63 {dimension_numbers = #tpu.dot_dimension_numbers<[1], [0], [0], [1], [0, 0, 1, 1], [], []>} : vector<48x48xf32>, vector<48x8xf32>, vector<48x8xf32> -> vector<48x8xf32>
    %157 = vector.broadcast %9 : vector<1x8xf32> to vector<48x8xf32>
    %158 = arith.addf %156, %157 : vector<48x8xf32>
    %159 = arith.negf %158 : vector<48x8xf32>
    %160 = math.exp %159 : vector<48x8xf32>
    %cst_64 = arith.constant 1.000000e+00 : f32
    %161 = vector.broadcast %cst_64 : f32 to vector<48x8xf32>
    %162 = arith.addf %161, %160 : vector<48x8xf32>
    %163 = arith.divf %161, %162 : vector<48x8xf32>
    %164 = vector.extract_strided_slice %163 {offsets = [0, 0], sizes = [48, 4], strides = [1, 1]} : vector<48x8xf32> to vector<48x4xf32>
    %165 = vector.extract_strided_slice %163 {offsets = [0, 4], sizes = [48, 4], strides = [1, 1]} : vector<48x8xf32> to vector<48x4xf32>
    %166 = vector.extract_strided_slice %152 {offsets = [0, 8], sizes = [48, 4], strides = [1, 1]} : vector<48x12xf32> to vector<48x4xf32>
    %167 = arith.mulf %165, %150 : vector<48x4xf32>
    %cst_65 = arith.constant dense<0.000000e+00> : vector<48x4xf32>
    %168 = tpu.matmul %167, %8, %cst_65 {dimension_numbers = #tpu.dot_dimension_numbers<[1], [0], [0], [1], [0, 0, 1, 1], [], []>} : vector<48x4xf32>, vector<4x4xf32>, vector<48x4xf32> -> vector<48x4xf32>
    %169 = arith.addf %166, %168 : vector<48x4xf32>
    %cst_66 = arith.constant dense<0.000000e+00> : vector<48x4xf32>
    %170 = tpu.matmul %0, %169, %cst_66 {dimension_numbers = #tpu.dot_dimension_numbers<[1], [0], [0], [1], [0, 0, 1, 1], [], []>} : vector<48x48xf32>, vector<48x4xf32>, vector<48x4xf32> -> vector<48x4xf32>
    %171 = vector.broadcast %10 : vector<1x4xf32> to vector<48x4xf32>
    %172 = arith.addf %170, %171 : vector<48x4xf32>
    %173 = math.tanh %172 : vector<48x4xf32>
    %174 = arith.mulf %164, %150 : vector<48x4xf32>
    %cst_67 = arith.constant 1.000000e+00 : f32
    %175 = vector.broadcast %cst_67 : f32 to vector<48x4xf32>
    %176 = arith.subf %175, %164 : vector<48x4xf32>
    %177 = arith.mulf %176, %173 : vector<48x4xf32>
    %178 = arith.addf %174, %177 : vector<48x4xf32>
    %c240_68 = arith.constant 240 : index
    %c0_69 = arith.constant 0 : index
    %179 = vector.load %arg21[%c240_68, %c0_69] : memref<384x4xf32, #tpu.memory_space<vmem>>, vector<48x4xf32>
    tpu.vector_store %arg21[%c240_68, %c0_69], %178 {strides = array<i32>} : memref<384x4xf32, #tpu.memory_space<vmem>>, vector<48x4xf32>,
    %c288 = arith.constant 288 : index
    %c0_70 = arith.constant 0 : index
    %180 = vector.load %arg19[%c288, %c0_70] : memref<384x12xf32, #tpu.memory_space<vmem>>, vector<48x12xf32>
    %181 = vector.extract_strided_slice %180 {offsets = [0, 0], sizes = [48, 8], strides = [1, 1]} : vector<48x12xf32> to vector<48x8xf32>
    %cst_71 = arith.constant dense<0.000000e+00> : vector<48x8xf32>
    %182 = tpu.matmul %178, %7, %cst_71 {dimension_numbers = #tpu.dot_dimension_numbers<[1], [0], [0], [1], [0, 0, 1, 1], [], []>} : vector<48x4xf32>, vector<4x8xf32>, vector<48x8xf32> -> vector<48x8xf32>
    %183 = arith.addf %181, %182 : vector<48x8xf32>
    %cst_72 = arith.constant dense<0.000000e+00> : vector<48x8xf32>
    %184 = tpu.matmul %0, %183, %cst_72 {dimension_numbers = #tpu.dot_dimension_numbers<[1], [0], [0], [1], [0, 0, 1, 1], [], []>} : vector<48x48xf32>, vector<48x8xf32>, vector<48x8xf32> -> vector<48x8xf32>
    %185 = vector.broadcast %9 : vector<1x8xf32> to vector<48x8xf32>
    %186 = arith.addf %184, %185 : vector<48x8xf32>
    %187 = arith.negf %186 : vector<48x8xf32>
    %188 = math.exp %187 : vector<48x8xf32>
    %cst_73 = arith.constant 1.000000e+00 : f32
    %189 = vector.broadcast %cst_73 : f32 to vector<48x8xf32>
    %190 = arith.addf %189, %188 : vector<48x8xf32>
    %191 = arith.divf %189, %190 : vector<48x8xf32>
    %192 = vector.extract_strided_slice %191 {offsets = [0, 0], sizes = [48, 4], strides = [1, 1]} : vector<48x8xf32> to vector<48x4xf32>
    %193 = vector.extract_strided_slice %191 {offsets = [0, 4], sizes = [48, 4], strides = [1, 1]} : vector<48x8xf32> to vector<48x4xf32>
    %194 = vector.extract_strided_slice %180 {offsets = [0, 8], sizes = [48, 4], strides = [1, 1]} : vector<48x12xf32> to vector<48x4xf32>
    %195 = arith.mulf %193, %178 : vector<48x4xf32>
    %cst_74 = arith.constant dense<0.000000e+00> : vector<48x4xf32>
    %196 = tpu.matmul %195, %8, %cst_74 {dimension_numbers = #tpu.dot_dimension_numbers<[1], [0], [0], [1], [0, 0, 1, 1], [], []>} : vector<48x4xf32>, vector<4x4xf32>, vector<48x4xf32> -> vector<48x4xf32>
    %197 = arith.addf %194, %196 : vector<48x4xf32>
    %cst_75 = arith.constant dense<0.000000e+00> : vector<48x4xf32>
    %198 = tpu.matmul %0, %197, %cst_75 {dimension_numbers = #tpu.dot_dimension_numbers<[1], [0], [0], [1], [0, 0, 1, 1], [], []>} : vector<48x48xf32>, vector<48x4xf32>, vector<48x4xf32> -> vector<48x4xf32>
    %199 = vector.broadcast %10 : vector<1x4xf32> to vector<48x4xf32>
    %200 = arith.addf %198, %199 : vector<48x4xf32>
    %201 = math.tanh %200 : vector<48x4xf32>
    %202 = arith.mulf %192, %178 : vector<48x4xf32>
    %cst_76 = arith.constant 1.000000e+00 : f32
    %203 = vector.broadcast %cst_76 : f32 to vector<48x4xf32>
    %204 = arith.subf %203, %192 : vector<48x4xf32>
    %205 = arith.mulf %204, %201 : vector<48x4xf32>
    %206 = arith.addf %202, %205 : vector<48x4xf32>
    %c288_77 = arith.constant 288 : index
    %c0_78 = arith.constant 0 : index
    %207 = vector.load %arg21[%c288_77, %c0_78] : memref<384x4xf32, #tpu.memory_space<vmem>>, vector<48x4xf32>
    tpu.vector_store %arg21[%c288_77, %c0_78], %206 {strides = array<i32>} : memref<384x4xf32, #tpu.memory_space<vmem>>, vector<48x4xf32>,
    %c336 = arith.constant 336 : index
    %c0_79 = arith.constant 0 : index
    %208 = vector.load %arg19[%c336, %c0_79] : memref<384x12xf32, #tpu.memory_space<vmem>>, vector<48x12xf32>
    %209 = vector.extract_strided_slice %208 {offsets = [0, 0], sizes = [48, 8], strides = [1, 1]} : vector<48x12xf32> to vector<48x8xf32>
    %cst_80 = arith.constant dense<0.000000e+00> : vector<48x8xf32>
    %210 = tpu.matmul %206, %7, %cst_80 {dimension_numbers = #tpu.dot_dimension_numbers<[1], [0], [0], [1], [0, 0, 1, 1], [], []>} : vector<48x4xf32>, vector<4x8xf32>, vector<48x8xf32> -> vector<48x8xf32>
    %211 = arith.addf %209, %210 : vector<48x8xf32>
    %cst_81 = arith.constant dense<0.000000e+00> : vector<48x8xf32>
    %212 = tpu.matmul %0, %211, %cst_81 {dimension_numbers = #tpu.dot_dimension_numbers<[1], [0], [0], [1], [0, 0, 1, 1], [], []>} : vector<48x48xf32>, vector<48x8xf32>, vector<48x8xf32> -> vector<48x8xf32>
    %213 = vector.broadcast %9 : vector<1x8xf32> to vector<48x8xf32>
    %214 = arith.addf %212, %213 : vector<48x8xf32>
    %215 = arith.negf %214 : vector<48x8xf32>
    %216 = math.exp %215 : vector<48x8xf32>
    %cst_82 = arith.constant 1.000000e+00 : f32
    %217 = vector.broadcast %cst_82 : f32 to vector<48x8xf32>
    %218 = arith.addf %217, %216 : vector<48x8xf32>
    %219 = arith.divf %217, %218 : vector<48x8xf32>
    %220 = vector.extract_strided_slice %219 {offsets = [0, 0], sizes = [48, 4], strides = [1, 1]} : vector<48x8xf32> to vector<48x4xf32>
    %221 = vector.extract_strided_slice %219 {offsets = [0, 4], sizes = [48, 4], strides = [1, 1]} : vector<48x8xf32> to vector<48x4xf32>
    %222 = vector.extract_strided_slice %208 {offsets = [0, 8], sizes = [48, 4], strides = [1, 1]} : vector<48x12xf32> to vector<48x4xf32>
    %223 = arith.mulf %221, %206 : vector<48x4xf32>
    %cst_83 = arith.constant dense<0.000000e+00> : vector<48x4xf32>
    %224 = tpu.matmul %223, %8, %cst_83 {dimension_numbers = #tpu.dot_dimension_numbers<[1], [0], [0], [1], [0, 0, 1, 1], [], []>} : vector<48x4xf32>, vector<4x4xf32>, vector<48x4xf32> -> vector<48x4xf32>
    %225 = arith.addf %222, %224 : vector<48x4xf32>
    %cst_84 = arith.constant dense<0.000000e+00> : vector<48x4xf32>
    %226 = tpu.matmul %0, %225, %cst_84 {dimension_numbers = #tpu.dot_dimension_numbers<[1], [0], [0], [1], [0, 0, 1, 1], [], []>} : vector<48x48xf32>, vector<48x4xf32>, vector<48x4xf32> -> vector<48x4xf32>
    %227 = vector.broadcast %10 : vector<1x4xf32> to vector<48x4xf32>
    %228 = arith.addf %226, %227 : vector<48x4xf32>
    %229 = math.tanh %228 : vector<48x4xf32>
    %230 = arith.mulf %220, %206 : vector<48x4xf32>
    %cst_85 = arith.constant 1.000000e+00 : f32
    %231 = vector.broadcast %cst_85 : f32 to vector<48x4xf32>
    %232 = arith.subf %231, %220 : vector<48x4xf32>
    %233 = arith.mulf %232, %229 : vector<48x4xf32>
    %234 = arith.addf %230, %233 : vector<48x4xf32>
    %c336_86 = arith.constant 336 : index
    %c0_87 = arith.constant 0 : index
    %235 = vector.load %arg21[%c336_86, %c0_87] : memref<384x4xf32, #tpu.memory_space<vmem>>, vector<48x4xf32>
    tpu.vector_store %arg21[%c336_86, %c0_87], %234 {strides = array<i32>} : memref<384x4xf32, #tpu.memory_space<vmem>>, vector<48x4xf32>,
    %c0_88 = arith.constant 0 : index
    %c0_89 = arith.constant 0 : index
    %236 = vector.load %arg21[%c0_88, %c0_89] : memref<384x4xf32, #tpu.memory_space<vmem>>, vector<384x4xf32>
    %c0_90 = arith.constant 0 : index
    %c0_91 = arith.constant 0 : index
    %237 = vector.load %arg8[%c0_90, %c0_91] : memref<4x24xf32, #tpu.memory_space<vmem>>, vector<4x24xf32>
    %cst_92 = arith.constant dense<0.000000e+00> : vector<384x24xf32>
    %238 = tpu.matmul %236, %237, %cst_92 {dimension_numbers = #tpu.dot_dimension_numbers<[1], [0], [0], [1], [0, 0, 1, 1], [], []>} : vector<384x4xf32>, vector<4x24xf32>, vector<384x24xf32> -> vector<384x24xf32>
    %c0_93 = arith.constant 0 : index
    %c0_94 = arith.constant 0 : index
    %239 = vector.load %arg20[%c0_93, %c0_94] : memref<384x24xf32, #tpu.memory_space<vmem>>, vector<384x24xf32>
    tpu.vector_store %arg20[%c0_93, %c0_94], %238 {strides = array<i32>} : memref<384x24xf32, #tpu.memory_space<vmem>>, vector<384x24xf32>,
    %c0_95 = arith.constant 0 : index
    %c0_96 = arith.constant 0 : index
    %240 = vector.load %arg9[%c0_95, %c0_96] : memref<8x16xf32, #tpu.memory_space<vmem>>, vector<8x16xf32>
    %c0_97 = arith.constant 0 : index
    %c0_98 = arith.constant 0 : index
    %241 = vector.load %arg10[%c0_97, %c0_98] : memref<8x8xf32, #tpu.memory_space<vmem>>, vector<8x8xf32>
    %c0_99 = arith.constant 0 : index
    %c0_100 = arith.constant 0 : index
    %242 = vector.load %arg11[%c0_99, %c0_100] : memref<1x16xf32, #tpu.memory_space<vmem>>, vector<1x16xf32>
    %c0_101 = arith.constant 0 : index
    %c0_102 = arith.constant 0 : index
    %243 = vector.load %arg12[%c0_101, %c0_102] : memref<1x8xf32, #tpu.memory_space<vmem>>, vector<1x8xf32>
    %cst_103 = arith.constant 0.000000e+00 : f32
    %244 = vector.broadcast %cst_103 : f32 to vector<48x8xf32>
    %c0_104 = arith.constant 0 : index
    %c0_105 = arith.constant 0 : index
    %245 = vector.load %arg20[%c0_104, %c0_105] : memref<384x24xf32, #tpu.memory_space<vmem>>, vector<48x24xf32>
    %246 = vector.extract_strided_slice %245 {offsets = [0, 0], sizes = [48, 16], strides = [1, 1]} : vector<48x24xf32> to vector<48x16xf32>
    %cst_106 = arith.constant dense<0.000000e+00> : vector<48x16xf32>
    %247 = tpu.matmul %244, %240, %cst_106 {dimension_numbers = #tpu.dot_dimension_numbers<[1], [0], [0], [1], [0, 0, 1, 1], [], []>} : vector<48x8xf32>, vector<8x16xf32>, vector<48x16xf32> -> vector<48x16xf32>
    %248 = arith.addf %246, %247 : vector<48x16xf32>
    %cst_107 = arith.constant dense<0.000000e+00> : vector<48x16xf32>
    %249 = tpu.matmul %0, %248, %cst_107 {dimension_numbers = #tpu.dot_dimension_numbers<[1], [0], [0], [1], [0, 0, 1, 1], [], []>} : vector<48x48xf32>, vector<48x16xf32>, vector<48x16xf32> -> vector<48x16xf32>
    %250 = vector.broadcast %242 : vector<1x16xf32> to vector<48x16xf32>
    %251 = arith.addf %249, %250 : vector<48x16xf32>
    %252 = arith.negf %251 : vector<48x16xf32>
    %253 = math.exp %252 : vector<48x16xf32>
    %cst_108 = arith.constant 1.000000e+00 : f32
    %254 = vector.broadcast %cst_108 : f32 to vector<48x16xf32>
    %255 = arith.addf %254, %253 : vector<48x16xf32>
    %256 = arith.divf %254, %255 : vector<48x16xf32>
    %257 = vector.extract_strided_slice %256 {offsets = [0, 0], sizes = [48, 8], strides = [1, 1]} : vector<48x16xf32> to vector<48x8xf32>
    %258 = vector.extract_strided_slice %256 {offsets = [0, 8], sizes = [48, 8], strides = [1, 1]} : vector<48x16xf32> to vector<48x8xf32>
    %259 = vector.extract_strided_slice %245 {offsets = [0, 16], sizes = [48, 8], strides = [1, 1]} : vector<48x24xf32> to vector<48x8xf32>
    %260 = arith.mulf %258, %244 : vector<48x8xf32>
    %cst_109 = arith.constant dense<0.000000e+00> : vector<48x8xf32>
    %261 = tpu.matmul %260, %241, %cst_109 {dimension_numbers = #tpu.dot_dimension_numbers<[1], [0], [0], [1], [0, 0, 1, 1], [], []>} : vector<48x8xf32>, vector<8x8xf32>, vector<48x8xf32> -> vector<48x8xf32>
    %262 = arith.addf %259, %261 : vector<48x8xf32>
    %cst_110 = arith.constant dense<0.000000e+00> : vector<48x8xf32>
    %263 = tpu.matmul %0, %262, %cst_110 {dimension_numbers = #tpu.dot_dimension_numbers<[1], [0], [0], [1], [0, 0, 1, 1], [], []>} : vector<48x48xf32>, vector<48x8xf32>, vector<48x8xf32> -> vector<48x8xf32>
    %264 = vector.broadcast %243 : vector<1x8xf32> to vector<48x8xf32>
    %265 = arith.addf %263, %264 : vector<48x8xf32>
    %266 = math.tanh %265 : vector<48x8xf32>
    %267 = arith.mulf %257, %244 : vector<48x8xf32>
    %cst_111 = arith.constant 1.000000e+00 : f32
    %268 = vector.broadcast %cst_111 : f32 to vector<48x8xf32>
    %269 = arith.subf %268, %257 : vector<48x8xf32>
    %270 = arith.mulf %269, %266 : vector<48x8xf32>
    %271 = arith.addf %267, %270 : vector<48x8xf32>
    %c48_112 = arith.constant 48 : index
    %c0_113 = arith.constant 0 : index
    %272 = vector.load %arg20[%c48_112, %c0_113] : memref<384x24xf32, #tpu.memory_space<vmem>>, vector<48x24xf32>
    %273 = vector.extract_strided_slice %272 {offsets = [0, 0], sizes = [48, 16], strides = [1, 1]} : vector<48x24xf32> to vector<48x16xf32>
    %cst_114 = arith.constant dense<0.000000e+00> : vector<48x16xf32>
    %274 = tpu.matmul %271, %240, %cst_114 {dimension_numbers = #tpu.dot_dimension_numbers<[1], [0], [0], [1], [0, 0, 1, 1], [], []>} : vector<48x8xf32>, vector<8x16xf32>, vector<48x16xf32> -> vector<48x16xf32>
    %275 = arith.addf %273, %274 : vector<48x16xf32>
    %cst_115 = arith.constant dense<0.000000e+00> : vector<48x16xf32>
    %276 = tpu.matmul %0, %275, %cst_115 {dimension_numbers = #tpu.dot_dimension_numbers<[1], [0], [0], [1], [0, 0, 1, 1], [], []>} : vector<48x48xf32>, vector<48x16xf32>, vector<48x16xf32> -> vector<48x16xf32>
    %277 = vector.broadcast %242 : vector<1x16xf32> to vector<48x16xf32>
    %278 = arith.addf %276, %277 : vector<48x16xf32>
    %279 = arith.negf %278 : vector<48x16xf32>
    %280 = math.exp %279 : vector<48x16xf32>
    %cst_116 = arith.constant 1.000000e+00 : f32
    %281 = vector.broadcast %cst_116 : f32 to vector<48x16xf32>
    %282 = arith.addf %281, %280 : vector<48x16xf32>
    %283 = arith.divf %281, %282 : vector<48x16xf32>
    %284 = vector.extract_strided_slice %283 {offsets = [0, 0], sizes = [48, 8], strides = [1, 1]} : vector<48x16xf32> to vector<48x8xf32>
    %285 = vector.extract_strided_slice %283 {offsets = [0, 8], sizes = [48, 8], strides = [1, 1]} : vector<48x16xf32> to vector<48x8xf32>
    %286 = vector.extract_strided_slice %272 {offsets = [0, 16], sizes = [48, 8], strides = [1, 1]} : vector<48x24xf32> to vector<48x8xf32>
    %287 = arith.mulf %285, %271 : vector<48x8xf32>
    %cst_117 = arith.constant dense<0.000000e+00> : vector<48x8xf32>
    %288 = tpu.matmul %287, %241, %cst_117 {dimension_numbers = #tpu.dot_dimension_numbers<[1], [0], [0], [1], [0, 0, 1, 1], [], []>} : vector<48x8xf32>, vector<8x8xf32>, vector<48x8xf32> -> vector<48x8xf32>
    %289 = arith.addf %286, %288 : vector<48x8xf32>
    %cst_118 = arith.constant dense<0.000000e+00> : vector<48x8xf32>
    %290 = tpu.matmul %0, %289, %cst_118 {dimension_numbers = #tpu.dot_dimension_numbers<[1], [0], [0], [1], [0, 0, 1, 1], [], []>} : vector<48x48xf32>, vector<48x8xf32>, vector<48x8xf32> -> vector<48x8xf32>
    %291 = vector.broadcast %243 : vector<1x8xf32> to vector<48x8xf32>
    %292 = arith.addf %290, %291 : vector<48x8xf32>
    %293 = math.tanh %292 : vector<48x8xf32>
    %294 = arith.mulf %284, %271 : vector<48x8xf32>
    %cst_119 = arith.constant 1.000000e+00 : f32
    %295 = vector.broadcast %cst_119 : f32 to vector<48x8xf32>
    %296 = arith.subf %295, %284 : vector<48x8xf32>
    %297 = arith.mulf %296, %293 : vector<48x8xf32>
    %298 = arith.addf %294, %297 : vector<48x8xf32>
    %c96_120 = arith.constant 96 : index
    %c0_121 = arith.constant 0 : index
    %299 = vector.load %arg20[%c96_120, %c0_121] : memref<384x24xf32, #tpu.memory_space<vmem>>, vector<48x24xf32>
    %300 = vector.extract_strided_slice %299 {offsets = [0, 0], sizes = [48, 16], strides = [1, 1]} : vector<48x24xf32> to vector<48x16xf32>
    %cst_122 = arith.constant dense<0.000000e+00> : vector<48x16xf32>
    %301 = tpu.matmul %298, %240, %cst_122 {dimension_numbers = #tpu.dot_dimension_numbers<[1], [0], [0], [1], [0, 0, 1, 1], [], []>} : vector<48x8xf32>, vector<8x16xf32>, vector<48x16xf32> -> vector<48x16xf32>
    %302 = arith.addf %300, %301 : vector<48x16xf32>
    %cst_123 = arith.constant dense<0.000000e+00> : vector<48x16xf32>
    %303 = tpu.matmul %0, %302, %cst_123 {dimension_numbers = #tpu.dot_dimension_numbers<[1], [0], [0], [1], [0, 0, 1, 1], [], []>} : vector<48x48xf32>, vector<48x16xf32>, vector<48x16xf32> -> vector<48x16xf32>
    %304 = vector.broadcast %242 : vector<1x16xf32> to vector<48x16xf32>
    %305 = arith.addf %303, %304 : vector<48x16xf32>
    %306 = arith.negf %305 : vector<48x16xf32>
    %307 = math.exp %306 : vector<48x16xf32>
    %cst_124 = arith.constant 1.000000e+00 : f32
    %308 = vector.broadcast %cst_124 : f32 to vector<48x16xf32>
    %309 = arith.addf %308, %307 : vector<48x16xf32>
    %310 = arith.divf %308, %309 : vector<48x16xf32>
    %311 = vector.extract_strided_slice %310 {offsets = [0, 0], sizes = [48, 8], strides = [1, 1]} : vector<48x16xf32> to vector<48x8xf32>
    %312 = vector.extract_strided_slice %310 {offsets = [0, 8], sizes = [48, 8], strides = [1, 1]} : vector<48x16xf32> to vector<48x8xf32>
    %313 = vector.extract_strided_slice %299 {offsets = [0, 16], sizes = [48, 8], strides = [1, 1]} : vector<48x24xf32> to vector<48x8xf32>
    %314 = arith.mulf %312, %298 : vector<48x8xf32>
    %cst_125 = arith.constant dense<0.000000e+00> : vector<48x8xf32>
    %315 = tpu.matmul %314, %241, %cst_125 {dimension_numbers = #tpu.dot_dimension_numbers<[1], [0], [0], [1], [0, 0, 1, 1], [], []>} : vector<48x8xf32>, vector<8x8xf32>, vector<48x8xf32> -> vector<48x8xf32>
    %316 = arith.addf %313, %315 : vector<48x8xf32>
    %cst_126 = arith.constant dense<0.000000e+00> : vector<48x8xf32>
    %317 = tpu.matmul %0, %316, %cst_126 {dimension_numbers = #tpu.dot_dimension_numbers<[1], [0], [0], [1], [0, 0, 1, 1], [], []>} : vector<48x48xf32>, vector<48x8xf32>, vector<48x8xf32> -> vector<48x8xf32>
    %318 = vector.broadcast %243 : vector<1x8xf32> to vector<48x8xf32>
    %319 = arith.addf %317, %318 : vector<48x8xf32>
    %320 = math.tanh %319 : vector<48x8xf32>
    %321 = arith.mulf %311, %298 : vector<48x8xf32>
    %cst_127 = arith.constant 1.000000e+00 : f32
    %322 = vector.broadcast %cst_127 : f32 to vector<48x8xf32>
    %323 = arith.subf %322, %311 : vector<48x8xf32>
    %324 = arith.mulf %323, %320 : vector<48x8xf32>
    %325 = arith.addf %321, %324 : vector<48x8xf32>
    %c144_128 = arith.constant 144 : index
    %c0_129 = arith.constant 0 : index
    %326 = vector.load %arg20[%c144_128, %c0_129] : memref<384x24xf32, #tpu.memory_space<vmem>>, vector<48x24xf32>
    %327 = vector.extract_strided_slice %326 {offsets = [0, 0], sizes = [48, 16], strides = [1, 1]} : vector<48x24xf32> to vector<48x16xf32>
    %cst_130 = arith.constant dense<0.000000e+00> : vector<48x16xf32>
    %328 = tpu.matmul %325, %240, %cst_130 {dimension_numbers = #tpu.dot_dimension_numbers<[1], [0], [0], [1], [0, 0, 1, 1], [], []>} : vector<48x8xf32>, vector<8x16xf32>, vector<48x16xf32> -> vector<48x16xf32>
    %329 = arith.addf %327, %328 : vector<48x16xf32>
    %cst_131 = arith.constant dense<0.000000e+00> : vector<48x16xf32>
    %330 = tpu.matmul %0, %329, %cst_131 {dimension_numbers = #tpu.dot_dimension_numbers<[1], [0], [0], [1], [0, 0, 1, 1], [], []>} : vector<48x48xf32>, vector<48x16xf32>, vector<48x16xf32> -> vector<48x16xf32>
    %331 = vector.broadcast %242 : vector<1x16xf32> to vector<48x16xf32>
    %332 = arith.addf %330, %331 : vector<48x16xf32>
    %333 = arith.negf %332 : vector<48x16xf32>
    %334 = math.exp %333 : vector<48x16xf32>
    %cst_132 = arith.constant 1.000000e+00 : f32
    %335 = vector.broadcast %cst_132 : f32 to vector<48x16xf32>
    %336 = arith.addf %335, %334 : vector<48x16xf32>
    %337 = arith.divf %335, %336 : vector<48x16xf32>
    %338 = vector.extract_strided_slice %337 {offsets = [0, 0], sizes = [48, 8], strides = [1, 1]} : vector<48x16xf32> to vector<48x8xf32>
    %339 = vector.extract_strided_slice %337 {offsets = [0, 8], sizes = [48, 8], strides = [1, 1]} : vector<48x16xf32> to vector<48x8xf32>
    %340 = vector.extract_strided_slice %326 {offsets = [0, 16], sizes = [48, 8], strides = [1, 1]} : vector<48x24xf32> to vector<48x8xf32>
    %341 = arith.mulf %339, %325 : vector<48x8xf32>
    %cst_133 = arith.constant dense<0.000000e+00> : vector<48x8xf32>
    %342 = tpu.matmul %341, %241, %cst_133 {dimension_numbers = #tpu.dot_dimension_numbers<[1], [0], [0], [1], [0, 0, 1, 1], [], []>} : vector<48x8xf32>, vector<8x8xf32>, vector<48x8xf32> -> vector<48x8xf32>
    %343 = arith.addf %340, %342 : vector<48x8xf32>
    %cst_134 = arith.constant dense<0.000000e+00> : vector<48x8xf32>
    %344 = tpu.matmul %0, %343, %cst_134 {dimension_numbers = #tpu.dot_dimension_numbers<[1], [0], [0], [1], [0, 0, 1, 1], [], []>} : vector<48x48xf32>, vector<48x8xf32>, vector<48x8xf32> -> vector<48x8xf32>
    %345 = vector.broadcast %243 : vector<1x8xf32> to vector<48x8xf32>
    %346 = arith.addf %344, %345 : vector<48x8xf32>
    %347 = math.tanh %346 : vector<48x8xf32>
    %348 = arith.mulf %338, %325 : vector<48x8xf32>
    %cst_135 = arith.constant 1.000000e+00 : f32
    %349 = vector.broadcast %cst_135 : f32 to vector<48x8xf32>
    %350 = arith.subf %349, %338 : vector<48x8xf32>
    %351 = arith.mulf %350, %347 : vector<48x8xf32>
    %352 = arith.addf %348, %351 : vector<48x8xf32>
    %c192_136 = arith.constant 192 : index
    %c0_137 = arith.constant 0 : index
    %353 = vector.load %arg20[%c192_136, %c0_137] : memref<384x24xf32, #tpu.memory_space<vmem>>, vector<48x24xf32>
    %354 = vector.extract_strided_slice %353 {offsets = [0, 0], sizes = [48, 16], strides = [1, 1]} : vector<48x24xf32> to vector<48x16xf32>
    %cst_138 = arith.constant dense<0.000000e+00> : vector<48x16xf32>
    %355 = tpu.matmul %352, %240, %cst_138 {dimension_numbers = #tpu.dot_dimension_numbers<[1], [0], [0], [1], [0, 0, 1, 1], [], []>} : vector<48x8xf32>, vector<8x16xf32>, vector<48x16xf32> -> vector<48x16xf32>
    %356 = arith.addf %354, %355 : vector<48x16xf32>
    %cst_139 = arith.constant dense<0.000000e+00> : vector<48x16xf32>
    %357 = tpu.matmul %0, %356, %cst_139 {dimension_numbers = #tpu.dot_dimension_numbers<[1], [0], [0], [1], [0, 0, 1, 1], [], []>} : vector<48x48xf32>, vector<48x16xf32>, vector<48x16xf32> -> vector<48x16xf32>
    %358 = vector.broadcast %242 : vector<1x16xf32> to vector<48x16xf32>
    %359 = arith.addf %357, %358 : vector<48x16xf32>
    %360 = arith.negf %359 : vector<48x16xf32>
    %361 = math.exp %360 : vector<48x16xf32>
    %cst_140 = arith.constant 1.000000e+00 : f32
    %362 = vector.broadcast %cst_140 : f32 to vector<48x16xf32>
    %363 = arith.addf %362, %361 : vector<48x16xf32>
    %364 = arith.divf %362, %363 : vector<48x16xf32>
    %365 = vector.extract_strided_slice %364 {offsets = [0, 0], sizes = [48, 8], strides = [1, 1]} : vector<48x16xf32> to vector<48x8xf32>
    %366 = vector.extract_strided_slice %364 {offsets = [0, 8], sizes = [48, 8], strides = [1, 1]} : vector<48x16xf32> to vector<48x8xf32>
    %367 = vector.extract_strided_slice %353 {offsets = [0, 16], sizes = [48, 8], strides = [1, 1]} : vector<48x24xf32> to vector<48x8xf32>
    %368 = arith.mulf %366, %352 : vector<48x8xf32>
    %cst_141 = arith.constant dense<0.000000e+00> : vector<48x8xf32>
    %369 = tpu.matmul %368, %241, %cst_141 {dimension_numbers = #tpu.dot_dimension_numbers<[1], [0], [0], [1], [0, 0, 1, 1], [], []>} : vector<48x8xf32>, vector<8x8xf32>, vector<48x8xf32> -> vector<48x8xf32>
    %370 = arith.addf %367, %369 : vector<48x8xf32>
    %cst_142 = arith.constant dense<0.000000e+00> : vector<48x8xf32>
    %371 = tpu.matmul %0, %370, %cst_142 {dimension_numbers = #tpu.dot_dimension_numbers<[1], [0], [0], [1], [0, 0, 1, 1], [], []>} : vector<48x48xf32>, vector<48x8xf32>, vector<48x8xf32> -> vector<48x8xf32>
    %372 = vector.broadcast %243 : vector<1x8xf32> to vector<48x8xf32>
    %373 = arith.addf %371, %372 : vector<48x8xf32>
    %374 = math.tanh %373 : vector<48x8xf32>
    %375 = arith.mulf %365, %352 : vector<48x8xf32>
    %cst_143 = arith.constant 1.000000e+00 : f32
    %376 = vector.broadcast %cst_143 : f32 to vector<48x8xf32>
    %377 = arith.subf %376, %365 : vector<48x8xf32>
    %378 = arith.mulf %377, %374 : vector<48x8xf32>
    %379 = arith.addf %375, %378 : vector<48x8xf32>
    %c240_144 = arith.constant 240 : index
    %c0_145 = arith.constant 0 : index
    %380 = vector.load %arg20[%c240_144, %c0_145] : memref<384x24xf32, #tpu.memory_space<vmem>>, vector<48x24xf32>
    %381 = vector.extract_strided_slice %380 {offsets = [0, 0], sizes = [48, 16], strides = [1, 1]} : vector<48x24xf32> to vector<48x16xf32>
    %cst_146 = arith.constant dense<0.000000e+00> : vector<48x16xf32>
    %382 = tpu.matmul %379, %240, %cst_146 {dimension_numbers = #tpu.dot_dimension_numbers<[1], [0], [0], [1], [0, 0, 1, 1], [], []>} : vector<48x8xf32>, vector<8x16xf32>, vector<48x16xf32> -> vector<48x16xf32>
    %383 = arith.addf %381, %382 : vector<48x16xf32>
    %cst_147 = arith.constant dense<0.000000e+00> : vector<48x16xf32>
    %384 = tpu.matmul %0, %383, %cst_147 {dimension_numbers = #tpu.dot_dimension_numbers<[1], [0], [0], [1], [0, 0, 1, 1], [], []>} : vector<48x48xf32>, vector<48x16xf32>, vector<48x16xf32> -> vector<48x16xf32>
    %385 = vector.broadcast %242 : vector<1x16xf32> to vector<48x16xf32>
    %386 = arith.addf %384, %385 : vector<48x16xf32>
    %387 = arith.negf %386 : vector<48x16xf32>
    %388 = math.exp %387 : vector<48x16xf32>
    %cst_148 = arith.constant 1.000000e+00 : f32
    %389 = vector.broadcast %cst_148 : f32 to vector<48x16xf32>
    %390 = arith.addf %389, %388 : vector<48x16xf32>
    %391 = arith.divf %389, %390 : vector<48x16xf32>
    %392 = vector.extract_strided_slice %391 {offsets = [0, 0], sizes = [48, 8], strides = [1, 1]} : vector<48x16xf32> to vector<48x8xf32>
    %393 = vector.extract_strided_slice %391 {offsets = [0, 8], sizes = [48, 8], strides = [1, 1]} : vector<48x16xf32> to vector<48x8xf32>
    %394 = vector.extract_strided_slice %380 {offsets = [0, 16], sizes = [48, 8], strides = [1, 1]} : vector<48x24xf32> to vector<48x8xf32>
    %395 = arith.mulf %393, %379 : vector<48x8xf32>
    %cst_149 = arith.constant dense<0.000000e+00> : vector<48x8xf32>
    %396 = tpu.matmul %395, %241, %cst_149 {dimension_numbers = #tpu.dot_dimension_numbers<[1], [0], [0], [1], [0, 0, 1, 1], [], []>} : vector<48x8xf32>, vector<8x8xf32>, vector<48x8xf32> -> vector<48x8xf32>
    %397 = arith.addf %394, %396 : vector<48x8xf32>
    %cst_150 = arith.constant dense<0.000000e+00> : vector<48x8xf32>
    %398 = tpu.matmul %0, %397, %cst_150 {dimension_numbers = #tpu.dot_dimension_numbers<[1], [0], [0], [1], [0, 0, 1, 1], [], []>} : vector<48x48xf32>, vector<48x8xf32>, vector<48x8xf32> -> vector<48x8xf32>
    %399 = vector.broadcast %243 : vector<1x8xf32> to vector<48x8xf32>
    %400 = arith.addf %398, %399 : vector<48x8xf32>
    %401 = math.tanh %400 : vector<48x8xf32>
    %402 = arith.mulf %392, %379 : vector<48x8xf32>
    %cst_151 = arith.constant 1.000000e+00 : f32
    %403 = vector.broadcast %cst_151 : f32 to vector<48x8xf32>
    %404 = arith.subf %403, %392 : vector<48x8xf32>
    %405 = arith.mulf %404, %401 : vector<48x8xf32>
    %406 = arith.addf %402, %405 : vector<48x8xf32>
    %c288_152 = arith.constant 288 : index
    %c0_153 = arith.constant 0 : index
    %407 = vector.load %arg20[%c288_152, %c0_153] : memref<384x24xf32, #tpu.memory_space<vmem>>, vector<48x24xf32>
    %408 = vector.extract_strided_slice %407 {offsets = [0, 0], sizes = [48, 16], strides = [1, 1]} : vector<48x24xf32> to vector<48x16xf32>
    %cst_154 = arith.constant dense<0.000000e+00> : vector<48x16xf32>
    %409 = tpu.matmul %406, %240, %cst_154 {dimension_numbers = #tpu.dot_dimension_numbers<[1], [0], [0], [1], [0, 0, 1, 1], [], []>} : vector<48x8xf32>, vector<8x16xf32>, vector<48x16xf32> -> vector<48x16xf32>
    %410 = arith.addf %408, %409 : vector<48x16xf32>
    %cst_155 = arith.constant dense<0.000000e+00> : vector<48x16xf32>
    %411 = tpu.matmul %0, %410, %cst_155 {dimension_numbers = #tpu.dot_dimension_numbers<[1], [0], [0], [1], [0, 0, 1, 1], [], []>} : vector<48x48xf32>, vector<48x16xf32>, vector<48x16xf32> -> vector<48x16xf32>
    %412 = vector.broadcast %242 : vector<1x16xf32> to vector<48x16xf32>
    %413 = arith.addf %411, %412 : vector<48x16xf32>
    %414 = arith.negf %413 : vector<48x16xf32>
    %415 = math.exp %414 : vector<48x16xf32>
    %cst_156 = arith.constant 1.000000e+00 : f32
    %416 = vector.broadcast %cst_156 : f32 to vector<48x16xf32>
    %417 = arith.addf %416, %415 : vector<48x16xf32>
    %418 = arith.divf %416, %417 : vector<48x16xf32>
    %419 = vector.extract_strided_slice %418 {offsets = [0, 0], sizes = [48, 8], strides = [1, 1]} : vector<48x16xf32> to vector<48x8xf32>
    %420 = vector.extract_strided_slice %418 {offsets = [0, 8], sizes = [48, 8], strides = [1, 1]} : vector<48x16xf32> to vector<48x8xf32>
    %421 = vector.extract_strided_slice %407 {offsets = [0, 16], sizes = [48, 8], strides = [1, 1]} : vector<48x24xf32> to vector<48x8xf32>
    %422 = arith.mulf %420, %406 : vector<48x8xf32>
    %cst_157 = arith.constant dense<0.000000e+00> : vector<48x8xf32>
    %423 = tpu.matmul %422, %241, %cst_157 {dimension_numbers = #tpu.dot_dimension_numbers<[1], [0], [0], [1], [0, 0, 1, 1], [], []>} : vector<48x8xf32>, vector<8x8xf32>, vector<48x8xf32> -> vector<48x8xf32>
    %424 = arith.addf %421, %423 : vector<48x8xf32>
    %cst_158 = arith.constant dense<0.000000e+00> : vector<48x8xf32>
    %425 = tpu.matmul %0, %424, %cst_158 {dimension_numbers = #tpu.dot_dimension_numbers<[1], [0], [0], [1], [0, 0, 1, 1], [], []>} : vector<48x48xf32>, vector<48x8xf32>, vector<48x8xf32> -> vector<48x8xf32>
    %426 = vector.broadcast %243 : vector<1x8xf32> to vector<48x8xf32>
    %427 = arith.addf %425, %426 : vector<48x8xf32>
    %428 = math.tanh %427 : vector<48x8xf32>
    %429 = arith.mulf %419, %406 : vector<48x8xf32>
    %cst_159 = arith.constant 1.000000e+00 : f32
    %430 = vector.broadcast %cst_159 : f32 to vector<48x8xf32>
    %431 = arith.subf %430, %419 : vector<48x8xf32>
    %432 = arith.mulf %431, %428 : vector<48x8xf32>
    %433 = arith.addf %429, %432 : vector<48x8xf32>
    %c336_160 = arith.constant 336 : index
    %c0_161 = arith.constant 0 : index
    %434 = vector.load %arg20[%c336_160, %c0_161] : memref<384x24xf32, #tpu.memory_space<vmem>>, vector<48x24xf32>
    %435 = vector.extract_strided_slice %434 {offsets = [0, 0], sizes = [48, 16], strides = [1, 1]} : vector<48x24xf32> to vector<48x16xf32>
    %cst_162 = arith.constant dense<0.000000e+00> : vector<48x16xf32>
    %436 = tpu.matmul %433, %240, %cst_162 {dimension_numbers = #tpu.dot_dimension_numbers<[1], [0], [0], [1], [0, 0, 1, 1], [], []>} : vector<48x8xf32>, vector<8x16xf32>, vector<48x16xf32> -> vector<48x16xf32>
    %437 = arith.addf %435, %436 : vector<48x16xf32>
    %cst_163 = arith.constant dense<0.000000e+00> : vector<48x16xf32>
    %438 = tpu.matmul %0, %437, %cst_163 {dimension_numbers = #tpu.dot_dimension_numbers<[1], [0], [0], [1], [0, 0, 1, 1], [], []>} : vector<48x48xf32>, vector<48x16xf32>, vector<48x16xf32> -> vector<48x16xf32>
    %439 = vector.broadcast %242 : vector<1x16xf32> to vector<48x16xf32>
    %440 = arith.addf %438, %439 : vector<48x16xf32>
    %441 = arith.negf %440 : vector<48x16xf32>
    %442 = math.exp %441 : vector<48x16xf32>
    %cst_164 = arith.constant 1.000000e+00 : f32
    %443 = vector.broadcast %cst_164 : f32 to vector<48x16xf32>
    %444 = arith.addf %443, %442 : vector<48x16xf32>
    %445 = arith.divf %443, %444 : vector<48x16xf32>
    %446 = vector.extract_strided_slice %445 {offsets = [0, 0], sizes = [48, 8], strides = [1, 1]} : vector<48x16xf32> to vector<48x8xf32>
    %447 = vector.extract_strided_slice %445 {offsets = [0, 8], sizes = [48, 8], strides = [1, 1]} : vector<48x16xf32> to vector<48x8xf32>
    %448 = vector.extract_strided_slice %434 {offsets = [0, 16], sizes = [48, 8], strides = [1, 1]} : vector<48x24xf32> to vector<48x8xf32>
    %449 = arith.mulf %447, %433 : vector<48x8xf32>
    %cst_165 = arith.constant dense<0.000000e+00> : vector<48x8xf32>
    %450 = tpu.matmul %449, %241, %cst_165 {dimension_numbers = #tpu.dot_dimension_numbers<[1], [0], [0], [1], [0, 0, 1, 1], [], []>} : vector<48x8xf32>, vector<8x8xf32>, vector<48x8xf32> -> vector<48x8xf32>
    %451 = arith.addf %448, %450 : vector<48x8xf32>
    %cst_166 = arith.constant dense<0.000000e+00> : vector<48x8xf32>
    %452 = tpu.matmul %0, %451, %cst_166 {dimension_numbers = #tpu.dot_dimension_numbers<[1], [0], [0], [1], [0, 0, 1, 1], [], []>} : vector<48x48xf32>, vector<48x8xf32>, vector<48x8xf32> -> vector<48x8xf32>
    %453 = vector.broadcast %243 : vector<1x8xf32> to vector<48x8xf32>
    %454 = arith.addf %452, %453 : vector<48x8xf32>
    %455 = math.tanh %454 : vector<48x8xf32>
    %456 = arith.mulf %446, %433 : vector<48x8xf32>
    %cst_167 = arith.constant 1.000000e+00 : f32
    %457 = vector.broadcast %cst_167 : f32 to vector<48x8xf32>
    %458 = arith.subf %457, %446 : vector<48x8xf32>
    %459 = arith.mulf %458, %455 : vector<48x8xf32>
    %460 = arith.addf %456, %459 : vector<48x8xf32>
    %461 = tpu.concatenate %234, %460 in 1 : vector<48x4xf32>, vector<48x8xf32> -> vector<48x12xf32>
    %cst_168 = arith.constant 0.000000e+00 : f32
    %462 = vector.broadcast %cst_168 : f32 to vector<48x10xf32>
    %463 = vector.extract_strided_slice %461 {offsets = [0, 0], sizes = [48, 1], strides = [1, 1]} : vector<48x12xf32> to vector<48x1xf32>
    %c0_169 = arith.constant 0 : index
    %c0_170 = arith.constant 0 : index
    %c0_171 = arith.constant 0 : index
    %464 = vector.load %arg13[%c0_169, %c0_170, %c0_171] : memref<12x48x10xf32, #tpu.memory_space<vmem>>, vector<1x48x10xf32>
    %465 = vector.shape_cast %464 : vector<1x48x10xf32> to vector<48x10xf32>
    %466 = vector.broadcast %463 : vector<48x1xf32> to vector<48x10xf32>
    %467 = arith.mulf %466, %465 : vector<48x10xf32>
    %468 = arith.addf %462, %467 : vector<48x10xf32>
    %469 = vector.extract_strided_slice %461 {offsets = [0, 1], sizes = [48, 1], strides = [1, 1]} : vector<48x12xf32> to vector<48x1xf32>
    %c1 = arith.constant 1 : index
    %c0_172 = arith.constant 0 : index
    %c0_173 = arith.constant 0 : index
    %470 = vector.load %arg13[%c1, %c0_172, %c0_173] : memref<12x48x10xf32, #tpu.memory_space<vmem>>, vector<1x48x10xf32>
    %471 = vector.shape_cast %470 : vector<1x48x10xf32> to vector<48x10xf32>
    %472 = vector.broadcast %469 : vector<48x1xf32> to vector<48x10xf32>
    %473 = arith.mulf %472, %471 : vector<48x10xf32>
    %474 = arith.addf %468, %473 : vector<48x10xf32>
    %475 = vector.extract_strided_slice %461 {offsets = [0, 2], sizes = [48, 1], strides = [1, 1]} : vector<48x12xf32> to vector<48x1xf32>
    %c2 = arith.constant 2 : index
    %c0_174 = arith.constant 0 : index
    %c0_175 = arith.constant 0 : index
    %476 = vector.load %arg13[%c2, %c0_174, %c0_175] : memref<12x48x10xf32, #tpu.memory_space<vmem>>, vector<1x48x10xf32>
    %477 = vector.shape_cast %476 : vector<1x48x10xf32> to vector<48x10xf32>
    %478 = vector.broadcast %475 : vector<48x1xf32> to vector<48x10xf32>
    %479 = arith.mulf %478, %477 : vector<48x10xf32>
    %480 = arith.addf %474, %479 : vector<48x10xf32>
    %481 = vector.extract_strided_slice %461 {offsets = [0, 3], sizes = [48, 1], strides = [1, 1]} : vector<48x12xf32> to vector<48x1xf32>
    %c3 = arith.constant 3 : index
    %c0_176 = arith.constant 0 : index
    %c0_177 = arith.constant 0 : index
    %482 = vector.load %arg13[%c3, %c0_176, %c0_177] : memref<12x48x10xf32, #tpu.memory_space<vmem>>, vector<1x48x10xf32>
    %483 = vector.shape_cast %482 : vector<1x48x10xf32> to vector<48x10xf32>
    %484 = vector.broadcast %481 : vector<48x1xf32> to vector<48x10xf32>
    %485 = arith.mulf %484, %483 : vector<48x10xf32>
    %486 = arith.addf %480, %485 : vector<48x10xf32>
    %487 = vector.extract_strided_slice %461 {offsets = [0, 4], sizes = [48, 1], strides = [1, 1]} : vector<48x12xf32> to vector<48x1xf32>
    %c4 = arith.constant 4 : index
    %c0_178 = arith.constant 0 : index
    %c0_179 = arith.constant 0 : index
    %488 = vector.load %arg13[%c4, %c0_178, %c0_179] : memref<12x48x10xf32, #tpu.memory_space<vmem>>, vector<1x48x10xf32>
    %489 = vector.shape_cast %488 : vector<1x48x10xf32> to vector<48x10xf32>
    %490 = vector.broadcast %487 : vector<48x1xf32> to vector<48x10xf32>
    %491 = arith.mulf %490, %489 : vector<48x10xf32>
    %492 = arith.addf %486, %491 : vector<48x10xf32>
    %493 = vector.extract_strided_slice %461 {offsets = [0, 5], sizes = [48, 1], strides = [1, 1]} : vector<48x12xf32> to vector<48x1xf32>
    %c5 = arith.constant 5 : index
    %c0_180 = arith.constant 0 : index
    %c0_181 = arith.constant 0 : index
    %494 = vector.load %arg13[%c5, %c0_180, %c0_181] : memref<12x48x10xf32, #tpu.memory_space<vmem>>, vector<1x48x10xf32>
    %495 = vector.shape_cast %494 : vector<1x48x10xf32> to vector<48x10xf32>
    %496 = vector.broadcast %493 : vector<48x1xf32> to vector<48x10xf32>
    %497 = arith.mulf %496, %495 : vector<48x10xf32>
    %498 = arith.addf %492, %497 : vector<48x10xf32>
    %499 = vector.extract_strided_slice %461 {offsets = [0, 6], sizes = [48, 1], strides = [1, 1]} : vector<48x12xf32> to vector<48x1xf32>
    %c6 = arith.constant 6 : index
    %c0_182 = arith.constant 0 : index
    %c0_183 = arith.constant 0 : index
    %500 = vector.load %arg13[%c6, %c0_182, %c0_183] : memref<12x48x10xf32, #tpu.memory_space<vmem>>, vector<1x48x10xf32>
    %501 = vector.shape_cast %500 : vector<1x48x10xf32> to vector<48x10xf32>
    %502 = vector.broadcast %499 : vector<48x1xf32> to vector<48x10xf32>
    %503 = arith.mulf %502, %501 : vector<48x10xf32>
    %504 = arith.addf %498, %503 : vector<48x10xf32>
    %505 = vector.extract_strided_slice %461 {offsets = [0, 7], sizes = [48, 1], strides = [1, 1]} : vector<48x12xf32> to vector<48x1xf32>
    %c7 = arith.constant 7 : index
    %c0_184 = arith.constant 0 : index
    %c0_185 = arith.constant 0 : index
    %506 = vector.load %arg13[%c7, %c0_184, %c0_185] : memref<12x48x10xf32, #tpu.memory_space<vmem>>, vector<1x48x10xf32>
    %507 = vector.shape_cast %506 : vector<1x48x10xf32> to vector<48x10xf32>
    %508 = vector.broadcast %505 : vector<48x1xf32> to vector<48x10xf32>
    %509 = arith.mulf %508, %507 : vector<48x10xf32>
    %510 = arith.addf %504, %509 : vector<48x10xf32>
    %511 = vector.extract_strided_slice %461 {offsets = [0, 8], sizes = [48, 1], strides = [1, 1]} : vector<48x12xf32> to vector<48x1xf32>
    %c8 = arith.constant 8 : index
    %c0_186 = arith.constant 0 : index
    %c0_187 = arith.constant 0 : index
    %512 = vector.load %arg13[%c8, %c0_186, %c0_187] : memref<12x48x10xf32, #tpu.memory_space<vmem>>, vector<1x48x10xf32>
    %513 = vector.shape_cast %512 : vector<1x48x10xf32> to vector<48x10xf32>
    %514 = vector.broadcast %511 : vector<48x1xf32> to vector<48x10xf32>
    %515 = arith.mulf %514, %513 : vector<48x10xf32>
    %516 = arith.addf %510, %515 : vector<48x10xf32>
    %517 = vector.extract_strided_slice %461 {offsets = [0, 9], sizes = [48, 1], strides = [1, 1]} : vector<48x12xf32> to vector<48x1xf32>
    %c9 = arith.constant 9 : index
    %c0_188 = arith.constant 0 : index
    %c0_189 = arith.constant 0 : index
    %518 = vector.load %arg13[%c9, %c0_188, %c0_189] : memref<12x48x10xf32, #tpu.memory_space<vmem>>, vector<1x48x10xf32>
    %519 = vector.shape_cast %518 : vector<1x48x10xf32> to vector<48x10xf32>
    %520 = vector.broadcast %517 : vector<48x1xf32> to vector<48x10xf32>
    %521 = arith.mulf %520, %519 : vector<48x10xf32>
    %522 = arith.addf %516, %521 : vector<48x10xf32>
    %523 = vector.extract_strided_slice %461 {offsets = [0, 10], sizes = [48, 1], strides = [1, 1]} : vector<48x12xf32> to vector<48x1xf32>
    %c10 = arith.constant 10 : index
    %c0_190 = arith.constant 0 : index
    %c0_191 = arith.constant 0 : index
    %524 = vector.load %arg13[%c10, %c0_190, %c0_191] : memref<12x48x10xf32, #tpu.memory_space<vmem>>, vector<1x48x10xf32>
    %525 = vector.shape_cast %524 : vector<1x48x10xf32> to vector<48x10xf32>
    %526 = vector.broadcast %523 : vector<48x1xf32> to vector<48x10xf32>
    %527 = arith.mulf %526, %525 : vector<48x10xf32>
    %528 = arith.addf %522, %527 : vector<48x10xf32>
    %529 = vector.extract_strided_slice %461 {offsets = [0, 11], sizes = [48, 1], strides = [1, 1]} : vector<48x12xf32> to vector<48x1xf32>
    %c11 = arith.constant 11 : index
    %c0_192 = arith.constant 0 : index
    %c0_193 = arith.constant 0 : index
    %530 = vector.load %arg13[%c11, %c0_192, %c0_193] : memref<12x48x10xf32, #tpu.memory_space<vmem>>, vector<1x48x10xf32>
    %531 = vector.shape_cast %530 : vector<1x48x10xf32> to vector<48x10xf32>
    %532 = vector.broadcast %529 : vector<48x1xf32> to vector<48x10xf32>
    %533 = arith.mulf %532, %531 : vector<48x10xf32>
    %534 = arith.addf %528, %533 : vector<48x10xf32>
    %535 = vector.extract_strided_slice %534 {offsets = [0, 0], sizes = [24, 10], strides = [1, 1]} : vector<48x10xf32> to vector<24x10xf32>
    %cst_194 = arith.constant dense<0.000000e+00> : vector<10xf32>
    %536 = vector.multi_reduction <add>, %535, %cst_194 [0] : vector<24x10xf32> to vector<10xf32>
    %537 = vector.shape_cast %536 : vector<10xf32> to vector<1x10xf32>
    %538 = vector.extract_strided_slice %534 {offsets = [24, 0], sizes = [24, 10], strides = [1, 1]} : vector<48x10xf32> to vector<24x10xf32>
    %cst_195 = arith.constant dense<0.000000e+00> : vector<10xf32>
    %539 = vector.multi_reduction <add>, %538, %cst_195 [0] : vector<24x10xf32> to vector<10xf32>
    %540 = vector.shape_cast %539 : vector<10xf32> to vector<1x10xf32>
    %541 = tpu.concatenate %537, %540 in 0 : vector<1x10xf32>, vector<1x10xf32> -> vector<2x10xf32>
    %c0_196 = arith.constant 0 : index
    %c0_197 = arith.constant 0 : index
    %542 = vector.load %arg14[%c0_196, %c0_197] : memref<1x10xf32, #tpu.memory_space<vmem>>, vector<1x10xf32>
    %543 = vector.broadcast %542 : vector<1x10xf32> to vector<2x10xf32>
    %544 = arith.addf %541, %543 : vector<2x10xf32>
    %545 = vector.extract_strided_slice %544 {offsets = [0, 0], sizes = [2, 5], strides = [1, 1]} : vector<2x10xf32> to vector<2x5xf32>
    %546 = arith.negf %545 : vector<2x5xf32>
    %547 = math.exp %546 : vector<2x5xf32>
    %cst_198 = arith.constant 1.000000e+00 : f32
    %548 = vector.broadcast %cst_198 : f32 to vector<2x5xf32>
    %549 = arith.addf %548, %547 : vector<2x5xf32>
    %550 = arith.divf %548, %549 : vector<2x5xf32>
    %551 = vector.extract_strided_slice %544 {offsets = [0, 5], sizes = [2, 5], strides = [1, 1]} : vector<2x10xf32> to vector<2x5xf32>
    %552 = arith.negf %551 : vector<2x5xf32>
    %553 = math.exp %552 : vector<2x5xf32>
    %cst_199 = arith.constant 1.000000e+00 : f32
    %554 = vector.broadcast %cst_199 : f32 to vector<2x5xf32>
    %555 = arith.addf %554, %553 : vector<2x5xf32>
    %556 = arith.divf %554, %555 : vector<2x5xf32>
    %cst_200 = arith.constant 5.000000e-01 : f32
    %557 = vector.broadcast %cst_200 : f32 to vector<2x5xf32>
    %558 = arith.mulf %557, %556 : vector<2x5xf32>
    %559 = math.exp %558 : vector<2x5xf32>
    %c0_201 = arith.constant 0 : index
    %c0_202 = arith.constant 0 : index
    %560 = vector.load %arg15[%c0_201, %c0_202] : memref<2x5xf32, #tpu.memory_space<vmem>>, vector<2x5xf32>
    %561 = arith.mulf %560, %559 : vector<2x5xf32>
    %562 = arith.addf %550, %561 : vector<2x5xf32>
    %c0_203 = arith.constant 0 : index
    %c0_204 = arith.constant 0 : index
    %563 = vector.load %arg16[%c0_203, %c0_204] : memref<2x5xf32, #tpu.memory_space<vmem>>, vector<2x5xf32>
    tpu.vector_store %arg16[%c0_203, %c0_204], %562 {strides = array<i32>} : memref<2x5xf32, #tpu.memory_space<vmem>>, vector<2x5xf32>,
    %c0_205 = arith.constant 0 : index
    %c0_206 = arith.constant 0 : index
    %564 = vector.load %arg17[%c0_205, %c0_206] : memref<2x5xf32, #tpu.memory_space<vmem>>, vector<2x5xf32>
    tpu.vector_store %arg17[%c0_205, %c0_206], %550 {strides = array<i32>} : memref<2x5xf32, #tpu.memory_space<vmem>>, vector<2x5xf32>,
    %c0_207 = arith.constant 0 : index
    %c0_208 = arith.constant 0 : index
    %565 = vector.load %arg18[%c0_207, %c0_208] : memref<2x5xf32, #tpu.memory_space<vmem>>, vector<2x5xf32>
    tpu.vector_store %arg18[%c0_207, %c0_208], %556 {strides = array<i32>} : memref<2x5xf32, #tpu.memory_space<vmem>>, vector<2x5xf32>,
    return
  }
  func.func @transform_0(%arg0: i32) -> (i32, i32) {
    %c0_i32 = arith.constant 0 : i32
    %c0_i32_0 = arith.constant 0 : i32
    %c0_i32_1 = arith.constant 0 : i32
    return %c0_i32, %c0_i32_0 : i32, i32
  }
  func.func @transform_1(%arg0: i32) -> (i32, i32) {
    %c0_i32 = arith.constant 0 : i32
    %c0_i32_0 = arith.constant 0 : i32
    %c0_i32_1 = arith.constant 0 : i32
    return %c0_i32, %c0_i32_0 : i32, i32
  }
  func.func @transform_2(%arg0: i32) -> (i32, i32) {
    %c0_i32 = arith.constant 0 : i32
    %c0_i32_0 = arith.constant 0 : i32
    %c0_i32_1 = arith.constant 0 : i32
    return %c0_i32, %c0_i32_0 : i32, i32
  }
  func.func @transform_3(%arg0: i32) -> (i32, i32) {
    %c0_i32 = arith.constant 0 : i32
    %c0_i32_0 = arith.constant 0 : i32
    %c0_i32_1 = arith.constant 0 : i32
    return %c0_i32, %c0_i32_0 : i32, i32
  }
  func.func @transform_4(%arg0: i32) -> (i32, i32) {
    %c0_i32 = arith.constant 0 : i32
    %c0_i32_0 = arith.constant 0 : i32
    %c0_i32_1 = arith.constant 0 : i32
    return %c0_i32, %c0_i32_0 : i32, i32
  }
  func.func @transform_5(%arg0: i32) -> (i32, i32) {
    %c0_i32 = arith.constant 0 : i32
    %c0_i32_0 = arith.constant 0 : i32
    %c0_i32_1 = arith.constant 0 : i32
    return %c0_i32, %c0_i32_0 : i32, i32
  }
  func.func @transform_6(%arg0: i32) -> (i32, i32) {
    %c0_i32 = arith.constant 0 : i32
    %c0_i32_0 = arith.constant 0 : i32
    %c0_i32_1 = arith.constant 0 : i32
    return %c0_i32, %c0_i32_0 : i32, i32
  }
  func.func @transform_7(%arg0: i32) -> (i32, i32) {
    %c0_i32 = arith.constant 0 : i32
    %c0_i32_0 = arith.constant 0 : i32
    %c0_i32_1 = arith.constant 0 : i32
    return %c0_i32, %c0_i32_0 : i32, i32
  }
  func.func @transform_8(%arg0: i32) -> (i32, i32) {
    %c0_i32 = arith.constant 0 : i32
    %c0_i32_0 = arith.constant 0 : i32
    %c0_i32_1 = arith.constant 0 : i32
    return %c0_i32, %c0_i32_0 : i32, i32
  }
  func.func @transform_9(%arg0: i32) -> (i32, i32) {
    %c0_i32 = arith.constant 0 : i32
    %c0_i32_0 = arith.constant 0 : i32
    %c0_i32_1 = arith.constant 0 : i32
    return %c0_i32, %c0_i32_0 : i32, i32
  }
  func.func @transform_10(%arg0: i32) -> (i32, i32) {
    %c0_i32 = arith.constant 0 : i32
    %c0_i32_0 = arith.constant 0 : i32
    %c0_i32_1 = arith.constant 0 : i32
    return %c0_i32, %c0_i32_0 : i32, i32
  }
  func.func @transform_11(%arg0: i32) -> (i32, i32) {
    %c0_i32 = arith.constant 0 : i32
    %c0_i32_0 = arith.constant 0 : i32
    %c0_i32_1 = arith.constant 0 : i32
    return %c0_i32, %c0_i32_0 : i32, i32
  }
  func.func @transform_12(%arg0: i32) -> (i32, i32, i32) {
    %c0_i32 = arith.constant 0 : i32
    %c0_i32_0 = arith.constant 0 : i32
    %c0_i32_1 = arith.constant 0 : i32
    %c0_i32_2 = arith.constant 0 : i32
    return %c0_i32, %c0_i32_0, %c0_i32_1 : i32, i32, i32
  }
  func.func @transform_13(%arg0: i32) -> (i32, i32) {
    %c0_i32 = arith.constant 0 : i32
    %c0_i32_0 = arith.constant 0 : i32
    %c0_i32_1 = arith.constant 0 : i32
    return %c0_i32, %c0_i32_0 : i32, i32
  }
  func.func @transform_14(%arg0: i32) -> (i32, i32) {
    %c0_i32 = arith.constant 0 : i32
    %c0_i32_0 = arith.constant 0 : i32
    %c0_i32_1 = arith.constant 0 : i32
    return %c0_i32, %c0_i32_0 : i32, i32
  }
  func.func @transform_15(%arg0: i32) -> (i32, i32) {
    %c0_i32 = arith.constant 0 : i32
    %c0_i32_0 = arith.constant 0 : i32
    %c0_i32_1 = arith.constant 0 : i32
    return %c0_i32, %c0_i32_0 : i32, i32
  }
  func.func @transform_16(%arg0: i32) -> (i32, i32) {
    %c0_i32 = arith.constant 0 : i32
    %c0_i32_0 = arith.constant 0 : i32
    %c0_i32_1 = arith.constant 0 : i32
    return %c0_i32, %c0_i32_0 : i32, i32
  }
  func.func @transform_17(%arg0: i32) -> (i32, i32) {
    %c0_i32 = arith.constant 0 : i32
    %c0_i32_0 = arith.constant 0 : i32
    %c0_i32_1 = arith.constant 0 : i32
    return %c0_i32, %c0_i32_0 : i32, i32
  }
}

</mosaic_0001>

<bundles_post_ra>
// kernel: _lambda_.1
= control target key start
LH: loop header
LB: loop body
LE: loop exit
PB: predicated region body
PF: predicated region fallthrough
CT: control target
= control target key end

     0   :  { %s18719_s0 = inlined_call_operand.vmem [shape: f32[384,1], index: 0, kind: input, shape index: {}]   ;;  %s18720_s1 = inlined_call_operand.vmem [shape: f32[48,48], index: 1, kind: input, shape index: {}]   ;;  %s18721_s2 = inlined_call_operand.vmem [shape: f32[1,12], index: 2, kind: input, shape index: {}]   ;;  %s18722_s3 = inlined_call_operand.vmem [shape: f32[4,8], index: 3, kind: input, shape index: {}]   ;;  %s18723_s4 = inlined_call_operand.vmem [shape: f32[4,4], index: 4, kind: input, shape index: {}]   ;;  %s18724_s5 = inlined_call_operand.vmem [shape: f32[1,8], index: 5, kind: input, shape index: {}]   ;;  %s18725_s6 = inlined_call_operand.vmem [shape: f32[1,4], index: 6, kind: input, shape index: {}]   ;;  %s18726_s7 = inlined_call_operand.vmem [shape: f32[4,24], index: 7, kind: input, shape index: {}]   ;;  %s18727_s8 = inlined_call_operand.vmem [shape: f32[8,16], index: 8, kind: input, shape index: {}]   ;;  %s18728_s9 = inlined_call_operand.vmem [shape: f32[8,8], index: 9, kind: input, shape index: {}]   ;;  %s18729_s10 = inlined_call_operand.vmem [shape: f32[1,16], index: 10, kind: input, shape index: {}]   ;;  %s18730_s11 = inlined_call_operand.vmem [shape: f32[1,8], index: 11, kind: input, shape index: {}]   ;;  %s18731_s12 = inlined_call_operand.vmem [shape: f32[12,48,10], index: 12, kind: input, shape index: {}]   ;;  %s18732_s13 = inlined_call_operand.vmem [shape: f32[1,10], index: 13, kind: input, shape index: {}]   ;;  %s18733_s14 = inlined_call_operand.vmem [shape: f32[2,5], index: 14, kind: input, shape index: {}]   ;;  %s18734_s15 = inlined_call_operand.hbm [shape: f32[2,5], index: 15, kind: output, shape index: {0}]   ;;  %s18735_s16 = inlined_call_operand.hbm [shape: f32[2,5], index: 16, kind: output, shape index: {1}]   ;;  %s18736_s17 = inlined_call_operand.hbm [shape: f32[2,5], index: 17, kind: output, shape index: {2}]  }
   0x1   :  { %18748 = sst [smem:[#allocation12_spill]] %s18719_s0 }
   0x2   :  { %18749 = sst [smem:[#allocation13_spill]] %s18720_s1 }
   0x3   :  { %18750 = sst [smem:[#allocation14_spill]] %s18734_s15 }
   0x4   :  { %23 = vsyncpa [#allocation6], 0  ;;  %v14943_v0 = vld [vmem:[%s18722_s3] sm:$0xf]  ;;  %vm467_vm0 = vcmask 1043456   ;;  %s18751_s28 = sld [smem:[#allocation12_spill]] }
   0x5   :  { %12288 = vmatprep.subr.msk.mxu0 %vm467_vm0, %v14943_v0  ;;  %v14827_v2 = vmov 0.0   ;;  %v14828_v3 = vmov 0  }
   0x6   :  { %12290 = vmatprep.mubr.f32.mxu0 %v14827_v2  ;;  %12289 = vmatpush3.msk.msra.mxu0 %vm467_vm0, %v14943_v0 }
   0x7   :  { %13799 = vset.pattern.permute.xlu0 %v14828_v3  ;;  %12291 = vmatmul.mubr.f32.vlgmr.msra.gmra.mrb[0].mxu0 %v14827_v2 }
   0xa   :  { %v61_v1 = vld [vmem:[%s18751_s28] sm:$0xff]  ;;  %v63_v4 = vld [vmem:[%s18751_s28 + $0x10] sm:$0xff] }
   0xb   :  { %112 = vperm.xlu0 %13799, %v61_v1  }
   0xc   :  { %24 = vsyncpa [#allocation8], 0  ;;  %12293 = vmatprep.mubr.f32.mxu0 %v14827_v2  ;;  %13800 = vset.pattern.permute.xlu1 %v14828_v3  ;;  %v62_v5 = vld [vmem:[%s18751_s28 + $0x8] sm:$0xff]  ;;  %v64_v6 = vld [vmem:[%s18751_s28 + $0x18] sm:$0xff]  ;;  %s18752_s26 = sld [smem:[#allocation13_spill]]  ;;  %vm578_vm1 = vcmask 392192  }
   0xd   :  { %122 = vperm.xlu1 %13800, %v63_v4   ;;  %12294 = vmatmul.mubr.f32.gmra.mrb[2].mxu0 %v14827_v2  ;;  %v65_v7 = vld [vmem:[%s18751_s28 + $0x20] sm:$0xff]  ;;  %v66_v8 = vld [vmem:[%s18751_s28 + $0x28] sm:$0xff]  ;;  %vm404_vm2 = vcmask 97280   ;;  %s18743_s30 = smov 124   ;;  %vm463_vm3 = vcmask 31744   ;;  %s18741_s18 = smov 8  }
   0xe   :  { %12296 = vmatprep.mubr.f32.mxu0 %v14827_v2  ;;  %v14985_v10 = vld [vmem:[%s18721_s2] ss:$0 sm:$0xff]  ;;  %s18739_s19 = smov 120   ;;  %s18745_s23 = smov 4   ;;  %vm5678_vm4 = vcmask 195584   ;;  %vm5737_vm5 = vcmask 64512  }
   0xf   :  { %117 = vperm.xlu0 %13799, %v62_v5   ;;  %v15057_v49 = vld [vmem:[%s18723_s4] sm:$0xf]  ;;  %s18753_s24 = smov 120   ;;  %s18754_s1 = smov 8   ;;  %vm10927_vm6 = vcmask 80896   ;;  %vm10950_vm7 = vcmask 1040384  }
  0x10   :  { %12320 = vmatprep.subr.msk.mxu0 %vm467_vm0, %v15057_v49  ;;  %v15068_v50 = vld [vmem:[%s18724_s5] ss:$0 sm:$0xff]  ;;  %s18755_s29 = smov 124   ;;  %s14833_s22 = smov 16   ;;  %vm10976_vm8 = vcmask 33792  }
  0x11   :  { %127 = vperm.xlu1 %13800, %v64_v6   ;;  %12297 = vmatmul.mubr.f32.gmra.mrb[4].mxu0 %v14827_v2  ;;  %s14834_s25 = smov 112  }
  0x12   :  { %v14978_v9 = vld [vmem:[%s18752_s26] sm:$0xff]  ;;  %v15020_v44 = vld [vmem:[%s18752_s26 + $0x8] sm:$0xff]  ;;  %v15025_v45 = vld [vmem:[%s18752_s26 + $0x10] sm:$0xff]  ;;  %12321 = vmatpush3.msk.msra.mxu0 %vm467_vm0, %v15057_v49 }
  0x13   :  { %132 = vperm.xlu0 %13799, %v65_v7   ;;  %12311 = vmatprep.mubr.msk.f32.mxu1 %vm578_vm1, %v14978_v9  ;;  %v15034_v46 = vld [vmem:[%s18752_s26 + $0x18] sm:$0xff]  ;;  %v15039_v47 = vld [vmem:[%s18752_s26 + $0x20] sm:$0xff]  ;;  %v15048_v48 = vld [vmem:[%s18752_s26 + $0x28] sm:$0xff] }
  0x14   :  { %12352 = vmatprep.subr.msk.mxu0 %vm467_vm0, %v14943_v0 }
  0x15   :  { %137 = vperm.xlu1 %13800, %v66_v8  }
  0x8a   :  { %v113_v11 = vpop.permute.xlu0 %112 }
  0x8b   :  { %v356_v12 = vmul.f32 %v14985_v10, %v113_v11 }
  0x8c   :  { %v123_v13 = vpop.permute.xlu1 %122 }
  0x8d   :  { %405 = vst.msk [vmem:[#allocation2] sm:$0xff] %vm404_vm2, %v356_v12  ;;  %v358_v14 = vmul.f32 %v14985_v10, %v123_v13 }
  0x8e   :  { %v118_v15 = vpop.permute.xlu0 %117 }
  0x8f   :  { %407 = vst.msk [vmem:[#allocation2 + $0x10] sm:$0xff] %vm404_vm2, %v358_v14  ;;  %v357_v16 = vmul.f32 %v14985_v10, %v118_v15 }
  0x90   :  { %v128_v17 = vpop.permute.xlu1 %127 }
  0x91   :  { %406 = vst.msk [vmem:[#allocation2 + $0x8] sm:$0xff] %vm404_vm2, %v357_v16  ;;  %v359_v18 = vmul.f32 %v14985_v10, %v128_v17 }
  0x92   :  { %v133_v19 = vpop.permute.xlu0 %132 }
  0x93   :  { %408 = vst.msk [vmem:[#allocation2 + $0x18] sm:$0xff] %vm404_vm2, %v359_v18  ;;  %v360_v20 = vmul.f32 %v14985_v10, %v133_v19 }
  0x94   :  { %v138_v21 = vpop.permute.xlu1 %137  ;;  %v15002_v26 = vld [vmem:[#allocation2] sm:$0xff] }
  0x95   :  { %409 = vst.msk [vmem:[#allocation2 + $0x20] sm:$0xff] %vm404_vm2, %v360_v20  ;;  %v361_v22 = vmul.f32 %v14985_v10, %v138_v21 }
  0x96   :  { %v15008_v33 = vld [vmem:[#allocation2 + $0x10] sm:$0xff] }
  0x97   :  { %410 = vst.msk [vmem:[#allocation2 + $0x28] sm:$0xff] %vm404_vm2, %v361_v22 }
  0x98   :  { %v14999_v23 = vld [vmem:[#allocation2 + $0x8] sm:$0xff] }
  0x9a   :  { %v15005_v29 = vld [vmem:[#allocation2 + $0x18] sm:$0xff] }
  0x9c   :  { %v15014_v40 = vld [vmem:[#allocation2 + $0x20] sm:$0xff] }
  0x9e   :  { %v15011_v37 = vld [vmem:[#allocation2 + $0x28] sm:$0xff] }
  0xda   :  { %v12292_v24 = vpop.f32.mrb[0].mxu0 }
  0xdb   :  { %v567_v25 = vadd.f32 %v12292_v24, %v14999_v23  ;;  %v537_v27 = vpop.f32.mrb[1].mxu0 }
  0xdc   :  { %v566_v28 = vadd.f32 %v537_v27, %v15002_v26 }
  0xde   :  { %v13386_v31 = vpack.c.bf16 %v567_v25, %v566_v28 }
  0xe0   :  { %v12295_v30 = vpop.f32.mrb[2].mxu0  ;;  %13387 = vmatprep.subr.bf16.mxu1 %v13386_v31 }
  0xe1   :  { %v569_v32 = vadd.f32 %v12295_v30, %v15005_v29  ;;  %v547_v34 = vpop.f32.mrb[3].mxu0  ;;  %13389 = vmatpush3.bf16.msra.mxu1 %v13386_v31 }
  0xe2   :  { %v568_v35 = vadd.f32 %v547_v34, %v15008_v33 }
  0xe4   :  { %v13390_v36 = vpack.c.bf16 %v569_v32, %v568_v35  ;;  %v12298_v38 = vpop.f32.mrb[4].mxu0 }
  0xe5   :  { %v571_v39 = vadd.f32 %v12298_v38, %v15011_v37  ;;  %v557_v41 = vpop.f32.mrb[5].mxu0 }
  0xe6   :  { %v570_v42 = vadd.f32 %v557_v41, %v15014_v40  ;;  %13391 = vmatprep.subr.bf16.mxu1 %v13390_v36 }
  0xe7   :  { %13393 = vmatpush3.bf16.msra.mxu1 %v13390_v36 }
  0xe8   :  { %v13394_v43 = vpack.c.bf16 %v571_v39, %v570_v42 }
  0xea   :  { %13395 = vmatprep.subr.bf16.mxu1 %v13394_v43 }
  0xeb   :  { %13397 = vmatpush3.bf16.msra.mxu1 %v13394_v43 }
  0xee   :  { %12312 = vmatmul.mubr.msk.f32.vlgmr.msra.gmra.mrb[0].mxu1 %vm578_vm1, %v15020_v44 }
  0xef   :  { %12314 = vmatprep.mubr.msk.f32.mxu1 %vm578_vm1, %v15025_v45 }
  0xf2   :  { %12315 = vmatmul.mubr.msk.f32.gmra.mrb[2].mxu1 %vm578_vm1, %v15034_v46 }
  0xf3   :  { %12317 = vmatprep.mubr.msk.f32.mxu1 %vm578_vm1, %v15039_v47 }
  0xf6   :  { %12318 = vmatmul.mubr.msk.f32.gmra.mrb[4].mxu1 %vm578_vm1, %v15048_v48 }
  0xf7   :  { %12343 = vmatprep.mubr.msk.f32.mxu1 %vm578_vm1, %v14978_v9 }
 0x1c1   :  { %v12313_v51 = vpop.f32.mrb[0].mxu1 }
 0x1c2   :  { %v669_v52 = vadd.f32 %v12313_v51, %v15068_v50  ;;  %v663_v53 = vpop.f32.mrb[1].mxu1 }
 0x1c3   :  { %v664_v54 = vadd.f32 %v15068_v50, %v663_v53 }
 0x1c4   :  { %v11035_v55 = vmul.f32 -1.442695, %v669_v52 }
 0x1c5   :  { %v11034_v56 = vmul.f32 -1.442695, %v664_v54  ;;  %v12316_v57 = vpop.f32.mrb[2].mxu1 }
 0x1c6   :  { %14111 = vpow2.f32 %v11035_v55  ;;  %v679_v58 = vadd.f32 %v12316_v57, %v15068_v50  ;;  %v673_v59 = vpop.f32.mrb[3].mxu1 }
 0x1c7   :  { %14113 = vpow2.f32 %v11034_v56  ;;  %v674_v60 = vadd.f32 %v15068_v50, %v673_v59 }
 0x1c8   :  { %v11037_v61 = vmul.f32 -1.442695, %v679_v58 }
 0x1c9   :  { %v11036_v62 = vmul.f32 -1.442695, %v674_v60  ;;  %v12319_v63 = vpop.f32.mrb[4].mxu1 }
 0x1ca   :  { %14115 = vpow2.f32 %v11037_v61  ;;  %v689_v1 = vadd.f32 %v12319_v63, %v15068_v50  ;;  %v683_v4 = vpop.f32.mrb[5].mxu1 }
 0x1cb   :  { %14117 = vpow2.f32 %v11036_v62  ;;  %v684_v5 = vadd.f32 %v15068_v50, %v683_v4 }
 0x1cc   :  { %v11039_v6 = vmul.f32 -1.442695, %v689_v1 }
 0x1cd   :  { %v11038_v7 = vmul.f32 -1.442695, %v684_v5 }
 0x1ce   :  { %14119 = vpow2.f32 %v11039_v6 }
 0x1cf   :  { %14121 = vpow2.f32 %v11038_v7 }
 0x1d0   :  { %v14112_v8 = vpop.eup %14111 }
 0x1d1   :  { %v14114_v11 = vpop.eup %14113  ;;  %v711_v12 = vadd.f32 1.0, %v14112_v8 }
 0x1d2   :  { %v710_v13 = vadd.f32 1.0, %v14114_v11 }
 0x1d3   :  { %14123 = vrcp.f32 %v711_v12 }
 0x1d4   :  { %v14116_v14 = vpop.eup %14115  ;;  %14125 = vrcp.f32 %v710_v13  ;;  %v70_v13 = vld [vmem:[%s18751_s28 + $0x48] sm:$0xff] }
 0x1d5   :  { %v14118_v15 = vpop.eup %14117  ;;  %v713_v16 = vadd.f32 1.0, %v14116_v14  ;;  %v72_v14 = vld [vmem:[%s18751_s28 + $0x58] sm:$0xff] }
 0x1d6   :  { %v712_v17 = vadd.f32 1.0, %v14118_v15 }
 0x1d7   :  { %14127 = vrcp.f32 %v713_v16 }
 0x1d8   :  { %v14120_v18 = vpop.eup %14119  ;;  %14129 = vrcp.f32 %v712_v17 }
 0x1d9   :  { %v14122_v19 = vpop.eup %14121  ;;  %v715_v20 = vadd.f32 1.0, %v14120_v18 }
 0x1da   :  { %v714_v21 = vadd.f32 1.0, %v14122_v19 }
 0x1db   :  { %14131 = vrcp.f32 %v715_v20 }
 0x1dc   :  { %14133 = vrcp.f32 %v714_v21 }
 0x1dd   :  { %v15076_v22 = vpop.eup %14123 }
 0x1de   :  { %v15078_v24 = vpop.eup %14125  ;;  %v15081_v25 = vmul.f32 0.0, %v15076_v22 }
 0x1df   :  { %v15084_v27 = vmul.f32 0.0, %v15078_v24 }
 0x1e0   :  { %742 = vrot.lane.b32.xlu1 %v15081_v25, %s18743_s30 }
 0x1e1   :  { %v15088_v28 = vpop.eup %14127  ;;  %740 = vrot.lane.b32.xlu0 %v15084_v27, %s18743_s30 }
 0x1e2   :  { %v15092_v30 = vpop.eup %14129  ;;  %v15095_v31 = vmul.f32 0.0, %v15088_v28 }
 0x1e3   :  { %v15098_v32 = vmul.f32 0.0, %v15092_v30 }
 0x1e4   :  { %746 = vrot.lane.b32.xlu1 %v15095_v31, %s18743_s30 }
 0x1e5   :  { %v15102_v34 = vpop.eup %14131  ;;  %744 = vrot.lane.b32.xlu0 %v15098_v32, %s18743_s30 }
 0x1e6   :  { %v15106_v35 = vpop.eup %14133  ;;  %v15109_v36 = vmul.f32 0.0, %v15102_v34 }
 0x1e7   :  { %v15112_v38 = vmul.f32 0.0, %v15106_v35 }
 0x1e8   :  { %750 = vrot.lane.b32.xlu1 %v15109_v36, %s18743_s30 }
 0x1e9   :  { %748 = vrot.lane.b32.xlu0 %v15112_v38, %s18743_s30 }
 0x252   :  { %v743_v39 = vpop.permute.xlu1 %742 }
 0x253   :  { %v741_v41 = vpop.permute.xlu0 %740 }
 0x254   :  { %12322 = vmatprep.mubr.msk.f32.mxu0 %vm463_vm3, %v741_v41 }
 0x255   :  { %12323 = vmatmul.mubr.msk.f32.vlgmr.msra.gmra.mrb[6].mxu0 %vm463_vm3, %v743_v39 }
 0x256   :  { %v747_v42 = vpop.permute.xlu1 %746  ;;  %12353 = vmatpush3.msk.msra.mxu0 %vm467_vm0, %v14943_v0 }
 0x257   :  { %v745_v43 = vpop.permute.xlu0 %744  ;;  %12384 = vmatprep.subr.msk.mxu0 %vm467_vm0, %v15057_v49 }
 0x258   :  { %12325 = vmatprep.mubr.msk.f32.mxu0 %vm463_vm3, %v745_v43 }
 0x259   :  { %12326 = vmatmul.mubr.msk.f32.gmra.mrb[8].mxu0 %vm463_vm3, %v747_v42 }
 0x25a   :  { %v751_v52 = vpop.permute.xlu1 %750 }
 0x25b   :  { %v749_v51 = vpop.permute.xlu0 %748 }
 0x25c   :  { %12328 = vmatprep.mubr.msk.f32.mxu0 %vm463_vm3, %v749_v51 }
 0x25d   :  { %12329 = vmatmul.mubr.msk.f32.gmra.mrb[10].mxu0 %vm463_vm3, %v751_v52 }
 0x328   :  { %v12324_v53 = vpop.f32.mrb[6].mxu0 }
 0x329   :  { %870 = vrot.lane.b32.xlu1 %v12324_v53, %s18741_s18  ;;  %v833_v54 = vpop.f32.mrb[7].mxu0 }
 0x32a   :  { %868 = vrot.lane.b32.xlu0 %v833_v54, %s18741_s18 }
 0x32c   :  { %v12327_v55 = vpop.f32.mrb[8].mxu0 }
 0x32d   :  { %874 = vrot.lane.b32.xlu1 %v12327_v55, %s18741_s18  ;;  %v843_v56 = vpop.f32.mrb[9].mxu0 }
 0x32e   :  { %872 = vrot.lane.b32.xlu0 %v843_v56, %s18741_s18 }
 0x330   :  { %v12330_v57 = vpop.f32.mrb[10].mxu0 }
 0x331   :  { %878 = vrot.lane.b32.xlu1 %v12330_v57, %s18741_s18  ;;  %v853_v58 = vpop.f32.mrb[11].mxu0 }
 0x332   :  { %876 = vrot.lane.b32.xlu0 %v853_v58, %s18741_s18 }
 0x39b   :  { %v871_v59 = vpop.permute.xlu1 %870 }
 0x39c   :  { %v887_v60 = vadd.f32 %v871_v59, %v14999_v23  ;;  %v869_v61 = vpop.permute.xlu0 %868 }
 0x39d   :  { %v886_v62 = vadd.f32 %v869_v61, %v15002_v26  ;;  %v67_v26 = vld [vmem:[%s18751_s28 + $0x30] sm:$0xff] }
 0x39f   :  { %v13801_v63 = vpack.i.bf16 %v887_v60, %v886_v62  ;;  %v875_v1 = vpop.permute.xlu1 %874 }
 0x3a0   :  { %v889_v4 = vadd.f32 %v875_v1, %v15005_v29  ;;  %v873_v5 = vpop.permute.xlu0 %872  ;;  %v15188_v1 = vld [vmem:[%s18725_s6] ss:$0 sm:$0xff] }
 0x3a1   :  { %v888_v6 = vadd.f32 %v873_v5, %v15008_v33  ;;  %13802 = vrot.lane.b32.xlu0 %v13801_v63, %s18739_s19  ;;  %v69_v33 = vld [vmem:[%s18751_s28 + $0x40] sm:$0xff] }
 0x3a3   :  { %v13806_v7 = vpack.i.bf16 %v889_v4, %v888_v6  ;;  %v879_v8 = vpop.permute.xlu1 %878 }
 0x3a4   :  { %v891_v11 = vadd.f32 %v879_v8, %v15011_v37  ;;  %v877_v12 = vpop.permute.xlu0 %876  ;;  %v68_v37 = vld [vmem:[%s18751_s28 + $0x38] sm:$0xff] }
 0x3a5   :  { %v890_v23 = vadd.f32 %v877_v12, %v15014_v40  ;;  %13807 = vrot.lane.b32.xlu1 %v13806_v7, %s18739_s19  ;;  %v71_v40 = vld [vmem:[%s18751_s28 + $0x50] sm:$0xff] }
 0x3a7   :  { %v13811_v29 = vpack.i.bf16 %v891_v11, %v890_v23 }
 0x3a9   :  { %142 = vperm.xlu1 %13800, %v67_v26   ;;  %13812 = vrot.lane.b32.xlu0 %v13811_v29, %s18739_s19 }
 0x3ad   :  { %152 = vperm.xlu1 %13800, %v69_v33   ;;  %147 = vperm.xlu0 %13799, %v68_v37  }
 0x3b1   :  { %162 = vperm.xlu1 %13800, %v71_v40   ;;  %157 = vperm.xlu0 %13799, %v70_v13   ;;  %v1024_v40 = vsub.f32 1.0, %v15076_v22 }
 0x3b5   :  { %167 = vperm.xlu0 %13799, %v72_v14   ;;  %v1023_v14 = vsub.f32 1.0, %v15078_v24 }
 0x413   :  { %v13803_v15 = vpop.permute.xlu0 %13802 }
 0x414   :  { %v13805_v16 = vunpack.i.h.bf16 %v13803_v15  ;;  %v13804_v17 = vunpack.i.l.bf16 %v13803_v15 }
 0x416   :  { %v13398_v18 = vpack.c.bf16 %v13805_v16, %v13804_v17 }
 0x417   :  { %v13808_v19 = vpop.permute.xlu1 %13807 }
 0x418   :  { %v13810_v20 = vunpack.i.h.bf16 %v13808_v19  ;;  %v13809_v21 = vunpack.i.l.bf16 %v13808_v19  ;;  %13399 = vmatprep.subr.bf16.mxu1 %v13398_v18  ;;  %v1026_v19 = vsub.f32 1.0, %v15088_v28 }
 0x419   :  { %13401 = vmatpush3.bf16.msra.mxu1 %v13398_v18 }
 0x41a   :  { %v13402_v39 = vpack.c.bf16 %v13810_v20, %v13809_v21 }
 0x41b   :  { %v13813_v41 = vpop.permute.xlu0 %13812 }
 0x41c   :  { %v13815_v42 = vunpack.i.h.bf16 %v13813_v41  ;;  %v13814_v43 = vunpack.i.l.bf16 %v13813_v41  ;;  %13403 = vmatprep.subr.bf16.mxu1 %v13402_v39 }
 0x41d   :  { %13405 = vmatpush3.bf16.msra.mxu1 %v13402_v39  ;;  %v1025_v39 = vsub.f32 1.0, %v15092_v30 }
 0x41e   :  { %v13406_v51 = vpack.c.bf16 %v13815_v42, %v13814_v43  ;;  %v1027_v42 = vsub.f32 1.0, %v15106_v35 }
 0x420   :  { %13407 = vmatprep.subr.bf16.mxu1 %v13406_v51 }
 0x421   :  { %13409 = vmatpush3.bf16.msra.mxu1 %v13406_v51 }
 0x424   :  { %12344 = vmatmul.mubr.msk.f32.vlgmr.msra.gmra.mrb[6].mxu1 %vm578_vm1, %v15020_v44 }
 0x425   :  { %12346 = vmatprep.mubr.msk.f32.mxu1 %vm578_vm1, %v15025_v45 }
 0x428   :  { %v143_v52 = vpop.permute.xlu1 %142  ;;  %12347 = vmatmul.mubr.msk.f32.gmra.mrb[8].mxu1 %vm578_vm1, %v15034_v46 }
 0x429   :  { %v362_v53 = vmul.f32 %v14985_v10, %v143_v52  ;;  %12349 = vmatprep.mubr.msk.f32.mxu1 %vm578_vm1, %v15039_v47 }
 0x42b   :  { %411 = vst.msk [vmem:[#allocation2 + $0x30] sm:$0xff] %vm404_vm2, %v362_v53 }
 0x42c   :  { %v153_v54 = vpop.permute.xlu1 %152  ;;  %v148_v55 = vpop.permute.xlu0 %147  ;;  %12350 = vmatmul.mubr.msk.f32.gmra.mrb[10].mxu1 %vm578_vm1, %v15048_v48 }
 0x42d   :  { %v364_v56 = vmul.f32 %v14985_v10, %v153_v54  ;;  %v363_v57 = vmul.f32 %v14985_v10, %v148_v55  ;;  %12375 = vmatprep.mubr.msk.f32.mxu1 %vm578_vm1, %v14978_v9 }
 0x42f   :  { %413 = vst.msk [vmem:[#allocation2 + $0x40] sm:$0xff] %vm404_vm2, %v364_v56  ;;  %412 = vst.msk [vmem:[#allocation2 + $0x38] sm:$0xff] %vm404_vm2, %v363_v57 }
 0x430   :  { %v163_v58 = vpop.permute.xlu1 %162  ;;  %v158_v59 = vpop.permute.xlu0 %157 }
 0x431   :  { %v366_v60 = vmul.f32 %v14985_v10, %v163_v58  ;;  %v365_v61 = vmul.f32 %v14985_v10, %v158_v59 }
 0x432   :  { %v15263_v52 = vld [vmem:[#allocation2 + $0x30] sm:$0xff] }
 0x433   :  { %415 = vst.msk [vmem:[#allocation2 + $0x50] sm:$0xff] %vm404_vm2, %v366_v60  ;;  %414 = vst.msk [vmem:[#allocation2 + $0x48] sm:$0xff] %vm404_vm2, %v365_v61 }
 0x434   :  { %v168_v62 = vpop.permute.xlu0 %167 }
 0x435   :  { %v367_v63 = vmul.f32 %v14985_v10, %v168_v62 }
 0x436   :  { %v15269_v59 = vld [vmem:[#allocation2 + $0x40] sm:$0xff] }
 0x437   :  { %416 = vst.msk [vmem:[#allocation2 + $0x58] sm:$0xff] %vm404_vm2, %v367_v63 }
 0x43a   :  { %v15266_v56 = vld [vmem:[#allocation2 + $0x48] sm:$0xff] }
 0x43e   :  { %v15272_v63 = vld [vmem:[#allocation2 + $0x58] sm:$0xff] }
 0x4f7   :  { %v12345_v4 = vpop.f32.mrb[6].mxu1 }
 0x4f8   :  { %v994_v5 = vadd.f32 %v12345_v4, %v15188_v1  ;;  %v988_v6 = vpop.f32.mrb[7].mxu1 }
 0x4f9   :  { %v989_v7 = vadd.f32 %v15188_v1, %v988_v6  ;;  %v15275_v6 = vld [vmem:[#allocation2 + $0x50] sm:$0xff] }
 0x4fa   :  { %14135 = vtanh.f32 %v994_v5 }
 0x4fb   :  { %14137 = vtanh.f32 %v989_v7  ;;  %v12348_v8 = vpop.f32.mrb[8].mxu1 }
 0x4fc   :  { %v1004_v11 = vadd.f32 %v12348_v8, %v15188_v1  ;;  %v998_v12 = vpop.f32.mrb[9].mxu1 }
 0x4fd   :  { %v999_v23 = vadd.f32 %v15188_v1, %v998_v12 }
 0x4fe   :  { %14139 = vtanh.f32 %v1004_v11 }
 0x4ff   :  { %14141 = vtanh.f32 %v999_v23  ;;  %v12351_v26 = vpop.f32.mrb[10].mxu1 }
 0x500   :  { %v1014_v29 = vadd.f32 %v12351_v26, %v15188_v1  ;;  %v1008_v33 = vpop.f32.mrb[11].mxu1 }
 0x501   :  { %v1009_v37 = vadd.f32 %v15188_v1, %v1008_v33 }
 0x502   :  { %14143 = vtanh.f32 %v1014_v29 }
 0x503   :  { %14145 = vtanh.f32 %v1009_v37 }
 0x504   :  { %v14136_v13 = vpop.eup %14135 }
 0x505   :  { %v14138_v15 = vpop.eup %14137  ;;  %v1030_v16 = vmul.f32 %v14136_v13, %v1024_v40 }
 0x506   :  { %v1029_v17 = vmul.f32 %v14138_v15, %v1023_v14 }
 0x507   :  { %v15199_v18 = vadd.f32 %v1030_v16, %v15081_v25 }
 0x508   :  { %v14140_v20 = vpop.eup %14139  ;;  %v15203_v21 = vadd.f32 %v1029_v17, %v15084_v27  ;;  %v1028_v27 = vsub.f32 1.0, %v15102_v34 }
 0x509   :  { %v14142_v41 = vpop.eup %14141  ;;  %1305 = vrot.lane.b32.xlu0 %v15199_v18, %s18745_s23  ;;  %1042 = vst.msk [vmem:[#allocation4 + $0x8] sm:$0xff] %vm463_vm3, %v15199_v18  ;;  %v1032_v22 = vmul.f32 %v14140_v20, %v1026_v19 }
 0x50a   :  { %1303 = vrot.lane.b32.xlu1 %v15203_v21, %s18745_s23  ;;  %1041 = vst.msk [vmem:[#allocation4] sm:$0xff] %vm463_vm3, %v15203_v21  ;;  %12354 = vmatprep.mubr.msk.f32.mxu0 %vm463_vm3, %v15203_v21  ;;  %v1031_v24 = vmul.f32 %v14142_v41, %v1025_v39 }
 0x50b   :  { %12355 = vmatmul.mubr.msk.f32.vlgmr.msra.gmra.mrb[12].mxu0 %vm463_vm3, %v15199_v18  ;;  %v15219_v25 = vadd.f32 %v1032_v22, %v15095_v31 }
 0x50c   :  { %v14144_v28 = vpop.eup %14143  ;;  %v15223_v30 = vadd.f32 %v1031_v24, %v15098_v32  ;;  %12385 = vmatpush3.msk.msra.mxu0 %vm467_vm0, %v15057_v49 }
 0x50d   :  { %v14146_v43 = vpop.eup %14145  ;;  %1309 = vrot.lane.b32.xlu0 %v15219_v25, %s18745_s23  ;;  %1044 = vst.msk [vmem:[#allocation4 + $0x18] sm:$0xff] %vm463_vm3, %v15219_v25  ;;  %v1034_v31 = vmul.f32 %v14144_v28, %v1028_v27  ;;  %12416 = vmatprep.subr.msk.mxu0 %vm467_vm0, %v14943_v0 }
 0x50e   :  { %1043 = vst.msk [vmem:[#allocation4 + $0x10] sm:$0xff] %vm463_vm3, %v15223_v30  ;;  %1307 = vrot.lane.b32.xlu1 %v15223_v30, %s18745_s23  ;;  %12357 = vmatprep.mubr.msk.f32.mxu0 %vm463_vm3, %v15223_v30  ;;  %v1033_v32 = vmul.f32 %v14146_v43, %v1027_v42 }
 0x50f   :  { %12358 = vmatmul.mubr.msk.f32.gmra.mrb[14].mxu0 %vm463_vm3, %v15219_v25  ;;  %v15243_v34 = vadd.f32 %v1034_v31, %v15109_v36  ;;  %v15260_v36 = vld [vmem:[#allocation2 + $0x38] sm:$0xff] }
 0x510   :  { %v15246_v35 = vadd.f32 %v1033_v32, %v15112_v38 }
 0x511   :  { %1313 = vrot.lane.b32.xlu0 %v15243_v34, %s18745_s23  ;;  %1046 = vst.msk [vmem:[#allocation4 + $0x28] sm:$0xff] %vm463_vm3, %v15243_v34 }
 0x512   :  { %1045 = vst.msk [vmem:[#allocation4 + $0x20] sm:$0xff] %vm463_vm3, %v15246_v35  ;;  %1311 = vrot.lane.b32.xlu1 %v15246_v35, %s18745_s23  ;;  %12360 = vmatprep.mubr.msk.f32.mxu0 %vm463_vm3, %v15246_v35 }
 0x513   :  { %12361 = vmatmul.mubr.msk.f32.gmra.mrb[16].mxu0 %vm463_vm3, %v15243_v34 }
 0x5de   :  { %v12356_v38 = vpop.f32.mrb[12].mxu0 }
 0x5df   :  { %v1167_v51 = vadd.f32 %v12356_v38, %v15260_v36  ;;  %v1137_v53 = vpop.f32.mrb[13].mxu0 }
 0x5e0   :  { %v1166_v54 = vadd.f32 %v1137_v53, %v15263_v52 }
 0x5e2   :  { %v13410_v55 = vpack.c.bf16 %v1167_v51, %v1166_v54  ;;  %v12359_v57 = vpop.f32.mrb[14].mxu0 }
 0x5e3   :  { %v1169_v58 = vadd.f32 %v12359_v57, %v15266_v56  ;;  %v1147_v60 = vpop.f32.mrb[15].mxu0  ;;  %v1304_v57 = vpop.permute.xlu1 %1303 }
 0x5e4   :  { %v1168_v61 = vadd.f32 %v1147_v60, %v15269_v59  ;;  %13411 = vmatprep.subr.bf16.mxu1 %v13410_v55 }
 0x5e5   :  { %13413 = vmatpush3.bf16.msra.mxu1 %v13410_v55  ;;  %v1306_v55 = vpop.permute.xlu0 %1305 }
 0x5e6   :  { %v13414_v62 = vpack.c.bf16 %v1169_v58, %v1168_v61  ;;  %v12362_v4 = vpop.f32.mrb[16].mxu0 }
 0x5e7   :  { %v1171_v5 = vadd.f32 %v12362_v4, %v15272_v63  ;;  %v1157_v7 = vpop.f32.mrb[17].mxu0 }
 0x5e8   :  { %v1170_v8 = vadd.f32 %v1157_v7, %v15275_v6  ;;  %13415 = vmatprep.subr.bf16.mxu1 %v13414_v62  ;;  %v1308_v7 = vpop.permute.xlu1 %1307 }
 0x5e9   :  { %13417 = vmatpush3.bf16.msra.mxu1 %v13414_v62  ;;  %v1310_v4 = vpop.permute.xlu0 %1309 }
 0x5ea   :  { %v13418_v11 = vpack.c.bf16 %v1171_v5, %v1170_v8 }
 0x5ec   :  { %13419 = vmatprep.subr.bf16.mxu1 %v13418_v11 }
 0x5ed   :  { %13421 = vmatpush3.bf16.msra.mxu1 %v13418_v11 }
 0x5f0   :  { %12376 = vmatmul.mubr.msk.f32.vlgmr.msra.gmra.mrb[12].mxu1 %vm578_vm1, %v15020_v44 }
 0x5f1   :  { %12378 = vmatprep.mubr.msk.f32.mxu1 %vm578_vm1, %v15025_v45 }
 0x5f4   :  { %12379 = vmatmul.mubr.msk.f32.gmra.mrb[14].mxu1 %vm578_vm1, %v15034_v46 }
 0x5f5   :  { %12381 = vmatprep.mubr.msk.f32.mxu1 %vm578_vm1, %v15039_v47 }
 0x5f8   :  { %12382 = vmatmul.mubr.msk.f32.gmra.mrb[16].mxu1 %vm578_vm1, %v15048_v48 }
 0x5f9   :  { %12407 = vmatprep.mubr.msk.f32.mxu1 %vm578_vm1, %v14978_v9 }
 0x6c3   :  { %v12377_v12 = vpop.f32.mrb[12].mxu1 }
 0x6c4   :  { %v1244_v23 = vadd.f32 %v12377_v12, %v15068_v50  ;;  %v1238_v26 = vpop.f32.mrb[13].mxu1 }
 0x6c5   :  { %v1239_v29 = vadd.f32 %v15068_v50, %v1238_v26 }
 0x6c6   :  { %v11068_v33 = vmul.f32 -1.442695, %v1244_v23 }
 0x6c7   :  { %v11067_v37 = vmul.f32 -1.442695, %v1239_v29  ;;  %v12380_v40 = vpop.f32.mrb[14].mxu1  ;;  %v1314_v29 = vpop.permute.xlu0 %1313 }
 0x6c8   :  { %14147 = vpow2.f32 %v11068_v33  ;;  %v1254_v13 = vadd.f32 %v12380_v40, %v15068_v50  ;;  %v1248_v14 = vpop.f32.mrb[15].mxu1 }
 0x6c9   :  { %14149 = vpow2.f32 %v11067_v37  ;;  %v1249_v15 = vadd.f32 %v15068_v50, %v1248_v14  ;;  %v1312_v37 = vpop.permute.xlu1 %1311 }
 0x6ca   :  { %v11070_v16 = vmul.f32 -1.442695, %v1254_v13 }
 0x6cb   :  { %v11069_v17 = vmul.f32 -1.442695, %v1249_v15  ;;  %v12383_v19 = vpop.f32.mrb[16].mxu1 }
 0x6cc   :  { %14151 = vpow2.f32 %v11070_v16  ;;  %v1264_v20 = vadd.f32 %v12383_v19, %v15068_v50  ;;  %v1258_v39 = vpop.f32.mrb[17].mxu1 }
 0x6cd   :  { %14153 = vpow2.f32 %v11069_v17  ;;  %v1259_v41 = vadd.f32 %v15068_v50, %v1258_v39 }
 0x6ce   :  { %v11072_v22 = vmul.f32 -1.442695, %v1264_v20 }
 0x6cf   :  { %v11071_v24 = vmul.f32 -1.442695, %v1259_v41 }
 0x6d0   :  { %14155 = vpow2.f32 %v11072_v22 }
 0x6d1   :  { %14157 = vpow2.f32 %v11071_v24 }
 0x6d2   :  { %v14148_v27 = vpop.eup %14147 }
 0x6d3   :  { %v14150_v28 = vpop.eup %14149  ;;  %v1286_v42 = vadd.f32 1.0, %v14148_v27 }
 0x6d4   :  { %v1285_v43 = vadd.f32 1.0, %v14150_v28 }
 0x6d5   :  { %14159 = vrcp.f32 %v1286_v42 }
 0x6d6   :  { %v14152_v31 = vpop.eup %14151  ;;  %14161 = vrcp.f32 %v1285_v43 }
 0x6d7   :  { %v14154_v32 = vpop.eup %14153  ;;  %v1288_v38 = vadd.f32 1.0, %v14152_v31 }
 0x6d8   :  { %v1287_v51 = vadd.f32 1.0, %v14154_v32 }
 0x6d9   :  { %14163 = vrcp.f32 %v1288_v38 }
 0x6da   :  { %v14156_v53 = vpop.eup %14155  ;;  %14165 = vrcp.f32 %v1287_v51 }
 0x6db   :  { %v14158_v54 = vpop.eup %14157  ;;  %v1290_v50 = vadd.f32 1.0, %v14156_v53 }
 0x6dc   :  { %v1289_v58 = vadd.f32 1.0, %v14158_v54 }
 0x6dd   :  { %14167 = vrcp.f32 %v1290_v50 }
 0x6de   :  { %14169 = vrcp.f32 %v1289_v58 }
 0x6df   :  { %v15296_v60 = vpop.eup %14159 }
 0x6e0   :  { %v15298_v61 = vpop.eup %14161  ;;  %v1322_v62 = vmul.f32 %v15296_v60, %v1306_v55 }
 0x6e1   :  { %v1321_v5 = vmul.f32 %v15298_v61, %v1304_v57 }
 0x6e2   :  { %1335 = vrot.lane.b32.xlu0 %v1322_v62, %s18743_s30 }
 0x6e3   :  { %v15303_v8 = vpop.eup %14163  ;;  %1333 = vrot.lane.b32.xlu1 %v1321_v5, %s18743_s30 }
 0x6e4   :  { %v15306_v11 = vpop.eup %14165  ;;  %v1324_v12 = vmul.f32 %v15303_v8, %v1310_v4  ;;  %v78_v4 = vld [vmem:[%s18751_s28 + $0x88] sm:$0xff] }
 0x6e5   :  { %v1323_v23 = vmul.f32 %v15306_v11, %v1308_v7 }
 0x6e6   :  { %1339 = vrot.lane.b32.xlu0 %v1324_v12, %s18743_s30 }
 0x6e7   :  { %v15311_v26 = vpop.eup %14167  ;;  %1337 = vrot.lane.b32.xlu1 %v1323_v23, %s18743_s30 }
 0x6e8   :  { %v15314_v33 = vpop.eup %14169  ;;  %v1326_v40 = vmul.f32 %v15311_v26, %v1314_v29 }
 0x6e9   :  { %v1325_v13 = vmul.f32 %v15314_v33, %v1312_v37 }
 0x6ea   :  { %1343 = vrot.lane.b32.xlu0 %v1326_v40, %s18743_s30 }
 0x6eb   :  { %1341 = vrot.lane.b32.xlu1 %v1325_v13, %s18743_s30 }
 0x754   :  { %v1336_v14 = vpop.permute.xlu0 %1335 }
 0x755   :  { %v1334_v15 = vpop.permute.xlu1 %1333 }
 0x756   :  { %12386 = vmatprep.mubr.msk.f32.mxu0 %vm463_vm3, %v1334_v15 }
 0x757   :  { %12387 = vmatmul.mubr.msk.f32.vlgmr.msra.gmra.mrb[18].mxu0 %vm463_vm3, %v1336_v14 }
 0x758   :  { %v1340_v16 = vpop.permute.xlu0 %1339  ;;  %12417 = vmatpush3.msk.msra.mxu0 %vm467_vm0, %v14943_v0 }
 0x759   :  { %v1338_v17 = vpop.permute.xlu1 %1337  ;;  %12448 = vmatprep.subr.msk.mxu0 %vm467_vm0, %v15057_v49 }
 0x75a   :  { %12389 = vmatprep.mubr.msk.f32.mxu0 %vm463_vm3, %v1338_v17 }
 0x75b   :  { %12390 = vmatmul.mubr.msk.f32.gmra.mrb[20].mxu0 %vm463_vm3, %v1340_v16 }
 0x75c   :  { %v1344_v20 = vpop.permute.xlu0 %1343 }
 0x75d   :  { %v1342_v19 = vpop.permute.xlu1 %1341 }
 0x75e   :  { %12392 = vmatprep.mubr.msk.f32.mxu0 %vm463_vm3, %v1342_v19 }
 0x75f   :  { %12393 = vmatmul.mubr.msk.f32.gmra.mrb[22].mxu0 %vm463_vm3, %v1344_v20 }
 0x82a   :  { %v12388_v39 = vpop.f32.mrb[18].mxu0 }
 0x82b   :  { %1460 = vrot.lane.b32.xlu0 %v12388_v39, %s18741_s18  ;;  %v1423_v41 = vpop.f32.mrb[19].mxu0 }
 0x82c   :  { %1458 = vrot.lane.b32.xlu1 %v1423_v41, %s18741_s18 }
 0x82e   :  { %v12391_v0 = vpop.f32.mrb[20].mxu0 }
 0x82f   :  { %1464 = vrot.lane.b32.xlu0 %v12391_v0, %s18741_s18  ;;  %v1433_v22 = vpop.f32.mrb[21].mxu0 }
 0x830   :  { %1462 = vrot.lane.b32.xlu1 %v1433_v22, %s18741_s18 }
 0x832   :  { %v12394_v24 = vpop.f32.mrb[22].mxu0 }
 0x833   :  { %1468 = vrot.lane.b32.xlu0 %v12394_v24, %s18741_s18  ;;  %v1443_v27 = vpop.f32.mrb[23].mxu0 }
 0x834   :  { %1466 = vrot.lane.b32.xlu1 %v1443_v27, %s18741_s18 }
 0x89d   :  { %v1461_v28 = vpop.permute.xlu0 %1460 }
 0x89e   :  { %v1477_v42 = vadd.f32 %v1461_v28, %v15260_v36  ;;  %v1459_v43 = vpop.permute.xlu1 %1458  ;;  %v73_v36 = vld [vmem:[%s18751_s28 + $0x60] sm:$0xff] }
 0x89f   :  { %v1476_v31 = vadd.f32 %v1459_v43, %v15263_v52 }
 0x8a1   :  { %v13816_v32 = vpack.i.bf16 %v1477_v42, %v1476_v31  ;;  %v1465_v38 = vpop.permute.xlu0 %1464 }
 0x8a2   :  { %v1479_v51 = vadd.f32 %v1465_v38, %v15266_v56  ;;  %v1463_v53 = vpop.permute.xlu1 %1462  ;;  %v75_v56 = vld [vmem:[%s18751_s28 + $0x70] sm:$0xff] }
 0x8a3   :  { %v1478_v54 = vadd.f32 %v1463_v53, %v15269_v59  ;;  %13817 = vrot.lane.b32.xlu1 %v13816_v32, %s18739_s19  ;;  %v74_v59 = vld [vmem:[%s18751_s28 + $0x68] sm:$0xff] }
 0x8a5   :  { %v13821_v55 = vpack.i.bf16 %v1479_v51, %v1478_v54  ;;  %v1469_v50 = vpop.permute.xlu0 %1468 }
 0x8a6   :  { %v1481_v57 = vadd.f32 %v1469_v50, %v15272_v63  ;;  %v1467_v58 = vpop.permute.xlu1 %1466  ;;  %v77_v63 = vld [vmem:[%s18751_s28 + $0x80] sm:$0xff] }
 0x8a7   :  { %v1480_v62 = vadd.f32 %v1467_v58, %v15275_v6  ;;  %13822 = vrot.lane.b32.xlu0 %v13821_v55, %s18739_s19  ;;  %v76_v6 = vld [vmem:[%s18751_s28 + $0x78] sm:$0xff]  ;;  %v1614_v55 = vsub.f32 1.0, %v15296_v60 }
 0x8a9   :  { %v13826_v52 = vpack.i.bf16 %v1481_v57, %v1480_v62  ;;  %v1613_v57 = vsub.f32 1.0, %v15298_v61  ;;  %v1608_v62 = vmul.f32 %v15296_v60, %v15199_v18  ;;  %v1610_v18 = vmul.f32 %v15303_v8, %v15219_v25 }
 0x8aa   :  { %v1609_v60 = vmul.f32 %v15306_v11, %v15223_v30  ;;  %v1618_v25 = vsub.f32 1.0, %v15311_v26  ;;  %v1612_v30 = vmul.f32 %v15311_v26, %v15243_v34 }
 0x8ab   :  { %172 = vperm.xlu0 %13799, %v73_v36   ;;  %13827 = vrot.lane.b32.xlu1 %v13826_v52, %s18739_s19  ;;  %v1607_v52 = vmul.f32 %v15298_v61, %v15203_v21 }
 0x8af   :  { %182 = vperm.xlu0 %13799, %v75_v56   ;;  %177 = vperm.xlu1 %13800, %v74_v59  }
 0x8b3   :  { %192 = vperm.xlu0 %13799, %v77_v63   ;;  %187 = vperm.xlu1 %13800, %v76_v6  }
 0x8b7   :  { %197 = vperm.xlu1 %13800, %v78_v4   ;;  %v1615_v4 = vsub.f32 1.0, %v15306_v11 }
 0x915   :  { %v13818_v5 = vpop.permute.xlu1 %13817 }
 0x916   :  { %v13820_v7 = vunpack.i.h.bf16 %v13818_v5  ;;  %v13819_v12 = vunpack.i.l.bf16 %v13818_v5 }
 0x918   :  { %v13422_v23 = vpack.c.bf16 %v13820_v7, %v13819_v12 }
 0x919   :  { %v13823_v29 = vpop.permute.xlu0 %13822 }
 0x91a   :  { %v13825_v37 = vunpack.i.h.bf16 %v13823_v29  ;;  %v13824_v40 = vunpack.i.l.bf16 %v13823_v29  ;;  %13423 = vmatprep.subr.bf16.mxu1 %v13422_v23 }
 0x91b   :  { %13425 = vmatpush3.bf16.msra.mxu1 %v13422_v23  ;;  %v1617_v23 = vsub.f32 1.0, %v15314_v33 }
 0x91c   :  { %v13426_v13 = vpack.c.bf16 %v13825_v37, %v13824_v40  ;;  %v15438_v37 = vld [vmem:[%s18722_s3] sm:$0xf] }
 0x91d   :  { %v13828_v14 = vpop.permute.xlu1 %13827 }
 0x91e   :  { %v13830_v15 = vunpack.i.h.bf16 %v13828_v14  ;;  %v13829_v16 = vunpack.i.l.bf16 %v13828_v14  ;;  %13427 = vmatprep.subr.bf16.mxu1 %v13426_v13 }
 0x91f   :  { %13429 = vmatpush3.bf16.msra.mxu1 %v13426_v13 }
 0x920   :  { %v13430_v17 = vpack.c.bf16 %v13830_v15, %v13829_v16 }
 0x922   :  { %13431 = vmatprep.subr.bf16.mxu1 %v13430_v17 }
 0x923   :  { %13433 = vmatpush3.bf16.msra.mxu1 %v13430_v17 }
 0x926   :  { %12408 = vmatmul.mubr.msk.f32.vlgmr.msra.gmra.mrb[18].mxu1 %vm578_vm1, %v15020_v44 }
 0x927   :  { %12410 = vmatprep.mubr.msk.f32.mxu1 %vm578_vm1, %v15025_v45 }
 0x92a   :  { %v173_v19 = vpop.permute.xlu0 %172  ;;  %12411 = vmatmul.mubr.msk.f32.gmra.mrb[20].mxu1 %vm578_vm1, %v15034_v46 }
 0x92b   :  { %v368_v20 = vmul.f32 %v14985_v10, %v173_v19  ;;  %12413 = vmatprep.mubr.msk.f32.mxu1 %vm578_vm1, %v15039_v47 }
 0x92d   :  { %417 = vst.msk [vmem:[#allocation2 + $0x60] sm:$0xff] %vm404_vm2, %v368_v20 }
 0x92e   :  { %v183_v39 = vpop.permute.xlu0 %182  ;;  %v178_v41 = vpop.permute.xlu1 %177  ;;  %12414 = vmatmul.mubr.msk.f32.gmra.mrb[22].mxu1 %vm578_vm1, %v15048_v48 }
 0x92f   :  { %v370_v44 = vmul.f32 %v14985_v10, %v183_v39  ;;  %v369_v45 = vmul.f32 %v14985_v10, %v178_v41  ;;  %12439 = vmatprep.mubr.msk.f32.mxu1 %vm578_vm1, %v14978_v9 }
 0x931   :  { %419 = vst.msk [vmem:[#allocation2 + $0x70] sm:$0xff] %vm404_vm2, %v370_v44  ;;  %418 = vst.msk [vmem:[#allocation2 + $0x68] sm:$0xff] %vm404_vm2, %v369_v45 }
 0x932   :  { %v193_v46 = vpop.permute.xlu0 %192  ;;  %v188_v47 = vpop.permute.xlu1 %187 }
 0x933   :  { %v372_v0 = vmul.f32 %v14985_v10, %v193_v46  ;;  %v371_v22 = vmul.f32 %v14985_v10, %v188_v47 }
 0x934   :  { %v15471_v14 = vld [vmem:[#allocation2 + $0x60] sm:$0xff] }
 0x935   :  { %421 = vst.msk [vmem:[#allocation2 + $0x80] sm:$0xff] %vm404_vm2, %v372_v0  ;;  %420 = vst.msk [vmem:[#allocation2 + $0x78] sm:$0xff] %vm404_vm2, %v371_v22 }
 0x936   :  { %v198_v48 = vpop.permute.xlu1 %197 }
 0x937   :  { %v373_v24 = vmul.f32 %v14985_v10, %v198_v48 }
 0x938   :  { %v15477_v41 = vld [vmem:[#allocation2 + $0x70] sm:$0xff] }
 0x939   :  { %422 = vst.msk [vmem:[#allocation2 + $0x88] sm:$0xff] %vm404_vm2, %v373_v24 }
 0x93c   :  { %v15474_v19 = vld [vmem:[#allocation2 + $0x78] sm:$0xff]  ;;  %v15483_v48 = vld [vmem:[#allocation2 + $0x80] sm:$0xff] }
 0x940   :  { %v15480_v47 = vld [vmem:[#allocation2 + $0x88] sm:$0xff] }
 0x9f9   :  { %v12409_v9 = vpop.f32.mrb[18].mxu1 }
 0x9fa   :  { %v1578_v27 = vadd.f32 %v12409_v9, %v15188_v1  ;;  %v1572_v28 = vpop.f32.mrb[19].mxu1 }
 0x9fb   :  { %v1573_v42 = vadd.f32 %v15188_v1, %v1572_v28  ;;  %v15489_v28 = vld [vmem:[%s18752_s26 + $0x8] sm:$0xff] }
 0x9fc   :  { %14171 = vtanh.f32 %v1578_v27 }
 0x9fd   :  { %14173 = vtanh.f32 %v1573_v42  ;;  %v12412_v43 = vpop.f32.mrb[20].mxu1  ;;  %v15496_v42 = vld [vmem:[%s18752_s26 + $0x10] sm:$0xff] }
 0x9fe   :  { %v1588_v31 = vadd.f32 %v12412_v43, %v15188_v1  ;;  %v1582_v32 = vpop.f32.mrb[21].mxu1  ;;  %v15503_v43 = vld [vmem:[%s18752_s26 + $0x18] sm:$0xff] }
 0x9ff   :  { %v1583_v38 = vadd.f32 %v15188_v1, %v1582_v32  ;;  %v15517_v32 = vld [vmem:[%s18752_s26 + $0x28] sm:$0xff] }
 0xa00   :  { %14175 = vtanh.f32 %v1588_v31  ;;  %v15510_v31 = vld [vmem:[%s18752_s26 + $0x20] sm:$0xff] }
 0xa01   :  { %14177 = vtanh.f32 %v1583_v38  ;;  %v12415_v51 = vpop.f32.mrb[22].mxu1  ;;  %v15524_v38 = vld [vmem:[%s18752_s26] sm:$0xff] }
 0xa02   :  { %v1598_v10 = vadd.f32 %v12415_v51, %v15188_v1  ;;  %v1592_v53 = vpop.f32.mrb[23].mxu1 }
 0xa03   :  { %v1593_v54 = vadd.f32 %v15188_v1, %v1592_v53  ;;  %v1616_v1 = vsub.f32 1.0, %v15303_v8 }
 0xa04   :  { %14179 = vtanh.f32 %v1598_v10  ;;  %v15531_v10 = vld [vmem:[%s18724_s5] ss:$0 sm:$0xff] }
 0xa05   :  { %14181 = vtanh.f32 %v1593_v54 }
 0xa06   :  { %v14172_v50 = vpop.eup %14171 }
 0xa07   :  { %v14174_v58 = vpop.eup %14173  ;;  %v1620_v36 = vmul.f32 %v14172_v50, %v1614_v55 }
 0xa08   :  { %v1619_v56 = vmul.f32 %v14174_v58, %v1613_v57 }
 0xa09   :  { %v15399_v59 = vadd.f32 %v1620_v36, %v1608_v62 }
 0xa0a   :  { %v14176_v63 = vpop.eup %14175  ;;  %v15402_v6 = vadd.f32 %v1619_v56, %v1607_v52 }
 0xa0b   :  { %v14178_v5 = vpop.eup %14177  ;;  %1895 = vrot.lane.b32.xlu1 %v15399_v59, %s18745_s23  ;;  %1632 = vst.msk [vmem:[#allocation4 + $0x38] sm:$0xff] %vm463_vm3, %v15399_v59  ;;  %v1622_v21 = vmul.f32 %v14176_v63, %v1616_v1 }
 0xa0c   :  { %1893 = vrot.lane.b32.xlu0 %v15402_v6, %s18745_s23  ;;  %1631 = vst.msk [vmem:[#allocation4 + $0x30] sm:$0xff] %vm463_vm3, %v15402_v6  ;;  %12418 = vmatprep.mubr.msk.f32.mxu0 %vm463_vm3, %v15402_v6  ;;  %v1621_v61 = vmul.f32 %v14178_v5, %v1615_v4 }
 0xa0d   :  { %12419 = vmatmul.mubr.msk.f32.vlgmr.msra.gmra.mrb[24].mxu0 %vm463_vm3, %v15399_v59  ;;  %v15421_v7 = vadd.f32 %v1622_v21, %v1610_v18 }
 0xa0e   :  { %v14180_v8 = vpop.eup %14179  ;;  %v15424_v12 = vadd.f32 %v1621_v61, %v1609_v60  ;;  %12449 = vmatpush3.msk.msra.mxu0 %vm467_vm0, %v15057_v49  ;;  %v1611_v49 = vmul.f32 %v15314_v33, %v15246_v35  ;;  %v15468_v35 = vld [vmem:[#allocation2 + $0x68] sm:$0xff] }
 0xa0f   :  { %v14182_v29 = vpop.eup %14181  ;;  %1899 = vrot.lane.b32.xlu1 %v15421_v7, %s18745_s23  ;;  %1634 = vst.msk [vmem:[#allocation4 + $0x48] sm:$0xff] %vm463_vm3, %v15421_v7  ;;  %v1624_v11 = vmul.f32 %v14180_v8, %v1618_v25  ;;  %12480 = vmatprep.subr.msk.mxu0 %vm467_vm0, %v15438_v37 }
 0xa10   :  { %1633 = vst.msk [vmem:[#allocation4 + $0x40] sm:$0xff] %vm463_vm3, %v15424_v12  ;;  %1897 = vrot.lane.b32.xlu0 %v15424_v12, %s18745_s23  ;;  %12421 = vmatprep.mubr.msk.f32.mxu0 %vm463_vm3, %v15424_v12  ;;  %v1623_v34 = vmul.f32 %v14182_v29, %v1617_v23 }
 0xa11   :  { %12422 = vmatmul.mubr.msk.f32.gmra.mrb[26].mxu0 %vm463_vm3, %v15421_v7  ;;  %v15452_v26 = vadd.f32 %v1624_v11, %v1612_v30 }
 0xa12   :  { %v15454_v40 = vadd.f32 %v1623_v34, %v1611_v49 }
 0xa13   :  { %1903 = vrot.lane.b32.xlu1 %v15452_v26, %s18745_s23  ;;  %1636 = vst.msk [vmem:[#allocation4 + $0x58] sm:$0xff] %vm463_vm3, %v15452_v26 }
 0xa14   :  { %1635 = vst.msk [vmem:[#allocation4 + $0x50] sm:$0xff] %vm463_vm3, %v15454_v40  ;;  %1901 = vrot.lane.b32.xlu0 %v15454_v40, %s18745_s23  ;;  %12424 = vmatprep.mubr.msk.f32.mxu0 %vm463_vm3, %v15454_v40 }
 0xa15   :  { %12425 = vmatmul.mubr.msk.f32.gmra.mrb[28].mxu0 %vm463_vm3, %v15452_v26 }
 0xae0   :  { %v12420_v33 = vpop.f32.mrb[24].mxu0 }
 0xae1   :  { %v1757_v13 = vadd.f32 %v12420_v33, %v15468_v35  ;;  %v1727_v15 = vpop.f32.mrb[25].mxu0 }
 0xae2   :  { %v1756_v16 = vadd.f32 %v1727_v15, %v15471_v14 }
 0xae4   :  { %v13434_v17 = vpack.c.bf16 %v1757_v13, %v1756_v16  ;;  %v12423_v20 = vpop.f32.mrb[26].mxu0  ;;  %v1896_v13 = vpop.permute.xlu1 %1895 }
 0xae5   :  { %v1759_v39 = vadd.f32 %v12423_v20, %v15474_v19  ;;  %v1737_v44 = vpop.f32.mrb[27].mxu0  ;;  %v1894_v16 = vpop.permute.xlu0 %1893 }
 0xae6   :  { %v1758_v45 = vadd.f32 %v1737_v44, %v15477_v41  ;;  %13435 = vmatprep.subr.bf16.mxu1 %v13434_v17 }
 0xae7   :  { %13437 = vmatpush3.bf16.msra.mxu1 %v13434_v17 }
 0xae8   :  { %v13438_v46 = vpack.c.bf16 %v1759_v39, %v1758_v45  ;;  %v12426_v0 = vpop.f32.mrb[28].mxu0  ;;  %v1900_v45 = vpop.permute.xlu1 %1899 }
 0xae9   :  { %v1761_v22 = vadd.f32 %v12426_v0, %v15480_v47  ;;  %v1747_v24 = vpop.f32.mrb[29].mxu0  ;;  %v1898_v0 = vpop.permute.xlu0 %1897 }
 0xaea   :  { %v1760_v9 = vadd.f32 %v1747_v24, %v15483_v48  ;;  %13439 = vmatprep.subr.bf16.mxu1 %v13438_v46 }
 0xaeb   :  { %13441 = vmatpush3.bf16.msra.mxu1 %v13438_v46 }
 0xaec   :  { %v13442_v27 = vpack.c.bf16 %v1761_v22, %v1760_v9 }
 0xaee   :  { %13443 = vmatprep.subr.bf16.mxu1 %v13442_v27 }
 0xaef   :  { %13445 = vmatpush3.bf16.msra.mxu1 %v13442_v27 }
 0xaf2   :  { %12440 = vmatmul.mubr.msk.f32.vlgmr.msra.gmra.mrb[24].mxu1 %vm578_vm1, %v15489_v28 }
 0xaf3   :  { %12442 = vmatprep.mubr.msk.f32.mxu1 %vm578_vm1, %v15496_v42 }
 0xaf6   :  { %12443 = vmatmul.mubr.msk.f32.gmra.mrb[26].mxu1 %vm578_vm1, %v15503_v43 }
 0xaf7   :  { %12445 = vmatprep.mubr.msk.f32.mxu1 %vm578_vm1, %v15510_v31 }
 0xafa   :  { %12446 = vmatmul.mubr.msk.f32.gmra.mrb[28].mxu1 %vm578_vm1, %v15517_v32 }
 0xafb   :  { %12471 = vmatprep.mubr.msk.f32.mxu1 %vm578_vm1, %v15524_v38 }
 0xbc5   :  { %v12441_v51 = vpop.f32.mrb[24].mxu1 }
 0xbc6   :  { %v1834_v53 = vadd.f32 %v15531_v10, %v12441_v51  ;;  %v1828_v54 = vpop.f32.mrb[25].mxu1 }
 0xbc7   :  { %v1829_v55 = vadd.f32 %v15531_v10, %v1828_v54 }
 0xbc8   :  { %v11100_v50 = vmul.f32 -1.442695, %v1834_v53  ;;  %v1904_v53 = vpop.permute.xlu1 %1903 }
 0xbc9   :  { %v11099_v57 = vmul.f32 -1.442695, %v1829_v55  ;;  %v12444_v58 = vpop.f32.mrb[26].mxu1  ;;  %v1902_v55 = vpop.permute.xlu0 %1901 }
 0xbca   :  { %14183 = vpow2.f32 %v11100_v50  ;;  %v1844_v62 = vadd.f32 %v15531_v10, %v12444_v58  ;;  %v1838_v36 = vpop.f32.mrb[27].mxu1 }
 0xbcb   :  { %14185 = vpow2.f32 %v11099_v57  ;;  %v1839_v52 = vadd.f32 %v15531_v10, %v1838_v36 }
 0xbcc   :  { %v11102_v56 = vmul.f32 -1.442695, %v1844_v62 }
 0xbcd   :  { %v11101_v1 = vmul.f32 -1.442695, %v1839_v52  ;;  %v12447_v63 = vpop.f32.mrb[28].mxu1 }
 0xbce   :  { %14187 = vpow2.f32 %v11102_v56  ;;  %v1854_v4 = vadd.f32 %v15531_v10, %v12447_v63  ;;  %v1848_v5 = vpop.f32.mrb[29].mxu1  ;;  %v15570_v56 = vld [vmem:[%s18723_s4] sm:$0xf] }
 0xbcf   :  { %14189 = vpow2.f32 %v11101_v1  ;;  %v1849_v18 = vadd.f32 %v15531_v10, %v1848_v5 }
 0xbd0   :  { %v11104_v21 = vmul.f32 -1.442695, %v1854_v4 }
 0xbd1   :  { %v11103_v60 = vmul.f32 -1.442695, %v1849_v18 }
 0xbd2   :  { %14191 = vpow2.f32 %v11104_v21 }
 0xbd3   :  { %14193 = vpow2.f32 %v11103_v60 }
 0xbd4   :  { %v14184_v61 = vpop.eup %14183 }
 0xbd5   :  { %v14186_v25 = vpop.eup %14185  ;;  %v1876_v8 = vadd.f32 1.0, %v14184_v61 }
 0xbd6   :  { %v1875_v23 = vadd.f32 1.0, %v14186_v25 }
 0xbd7   :  { %14195 = vrcp.f32 %v1876_v8 }
 0xbd8   :  { %v14188_v29 = vpop.eup %14187  ;;  %14197 = vrcp.f32 %v1875_v23 }
 0xbd9   :  { %v14190_v30 = vpop.eup %14189  ;;  %v1878_v11 = vadd.f32 1.0, %v14188_v29 }
 0xbda   :  { %v1877_v49 = vadd.f32 1.0, %v14190_v30 }
 0xbdb   :  { %14199 = vrcp.f32 %v1878_v11 }
 0xbdc   :  { %v14192_v34 = vpop.eup %14191  ;;  %14201 = vrcp.f32 %v1877_v49 }
 0xbdd   :  { %v14194_v33 = vpop.eup %14193  ;;  %v1880_v15 = vadd.f32 1.0, %v14192_v34 }
 0xbde   :  { %v1879_v17 = vadd.f32 1.0, %v14194_v33 }
 0xbdf   :  { %14203 = vrcp.f32 %v1880_v15 }
 0xbe0   :  { %14205 = vrcp.f32 %v1879_v17 }
 0xbe1   :  { %v15539_v20 = vpop.eup %14195 }
 0xbe2   :  { %v15541_v39 = vpop.eup %14197  ;;  %v1912_v44 = vmul.f32 %v15539_v20, %v1896_v13 }
 0xbe3   :  { %v1911_v46 = vmul.f32 %v15541_v39, %v1894_v16 }
 0xbe4   :  { %1925 = vrot.lane.b32.xlu1 %v1912_v44, %s18743_s30 }
 0xbe5   :  { %v15546_v22 = vpop.eup %14199  ;;  %1923 = vrot.lane.b32.xlu0 %v1911_v46, %s18743_s30 }
 0xbe6   :  { %v15549_v24 = vpop.eup %14201  ;;  %v1914_v9 = vmul.f32 %v15546_v22, %v1900_v45  ;;  %v84_v45 = vld [vmem:[%s18751_s28 + $0xb8] sm:$0xff] }
 0xbe7   :  { %v1913_v27 = vmul.f32 %v15549_v24, %v1898_v0 }
 0xbe8   :  { %1929 = vrot.lane.b32.xlu1 %v1914_v9, %s18743_s30 }
 0xbe9   :  { %v15554_v51 = vpop.eup %14203  ;;  %1927 = vrot.lane.b32.xlu0 %v1913_v27, %s18743_s30 }
 0xbea   :  { %v15557_v54 = vpop.eup %14205  ;;  %v1916_v50 = vmul.f32 %v15554_v51, %v1904_v53 }
 0xbeb   :  { %v1915_v57 = vmul.f32 %v15557_v54, %v1902_v55 }
 0xbec   :  { %1933 = vrot.lane.b32.xlu1 %v1916_v50, %s18743_s30 }
 0xbed   :  { %1931 = vrot.lane.b32.xlu0 %v1915_v57, %s18743_s30 }
 0xc56   :  { %v1926_v58 = vpop.permute.xlu1 %1925 }
 0xc57   :  { %v1924_v62 = vpop.permute.xlu0 %1923 }
 0xc58   :  { %12450 = vmatprep.mubr.msk.f32.mxu0 %vm463_vm3, %v1924_v62 }
 0xc59   :  { %12451 = vmatmul.mubr.msk.f32.vlgmr.msra.gmra.mrb[30].mxu0 %vm463_vm3, %v1926_v58 }
 0xc5a   :  { %v1930_v36 = vpop.permute.xlu1 %1929  ;;  %12481 = vmatpush3.msk.msra.mxu0 %vm467_vm0, %v15438_v37 }
 0xc5b   :  { %v1928_v52 = vpop.permute.xlu0 %1927  ;;  %12512 = vmatprep.subr.msk.mxu0 %vm467_vm0, %v15570_v56 }
 0xc5c   :  { %12453 = vmatprep.mubr.msk.f32.mxu0 %vm463_vm3, %v1928_v52 }
 0xc5d   :  { %12454 = vmatmul.mubr.msk.f32.gmra.mrb[32].mxu0 %vm463_vm3, %v1930_v36 }
 0xc5e   :  { %v1934_v63 = vpop.permute.xlu1 %1933 }
 0xc5f   :  { %v1932_v1 = vpop.permute.xlu0 %1931 }
 0xc60   :  { %12456 = vmatprep.mubr.msk.f32.mxu0 %vm463_vm3, %v1932_v1 }
 0xc61   :  { %12457 = vmatmul.mubr.msk.f32.gmra.mrb[34].mxu0 %vm463_vm3, %v1934_v63  ;;  %v15620_v63 = vld [vmem:[%s18721_s2] ss:$0 sm:$0xff] }
 0xd2c   :  { %v12452_v4 = vpop.f32.mrb[30].mxu0 }
 0xd2d   :  { %2050 = vrot.lane.b32.xlu1 %v12452_v4, %s18741_s18  ;;  %v2013_v5 = vpop.f32.mrb[31].mxu0 }
 0xd2e   :  { %2048 = vrot.lane.b32.xlu0 %v2013_v5, %s18741_s18 }
 0xd30   :  { %v12455_v18 = vpop.f32.mrb[32].mxu0 }
 0xd31   :  { %2054 = vrot.lane.b32.xlu1 %v12455_v18, %s18741_s18  ;;  %v2023_v21 = vpop.f32.mrb[33].mxu0 }
 0xd32   :  { %2052 = vrot.lane.b32.xlu0 %v2023_v21, %s18741_s18 }
 0xd34   :  { %v12458_v60 = vpop.f32.mrb[34].mxu0 }
 0xd35   :  { %2058 = vrot.lane.b32.xlu1 %v12458_v60, %s18741_s18  ;;  %v2033_v61 = vpop.f32.mrb[35].mxu0 }
 0xd36   :  { %2056 = vrot.lane.b32.xlu0 %v2033_v61, %s18741_s18  ;;  %s18756_s18 = smov 4  }
 0xd9f   :  { %v2051_v25 = vpop.permute.xlu1 %2050 }
 0xda0   :  { %v2067_v8 = vadd.f32 %v2051_v25, %v15468_v35  ;;  %v2049_v23 = vpop.permute.xlu0 %2048  ;;  %v79_v35 = vld [vmem:[%s18751_s28 + $0x90] sm:$0xff] }
 0xda1   :  { %v2066_v29 = vadd.f32 %v2049_v23, %v15471_v14 }
 0xda3   :  { %v13831_v30 = vpack.i.bf16 %v2067_v8, %v2066_v29  ;;  %v2055_v11 = vpop.permute.xlu1 %2054 }
 0xda4   :  { %v2069_v49 = vadd.f32 %v2055_v11, %v15474_v19  ;;  %v2053_v34 = vpop.permute.xlu0 %2052  ;;  %v81_v19 = vld [vmem:[%s18751_s28 + $0xa0] sm:$0xff] }
 0xda5   :  { %v2068_v33 = vadd.f32 %v2053_v34, %v15477_v41  ;;  %13832 = vrot.lane.b32.xlu0 %v13831_v30, %s18753_s24  ;;  %v80_v41 = vld [vmem:[%s18751_s28 + $0x98] sm:$0xff] }
 0xda7   :  { %v13836_v13 = vpack.i.bf16 %v2069_v49, %v2068_v33  ;;  %v2059_v15 = vpop.permute.xlu1 %2058  ;;  %v15643_v49 = vld [vmem:[%s18725_s6] ss:$0 sm:$0xff] }
 0xda8   :  { %v2071_v16 = vadd.f32 %v2059_v15, %v15480_v47  ;;  %v2057_v17 = vpop.permute.xlu0 %2056  ;;  %v83_v47 = vld [vmem:[%s18751_s28 + $0xb0] sm:$0xff] }
 0xda9   :  { %v2070_v44 = vadd.f32 %v2057_v17, %v15483_v48  ;;  %13837 = vrot.lane.b32.xlu1 %v13836_v13, %s18753_s24  ;;  %v82_v48 = vld [vmem:[%s18751_s28 + $0xa8] sm:$0xff] }
 0xdab   :  { %v13841_v14 = vpack.i.bf16 %v2071_v16, %v2070_v44 }
 0xdad   :  { %202 = vperm.xlu1 %13800, %v79_v35   ;;  %13842 = vrot.lane.b32.xlu0 %v13841_v14, %s18753_s24 }
 0xdb1   :  { %212 = vperm.xlu1 %13800, %v81_v19   ;;  %207 = vperm.xlu0 %13799, %v80_v41  }
 0xdb5   :  { %222 = vperm.xlu1 %13800, %v83_v47   ;;  %217 = vperm.xlu0 %13799, %v82_v48   ;;  %v2204_v47 = vsub.f32 1.0, %v15539_v20 }
 0xdb9   :  { %227 = vperm.xlu0 %13799, %v84_v45   ;;  %v2203_v45 = vsub.f32 1.0, %v15541_v39 }
 0xe17   :  { %v13833_v46 = vpop.permute.xlu0 %13832 }
 0xe18   :  { %v13835_v0 = vunpack.i.h.bf16 %v13833_v46  ;;  %v13834_v9 = vunpack.i.l.bf16 %v13833_v46 }
 0xe1a   :  { %v13446_v27 = vpack.c.bf16 %v13835_v0, %v13834_v9  ;;  %v2198_v0 = vmul.f32 %v15539_v20, %v15399_v59  ;;  %v2200_v59 = vmul.f32 %v15546_v22, %v15421_v7  ;;  %v2199_v20 = vmul.f32 %v15549_v24, %v15424_v12 }
 0xe1b   :  { %v13838_v53 = vpop.permute.xlu1 %13837  ;;  %v2208_v7 = vsub.f32 1.0, %v15554_v51  ;;  %v2202_v12 = vmul.f32 %v15554_v51, %v15452_v26 }
 0xe1c   :  { %v13840_v55 = vunpack.i.h.bf16 %v13838_v53  ;;  %v13839_v50 = vunpack.i.l.bf16 %v13838_v53  ;;  %13447 = vmatprep.subr.bf16.mxu1 %v13446_v27 }
 0xe1d   :  { %13449 = vmatpush3.bf16.msra.mxu1 %v13446_v27  ;;  %v2197_v27 = vmul.f32 %v15541_v39, %v15402_v6 }
 0xe1e   :  { %v13450_v57 = vpack.c.bf16 %v13840_v55, %v13839_v50  ;;  %v2206_v50 = vsub.f32 1.0, %v15546_v22 }
 0xe1f   :  { %v13843_v58 = vpop.permute.xlu0 %13842 }
 0xe20   :  { %v13845_v62 = vunpack.i.h.bf16 %v13843_v58  ;;  %v13844_v36 = vunpack.i.l.bf16 %v13843_v58  ;;  %13451 = vmatprep.subr.bf16.mxu1 %v13450_v57 }
 0xe21   :  { %13453 = vmatpush3.bf16.msra.mxu1 %v13450_v57 }
 0xe22   :  { %v13454_v52 = vpack.c.bf16 %v13845_v62, %v13844_v36  ;;  %v2205_v62 = vsub.f32 1.0, %v15549_v24 }
 0xe24   :  { %13455 = vmatprep.subr.bf16.mxu1 %v13454_v52 }
 0xe25   :  { %13457 = vmatpush3.bf16.msra.mxu1 %v13454_v52 }
 0xe28   :  { %12472 = vmatmul.mubr.msk.f32.vlgmr.msra.gmra.mrb[30].mxu1 %vm578_vm1, %v15489_v28 }
 0xe29   :  { %12474 = vmatprep.mubr.msk.f32.mxu1 %vm578_vm1, %v15496_v42 }
 0xe2c   :  { %v203_v1 = vpop.permute.xlu1 %202  ;;  %12475 = vmatmul.mubr.msk.f32.gmra.mrb[32].mxu1 %vm578_vm1, %v15503_v43 }
 0xe2d   :  { %v374_v4 = vmul.f32 %v15620_v63, %v203_v1  ;;  %12477 = vmatprep.mubr.msk.f32.mxu1 %vm578_vm1, %v15510_v31 }
 0xe2f   :  { %423 = vst.msk [vmem:[#allocation2 + $0x90] sm:$0xff] %vm404_vm2, %v374_v4  ;;  %v2207_v4 = vsub.f32 1.0, %v15557_v54 }
 0xe30   :  { %v213_v5 = vpop.permute.xlu1 %212  ;;  %v208_v18 = vpop.permute.xlu0 %207  ;;  %12478 = vmatmul.mubr.msk.f32.gmra.mrb[34].mxu1 %vm578_vm1, %v15517_v32 }
 0xe31   :  { %v376_v21 = vmul.f32 %v15620_v63, %v213_v5  ;;  %v375_v60 = vmul.f32 %v15620_v63, %v208_v18  ;;  %12503 = vmatprep.mubr.msk.f32.mxu1 %vm578_vm1, %v15524_v38  ;;  %v2201_v18 = vmul.f32 %v15557_v54, %v15454_v40 }
 0xe33   :  { %425 = vst.msk [vmem:[#allocation2 + $0xa0] sm:$0xff] %vm404_vm2, %v376_v21  ;;  %424 = vst.msk [vmem:[#allocation2 + $0x98] sm:$0xff] %vm404_vm2, %v375_v60 }
 0xe34   :  { %v223_v61 = vpop.permute.xlu1 %222  ;;  %v218_v25 = vpop.permute.xlu0 %217 }
 0xe35   :  { %v378_v8 = vmul.f32 %v15620_v63, %v223_v61  ;;  %v377_v23 = vmul.f32 %v15620_v63, %v218_v25 }
 0xe36   :  { %v15724_v61 = vld [vmem:[#allocation2 + $0x90] sm:$0xff] }
 0xe37   :  { %427 = vst.msk [vmem:[#allocation2 + $0xb0] sm:$0xff] %vm404_vm2, %v378_v8  ;;  %426 = vst.msk [vmem:[#allocation2 + $0xa8] sm:$0xff] %vm404_vm2, %v377_v23 }
 0xe38   :  { %v228_v29 = vpop.permute.xlu0 %227 }
 0xe39   :  { %v379_v30 = vmul.f32 %v15620_v63, %v228_v29 }
 0xe3a   :  { %v15721_v40 = vld [vmem:[#allocation2 + $0x98] sm:$0xff] }
 0xe3b   :  { %428 = vst.msk [vmem:[#allocation2 + $0xb8] sm:$0xff] %vm404_vm2, %v379_v30 }
 0xe3e   :  { %v15727_v29 = vld [vmem:[#allocation2 + $0xa8] sm:$0xff] }
 0xefb   :  { %v12473_v11 = vpop.f32.mrb[30].mxu1 }
 0xefc   :  { %v2168_v34 = vadd.f32 %v15643_v49, %v12473_v11  ;;  %v2162_v33 = vpop.f32.mrb[31].mxu1 }
 0xefd   :  { %v2163_v13 = vadd.f32 %v15643_v49, %v2162_v33 }
 0xefe   :  { %14207 = vtanh.f32 %v2168_v34  ;;  %v15730_v34 = vld [vmem:[#allocation2 + $0xa0] sm:$0xff] }
 0xeff   :  { %14209 = vtanh.f32 %v2163_v13  ;;  %v12476_v15 = vpop.f32.mrb[32].mxu1 }
 0xf00   :  { %v2178_v16 = vadd.f32 %v15643_v49, %v12476_v15  ;;  %v2172_v17 = vpop.f32.mrb[33].mxu1 }
 0xf01   :  { %v2173_v44 = vadd.f32 %v15643_v49, %v2172_v17 }
 0xf02   :  { %14211 = vtanh.f32 %v2178_v16  ;;  %v15733_v16 = vld [vmem:[#allocation2 + $0xb8] sm:$0xff] }
 0xf03   :  { %14213 = vtanh.f32 %v2173_v44  ;;  %v12479_v35 = vpop.f32.mrb[34].mxu1 }
 0xf04   :  { %v2188_v14 = vadd.f32 %v15643_v49, %v12479_v35  ;;  %v2182_v19 = vpop.f32.mrb[35].mxu1  ;;  %v15736_v35 = vld [vmem:[#allocation2 + $0xb0] sm:$0xff] }
 0xf05   :  { %v2183_v41 = vadd.f32 %v15643_v49, %v2182_v19 }
 0xf06   :  { %14215 = vtanh.f32 %v2188_v14 }
 0xf07   :  { %14217 = vtanh.f32 %v2183_v41 }
 0xf08   :  { %v14208_v48 = vpop.eup %14207 }
 0xf09   :  { %v14210_v46 = vpop.eup %14209  ;;  %v2210_v9 = vmul.f32 %v14208_v48, %v2204_v47 }
 0xf0a   :  { %v2209_v53 = vmul.f32 %v14210_v46, %v2203_v45 }
 0xf0b   :  { %v15657_v55 = vadd.f32 %v2210_v9, %v2198_v0 }
 0xf0c   :  { %v14212_v57 = vpop.eup %14211  ;;  %v15660_v58 = vadd.f32 %v2209_v53, %v2197_v27 }
 0xf0d   :  { %v14214_v36 = vpop.eup %14213  ;;  %2485 = vrot.lane.b32.xlu0 %v15657_v55, %s18745_s23  ;;  %2222 = vst.msk [vmem:[#allocation4 + $0x68] sm:$0xff] %vm463_vm3, %v15657_v55  ;;  %v2212_v6 = vmul.f32 %v14212_v57, %v2206_v50 }
 0xf0e   :  { %2483 = vrot.lane.b32.xlu1 %v15660_v58, %s18745_s23  ;;  %2221 = vst.msk [vmem:[#allocation4 + $0x60] sm:$0xff] %vm463_vm3, %v15660_v58  ;;  %12482 = vmatprep.mubr.msk.f32.mxu0 %vm463_vm3, %v15660_v58  ;;  %v2211_v39 = vmul.f32 %v14214_v36, %v2205_v62 }
 0xf0f   :  { %12483 = vmatmul.mubr.msk.f32.vlgmr.msra.gmra.mrb[36].mxu0 %vm463_vm3, %v15657_v55  ;;  %v15679_v52 = vadd.f32 %v2212_v6, %v2200_v59 }
 0xf10   :  { %v14216_v22 = vpop.eup %14215  ;;  %v15682_v1 = vadd.f32 %v2211_v39, %v2199_v20  ;;  %12513 = vmatpush3.msk.msra.mxu0 %vm467_vm0, %v15570_v56 }
 0xf11   :  { %v14218_v5 = vpop.eup %14217  ;;  %2489 = vrot.lane.b32.xlu0 %v15679_v52, %s18745_s23  ;;  %2224 = vst.msk [vmem:[#allocation4 + $0x78] sm:$0xff] %vm463_vm3, %v15679_v52  ;;  %v2214_v24 = vmul.f32 %v14216_v22, %v2208_v7  ;;  %12544 = vmatprep.subr.msk.mxu0 %vm467_vm0, %v15438_v37 }
 0xf12   :  { %2223 = vst.msk [vmem:[#allocation4 + $0x70] sm:$0xff] %vm463_vm3, %v15682_v1  ;;  %2487 = vrot.lane.b32.xlu1 %v15682_v1, %s18745_s23  ;;  %12485 = vmatprep.mubr.msk.f32.mxu0 %vm463_vm3, %v15682_v1  ;;  %v2213_v21 = vmul.f32 %v14218_v5, %v2207_v4 }
 0xf13   :  { %12486 = vmatmul.mubr.msk.f32.gmra.mrb[38].mxu0 %vm463_vm3, %v15679_v52  ;;  %v15705_v26 = vadd.f32 %v2214_v24, %v2202_v12 }
 0xf14   :  { %v15707_v51 = vadd.f32 %v2213_v21, %v2201_v18 }
 0xf15   :  { %2493 = vrot.lane.b32.xlu0 %v15705_v26, %s18745_s23  ;;  %2226 = vst.msk [vmem:[#allocation4 + $0x88] sm:$0xff] %vm463_vm3, %v15705_v26 }
 0xf16   :  { %2225 = vst.msk [vmem:[#allocation4 + $0x80] sm:$0xff] %vm463_vm3, %v15707_v51  ;;  %2491 = vrot.lane.b32.xlu1 %v15707_v51, %s18745_s23  ;;  %12488 = vmatprep.mubr.msk.f32.mxu0 %vm463_vm3, %v15707_v51 }
 0xf17   :  { %12489 = vmatmul.mubr.msk.f32.gmra.mrb[40].mxu0 %vm463_vm3, %v15705_v26 }
 0xfe2   :  { %v12484_v54 = vpop.f32.mrb[36].mxu0 }
 0xfe3   :  { %v2347_v60 = vadd.f32 %v12484_v54, %v15721_v40  ;;  %v2317_v25 = vpop.f32.mrb[37].mxu0 }
 0xfe4   :  { %v2346_v8 = vadd.f32 %v2317_v25, %v15724_v61 }
 0xfe6   :  { %v13458_v23 = vpack.c.bf16 %v2347_v60, %v2346_v8  ;;  %v12487_v30 = vpop.f32.mrb[38].mxu0 }
 0xfe7   :  { %v2349_v11 = vadd.f32 %v12487_v30, %v15727_v29  ;;  %v2327_v33 = vpop.f32.mrb[39].mxu0  ;;  %v2484_v30 = vpop.permute.xlu1 %2483 }
 0xfe8   :  { %v2348_v13 = vadd.f32 %v2327_v33, %v15730_v34  ;;  %13459 = vmatprep.subr.bf16.mxu1 %v13458_v23 }
 0xfe9   :  { %13461 = vmatpush3.bf16.msra.mxu1 %v13458_v23  ;;  %v2486_v23 = vpop.permute.xlu0 %2485 }
 0xfea   :  { %v13462_v15 = vpack.c.bf16 %v2349_v11, %v2348_v13  ;;  %v12490_v17 = vpop.f32.mrb[40].mxu0 }
 0xfeb   :  { %v2351_v44 = vadd.f32 %v12490_v17, %v15733_v16  ;;  %v2337_v14 = vpop.f32.mrb[41].mxu0 }
 0xfec   :  { %v2350_v19 = vadd.f32 %v2337_v14, %v15736_v35  ;;  %13463 = vmatprep.subr.bf16.mxu1 %v13462_v15  ;;  %v2488_v14 = vpop.permute.xlu1 %2487 }
 0xfed   :  { %13465 = vmatpush3.bf16.msra.mxu1 %v13462_v15  ;;  %v2490_v17 = vpop.permute.xlu0 %2489 }
 0xfee   :  { %v13466_v41 = vpack.c.bf16 %v2351_v44, %v2350_v19 }
 0xff0   :  { %13467 = vmatprep.subr.bf16.mxu1 %v13466_v41 }
 0xff1   :  { %13469 = vmatpush3.bf16.msra.mxu1 %v13466_v41 }
 0xff4   :  { %12504 = vmatmul.mubr.msk.f32.vlgmr.msra.gmra.mrb[36].mxu1 %vm578_vm1, %v15489_v28 }
 0xff5   :  { %12506 = vmatprep.mubr.msk.f32.mxu1 %vm578_vm1, %v15496_v42 }
 0xff8   :  { %12507 = vmatmul.mubr.msk.f32.gmra.mrb[38].mxu1 %vm578_vm1, %v15503_v43 }
 0xff9   :  { %12509 = vmatprep.mubr.msk.f32.mxu1 %vm578_vm1, %v15510_v31 }
 0xffc   :  { %12510 = vmatmul.mubr.msk.f32.gmra.mrb[40].mxu1 %vm578_vm1, %v15517_v32 }
 0xffd   :  { %12535 = vmatprep.mubr.msk.f32.mxu1 %vm578_vm1, %v15524_v38 }
0x10c7   :  { %v12505_v47 = vpop.f32.mrb[36].mxu1 }
0x10c8   :  { %v2424_v48 = vadd.f32 %v15531_v10, %v12505_v47  ;;  %v2418_v45 = vpop.f32.mrb[37].mxu1 }
0x10c9   :  { %v2419_v46 = vadd.f32 %v15531_v10, %v2418_v45 }
0x10ca   :  { %v11132_v0 = vmul.f32 -1.442695, %v2424_v48 }
0x10cb   :  { %v11131_v9 = vmul.f32 -1.442695, %v2419_v46  ;;  %v12508_v27 = vpop.f32.mrb[38].mxu1  ;;  %v2494_v46 = vpop.permute.xlu0 %2493 }
0x10cc   :  { %14219 = vpow2.f32 %v11132_v0  ;;  %v2434_v53 = vadd.f32 %v15531_v10, %v12508_v27  ;;  %v2428_v50 = vpop.f32.mrb[39].mxu1 }
0x10cd   :  { %14221 = vpow2.f32 %v11131_v9  ;;  %v2429_v57 = vadd.f32 %v15531_v10, %v2428_v50  ;;  %v2492_v9 = vpop.permute.xlu1 %2491 }
0x10ce   :  { %v11134_v62 = vmul.f32 -1.442695, %v2434_v53 }
0x10cf   :  { %v11133_v36 = vmul.f32 -1.442695, %v2429_v57  ;;  %v12511_v59 = vpop.f32.mrb[40].mxu1 }
0x10d0   :  { %14223 = vpow2.f32 %v11134_v62  ;;  %v2444_v6 = vadd.f32 %v15531_v10, %v12511_v59  ;;  %v2438_v20 = vpop.f32.mrb[41].mxu1 }
0x10d1   :  { %14225 = vpow2.f32 %v11133_v36  ;;  %v2439_v39 = vadd.f32 %v15531_v10, %v2438_v20 }
0x10d2   :  { %v11136_v7 = vmul.f32 -1.442695, %v2444_v6 }
0x10d3   :  { %v11135_v22 = vmul.f32 -1.442695, %v2439_v39 }
0x10d4   :  { %14227 = vpow2.f32 %v11136_v7 }
0x10d5   :  { %14229 = vpow2.f32 %v11135_v22 }
0x10d6   :  { %v14220_v4 = vpop.eup %14219 }
0x10d7   :  { %v14222_v5 = vpop.eup %14221  ;;  %v2466_v12 = vadd.f32 1.0, %v14220_v4 }
0x10d8   :  { %v2465_v24 = vadd.f32 1.0, %v14222_v5 }
0x10d9   :  { %14231 = vrcp.f32 %v2466_v12 }
0x10da   :  { %v14224_v18 = vpop.eup %14223  ;;  %14233 = vrcp.f32 %v2465_v24 }
0x10db   :  { %v14226_v21 = vpop.eup %14225  ;;  %v2468_v54 = vadd.f32 1.0, %v14224_v18 }
0x10dc   :  { %v2467_v60 = vadd.f32 1.0, %v14226_v21 }
0x10dd   :  { %14235 = vrcp.f32 %v2468_v54 }
0x10de   :  { %v14228_v25 = vpop.eup %14227  ;;  %14237 = vrcp.f32 %v2467_v60 }
0x10df   :  { %v14230_v8 = vpop.eup %14229  ;;  %v2470_v10 = vadd.f32 1.0, %v14228_v25 }
0x10e0   :  { %v2469_v11 = vadd.f32 1.0, %v14230_v8 }
0x10e1   :  { %14239 = vrcp.f32 %v2470_v10 }
0x10e2   :  { %14241 = vrcp.f32 %v2469_v11 }
0x10e3   :  { %v15757_v33 = vpop.eup %14231 }
0x10e4   :  { %v15759_v13 = vpop.eup %14233  ;;  %v2502_v15 = vmul.f32 %v15757_v33, %v2486_v23 }
0x10e5   :  { %v2501_v44 = vmul.f32 %v15759_v13, %v2484_v30 }
0x10e6   :  { %2515 = vrot.lane.b32.xlu0 %v2502_v15, %s18743_s30 }
0x10e7   :  { %v15764_v19 = vpop.eup %14235  ;;  %2513 = vrot.lane.b32.xlu1 %v2501_v44, %s18743_s30 }
0x10e8   :  { %v15767_v41 = vpop.eup %14237  ;;  %v2504_v47 = vmul.f32 %v15764_v19, %v2490_v17  ;;  %v90_v17 = vld [vmem:[%s18751_s28 + $0xe8] sm:$0xff] }
0x10e9   :  { %v2503_v48 = vmul.f32 %v15767_v41, %v2488_v14 }
0x10ea   :  { %2519 = vrot.lane.b32.xlu0 %v2504_v47, %s18743_s30 }
0x10eb   :  { %v15772_v45 = vpop.eup %14239  ;;  %2517 = vrot.lane.b32.xlu1 %v2503_v48, %s18743_s30 }
0x10ec   :  { %v15775_v0 = vpop.eup %14241  ;;  %v2506_v27 = vmul.f32 %v15772_v45, %v2494_v46 }
0x10ed   :  { %v2505_v53 = vmul.f32 %v15775_v0, %v2492_v9 }
0x10ee   :  { %2523 = vrot.lane.b32.xlu0 %v2506_v27, %s18743_s30 }
0x10ef   :  { %2521 = vrot.lane.b32.xlu1 %v2505_v53, %s18743_s30 }
0x1158   :  { %v2516_v50 = vpop.permute.xlu0 %2515 }
0x1159   :  { %v2514_v57 = vpop.permute.xlu1 %2513 }
0x115a   :  { %12514 = vmatprep.mubr.msk.f32.mxu0 %vm463_vm3, %v2514_v57 }
0x115b   :  { %12515 = vmatmul.mubr.msk.f32.vlgmr.msra.gmra.mrb[42].mxu0 %vm463_vm3, %v2516_v50 }
0x115c   :  { %v2520_v62 = vpop.permute.xlu0 %2519  ;;  %12545 = vmatpush3.msk.msra.mxu0 %vm467_vm0, %v15438_v37 }
0x115d   :  { %v2518_v36 = vpop.permute.xlu1 %2517  ;;  %12576 = vmatprep.subr.msk.mxu0 %vm467_vm0, %v15570_v56 }
0x115e   :  { %12517 = vmatprep.mubr.msk.f32.mxu0 %vm463_vm3, %v2518_v36 }
0x115f   :  { %12518 = vmatmul.mubr.msk.f32.gmra.mrb[44].mxu0 %vm463_vm3, %v2520_v62 }
0x1160   :  { %v2524_v6 = vpop.permute.xlu0 %2523 }
0x1161   :  { %v2522_v59 = vpop.permute.xlu1 %2521 }
0x1162   :  { %12520 = vmatprep.mubr.msk.f32.mxu0 %vm463_vm3, %v2522_v59 }
0x1163   :  { %12521 = vmatmul.mubr.msk.f32.gmra.mrb[46].mxu0 %vm463_vm3, %v2524_v6 }
0x122e   :  { %v12516_v20 = vpop.f32.mrb[42].mxu0 }
0x122f   :  { %2640 = vrot.lane.b32.xlu0 %v12516_v20, %s18754_s1  ;;  %v2603_v39 = vpop.f32.mrb[43].mxu0 }
0x1230   :  { %2638 = vrot.lane.b32.xlu1 %v2603_v39, %s18754_s1 }
0x1232   :  { %v12519_v37 = vpop.f32.mrb[44].mxu0 }
0x1233   :  { %2644 = vrot.lane.b32.xlu0 %v12519_v37, %s18754_s1  ;;  %v2613_v7 = vpop.f32.mrb[45].mxu0 }
0x1234   :  { %2642 = vrot.lane.b32.xlu1 %v2613_v7, %s18754_s1 }
0x1236   :  { %v12522_v22 = vpop.f32.mrb[46].mxu0 }
0x1237   :  { %2648 = vrot.lane.b32.xlu0 %v12522_v22, %s18754_s1  ;;  %v2623_v4 = vpop.f32.mrb[47].mxu0 }
0x1238   :  { %2646 = vrot.lane.b32.xlu1 %v2623_v4, %s18754_s1 }
0x12a1   :  { %v2641_v5 = vpop.permute.xlu0 %2640 }
0x12a2   :  { %v2657_v12 = vadd.f32 %v2641_v5, %v15721_v40  ;;  %v2639_v24 = vpop.permute.xlu1 %2638  ;;  %v85_v40 = vld [vmem:[%s18751_s28 + $0xc0] sm:$0xff] }
0x12a3   :  { %v2656_v18 = vadd.f32 %v2639_v24, %v15724_v61 }
0x12a5   :  { %v13846_v21 = vpack.i.bf16 %v2657_v12, %v2656_v18  ;;  %v2645_v54 = vpop.permute.xlu0 %2644 }
0x12a6   :  { %v2659_v60 = vadd.f32 %v2645_v54, %v15727_v29  ;;  %v2643_v25 = vpop.permute.xlu1 %2642  ;;  %v87_v29 = vld [vmem:[%s18751_s28 + $0xd0] sm:$0xff] }
0x12a7   :  { %v2658_v8 = vadd.f32 %v2643_v25, %v15730_v34  ;;  %13847 = vrot.lane.b32.xlu1 %v13846_v21, %s18753_s24  ;;  %v86_v34 = vld [vmem:[%s18751_s28 + $0xc8] sm:$0xff] }
0x12a9   :  { %v13851_v23 = vpack.i.bf16 %v2659_v60, %v2658_v8  ;;  %v2649_v10 = vpop.permute.xlu0 %2648 }
0x12aa   :  { %v2661_v30 = vadd.f32 %v2649_v10, %v15733_v16  ;;  %v2647_v11 = vpop.permute.xlu1 %2646  ;;  %v89_v16 = vld [vmem:[%s18751_s28 + $0xe0] sm:$0xff] }
0x12ab   :  { %v2660_v15 = vadd.f32 %v2647_v11, %v15736_v35  ;;  %13852 = vrot.lane.b32.xlu0 %v13851_v23, %s18753_s24  ;;  %v88_v35 = vld [vmem:[%s18751_s28 + $0xd8] sm:$0xff]  ;;  %v2794_v23 = vsub.f32 1.0, %v15757_v33 }
0x12ad   :  { %v13856_v61 = vpack.i.bf16 %v2661_v30, %v2660_v15  ;;  %v2793_v30 = vsub.f32 1.0, %v15759_v13  ;;  %v2788_v15 = vmul.f32 %v15757_v33, %v15657_v55  ;;  %v2790_v55 = vmul.f32 %v15764_v19, %v15679_v52 }
0x12ae   :  { %v2789_v33 = vmul.f32 %v15767_v41, %v15682_v1  ;;  %v2798_v52 = vsub.f32 1.0, %v15772_v45  ;;  %v2792_v1 = vmul.f32 %v15772_v45, %v15705_v26 }
0x12af   :  { %232 = vperm.xlu0 %13799, %v85_v40   ;;  %13857 = vrot.lane.b32.xlu1 %v13856_v61, %s18753_s24  ;;  %v2787_v61 = vmul.f32 %v15759_v13, %v15660_v58 }
0x12b3   :  { %242 = vperm.xlu0 %13799, %v87_v29   ;;  %237 = vperm.xlu1 %13800, %v86_v34  }
0x12b7   :  { %252 = vperm.xlu0 %13799, %v89_v16   ;;  %247 = vperm.xlu1 %13800, %v88_v35  }
0x12bb   :  { %257 = vperm.xlu1 %13800, %v90_v17   ;;  %v2795_v17 = vsub.f32 1.0, %v15767_v41 }
0x1319   :  { %v13848_v44 = vpop.permute.xlu1 %13847 }
0x131a   :  { %v13850_v14 = vunpack.i.h.bf16 %v13848_v44  ;;  %v13849_v47 = vunpack.i.l.bf16 %v13848_v44 }
0x131c   :  { %v13470_v48 = vpack.c.bf16 %v13850_v14, %v13849_v47 }
0x131d   :  { %v13853_v46 = vpop.permute.xlu0 %13852 }
0x131e   :  { %v13855_v9 = vunpack.i.h.bf16 %v13853_v46  ;;  %v13854_v27 = vunpack.i.l.bf16 %v13853_v46  ;;  %13471 = vmatprep.subr.bf16.mxu1 %v13470_v48 }
0x131f   :  { %13473 = vmatpush3.bf16.msra.mxu1 %v13470_v48  ;;  %v2797_v48 = vsub.f32 1.0, %v15775_v0 }
0x1320   :  { %v13474_v53 = vpack.c.bf16 %v13855_v9, %v13854_v27  ;;  %v15899_v9 = vld [vmem:[%s18722_s3] sm:$0xf] }
0x1321   :  { %v13858_v50 = vpop.permute.xlu1 %13857 }
0x1322   :  { %v13860_v57 = vunpack.i.h.bf16 %v13858_v50  ;;  %v13859_v62 = vunpack.i.l.bf16 %v13858_v50  ;;  %13475 = vmatprep.subr.bf16.mxu1 %v13474_v53 }
0x1323   :  { %13477 = vmatpush3.bf16.msra.mxu1 %v13474_v53 }
0x1324   :  { %v13478_v36 = vpack.c.bf16 %v13860_v57, %v13859_v62 }
0x1326   :  { %13479 = vmatprep.subr.bf16.mxu1 %v13478_v36 }
0x1327   :  { %13481 = vmatpush3.bf16.msra.mxu1 %v13478_v36 }
0x132a   :  { %12536 = vmatmul.mubr.msk.f32.vlgmr.msra.gmra.mrb[42].mxu1 %vm578_vm1, %v15489_v28 }
0x132b   :  { %12538 = vmatprep.mubr.msk.f32.mxu1 %vm578_vm1, %v15496_v42 }
0x132e   :  { %v233_v59 = vpop.permute.xlu0 %232  ;;  %12539 = vmatmul.mubr.msk.f32.gmra.mrb[44].mxu1 %vm578_vm1, %v15503_v43 }
0x132f   :  { %v380_v6 = vmul.f32 %v15620_v63, %v233_v59  ;;  %12541 = vmatprep.mubr.msk.f32.mxu1 %vm578_vm1, %v15510_v31 }
0x1331   :  { %429 = vst.msk [vmem:[#allocation2 + $0xc0] sm:$0xff] %vm404_vm2, %v380_v6 }
0x1332   :  { %v243_v20 = vpop.permute.xlu0 %242  ;;  %v238_v39 = vpop.permute.xlu1 %237  ;;  %12542 = vmatmul.mubr.msk.f32.gmra.mrb[46].mxu1 %vm578_vm1, %v15517_v32 }
0x1333   :  { %v382_v28 = vmul.f32 %v15620_v63, %v243_v20  ;;  %v381_v42 = vmul.f32 %v15620_v63, %v238_v39  ;;  %12567 = vmatprep.mubr.msk.f32.mxu1 %vm578_vm1, %v15524_v38 }
0x1335   :  { %431 = vst.msk [vmem:[#allocation2 + $0xd0] sm:$0xff] %vm404_vm2, %v382_v28  ;;  %430 = vst.msk [vmem:[#allocation2 + $0xc8] sm:$0xff] %vm404_vm2, %v381_v42 }
0x1336   :  { %v253_v43 = vpop.permute.xlu0 %252  ;;  %v248_v31 = vpop.permute.xlu1 %247 }
0x1337   :  { %v384_v37 = vmul.f32 %v15620_v63, %v253_v43  ;;  %v383_v7 = vmul.f32 %v15620_v63, %v248_v31 }
0x1338   :  { %v15932_v50 = vld [vmem:[#allocation2 + $0xc0] sm:$0xff] }
0x1339   :  { %433 = vst.msk [vmem:[#allocation2 + $0xe0] sm:$0xff] %vm404_vm2, %v384_v37  ;;  %432 = vst.msk [vmem:[#allocation2 + $0xd8] sm:$0xff] %vm404_vm2, %v383_v7 }
0x133a   :  { %v258_v32 = vpop.permute.xlu1 %257 }
0x133b   :  { %v385_v22 = vmul.f32 %v15620_v63, %v258_v32 }
0x133c   :  { %v15938_v39 = vld [vmem:[#allocation2 + $0xd0] sm:$0xff] }
0x133d   :  { %434 = vst.msk [vmem:[#allocation2 + $0xe8] sm:$0xff] %vm404_vm2, %v385_v22 }
0x1340   :  { %v15935_v59 = vld [vmem:[#allocation2 + $0xd8] sm:$0xff]  ;;  %v15944_v32 = vld [vmem:[#allocation2 + $0xe0] sm:$0xff] }
0x1344   :  { %v15941_v31 = vld [vmem:[#allocation2 + $0xe8] sm:$0xff] }
0x13fd   :  { %v12537_v38 = vpop.f32.mrb[42].mxu1 }
0x13fe   :  { %v2758_v4 = vadd.f32 %v15643_v49, %v12537_v38  ;;  %v2752_v5 = vpop.f32.mrb[43].mxu1 }
0x13ff   :  { %v2753_v12 = vadd.f32 %v15643_v49, %v2752_v5  ;;  %v15950_v5 = vld [vmem:[%s18752_s26 + $0x8] sm:$0xff] }
0x1400   :  { %14243 = vtanh.f32 %v2758_v4 }
0x1401   :  { %14245 = vtanh.f32 %v2753_v12  ;;  %v12540_v24 = vpop.f32.mrb[44].mxu1  ;;  %v15957_v12 = vld [vmem:[%s18752_s26 + $0x10] sm:$0xff] }
0x1402   :  { %v2768_v18 = vadd.f32 %v15643_v49, %v12540_v24  ;;  %v2762_v21 = vpop.f32.mrb[45].mxu1  ;;  %v15964_v24 = vld [vmem:[%s18752_s26 + $0x18] sm:$0xff] }
0x1403   :  { %v2763_v54 = vadd.f32 %v15643_v49, %v2762_v21  ;;  %v15978_v21 = vld [vmem:[%s18752_s26 + $0x28] sm:$0xff] }
0x1404   :  { %14247 = vtanh.f32 %v2768_v18  ;;  %v15971_v18 = vld [vmem:[%s18752_s26 + $0x20] sm:$0xff] }
0x1405   :  { %14249 = vtanh.f32 %v2763_v54  ;;  %v12543_v60 = vpop.f32.mrb[46].mxu1  ;;  %v15985_v54 = vld [vmem:[%s18752_s26] sm:$0xff] }
0x1406   :  { %v2778_v63 = vadd.f32 %v15643_v49, %v12543_v60  ;;  %v2772_v25 = vpop.f32.mrb[47].mxu1 }
0x1407   :  { %v2773_v8 = vadd.f32 %v15643_v49, %v2772_v25  ;;  %v2796_v49 = vsub.f32 1.0, %v15764_v19 }
0x1408   :  { %14251 = vtanh.f32 %v2778_v63  ;;  %v15992_v63 = vld [vmem:[%s18724_s5] ss:$0 sm:$0xff] }
0x1409   :  { %14253 = vtanh.f32 %v2773_v8 }
0x140a   :  { %v14244_v10 = vpop.eup %14243 }
0x140b   :  { %v14246_v11 = vpop.eup %14245  ;;  %v2800_v40 = vmul.f32 %v14244_v10, %v2794_v23 }
0x140c   :  { %v2799_v29 = vmul.f32 %v14246_v11, %v2793_v30 }
0x140d   :  { %v15860_v34 = vadd.f32 %v2800_v40, %v2788_v15 }
0x140e   :  { %v14248_v16 = vpop.eup %14247  ;;  %v15863_v35 = vadd.f32 %v2799_v29, %v2787_v61 }
0x140f   :  { %v14250_v44 = vpop.eup %14249  ;;  %3075 = vrot.lane.b32.xlu1 %v15860_v34, %s18745_s23  ;;  %2812 = vst.msk [vmem:[#allocation4 + $0x98] sm:$0xff] %vm463_vm3, %v15860_v34  ;;  %v2802_v58 = vmul.f32 %v14248_v16, %v2796_v49 }
0x1410   :  { %3073 = vrot.lane.b32.xlu0 %v15863_v35, %s18745_s23  ;;  %2811 = vst.msk [vmem:[#allocation4 + $0x90] sm:$0xff] %vm463_vm3, %v15863_v35  ;;  %12546 = vmatprep.mubr.msk.f32.mxu0 %vm463_vm3, %v15863_v35  ;;  %v2801_v13 = vmul.f32 %v14250_v44, %v2795_v17 }
0x1411   :  { %12547 = vmatmul.mubr.msk.f32.vlgmr.msra.gmra.mrb[48].mxu0 %vm463_vm3, %v15860_v34  ;;  %v15882_v14 = vadd.f32 %v2802_v58, %v2790_v55 }
0x1412   :  { %v14252_v19 = vpop.eup %14251  ;;  %v15885_v47 = vadd.f32 %v2801_v13, %v2789_v33  ;;  %12577 = vmatpush3.msk.msra.mxu0 %vm467_vm0, %v15570_v56  ;;  %v2791_v56 = vmul.f32 %v15775_v0, %v15707_v51  ;;  %v15929_v51 = vld [vmem:[#allocation2 + $0xc8] sm:$0xff] }
0x1413   :  { %v14254_v46 = vpop.eup %14253  ;;  %3079 = vrot.lane.b32.xlu1 %v15882_v14, %s18745_s23  ;;  %2814 = vst.msk [vmem:[#allocation4 + $0xa8] sm:$0xff] %vm463_vm3, %v15882_v14  ;;  %v2804_v41 = vmul.f32 %v14252_v19, %v2798_v52  ;;  %12608 = vmatprep.subr.msk.mxu0 %vm467_vm0, %v15899_v9 }
0x1414   :  { %2813 = vst.msk [vmem:[#allocation4 + $0xa0] sm:$0xff] %vm463_vm3, %v15885_v47  ;;  %3077 = vrot.lane.b32.xlu0 %v15885_v47, %s18745_s23  ;;  %12549 = vmatprep.mubr.msk.f32.mxu0 %vm463_vm3, %v15885_v47  ;;  %v2803_v26 = vmul.f32 %v14254_v46, %v2797_v48 }
0x1415   :  { %12550 = vmatmul.mubr.msk.f32.gmra.mrb[50].mxu0 %vm463_vm3, %v15882_v14  ;;  %v15913_v45 = vadd.f32 %v2804_v41, %v2792_v1 }
0x1416   :  { %v15915_v27 = vadd.f32 %v2803_v26, %v2791_v56 }
0x1417   :  { %3083 = vrot.lane.b32.xlu1 %v15913_v45, %s18745_s23  ;;  %2816 = vst.msk [vmem:[#allocation4 + $0xb8] sm:$0xff] %vm463_vm3, %v15913_v45 }
0x1418   :  { %2815 = vst.msk [vmem:[#allocation4 + $0xb0] sm:$0xff] %vm463_vm3, %v15915_v27  ;;  %3081 = vrot.lane.b32.xlu0 %v15915_v27, %s18745_s23  ;;  %12552 = vmatprep.mubr.msk.f32.mxu0 %vm463_vm3, %v15915_v27 }
0x1419   :  { %12553 = vmatmul.mubr.msk.f32.gmra.mrb[52].mxu0 %vm463_vm3, %v15913_v45 }
0x14e4   :  { %v12548_v0 = vpop.f32.mrb[48].mxu0 }
0x14e5   :  { %v2937_v53 = vadd.f32 %v12548_v0, %v15929_v51  ;;  %v2907_v57 = vpop.f32.mrb[49].mxu0 }
0x14e6   :  { %v2936_v62 = vadd.f32 %v2907_v57, %v15932_v50 }
0x14e8   :  { %v13482_v36 = vpack.c.bf16 %v2937_v53, %v2936_v62  ;;  %v12551_v6 = vpop.f32.mrb[50].mxu0  ;;  %v3076_v53 = vpop.permute.xlu1 %3075 }
0x14e9   :  { %v2939_v20 = vadd.f32 %v12551_v6, %v15935_v59  ;;  %v2917_v28 = vpop.f32.mrb[51].mxu0  ;;  %v3074_v62 = vpop.permute.xlu0 %3073 }
0x14ea   :  { %v2938_v42 = vadd.f32 %v2917_v28, %v15938_v39  ;;  %13483 = vmatprep.subr.bf16.mxu1 %v13482_v36 }
0x14eb   :  { %13485 = vmatpush3.bf16.msra.mxu1 %v13482_v36 }
0x14ec   :  { %v13486_v43 = vpack.c.bf16 %v2939_v20, %v2938_v42  ;;  %v12554_v37 = vpop.f32.mrb[52].mxu0  ;;  %v3080_v42 = vpop.permute.xlu1 %3079 }
0x14ed   :  { %v2941_v7 = vadd.f32 %v12554_v37, %v15941_v31  ;;  %v2927_v22 = vpop.f32.mrb[53].mxu0  ;;  %v3078_v37 = vpop.permute.xlu0 %3077 }
0x14ee   :  { %v2940_v38 = vadd.f32 %v2927_v22, %v15944_v32  ;;  %13487 = vmatprep.subr.bf16.mxu1 %v13486_v43 }
0x14ef   :  { %13489 = vmatpush3.bf16.msra.mxu1 %v13486_v43 }
0x14f0   :  { %v13490_v4 = vpack.c.bf16 %v2941_v7, %v2940_v38 }
0x14f2   :  { %13491 = vmatprep.subr.bf16.mxu1 %v13490_v4 }
0x14f3   :  { %13493 = vmatpush3.bf16.msra.mxu1 %v13490_v4 }
0x14f6   :  { %12568 = vmatmul.mubr.msk.f32.vlgmr.msra.gmra.mrb[48].mxu1 %vm578_vm1, %v15950_v5 }
0x14f7   :  { %12570 = vmatprep.mubr.msk.f32.mxu1 %vm578_vm1, %v15957_v12 }
0x14fa   :  { %12571 = vmatmul.mubr.msk.f32.gmra.mrb[50].mxu1 %vm578_vm1, %v15964_v24 }
0x14fb   :  { %12573 = vmatprep.mubr.msk.f32.mxu1 %vm578_vm1, %v15971_v18 }
0x14fe   :  { %12574 = vmatmul.mubr.msk.f32.gmra.mrb[52].mxu1 %vm578_vm1, %v15978_v21 }
0x14ff   :  { %12599 = vmatprep.mubr.msk.f32.mxu1 %vm578_vm1, %v15985_v54 }
0x15c9   :  { %v12569_v60 = vpop.f32.mrb[48].mxu1 }
0x15ca   :  { %v3014_v25 = vadd.f32 %v15992_v63, %v12569_v60  ;;  %v3008_v8 = vpop.f32.mrb[49].mxu1 }
0x15cb   :  { %v3009_v23 = vadd.f32 %v15992_v63, %v3008_v8 }
0x15cc   :  { %v11164_v10 = vmul.f32 -1.442695, %v3014_v25  ;;  %v3084_v25 = vpop.permute.xlu1 %3083 }
0x15cd   :  { %v11163_v30 = vmul.f32 -1.442695, %v3009_v23  ;;  %v12572_v11 = vpop.f32.mrb[50].mxu1  ;;  %v3082_v23 = vpop.permute.xlu0 %3081 }
0x15ce   :  { %14255 = vpow2.f32 %v11164_v10  ;;  %v3024_v15 = vadd.f32 %v15992_v63, %v12572_v11  ;;  %v3018_v40 = vpop.f32.mrb[51].mxu1 }
0x15cf   :  { %14257 = vpow2.f32 %v11163_v30  ;;  %v3019_v61 = vadd.f32 %v15992_v63, %v3018_v40 }
0x15d0   :  { %v11166_v29 = vmul.f32 -1.442695, %v3024_v15 }
0x15d1   :  { %v11165_v49 = vmul.f32 -1.442695, %v3019_v61  ;;  %v12575_v16 = vpop.f32.mrb[52].mxu1 }
0x15d2   :  { %14259 = vpow2.f32 %v11166_v29  ;;  %v3034_v17 = vadd.f32 %v15992_v63, %v12575_v16  ;;  %v3028_v44 = vpop.f32.mrb[53].mxu1  ;;  %v16031_v29 = vld [vmem:[%s18723_s4] sm:$0xf] }
0x15d3   :  { %14261 = vpow2.f32 %v11165_v49  ;;  %v3029_v55 = vadd.f32 %v15992_v63, %v3028_v44 }
0x15d4   :  { %v11168_v58 = vmul.f32 -1.442695, %v3034_v17 }
0x15d5   :  { %v11167_v33 = vmul.f32 -1.442695, %v3029_v55 }
0x15d6   :  { %14263 = vpow2.f32 %v11168_v58 }
0x15d7   :  { %14265 = vpow2.f32 %v11167_v33 }
0x15d8   :  { %v14256_v13 = vpop.eup %14255 }
0x15d9   :  { %v14258_v52 = vpop.eup %14257  ;;  %v3056_v19 = vadd.f32 1.0, %v14256_v13 }
0x15da   :  { %v3055_v48 = vadd.f32 1.0, %v14258_v52 }
0x15db   :  { %14267 = vrcp.f32 %v3056_v19 }
0x15dc   :  { %v14260_v46 = vpop.eup %14259  ;;  %14269 = vrcp.f32 %v3055_v48 }
0x15dd   :  { %v14262_v1 = vpop.eup %14261  ;;  %v3058_v41 = vadd.f32 1.0, %v14260_v46 }
0x15de   :  { %v3057_v56 = vadd.f32 1.0, %v14262_v1 }
0x15df   :  { %14271 = vrcp.f32 %v3058_v41 }
0x15e0   :  { %v14264_v26 = vpop.eup %14263  ;;  %14273 = vrcp.f32 %v3057_v56 }
0x15e1   :  { %v14266_v0 = vpop.eup %14265  ;;  %v3060_v57 = vadd.f32 1.0, %v14264_v26 }
0x15e2   :  { %v3059_v36 = vadd.f32 1.0, %v14266_v0 }
0x15e3   :  { %14275 = vrcp.f32 %v3060_v57 }
0x15e4   :  { %14277 = vrcp.f32 %v3059_v36 }
0x15e5   :  { %v16000_v6 = vpop.eup %14267 }
0x15e6   :  { %v16002_v20 = vpop.eup %14269  ;;  %v3092_v28 = vmul.f32 %v16000_v6, %v3076_v53 }
0x15e7   :  { %v3091_v43 = vmul.f32 %v16002_v20, %v3074_v62 }
0x15e8   :  { %3105 = vrot.lane.b32.xlu1 %v3092_v28, %s18755_s29 }
0x15e9   :  { %v16007_v7 = vpop.eup %14271  ;;  %3103 = vrot.lane.b32.xlu0 %v3091_v43, %s18755_s29 }
0x15ea   :  { %v16010_v22 = vpop.eup %14273  ;;  %v3094_v38 = vmul.f32 %v16007_v7, %v3080_v42  ;;  %v96_v42 = vld [vmem:[%s18751_s28 + $0x118] sm:$0xff] }
0x15eb   :  { %v3093_v4 = vmul.f32 %v16010_v22, %v3078_v37 }
0x15ec   :  { %3109 = vrot.lane.b32.xlu1 %v3094_v38, %s18755_s29 }
0x15ed   :  { %v16015_v60 = vpop.eup %14275  ;;  %3107 = vrot.lane.b32.xlu0 %v3093_v4, %s18755_s29 }
0x15ee   :  { %v16018_v8 = vpop.eup %14277  ;;  %v3096_v10 = vmul.f32 %v16015_v60, %v3084_v25 }
0x15ef   :  { %v3095_v30 = vmul.f32 %v16018_v8, %v3082_v23 }
0x15f0   :  { %3113 = vrot.lane.b32.xlu1 %v3096_v10, %s18755_s29 }
0x15f1   :  { %3111 = vrot.lane.b32.xlu0 %v3095_v30, %s18755_s29 }
0x165a   :  { %v3106_v11 = vpop.permute.xlu1 %3105 }
0x165b   :  { %v3104_v15 = vpop.permute.xlu0 %3103 }
0x165c   :  { %12578 = vmatprep.mubr.msk.f32.mxu0 %vm463_vm3, %v3104_v15 }
0x165d   :  { %12579 = vmatmul.mubr.msk.f32.vlgmr.msra.gmra.mrb[54].mxu0 %vm463_vm3, %v3106_v11 }
0x165e   :  { %v3110_v40 = vpop.permute.xlu1 %3109  ;;  %12609 = vmatpush3.msk.msra.mxu0 %vm467_vm0, %v15899_v9 }
0x165f   :  { %v3108_v61 = vpop.permute.xlu0 %3107  ;;  %12640 = vmatprep.subr.msk.mxu0 %vm467_vm0, %v16031_v29 }
0x1660   :  { %12581 = vmatprep.mubr.msk.f32.mxu0 %vm463_vm3, %v3108_v61 }
0x1661   :  { %12582 = vmatmul.mubr.msk.f32.gmra.mrb[56].mxu0 %vm463_vm3, %v3110_v40 }
0x1662   :  { %v3114_v16 = vpop.permute.xlu1 %3113 }
0x1663   :  { %v3112_v49 = vpop.permute.xlu0 %3111 }
0x1664   :  { %12584 = vmatprep.mubr.msk.f32.mxu0 %vm463_vm3, %v3112_v49 }
0x1665   :  { %12585 = vmatmul.mubr.msk.f32.gmra.mrb[58].mxu0 %vm463_vm3, %v3114_v16  ;;  %v16081_v16 = vld [vmem:[%s18721_s2] ss:$0 sm:$0xff] }
0x1730   :  { %v12580_v17 = vpop.f32.mrb[54].mxu0 }
0x1731   :  { %3230 = vrot.lane.b32.xlu1 %v12580_v17, %s18754_s1  ;;  %v3193_v44 = vpop.f32.mrb[55].mxu0 }
0x1732   :  { %3228 = vrot.lane.b32.xlu0 %v3193_v44, %s18754_s1 }
0x1734   :  { %v12583_v55 = vpop.f32.mrb[56].mxu0 }
0x1735   :  { %3234 = vrot.lane.b32.xlu1 %v12583_v55, %s18754_s1  ;;  %v3203_v58 = vpop.f32.mrb[57].mxu0 }
0x1736   :  { %3232 = vrot.lane.b32.xlu0 %v3203_v58, %s18754_s1 }
0x1738   :  { %v12586_v33 = vpop.f32.mrb[58].mxu0 }
0x1739   :  { %3238 = vrot.lane.b32.xlu1 %v12586_v33, %s18754_s1  ;;  %v3213_v13 = vpop.f32.mrb[59].mxu0 }
0x173a   :  { %3236 = vrot.lane.b32.xlu0 %v3213_v13, %s18754_s1 }
0x17a3   :  { %v3231_v52 = vpop.permute.xlu1 %3230 }
0x17a4   :  { %v3247_v19 = vadd.f32 %v3231_v52, %v15929_v51  ;;  %v3229_v48 = vpop.permute.xlu0 %3228  ;;  %v91_v51 = vld [vmem:[%s18751_s28 + $0xf0] sm:$0xff] }
0x17a5   :  { %v3246_v46 = vadd.f32 %v3229_v48, %v15932_v50 }
0x17a7   :  { %v13861_v1 = vpack.i.bf16 %v3247_v19, %v3246_v46  ;;  %v3235_v41 = vpop.permute.xlu1 %3234 }
0x17a8   :  { %v3249_v56 = vadd.f32 %v3235_v41, %v15935_v59  ;;  %v3233_v26 = vpop.permute.xlu0 %3232  ;;  %v93_v59 = vld [vmem:[%s18751_s28 + $0x100] sm:$0xff] }
0x17a9   :  { %v3248_v0 = vadd.f32 %v3233_v26, %v15938_v39  ;;  %13862 = vrot.lane.b32.xlu0 %v13861_v1, %s18753_s24  ;;  %v92_v39 = vld [vmem:[%s18751_s28 + $0xf8] sm:$0xff] }
0x17ab   :  { %v13866_v53 = vpack.i.bf16 %v3249_v56, %v3248_v0  ;;  %v3239_v57 = vpop.permute.xlu1 %3238  ;;  %v16104_v56 = vld [vmem:[%s18725_s6] ss:$0 sm:$0xff] }
0x17ac   :  { %v3251_v62 = vadd.f32 %v3239_v57, %v15941_v31  ;;  %v3237_v36 = vpop.permute.xlu0 %3236  ;;  %v95_v31 = vld [vmem:[%s18751_s28 + $0x110] sm:$0xff] }
0x17ad   :  { %v3250_v28 = vadd.f32 %v3237_v36, %v15944_v32  ;;  %13867 = vrot.lane.b32.xlu1 %v13866_v53, %s18753_s24  ;;  %v94_v32 = vld [vmem:[%s18751_s28 + $0x108] sm:$0xff] }
0x17af   :  { %v13871_v50 = vpack.i.bf16 %v3251_v62, %v3250_v28 }
0x17b1   :  { %262 = vperm.xlu1 %13800, %v91_v51   ;;  %13872 = vrot.lane.b32.xlu0 %v13871_v50, %s18753_s24 }
0x17b5   :  { %272 = vperm.xlu1 %13800, %v93_v59   ;;  %267 = vperm.xlu0 %13799, %v92_v39  }
0x17b9   :  { %282 = vperm.xlu1 %13800, %v95_v31   ;;  %277 = vperm.xlu0 %13799, %v94_v32   ;;  %v3384_v31 = vsub.f32 1.0, %v16000_v6 }
0x17bd   :  { %287 = vperm.xlu0 %13799, %v96_v42   ;;  %v3383_v42 = vsub.f32 1.0, %v16002_v20 }
0x181b   :  { %v13863_v43 = vpop.permute.xlu0 %13862 }
0x181c   :  { %v13865_v37 = vunpack.i.h.bf16 %v13863_v43  ;;  %v13864_v38 = vunpack.i.l.bf16 %v13863_v43 }
0x181e   :  { %v13494_v4 = vpack.c.bf16 %v13865_v37, %v13864_v38  ;;  %v3378_v37 = vmul.f32 %v16000_v6, %v15860_v34  ;;  %v3380_v34 = vmul.f32 %v16007_v7, %v15882_v14  ;;  %v3379_v6 = vmul.f32 %v16010_v22, %v15885_v47 }
0x181f   :  { %v13868_v25 = vpop.permute.xlu1 %13867  ;;  %v3388_v14 = vsub.f32 1.0, %v16015_v60  ;;  %v3382_v47 = vmul.f32 %v16015_v60, %v15913_v45 }
0x1820   :  { %v13870_v23 = vunpack.i.h.bf16 %v13868_v25  ;;  %v13869_v10 = vunpack.i.l.bf16 %v13868_v25  ;;  %13495 = vmatprep.subr.bf16.mxu1 %v13494_v4 }
0x1821   :  { %13497 = vmatpush3.bf16.msra.mxu1 %v13494_v4  ;;  %v3377_v4 = vmul.f32 %v16002_v20, %v15863_v35 }
0x1822   :  { %v13498_v30 = vpack.c.bf16 %v13870_v23, %v13869_v10  ;;  %v3386_v10 = vsub.f32 1.0, %v16007_v7 }
0x1823   :  { %v13873_v11 = vpop.permute.xlu0 %13872 }
0x1824   :  { %v13875_v15 = vunpack.i.h.bf16 %v13873_v11  ;;  %v13874_v40 = vunpack.i.l.bf16 %v13873_v11  ;;  %13499 = vmatprep.subr.bf16.mxu1 %v13498_v30 }
0x1825   :  { %13501 = vmatpush3.bf16.msra.mxu1 %v13498_v30 }
0x1826   :  { %v13502_v61 = vpack.c.bf16 %v13875_v15, %v13874_v40  ;;  %v3385_v15 = vsub.f32 1.0, %v16010_v22 }
0x1828   :  { %13503 = vmatprep.subr.bf16.mxu1 %v13502_v61 }
0x1829   :  { %13505 = vmatpush3.bf16.msra.mxu1 %v13502_v61 }
0x182c   :  { %12600 = vmatmul.mubr.msk.f32.vlgmr.msra.gmra.mrb[54].mxu1 %vm578_vm1, %v15950_v5 }
0x182d   :  { %12602 = vmatprep.mubr.msk.f32.mxu1 %vm578_vm1, %v15957_v12 }
0x1830   :  { %v263_v49 = vpop.permute.xlu1 %262  ;;  %12603 = vmatmul.mubr.msk.f32.gmra.mrb[56].mxu1 %vm578_vm1, %v15964_v24 }
0x1831   :  { %v386_v17 = vmul.f32 %v16081_v16, %v263_v49  ;;  %12605 = vmatprep.mubr.msk.f32.mxu1 %vm578_vm1, %v15971_v18 }
0x1833   :  { %435 = vst.msk [vmem:[#allocation2 + $0xf0] sm:$0xff] %vm404_vm2, %v386_v17  ;;  %v3387_v17 = vsub.f32 1.0, %v16018_v8 }
0x1834   :  { %v273_v44 = vpop.permute.xlu1 %272  ;;  %v268_v55 = vpop.permute.xlu0 %267  ;;  %12606 = vmatmul.mubr.msk.f32.gmra.mrb[58].mxu1 %vm578_vm1, %v15978_v21 }
0x1835   :  { %v388_v58 = vmul.f32 %v16081_v16, %v273_v44  ;;  %v387_v33 = vmul.f32 %v16081_v16, %v268_v55  ;;  %12631 = vmatprep.mubr.msk.f32.mxu1 %vm578_vm1, %v15985_v54  ;;  %v3381_v55 = vmul.f32 %v16018_v8, %v15915_v27 }
0x1837   :  { %437 = vst.msk [vmem:[#allocation2 + $0x100] sm:$0xff] %vm404_vm2, %v388_v58  ;;  %436 = vst.msk [vmem:[#allocation2 + $0xf8] sm:$0xff] %vm404_vm2, %v387_v33 }
0x1838   :  { %v283_v13 = vpop.permute.xlu1 %282  ;;  %v278_v52 = vpop.permute.xlu0 %277 }
0x1839   :  { %v390_v19 = vmul.f32 %v16081_v16, %v283_v13  ;;  %v389_v48 = vmul.f32 %v16081_v16, %v278_v52 }
0x183a   :  { %v16185_v13 = vld [vmem:[#allocation2 + $0xf0] sm:$0xff] }
0x183b   :  { %439 = vst.msk [vmem:[#allocation2 + $0x110] sm:$0xff] %vm404_vm2, %v390_v19  ;;  %438 = vst.msk [vmem:[#allocation2 + $0x108] sm:$0xff] %vm404_vm2, %v389_v48 }
0x183c   :  { %v288_v46 = vpop.permute.xlu0 %287 }
0x183d   :  { %v391_v1 = vmul.f32 %v16081_v16, %v288_v46 }
0x183e   :  { %v16182_v27 = vld [vmem:[#allocation2 + $0xf8] sm:$0xff] }
0x183f   :  { %440 = vst.msk [vmem:[#allocation2 + $0x118] sm:$0xff] %vm404_vm2, %v391_v1 }
0x1842   :  { %v16188_v46 = vld [vmem:[#allocation2 + $0x108] sm:$0xff] }
0x18ff   :  { %v12601_v41 = vpop.f32.mrb[54].mxu1 }
0x1900   :  { %v3348_v26 = vadd.f32 %v16104_v56, %v12601_v41  ;;  %v3342_v0 = vpop.f32.mrb[55].mxu1 }
0x1901   :  { %v3343_v53 = vadd.f32 %v16104_v56, %v3342_v0 }
0x1902   :  { %14279 = vtanh.f32 %v3348_v26  ;;  %v16191_v26 = vld [vmem:[#allocation2 + $0x100] sm:$0xff] }
0x1903   :  { %14281 = vtanh.f32 %v3343_v53  ;;  %v12604_v57 = vpop.f32.mrb[56].mxu1 }
0x1904   :  { %v3358_v62 = vadd.f32 %v16104_v56, %v12604_v57  ;;  %v3352_v36 = vpop.f32.mrb[57].mxu1 }
0x1905   :  { %v3353_v28 = vadd.f32 %v16104_v56, %v3352_v36 }
0x1906   :  { %14283 = vtanh.f32 %v3358_v62  ;;  %v16194_v62 = vld [vmem:[#allocation2 + $0x118] sm:$0xff] }
0x1907   :  { %14285 = vtanh.f32 %v3353_v28  ;;  %v12607_v51 = vpop.f32.mrb[58].mxu1 }
0x1908   :  { %v3368_v50 = vadd.f32 %v16104_v56, %v12607_v51  ;;  %v3362_v59 = vpop.f32.mrb[59].mxu1  ;;  %v16197_v51 = vld [vmem:[#allocation2 + $0x110] sm:$0xff] }
0x1909   :  { %v3363_v39 = vadd.f32 %v16104_v56, %v3362_v59 }
0x190a   :  { %14287 = vtanh.f32 %v3368_v50 }
0x190b   :  { %14289 = vtanh.f32 %v3363_v39 }
0x190c   :  { %v14280_v32 = vpop.eup %14279 }
0x190d   :  { %v14282_v43 = vpop.eup %14281  ;;  %v3390_v38 = vmul.f32 %v14280_v32, %v3384_v31 }
0x190e   :  { %v3389_v25 = vmul.f32 %v14282_v43, %v3383_v42 }
0x190f   :  { %v16118_v23 = vadd.f32 %v3390_v38, %v3378_v37 }
0x1910   :  { %v14284_v30 = vpop.eup %14283  ;;  %v16121_v11 = vadd.f32 %v3389_v25, %v3377_v4 }
0x1911   :  { %v14286_v40 = vpop.eup %14285  ;;  %3665 = vrot.lane.b32.xlu0 %v16118_v23, %s18756_s18  ;;  %3402 = vst.msk [vmem:[#allocation4 + $0xc8] sm:$0xff] %vm463_vm3, %v16118_v23  ;;  %v3392_v35 = vmul.f32 %v14284_v30, %v3386_v10 }
0x1912   :  { %3663 = vrot.lane.b32.xlu1 %v16121_v11, %s18756_s18  ;;  %3401 = vst.msk [vmem:[#allocation4 + $0xc0] sm:$0xff] %vm463_vm3, %v16121_v11  ;;  %12610 = vmatprep.mubr.msk.f32.mxu0 %vm463_vm3, %v16121_v11  ;;  %v3391_v20 = vmul.f32 %v14286_v40, %v3385_v15 }
0x1913   :  { %12611 = vmatmul.mubr.msk.f32.vlgmr.msra.gmra.mrb[60].mxu0 %vm463_vm3, %v16118_v23  ;;  %v16140_v61 = vadd.f32 %v3392_v35, %v3380_v34 }
0x1914   :  { %v14288_v7 = vpop.eup %14287  ;;  %v16143_v49 = vadd.f32 %v3391_v20, %v3379_v6  ;;  %12641 = vmatpush3.msk.msra.mxu0 %vm467_vm0, %v16031_v29 }
0x1915   :  { %v14290_v44 = vpop.eup %14289  ;;  %3669 = vrot.lane.b32.xlu0 %v16140_v61, %s18756_s18  ;;  %3404 = vst.msk [vmem:[#allocation4 + $0xd8] sm:$0xff] %vm463_vm3, %v16140_v61  ;;  %v3394_v22 = vmul.f32 %v14288_v7, %v3388_v14  ;;  %12672 = vmatprep.subr.msk.mxu0 %vm467_vm0, %v15899_v9 }
0x1916   :  { %3403 = vst.msk [vmem:[#allocation4 + $0xd0] sm:$0xff] %vm463_vm3, %v16143_v49  ;;  %3667 = vrot.lane.b32.xlu1 %v16143_v49, %s18756_s18  ;;  %12613 = vmatprep.mubr.msk.f32.mxu0 %vm463_vm3, %v16143_v49  ;;  %v3393_v58 = vmul.f32 %v14290_v44, %v3387_v17 }
0x1917   :  { %12614 = vmatmul.mubr.msk.f32.gmra.mrb[62].mxu0 %vm463_vm3, %v16140_v61  ;;  %v16166_v45 = vadd.f32 %v3394_v22, %v3382_v47 }
0x1918   :  { %v16168_v60 = vadd.f32 %v3393_v58, %v3381_v55 }
0x1919   :  { %3673 = vrot.lane.b32.xlu0 %v16166_v45, %s18756_s18  ;;  %3406 = vst.msk [vmem:[#allocation4 + $0xe8] sm:$0xff] %vm463_vm3, %v16166_v45 }
0x191a   :  { %3405 = vst.msk [vmem:[#allocation4 + $0xe0] sm:$0xff] %vm463_vm3, %v16168_v60  ;;  %3671 = vrot.lane.b32.xlu1 %v16168_v60, %s18756_s18  ;;  %12616 = vmatprep.mubr.msk.f32.mxu0 %vm463_vm3, %v16168_v60 }
0x191b   :  { %12617 = vmatmul.mubr.msk.f32.gmra.mrb[64].mxu0 %vm463_vm3, %v16166_v45 }
0x19e6   :  { %v12612_v8 = vpop.f32.mrb[60].mxu0 }
0x19e7   :  { %v3527_v33 = vadd.f32 %v12612_v8, %v16182_v27  ;;  %v3497_v52 = vpop.f32.mrb[61].mxu0 }
0x19e8   :  { %v3526_v19 = vadd.f32 %v3497_v52, %v16185_v13 }
0x19ea   :  { %v13506_v48 = vpack.c.bf16 %v3527_v33, %v3526_v19  ;;  %v12615_v1 = vpop.f32.mrb[62].mxu0 }
0x19eb   :  { %v3529_v41 = vadd.f32 %v12615_v1, %v16188_v46  ;;  %v3507_v0 = vpop.f32.mrb[63].mxu0  ;;  %v3664_v1 = vpop.permute.xlu1 %3663 }
0x19ec   :  { %v3528_v53 = vadd.f32 %v3507_v0, %v16191_v26  ;;  %13507 = vmatprep.subr.bf16.mxu1 %v13506_v48 }
0x19ed   :  { %13509 = vmatpush3.bf16.msra.mxu1 %v13506_v48  ;;  %v3666_v48 = vpop.permute.xlu0 %3665 }
0x19ee   :  { %v13510_v57 = vpack.c.bf16 %v3529_v41, %v3528_v53  ;;  %v12618_v36 = vpop.f32.mrb[64].mxu0 }
0x19ef   :  { %v3531_v28 = vadd.f32 %v12618_v36, %v16194_v62  ;;  %v3517_v50 = vpop.f32.mrb[65].mxu0 }
0x19f0   :  { %v3530_v59 = vadd.f32 %v3517_v50, %v16197_v51  ;;  %13511 = vmatprep.subr.bf16.mxu1 %v13510_v57  ;;  %v3668_v50 = vpop.permute.xlu1 %3667 }
0x19f1   :  { %13513 = vmatpush3.bf16.msra.mxu1 %v13510_v57  ;;  %v3670_v36 = vpop.permute.xlu0 %3669 }
0x19f2   :  { %v13514_v39 = vpack.c.bf16 %v3531_v28, %v3530_v59 }
0x19f4   :  { %13515 = vmatprep.subr.bf16.mxu1 %v13514_v39 }
0x19f5   :  { %13517 = vmatpush3.bf16.msra.mxu1 %v13514_v39 }
0x19f8   :  { %12632 = vmatmul.mubr.msk.f32.vlgmr.msra.gmra.mrb[60].mxu1 %vm578_vm1, %v15950_v5 }
0x19f9   :  { %12634 = vmatprep.mubr.msk.f32.mxu1 %vm578_vm1, %v15957_v12 }
0x19fc   :  { %12635 = vmatmul.mubr.msk.f32.gmra.mrb[62].mxu1 %vm578_vm1, %v15964_v24 }
0x19fd   :  { %12637 = vmatprep.mubr.msk.f32.mxu1 %vm578_vm1, %v15971_v18 }
0x1a00   :  { %12638 = vmatmul.mubr.msk.f32.gmra.mrb[64].mxu1 %vm578_vm1, %v15978_v21 }
0x1a01   :  { %12663 = vmatprep.mubr.msk.f32.mxu1 %vm578_vm1, %v15985_v54 }
0x1acb   :  { %v12633_v31 = vpop.f32.mrb[60].mxu1 }
0x1acc   :  { %v3604_v32 = vadd.f32 %v15992_v63, %v12633_v31  ;;  %v3598_v42 = vpop.f32.mrb[61].mxu1 }
0x1acd   :  { %v3599_v43 = vadd.f32 %v15992_v63, %v3598_v42 }
0x1ace   :  { %v11196_v37 = vmul.f32 -1.442695, %v3604_v32 }
0x1acf   :  { %v11195_v38 = vmul.f32 -1.442695, %v3599_v43  ;;  %v12636_v4 = vpop.f32.mrb[62].mxu1  ;;  %v3674_v43 = vpop.permute.xlu0 %3673 }
0x1ad0   :  { %14291 = vpow2.f32 %v11196_v37  ;;  %v3614_v25 = vadd.f32 %v15992_v63, %v12636_v4  ;;  %v3608_v10 = vpop.f32.mrb[63].mxu1 }
0x1ad1   :  { %14293 = vpow2.f32 %v11195_v38  ;;  %v3609_v30 = vadd.f32 %v15992_v63, %v3608_v10  ;;  %v3672_v38 = vpop.permute.xlu1 %3671 }
0x1ad2   :  { %v11198_v15 = vmul.f32 -1.442695, %v3614_v25 }
0x1ad3   :  { %v11197_v40 = vmul.f32 -1.442695, %v3609_v30  ;;  %v12639_v34 = vpop.f32.mrb[64].mxu1 }
0x1ad4   :  { %14295 = vpow2.f32 %v11198_v15  ;;  %v3624_v35 = vadd.f32 %v15992_v63, %v12639_v34  ;;  %v3618_v6 = vpop.f32.mrb[65].mxu1 }
0x1ad5   :  { %14297 = vpow2.f32 %v11197_v40  ;;  %v3619_v20 = vadd.f32 %v15992_v63, %v3618_v6 }
0x1ad6   :  { %v11200_v14 = vmul.f32 -1.442695, %v3624_v35 }
0x1ad7   :  { %v11199_v7 = vmul.f32 -1.442695, %v3619_v20 }
0x1ad8   :  { %14299 = vpow2.f32 %v11200_v14 }
0x1ad9   :  { %14301 = vpow2.f32 %v11199_v7 }
0x1ada   :  { %v14292_v17 = vpop.eup %14291 }
0x1adb   :  { %v14294_v44 = vpop.eup %14293  ;;  %v3646_v47 = vadd.f32 1.0, %v14292_v17 }
0x1adc   :  { %v3645_v22 = vadd.f32 1.0, %v14294_v44 }
0x1add   :  { %14303 = vrcp.f32 %v3646_v47 }
0x1ade   :  { %v14296_v55 = vpop.eup %14295  ;;  %14305 = vrcp.f32 %v3645_v22 }
0x1adf   :  { %v14298_v58 = vpop.eup %14297  ;;  %v3648_v8 = vadd.f32 1.0, %v14296_v55 }
0x1ae0   :  { %v3647_v33 = vadd.f32 1.0, %v14298_v58 }
0x1ae1   :  { %14307 = vrcp.f32 %v3648_v8 }
0x1ae2   :  { %v14300_v52 = vpop.eup %14299  ;;  %14309 = vrcp.f32 %v3647_v33 }
0x1ae3   :  { %v14302_v19 = vpop.eup %14301  ;;  %v3650_v63 = vadd.f32 1.0, %v14300_v52 }
0x1ae4   :  { %v3649_v41 = vadd.f32 1.0, %v14302_v19 }
0x1ae5   :  { %14311 = vrcp.f32 %v3650_v63 }
0x1ae6   :  { %14313 = vrcp.f32 %v3649_v41 }
0x1ae7   :  { %v16218_v0 = vpop.eup %14303 }
0x1ae8   :  { %v16220_v53 = vpop.eup %14305  ;;  %v3682_v57 = vmul.f32 %v16218_v0, %v3666_v48 }
0x1ae9   :  { %v3681_v28 = vmul.f32 %v16220_v53, %v3664_v1 }
0x1aea   :  { %3695 = vrot.lane.b32.xlu0 %v3682_v57, %s18755_s29 }
0x1aeb   :  { %v16225_v59 = vpop.eup %14307  ;;  %3693 = vrot.lane.b32.xlu1 %v3681_v28, %s18755_s29 }
0x1aec   :  { %v16228_v39 = vpop.eup %14309  ;;  %v3684_v31 = vmul.f32 %v16225_v59, %v3670_v36  ;;  %v102_v36 = vld [vmem:[%s18751_s28 + $0x148] sm:$0xff] }
0x1aed   :  { %v3683_v32 = vmul.f32 %v16228_v39, %v3668_v50 }
0x1aee   :  { %3699 = vrot.lane.b32.xlu0 %v3684_v31, %s18755_s29 }
0x1aef   :  { %v16233_v42 = vpop.eup %14311  ;;  %3697 = vrot.lane.b32.xlu1 %v3683_v32, %s18755_s29 }
0x1af0   :  { %v16236_v37 = vpop.eup %14313  ;;  %v3686_v4 = vmul.f32 %v16233_v42, %v3674_v43 }
0x1af1   :  { %v3685_v25 = vmul.f32 %v16236_v37, %v3672_v38 }
0x1af2   :  { %3703 = vrot.lane.b32.xlu0 %v3686_v4, %s18755_s29 }
0x1af3   :  { %3701 = vrot.lane.b32.xlu1 %v3685_v25, %s18755_s29 }
0x1b5c   :  { %v3696_v10 = vpop.permute.xlu0 %3695 }
0x1b5d   :  { %v3694_v30 = vpop.permute.xlu1 %3693 }
0x1b5e   :  { %12642 = vmatprep.mubr.msk.f32.mxu0 %vm463_vm3, %v3694_v30 }
0x1b5f   :  { %12643 = vmatmul.mubr.msk.f32.vlgmr.msra.gmra.mrb[66].mxu0 %vm463_vm3, %v3696_v10 }
0x1b60   :  { %v3700_v15 = vpop.permute.xlu0 %3699  ;;  %12673 = vmatpush3.msk.msra.mxu0 %vm467_vm0, %v15899_v9 }
0x1b61   :  { %v3698_v40 = vpop.permute.xlu1 %3697  ;;  %12704 = vmatprep.subr.msk.mxu0 %vm467_vm0, %v16031_v29 }
0x1b62   :  { %12645 = vmatprep.mubr.msk.f32.mxu0 %vm463_vm3, %v3698_v40 }
0x1b63   :  { %12646 = vmatmul.mubr.msk.f32.gmra.mrb[68].mxu0 %vm463_vm3, %v3700_v15 }
0x1b64   :  { %v3704_v35 = vpop.permute.xlu0 %3703 }
0x1b65   :  { %v3702_v34 = vpop.permute.xlu1 %3701 }
0x1b66   :  { %12648 = vmatprep.mubr.msk.f32.mxu0 %vm463_vm3, %v3702_v34 }
0x1b67   :  { %12649 = vmatmul.mubr.msk.f32.gmra.mrb[70].mxu0 %vm463_vm3, %v3704_v35 }
0x1c32   :  { %v12644_v6 = vpop.f32.mrb[66].mxu0 }
0x1c33   :  { %3820 = vrot.lane.b32.xlu0 %v12644_v6, %s18754_s1  ;;  %v3783_v20 = vpop.f32.mrb[67].mxu0 }
0x1c34   :  { %3818 = vrot.lane.b32.xlu1 %v3783_v20, %s18754_s1 }
0x1c36   :  { %v12647_v9 = vpop.f32.mrb[68].mxu0 }
0x1c37   :  { %3824 = vrot.lane.b32.xlu0 %v12647_v9, %s18754_s1  ;;  %v3793_v14 = vpop.f32.mrb[69].mxu0 }
0x1c38   :  { %3822 = vrot.lane.b32.xlu1 %v3793_v14, %s18754_s1 }
0x1c3a   :  { %v12650_v7 = vpop.f32.mrb[70].mxu0 }
0x1c3b   :  { %3828 = vrot.lane.b32.xlu0 %v12650_v7, %s18754_s1  ;;  %v3803_v17 = vpop.f32.mrb[71].mxu0 }
0x1c3c   :  { %3826 = vrot.lane.b32.xlu1 %v3803_v17, %s18754_s1 }
0x1ca5   :  { %v3821_v44 = vpop.permute.xlu0 %3820 }
0x1ca6   :  { %v3837_v47 = vadd.f32 %v3821_v44, %v16182_v27  ;;  %v3819_v22 = vpop.permute.xlu1 %3818  ;;  %v97_v27 = vld [vmem:[%s18751_s28 + $0x120] sm:$0xff] }
0x1ca7   :  { %v3836_v55 = vadd.f32 %v3819_v22, %v16185_v13 }
0x1ca9   :  { %v13876_v58 = vpack.i.bf16 %v3837_v47, %v3836_v55  ;;  %v3825_v8 = vpop.permute.xlu0 %3824 }
0x1caa   :  { %v3839_v33 = vadd.f32 %v3825_v8, %v16188_v46  ;;  %v3823_v52 = vpop.permute.xlu1 %3822  ;;  %v99_v46 = vld [vmem:[%s18751_s28 + $0x130] sm:$0xff] }
0x1cab   :  { %v3838_v19 = vadd.f32 %v3823_v52, %v16191_v26  ;;  %13877 = vrot.lane.b32.xlu1 %v13876_v58, %s18753_s24  ;;  %v98_v26 = vld [vmem:[%s18751_s28 + $0x128] sm:$0xff] }
0x1cad   :  { %v13881_v48 = vpack.i.bf16 %v3839_v33, %v3838_v19  ;;  %v3829_v63 = vpop.permute.xlu0 %3828 }
0x1cae   :  { %v3841_v1 = vadd.f32 %v3829_v63, %v16194_v62  ;;  %v3827_v41 = vpop.permute.xlu1 %3826  ;;  %v101_v62 = vld [vmem:[%s18751_s28 + $0x140] sm:$0xff] }
0x1caf   :  { %v3840_v57 = vadd.f32 %v3827_v41, %v16197_v51  ;;  %13882 = vrot.lane.b32.xlu0 %v13881_v48, %s18753_s24  ;;  %v100_v51 = vld [vmem:[%s18751_s28 + $0x138] sm:$0xff]  ;;  %v3974_v48 = vsub.f32 1.0, %v16218_v0 }
0x1cb1   :  { %v13886_v13 = vpack.i.bf16 %v3841_v1, %v3840_v57  ;;  %v3973_v1 = vsub.f32 1.0, %v16220_v53  ;;  %v3968_v57 = vmul.f32 %v16218_v0, %v16118_v23  ;;  %v3970_v23 = vmul.f32 %v16225_v59, %v16140_v61 }
0x1cb2   :  { %v3969_v0 = vmul.f32 %v16228_v39, %v16143_v49  ;;  %v3978_v61 = vsub.f32 1.0, %v16233_v42  ;;  %v3972_v49 = vmul.f32 %v16233_v42, %v16166_v45 }
0x1cb3   :  { %292 = vperm.xlu0 %13799, %v97_v27   ;;  %13887 = vrot.lane.b32.xlu1 %v13886_v13, %s18753_s24  ;;  %v3967_v13 = vmul.f32 %v16220_v53, %v16121_v11 }
0x1cb7   :  { %302 = vperm.xlu0 %13799, %v99_v46   ;;  %297 = vperm.xlu1 %13800, %v98_v26  }
0x1cbb   :  { %312 = vperm.xlu0 %13799, %v101_v62   ;;  %307 = vperm.xlu1 %13800, %v100_v51  }
0x1cbf   :  { %317 = vperm.xlu1 %13800, %v102_v36   ;;  %v3975_v36 = vsub.f32 1.0, %v16228_v39 }
0x1d1d   :  { %v13878_v28 = vpop.permute.xlu1 %13877 }
0x1d1e   :  { %v13880_v50 = vunpack.i.h.bf16 %v13878_v28  ;;  %v13879_v31 = vunpack.i.l.bf16 %v13878_v28 }
0x1d20   :  { %v13518_v32 = vpack.c.bf16 %v13880_v50, %v13879_v31 }
0x1d21   :  { %v13883_v43 = vpop.permute.xlu0 %13882 }
0x1d22   :  { %v13885_v38 = vunpack.i.h.bf16 %v13883_v43  ;;  %v13884_v4 = vunpack.i.l.bf16 %v13883_v43  ;;  %13519 = vmatprep.subr.bf16.mxu1 %v13518_v32 }
0x1d23   :  { %13521 = vmatpush3.bf16.msra.mxu1 %v13518_v32  ;;  %v3977_v32 = vsub.f32 1.0, %v16236_v37 }
0x1d24   :  { %v13522_v25 = vpack.c.bf16 %v13885_v38, %v13884_v4  ;;  %v16360_v38 = vld [vmem:[%s18722_s3] sm:$0xf]  ;;  %s14846_s3 = smov 123  }
0x1d25   :  { %v13888_v10 = vpop.permute.xlu1 %13887 }
0x1d26   :  { %v13890_v30 = vunpack.i.h.bf16 %v13888_v10  ;;  %v13889_v15 = vunpack.i.l.bf16 %v13888_v10  ;;  %13523 = vmatprep.subr.bf16.mxu1 %v13522_v25 }
0x1d27   :  { %13525 = vmatpush3.bf16.msra.mxu1 %v13522_v25 }
0x1d28   :  { %v13526_v40 = vpack.c.bf16 %v13890_v30, %v13889_v15 }
0x1d2a   :  { %13527 = vmatprep.subr.bf16.mxu1 %v13526_v40 }
0x1d2b   :  { %13529 = vmatpush3.bf16.msra.mxu1 %v13526_v40 }
0x1d2e   :  { %12664 = vmatmul.mubr.msk.f32.vlgmr.msra.gmra.mrb[66].mxu1 %vm578_vm1, %v15950_v5 }
0x1d2f   :  { %12666 = vmatprep.mubr.msk.f32.mxu1 %vm578_vm1, %v15957_v12 }
0x1d32   :  { %v293_v34 = vpop.permute.xlu0 %292  ;;  %12667 = vmatmul.mubr.msk.f32.gmra.mrb[68].mxu1 %vm578_vm1, %v15964_v24 }
0x1d33   :  { %v392_v35 = vmul.f32 %v16081_v16, %v293_v34  ;;  %12669 = vmatprep.mubr.msk.f32.mxu1 %vm578_vm1, %v15971_v18 }
0x1d35   :  { %441 = vst.msk [vmem:[#allocation2 + $0x120] sm:$0xff] %vm404_vm2, %v392_v35 }
0x1d36   :  { %v303_v6 = vpop.permute.xlu0 %302  ;;  %v298_v20 = vpop.permute.xlu1 %297  ;;  %12670 = vmatmul.mubr.msk.f32.gmra.mrb[70].mxu1 %vm578_vm1, %v15978_v21 }
0x1d37   :  { %v394_v5 = vmul.f32 %v16081_v16, %v303_v6  ;;  %v393_v12 = vmul.f32 %v16081_v16, %v298_v20  ;;  %12695 = vmatprep.mubr.msk.f32.mxu1 %vm578_vm1, %v15985_v54 }
0x1d39   :  { %443 = vst.msk [vmem:[#allocation2 + $0x130] sm:$0xff] %vm404_vm2, %v394_v5  ;;  %442 = vst.msk [vmem:[#allocation2 + $0x128] sm:$0xff] %vm404_vm2, %v393_v12 }
0x1d3a   :  { %v313_v24 = vpop.permute.xlu0 %312  ;;  %v308_v18 = vpop.permute.xlu1 %307 }
0x1d3b   :  { %v396_v9 = vmul.f32 %v16081_v16, %v313_v24  ;;  %v395_v14 = vmul.f32 %v16081_v16, %v308_v18 }
0x1d3c   :  { %v16393_v10 = vld [vmem:[#allocation2 + $0x120] sm:$0xff] }
0x1d3d   :  { %445 = vst.msk [vmem:[#allocation2 + $0x140] sm:$0xff] %vm404_vm2, %v396_v9  ;;  %444 = vst.msk [vmem:[#allocation2 + $0x138] sm:$0xff] %vm404_vm2, %v395_v14 }
0x1d3e   :  { %v318_v21 = vpop.permute.xlu1 %317 }
0x1d3f   :  { %v397_v7 = vmul.f32 %v16081_v16, %v318_v21 }
0x1d40   :  { %v16399_v20 = vld [vmem:[#allocation2 + $0x130] sm:$0xff] }
0x1d41   :  { %446 = vst.msk [vmem:[#allocation2 + $0x148] sm:$0xff] %vm404_vm2, %v397_v7 }
0x1d44   :  { %v16396_v34 = vld [vmem:[#allocation2 + $0x138] sm:$0xff]  ;;  %v16405_v21 = vld [vmem:[#allocation2 + $0x140] sm:$0xff] }
0x1d48   :  { %v16402_v18 = vld [vmem:[#allocation2 + $0x148] sm:$0xff] }
0x1e01   :  { %v12665_v54 = vpop.f32.mrb[66].mxu1 }
0x1e02   :  { %v3938_v17 = vadd.f32 %v16104_v56, %v12665_v54  ;;  %v3932_v44 = vpop.f32.mrb[67].mxu1 }
0x1e03   :  { %v3933_v47 = vadd.f32 %v16104_v56, %v3932_v44  ;;  %v16411_v44 = vld [vmem:[%s18752_s26 + $0x8] sm:$0xff] }
0x1e04   :  { %14315 = vtanh.f32 %v3938_v17 }
0x1e05   :  { %14317 = vtanh.f32 %v3933_v47  ;;  %v12668_v22 = vpop.f32.mrb[68].mxu1  ;;  %v16418_v47 = vld [vmem:[%s18752_s26 + $0x10] sm:$0xff] }
0x1e06   :  { %v3948_v55 = vadd.f32 %v16104_v56, %v12668_v22  ;;  %v3942_v58 = vpop.f32.mrb[69].mxu1  ;;  %v16425_v22 = vld [vmem:[%s18752_s26 + $0x18] sm:$0xff] }
0x1e07   :  { %v3943_v8 = vadd.f32 %v16104_v56, %v3942_v58  ;;  %v16439_v58 = vld [vmem:[%s18752_s26 + $0x28] sm:$0xff] }
0x1e08   :  { %14319 = vtanh.f32 %v3948_v55  ;;  %v16432_v55 = vld [vmem:[%s18752_s26 + $0x20] sm:$0xff] }
0x1e09   :  { %14321 = vtanh.f32 %v3943_v8  ;;  %v12671_v33 = vpop.f32.mrb[70].mxu1  ;;  %v16446_v8 = vld [vmem:[%s18752_s26] sm:$0xff] }
0x1e0a   :  { %v3958_v16 = vadd.f32 %v16104_v56, %v12671_v33  ;;  %v3952_v52 = vpop.f32.mrb[71].mxu1 }
0x1e0b   :  { %v3953_v19 = vadd.f32 %v16104_v56, %v3952_v52  ;;  %v3976_v56 = vsub.f32 1.0, %v16225_v59 }
0x1e0c   :  { %14323 = vtanh.f32 %v3958_v16  ;;  %v16453_v16 = vld [vmem:[%s18724_s5] ss:$0 sm:$0xff] }
0x1e0d   :  { %14325 = vtanh.f32 %v3953_v19 }
0x1e0e   :  { %v14316_v63 = vpop.eup %14315 }
0x1e0f   :  { %v14318_v41 = vpop.eup %14317  ;;  %v3980_v27 = vmul.f32 %v14316_v63, %v3974_v48 }
0x1e10   :  { %v3979_v46 = vmul.f32 %v14318_v41, %v3973_v1 }
0x1e11   :  { %v16321_v26 = vadd.f32 %v3980_v27, %v3968_v57 }
0x1e12   :  { %v14320_v62 = vpop.eup %14319  ;;  %v16324_v51 = vadd.f32 %v3979_v46, %v3967_v13 }
0x1e13   :  { %v14322_v28 = vpop.eup %14321  ;;  %4255 = vrot.lane.b32.xlu1 %v16321_v26, %s18756_s18  ;;  %3992 = vst.msk [vmem:[#allocation4 + $0xf8] sm:$0xff] %vm463_vm3, %v16321_v26  ;;  %v3982_v11 = vmul.f32 %v14320_v62, %v3976_v56 }
0x1e14   :  { %4253 = vrot.lane.b32.xlu0 %v16324_v51, %s18756_s18  ;;  %3991 = vst.msk [vmem:[#allocation4 + $0xf0] sm:$0xff] %vm463_vm3, %v16324_v51  ;;  %12674 = vmatprep.mubr.msk.f32.mxu0 %vm463_vm3, %v16324_v51  ;;  %v3981_v53 = vmul.f32 %v14322_v28, %v3975_v36 }
0x1e15   :  { %12675 = vmatmul.mubr.msk.f32.vlgmr.msra.gmra.mrb[72].mxu0 %vm463_vm3, %v16321_v26  ;;  %v16343_v50 = vadd.f32 %v3982_v11, %v3970_v23 }
0x1e16   :  { %v14324_v59 = vpop.eup %14323  ;;  %v16346_v31 = vadd.f32 %v3981_v53, %v3969_v0  ;;  %12705 = vmatpush3.msk.msra.mxu0 %vm467_vm0, %v16031_v29  ;;  %v3971_v29 = vmul.f32 %v16236_v37, %v16168_v60  ;;  %v16390_v60 = vld [vmem:[#allocation2 + $0x128] sm:$0xff] }
0x1e17   :  { %v14326_v43 = vpop.eup %14325  ;;  %4259 = vrot.lane.b32.xlu1 %v16343_v50, %s18756_s18  ;;  %3994 = vst.msk [vmem:[#allocation4 + $0x108] sm:$0xff] %vm463_vm3, %v16343_v50  ;;  %v3984_v39 = vmul.f32 %v14324_v59, %v3978_v61  ;;  %12736 = vmatprep.subr.msk.mxu0 %vm467_vm0, %v16360_v38 }
0x1e18   :  { %3993 = vst.msk [vmem:[#allocation4 + $0x100] sm:$0xff] %vm463_vm3, %v16346_v31  ;;  %4257 = vrot.lane.b32.xlu0 %v16346_v31, %s18756_s18  ;;  %12677 = vmatprep.mubr.msk.f32.mxu0 %vm463_vm3, %v16346_v31  ;;  %v3983_v45 = vmul.f32 %v14326_v43, %v3977_v32 }
0x1e19   :  { %12678 = vmatmul.mubr.msk.f32.gmra.mrb[74].mxu0 %vm463_vm3, %v16343_v50  ;;  %v16374_v42 = vadd.f32 %v3984_v39, %v3972_v49 }
0x1e1a   :  { %v16376_v4 = vadd.f32 %v3983_v45, %v3971_v29 }
0x1e1b   :  { %4263 = vrot.lane.b32.xlu1 %v16374_v42, %s18756_s18  ;;  %3996 = vst.msk [vmem:[#allocation4 + $0x118] sm:$0xff] %vm463_vm3, %v16374_v42 }
0x1e1c   :  { %3995 = vst.msk [vmem:[#allocation4 + $0x110] sm:$0xff] %vm463_vm3, %v16376_v4  ;;  %4261 = vrot.lane.b32.xlu0 %v16376_v4, %s18756_s18  ;;  %12680 = vmatprep.mubr.msk.f32.mxu0 %vm463_vm3, %v16376_v4 }
0x1e1d   :  { %12681 = vmatmul.mubr.msk.f32.gmra.mrb[76].mxu0 %vm463_vm3, %v16374_v42 }
0x1ee8   :  { %v12676_v37 = vpop.f32.mrb[72].mxu0 }
0x1ee9   :  { %v4117_v25 = vadd.f32 %v12676_v37, %v16390_v60  ;;  %v4087_v30 = vpop.f32.mrb[73].mxu0 }
0x1eea   :  { %v4116_v15 = vadd.f32 %v4087_v30, %v16393_v10 }
0x1eec   :  { %v13530_v40 = vpack.c.bf16 %v4117_v25, %v4116_v15  ;;  %v12679_v35 = vpop.f32.mrb[74].mxu0  ;;  %v4256_v25 = vpop.permute.xlu1 %4255 }
0x1eed   :  { %v4119_v6 = vadd.f32 %v12679_v35, %v16396_v34  ;;  %v4097_v5 = vpop.f32.mrb[75].mxu0  ;;  %v4254_v15 = vpop.permute.xlu0 %4253 }
0x1eee   :  { %v4118_v12 = vadd.f32 %v4097_v5, %v16399_v20  ;;  %13531 = vmatprep.subr.bf16.mxu1 %v13530_v40 }
0x1eef   :  { %13533 = vmatpush3.bf16.msra.mxu1 %v13530_v40 }
0x1ef0   :  { %v13534_v24 = vpack.c.bf16 %v4119_v6, %v4118_v12  ;;  %v12682_v9 = vpop.f32.mrb[76].mxu0  ;;  %v4260_v12 = vpop.permute.xlu1 %4259 }
0x1ef1   :  { %v4121_v14 = vadd.f32 %v12682_v9, %v16402_v18  ;;  %v4107_v7 = vpop.f32.mrb[77].mxu0  ;;  %v4258_v9 = vpop.permute.xlu0 %4257 }
0x1ef2   :  { %v4120_v54 = vadd.f32 %v4107_v7, %v16405_v21  ;;  %13535 = vmatprep.subr.bf16.mxu1 %v13534_v24 }
0x1ef3   :  { %13537 = vmatpush3.bf16.msra.mxu1 %v13534_v24 }
0x1ef4   :  { %v13538_v17 = vpack.c.bf16 %v4121_v14, %v4120_v54 }
0x1ef6   :  { %13539 = vmatprep.subr.bf16.mxu1 %v13538_v17 }
0x1ef7   :  { %13541 = vmatpush3.bf16.msra.mxu1 %v13538_v17 }
0x1efa   :  { %12696 = vmatmul.mubr.msk.f32.vlgmr.msra.gmra.mrb[72].mxu1 %vm578_vm1, %v16411_v44 }
0x1efb   :  { %12698 = vmatprep.mubr.msk.f32.mxu1 %vm578_vm1, %v16418_v47 }
0x1efe   :  { %12699 = vmatmul.mubr.msk.f32.gmra.mrb[74].mxu1 %vm578_vm1, %v16425_v22 }
0x1eff   :  { %12701 = vmatprep.mubr.msk.f32.mxu1 %vm578_vm1, %v16432_v55 }
0x1f02   :  { %12702 = vmatmul.mubr.msk.f32.gmra.mrb[76].mxu1 %vm578_vm1, %v16439_v58 }
0x1f03   :  { %12727 = vmatprep.mubr.msk.f32.mxu1 %vm578_vm1, %v16446_v8 }
0x1fcd   :  { %v12697_v33 = vpop.f32.mrb[72].mxu1 }
0x1fce   :  { %v4194_v52 = vadd.f32 %v16453_v16, %v12697_v33  ;;  %v4188_v19 = vpop.f32.mrb[73].mxu1 }
0x1fcf   :  { %v4189_v48 = vadd.f32 %v16453_v16, %v4188_v19 }
0x1fd0   :  { %v11228_v63 = vmul.f32 -1.442695, %v4194_v52  ;;  %v4264_v52 = vpop.permute.xlu1 %4263 }
0x1fd1   :  { %v11227_v1 = vmul.f32 -1.442695, %v4189_v48  ;;  %v12700_v41 = vpop.f32.mrb[74].mxu1  ;;  %v4262_v48 = vpop.permute.xlu0 %4261 }
0x1fd2   :  { %14327 = vpow2.f32 %v11228_v63  ;;  %v4204_v57 = vadd.f32 %v16453_v16, %v12700_v41  ;;  %v4198_v27 = vpop.f32.mrb[75].mxu1 }
0x1fd3   :  { %14329 = vpow2.f32 %v11227_v1  ;;  %v4199_v13 = vadd.f32 %v16453_v16, %v4198_v27 }
0x1fd4   :  { %v11230_v46 = vmul.f32 -1.442695, %v4204_v57 }
0x1fd5   :  { %v11229_v56 = vmul.f32 -1.442695, %v4199_v13  ;;  %v12703_v62 = vpop.f32.mrb[76].mxu1 }
0x1fd6   :  { %14331 = vpow2.f32 %v11230_v46  ;;  %v4214_v36 = vadd.f32 %v16453_v16, %v12703_v62  ;;  %v4208_v28 = vpop.f32.mrb[77].mxu1  ;;  %v16492_v46 = vld [vmem:[%s18723_s4] sm:$0xf] }
0x1fd7   :  { %14333 = vpow2.f32 %v11229_v56  ;;  %v4209_v23 = vadd.f32 %v16453_v16, %v4208_v28 }
0x1fd8   :  { %v11232_v11 = vmul.f32 -1.442695, %v4214_v36 }
0x1fd9   :  { %v11231_v0 = vmul.f32 -1.442695, %v4209_v23 }
0x1fda   :  { %14335 = vpow2.f32 %v11232_v11 }
0x1fdb   :  { %14337 = vpow2.f32 %v11231_v0 }
0x1fdc   :  { %v14328_v53 = vpop.eup %14327 }
0x1fdd   :  { %v14330_v61 = vpop.eup %14329  ;;  %v4236_v59 = vadd.f32 1.0, %v14328_v53 }
0x1fde   :  { %v4235_v32 = vadd.f32 1.0, %v14330_v61 }
0x1fdf   :  { %14339 = vrcp.f32 %v4236_v59 }
0x1fe0   :  { %v14332_v43 = vpop.eup %14331  ;;  %14341 = vrcp.f32 %v4235_v32 }
0x1fe1   :  { %v14334_v49 = vpop.eup %14333  ;;  %v4238_v39 = vadd.f32 1.0, %v14332_v43 }
0x1fe2   :  { %v4237_v29 = vadd.f32 1.0, %v14334_v49 }
0x1fe3   :  { %14343 = vrcp.f32 %v4238_v39 }
0x1fe4   :  { %v14336_v45 = vpop.eup %14335  ;;  %14345 = vrcp.f32 %v4237_v29 }
0x1fe5   :  { %v14338_v37 = vpop.eup %14337  ;;  %v4240_v30 = vadd.f32 1.0, %v14336_v45 }
0x1fe6   :  { %v4239_v40 = vadd.f32 1.0, %v14338_v37 }
0x1fe7   :  { %14347 = vrcp.f32 %v4240_v30 }
0x1fe8   :  { %14349 = vrcp.f32 %v4239_v40 }
0x1fe9   :  { %v16461_v35 = vpop.eup %14339 }
0x1fea   :  { %v16463_v6 = vpop.eup %14341  ;;  %v4272_v5 = vmul.f32 %v16461_v35, %v4256_v25 }
0x1feb   :  { %v4271_v24 = vmul.f32 %v16463_v6, %v4254_v15 }
0x1fec   :  { %4285 = vrot.lane.b32.xlu1 %v4272_v5, %s18755_s29  ;;  %v108_v5 = vld [vmem:[%s18751_s28 + $0x178] sm:$0xff] }
0x1fed   :  { %v16468_v14 = vpop.eup %14343  ;;  %4283 = vrot.lane.b32.xlu0 %v4271_v24, %s18755_s29 }
0x1fee   :  { %v16471_v7 = vpop.eup %14345  ;;  %v4274_v54 = vmul.f32 %v16468_v14, %v4260_v12 }
0x1fef   :  { %v4273_v17 = vmul.f32 %v16471_v7, %v4258_v9 }
0x1ff0   :  { %4289 = vrot.lane.b32.xlu1 %v4274_v54, %s18755_s29 }
0x1ff1   :  { %v16476_v33 = vpop.eup %14347  ;;  %4287 = vrot.lane.b32.xlu0 %v4273_v17, %s18755_s29 }
0x1ff2   :  { %v16479_v19 = vpop.eup %14349  ;;  %v4276_v63 = vmul.f32 %v16476_v33, %v4264_v52 }
0x1ff3   :  { %v4275_v1 = vmul.f32 %v16479_v19, %v4262_v48 }
0x1ff4   :  { %4293 = vrot.lane.b32.xlu1 %v4276_v63, %s18755_s29 }
0x1ff5   :  { %4291 = vrot.lane.b32.xlu0 %v4275_v1, %s18755_s29 }
0x205e   :  { %v4286_v41 = vpop.permute.xlu1 %4285 }
0x205f   :  { %v4284_v57 = vpop.permute.xlu0 %4283 }
0x2060   :  { %12706 = vmatprep.mubr.msk.f32.mxu0 %vm463_vm3, %v4284_v57 }
0x2061   :  { %12707 = vmatmul.mubr.msk.f32.vlgmr.msra.gmra.mrb[78].mxu0 %vm463_vm3, %v4286_v41 }
0x2062   :  { %v4290_v27 = vpop.permute.xlu1 %4289  ;;  %12737 = vmatpush3.msk.msra.mxu0 %vm467_vm0, %v16360_v38 }
0x2063   :  { %v4288_v13 = vpop.permute.xlu0 %4287  ;;  %12768 = vmatprep.subr.msk.mxu0 %vm467_vm0, %v16492_v46 }
0x2064   :  { %12709 = vmatprep.mubr.msk.f32.mxu0 %vm463_vm3, %v4288_v13 }
0x2065   :  { %12710 = vmatmul.mubr.msk.f32.gmra.mrb[80].mxu0 %vm463_vm3, %v4290_v27 }
0x2066   :  { %v4294_v62 = vpop.permute.xlu1 %4293 }
0x2067   :  { %v4292_v56 = vpop.permute.xlu0 %4291 }
0x2068   :  { %12712 = vmatprep.mubr.msk.f32.mxu0 %vm463_vm3, %v4292_v56  ;;  %v14724_v56 = vld [vmem:[%s18721_s2] ss:$0 sm:$0xff] }
0x2069   :  { %12713 = vmatmul.mubr.msk.f32.gmra.mrb[82].mxu0 %vm463_vm3, %v4294_v62 }
0x2134   :  { %v12708_v38 = vpop.f32.mrb[78].mxu0 }
0x2135   :  { %4410 = vrot.lane.b32.xlu1 %v12708_v38, %s18754_s1  ;;  %v4373_v36 = vpop.f32.mrb[79].mxu0 }
0x2136   :  { %4408 = vrot.lane.b32.xlu0 %v4373_v36, %s18754_s1 }
0x2138   :  { %v12711_v28 = vpop.f32.mrb[80].mxu0 }
0x2139   :  { %4414 = vrot.lane.b32.xlu1 %v12711_v28, %s18754_s1  ;;  %v4383_v23 = vpop.f32.mrb[81].mxu0 }
0x213a   :  { %4412 = vrot.lane.b32.xlu0 %v4383_v23, %s18754_s1 }
0x213c   :  { %v12714_v11 = vpop.f32.mrb[82].mxu0 }
0x213d   :  { %4418 = vrot.lane.b32.xlu1 %v12714_v11, %s18754_s1  ;;  %v4393_v0 = vpop.f32.mrb[83].mxu0 }
0x213e   :  { %4416 = vrot.lane.b32.xlu0 %v4393_v0, %s18754_s1 }
0x21a7   :  { %v4411_v53 = vpop.permute.xlu1 %4410 }
0x21a8   :  { %v4427_v61 = vadd.f32 %v4411_v53, %v16390_v60  ;;  %v4409_v59 = vpop.permute.xlu0 %4408  ;;  %v103_v60 = vld [vmem:[%s18751_s28 + $0x150] sm:$0xff] }
0x21a9   :  { %v4426_v32 = vadd.f32 %v4409_v59, %v16393_v10 }
0x21ab   :  { %v13891_v43 = vpack.i.bf16 %v4427_v61, %v4426_v32  ;;  %v4415_v49 = vpop.permute.xlu1 %4414 }
0x21ac   :  { %v4429_v39 = vadd.f32 %v4415_v49, %v16396_v34  ;;  %v4413_v29 = vpop.permute.xlu0 %4412  ;;  %v105_v34 = vld [vmem:[%s18751_s28 + $0x160] sm:$0xff] }
0x21ad   :  { %v4428_v45 = vadd.f32 %v4413_v29, %v16399_v20  ;;  %13892 = vrot.lane.b32.xlu0 %v13891_v43, %s18753_s24  ;;  %v104_v20 = vld [vmem:[%s18751_s28 + $0x158] sm:$0xff]  ;;  %v16557_v49 = vld [vmem:[%s18725_s6] ss:$0 sm:$0xff] }
0x21af   :  { %v13896_v37 = vpack.i.bf16 %v4429_v39, %v4428_v45  ;;  %v4419_v25 = vpop.permute.xlu1 %4418 }
0x21b0   :  { %v4431_v30 = vadd.f32 %v4419_v25, %v16402_v18  ;;  %v4417_v15 = vpop.permute.xlu0 %4416  ;;  %v107_v18 = vld [vmem:[%s18751_s28 + $0x170] sm:$0xff] }
0x21b1   :  { %v4430_v40 = vadd.f32 %v4417_v15, %v16405_v21  ;;  %13897 = vrot.lane.b32.xlu1 %v13896_v37, %s18753_s24  ;;  %v106_v21 = vld [vmem:[%s18751_s28 + $0x168] sm:$0xff] }
0x21b3   :  { %v13901_v10 = vpack.i.bf16 %v4431_v30, %v4430_v40 }
0x21b5   :  { %322 = vperm.xlu1 %13800, %v103_v60   ;;  %13902 = vrot.lane.b32.xlu0 %v13901_v10, %s18753_s24 }
0x21b9   :  { %332 = vperm.xlu1 %13800, %v105_v34   ;;  %327 = vperm.xlu0 %13799, %v104_v20   ;;  %v4564_v20 = vsub.f32 1.0, %v16461_v35 }
0x21bd   :  { %342 = vperm.xlu1 %13800, %v107_v18   ;;  %337 = vperm.xlu0 %13799, %v106_v21   ;;  %v4563_v21 = vsub.f32 1.0, %v16463_v6 }
0x21c1   :  { %347 = vperm.xlu0 %13799, %v108_v5  }
0x221f   :  { %v13893_v12 = vpop.permute.xlu0 %13892 }
0x2220   :  { %v13895_v24 = vunpack.i.h.bf16 %v13893_v12  ;;  %v13894_v9 = vunpack.i.l.bf16 %v13893_v12  ;;  %v4558_v12 = vmul.f32 %v16461_v35, %v16321_v26  ;;  %v4560_v26 = vmul.f32 %v16468_v14, %v16343_v50 }
0x2221   :  { %v4559_v35 = vmul.f32 %v16471_v7, %v16346_v31  ;;  %v4568_v50 = vsub.f32 1.0, %v16476_v33  ;;  %v4562_v31 = vmul.f32 %v16476_v33, %v16374_v42 }
0x2222   :  { %v13542_v54 = vpack.c.bf16 %v13895_v24, %v13894_v9  ;;  %v4557_v9 = vmul.f32 %v16463_v6, %v16324_v51 }
0x2223   :  { %v13898_v17 = vpop.permute.xlu1 %13897 }
0x2224   :  { %v13900_v52 = vunpack.i.h.bf16 %v13898_v17  ;;  %v13899_v48 = vunpack.i.l.bf16 %v13898_v17  ;;  %13543 = vmatprep.subr.bf16.mxu1 %v13542_v54 }
0x2225   :  { %13545 = vmatpush3.bf16.msra.mxu1 %v13542_v54 }
0x2226   :  { %v13546_v63 = vpack.c.bf16 %v13900_v52, %v13899_v48  ;;  %v4566_v52 = vsub.f32 1.0, %v16468_v14 }
0x2227   :  { %v13903_v1 = vpop.permute.xlu0 %13902 }
0x2228   :  { %v13905_v41 = vunpack.i.h.bf16 %v13903_v1  ;;  %v13904_v57 = vunpack.i.l.bf16 %v13903_v1  ;;  %13547 = vmatprep.subr.bf16.mxu1 %v13546_v63  ;;  %v4565_v1 = vsub.f32 1.0, %v16471_v7 }
0x2229   :  { %13549 = vmatpush3.bf16.msra.mxu1 %v13546_v63 }
0x222a   :  { %v13550_v27 = vpack.c.bf16 %v13905_v41, %v13904_v57 }
0x222c   :  { %13551 = vmatprep.subr.bf16.mxu1 %v13550_v27 }
0x222d   :  { %13553 = vmatpush3.bf16.msra.mxu1 %v13550_v27 }
0x2230   :  { %12728 = vmatmul.mubr.msk.f32.vlgmr.msra.gmra.mrb[78].mxu1 %vm578_vm1, %v16411_v44 }
0x2231   :  { %12730 = vmatprep.mubr.msk.f32.mxu1 %vm578_vm1, %v16418_v47 }
0x2234   :  { %v323_v13 = vpop.permute.xlu1 %322  ;;  %12731 = vmatmul.mubr.msk.f32.gmra.mrb[80].mxu1 %vm578_vm1, %v16425_v22 }
0x2235   :  { %v398_v62 = vmul.f32 %v14724_v56, %v323_v13  ;;  %12733 = vmatprep.mubr.msk.f32.mxu1 %vm578_vm1, %v16432_v55  ;;  %v4567_v13 = vsub.f32 1.0, %v16479_v19 }
0x2237   :  { %447 = vst.msk [vmem:[#allocation2 + $0x150] sm:$0xff] %vm404_vm2, %v398_v62 }
0x2238   :  { %v333_v38 = vpop.permute.xlu1 %332  ;;  %v328_v36 = vpop.permute.xlu0 %327  ;;  %12734 = vmatmul.mubr.msk.f32.gmra.mrb[82].mxu1 %vm578_vm1, %v16439_v58 }
0x2239   :  { %v400_v28 = vmul.f32 %v14724_v56, %v333_v38  ;;  %v399_v23 = vmul.f32 %v14724_v56, %v328_v36  ;;  %12759 = vmatprep.mubr.msk.f32.mxu1 %vm578_vm1, %v16446_v8 }
0x223b   :  { %449 = vst.msk [vmem:[#allocation2 + $0x160] sm:$0xff] %vm404_vm2, %v400_v28  ;;  %448 = vst.msk [vmem:[#allocation2 + $0x158] sm:$0xff] %vm404_vm2, %v399_v23 }
0x223c   :  { %v343_v11 = vpop.permute.xlu1 %342  ;;  %v338_v0 = vpop.permute.xlu0 %337 }
0x223d   :  { %v402_v53 = vmul.f32 %v14724_v56, %v343_v11  ;;  %v401_v61 = vmul.f32 %v14724_v56, %v338_v0 }
0x223e   :  { %v16636_v36 = vld [vmem:[#allocation2 + $0x150] sm:$0xff] }
0x223f   :  { %451 = vst.msk [vmem:[#allocation2 + $0x170] sm:$0xff] %vm404_vm2, %v402_v53  ;;  %450 = vst.msk [vmem:[#allocation2 + $0x168] sm:$0xff] %vm404_vm2, %v401_v61 }
0x2240   :  { %v348_v59 = vpop.permute.xlu0 %347 }
0x2241   :  { %v403_v32 = vmul.f32 %v14724_v56, %v348_v59 }
0x2242   :  { %v16642_v59 = vld [vmem:[#allocation2 + $0x160] sm:$0xff] }
0x2243   :  { %452 = vst.msk [vmem:[#allocation2 + $0x178] sm:$0xff] %vm404_vm2, %v403_v32 }
0x2246   :  { %v16639_v0 = vld [vmem:[#allocation2 + $0x168] sm:$0xff] }
0x2303   :  { %v12729_v43 = vpop.f32.mrb[78].mxu1 }
0x2304   :  { %v4528_v39 = vadd.f32 %v16557_v49, %v12729_v43  ;;  %v4522_v29 = vpop.f32.mrb[79].mxu1 }
0x2305   :  { %v4523_v45 = vadd.f32 %v16557_v49, %v4522_v29  ;;  %v16645_v29 = vld [vmem:[#allocation2 + $0x178] sm:$0xff] }
0x2306   :  { %14351 = vtanh.f32 %v4528_v39 }
0x2307   :  { %14353 = vtanh.f32 %v4523_v45  ;;  %v12732_v37 = vpop.f32.mrb[80].mxu1 }
0x2308   :  { %v4538_v25 = vadd.f32 %v16557_v49, %v12732_v37  ;;  %v4532_v30 = vpop.f32.mrb[81].mxu1 }
0x2309   :  { %v4533_v15 = vadd.f32 %v16557_v49, %v4532_v30 }
0x230a   :  { %14355 = vtanh.f32 %v4538_v25  ;;  %v16648_v25 = vld [vmem:[#allocation2 + $0x170] sm:$0xff] }
0x230b   :  { %14357 = vtanh.f32 %v4533_v15  ;;  %v12735_v40 = vpop.f32.mrb[82].mxu1 }
0x230c   :  { %v4548_v60 = vadd.f32 %v16557_v49, %v12735_v40  ;;  %v4542_v10 = vpop.f32.mrb[83].mxu1 }
0x230d   :  { %v4543_v34 = vadd.f32 %v16557_v49, %v4542_v10 }
0x230e   :  { %14359 = vtanh.f32 %v4548_v60 }
0x230f   :  { %14361 = vtanh.f32 %v4543_v34 }
0x2310   :  { %v14352_v18 = vpop.eup %14351 }
0x2311   :  { %v14354_v5 = vpop.eup %14353  ;;  %v4570_v24 = vmul.f32 %v14352_v18, %v4564_v20 }
0x2312   :  { %v4569_v54 = vmul.f32 %v14354_v5, %v4563_v21 }
0x2313   :  { %v16571_v17 = vadd.f32 %v4570_v24, %v4558_v12 }
0x2314   :  { %v14356_v48 = vpop.eup %14355  ;;  %v16574_v63 = vadd.f32 %v4569_v54, %v4557_v9 }
0x2315   :  { %v14358_v41 = vpop.eup %14357  ;;  %4845 = vrot.lane.b32.xlu0 %v16571_v17, %s18756_s18  ;;  %4582 = vst.msk [vmem:[#allocation4 + $0x128] sm:$0xff] %vm463_vm3, %v16571_v17  ;;  %v4572_v51 = vmul.f32 %v14356_v48, %v4566_v52 }
0x2316   :  { %4843 = vrot.lane.b32.xlu1 %v16574_v63, %s18756_s18  ;;  %4581 = vst.msk [vmem:[#allocation4 + $0x120] sm:$0xff] %vm463_vm3, %v16574_v63  ;;  %12738 = vmatprep.mubr.msk.f32.mxu0 %vm463_vm3, %v16574_v63  ;;  %v4571_v6 = vmul.f32 %v14358_v41, %v4565_v1 }
0x2317   :  { %12739 = vmatmul.mubr.msk.f32.vlgmr.msra.gmra.mrb[84].mxu0 %vm463_vm3, %v16571_v17  ;;  %v16593_v57 = vadd.f32 %v4572_v51, %v4560_v26 }
0x2318   :  { %v14360_v14 = vpop.eup %14359  ;;  %v16596_v27 = vadd.f32 %v4571_v6, %v4559_v35  ;;  %12769 = vmatpush3.msk.msra.mxu0 %vm467_vm0, %v16492_v46  ;;  %v4561_v46 = vmul.f32 %v16479_v19, %v16376_v4  ;;  %v16633_v4 = vld [vmem:[#allocation2 + $0x158] sm:$0xff] }
0x2319   :  { %v14362_v56 = vpop.eup %14361  ;;  %4849 = vrot.lane.b32.xlu0 %v16593_v57, %s18756_s18  ;;  %4584 = vst.msk [vmem:[#allocation4 + $0x138] sm:$0xff] %vm463_vm3, %v16593_v57  ;;  %v4574_v7 = vmul.f32 %v14360_v14, %v4568_v50 }
0x231a   :  { %4583 = vst.msk [vmem:[#allocation4 + $0x130] sm:$0xff] %vm463_vm3, %v16596_v27  ;;  %4847 = vrot.lane.b32.xlu1 %v16596_v27, %s18756_s18  ;;  %12741 = vmatprep.mubr.msk.f32.mxu0 %vm463_vm3, %v16596_v27  ;;  %v4573_v62 = vmul.f32 %v14362_v56, %v4567_v13 }
0x231b   :  { %12742 = vmatmul.mubr.msk.f32.gmra.mrb[86].mxu0 %vm463_vm3, %v16593_v57  ;;  %v16617_v38 = vadd.f32 %v4574_v7, %v4562_v31 }
0x231c   :  { %v16619_v42 = vadd.f32 %v4573_v62, %v4561_v46 }
0x231d   :  { %4853 = vrot.lane.b32.xlu0 %v16617_v38, %s18756_s18  ;;  %4586 = vst.msk [vmem:[#allocation4 + $0x148] sm:$0xff] %vm463_vm3, %v16617_v38 }
0x231e   :  { %4585 = vst.msk [vmem:[#allocation4 + $0x140] sm:$0xff] %vm463_vm3, %v16619_v42  ;;  %4851 = vrot.lane.b32.xlu1 %v16619_v42, %s18756_s18  ;;  %12744 = vmatprep.mubr.msk.f32.mxu0 %vm463_vm3, %v16619_v42 }
0x231f   :  { %12745 = vmatmul.mubr.msk.f32.gmra.mrb[88].mxu0 %vm463_vm3, %v16617_v38 }
0x23ea   :  { %v12740_v33 = vpop.f32.mrb[84].mxu0 }
0x23eb   :  { %v4707_v19 = vadd.f32 %v12740_v33, %v16633_v4  ;;  %v4677_v28 = vpop.f32.mrb[85].mxu0  ;;  %v4846_v33 = vpop.permute.xlu0 %4845 }
0x23ec   :  { %v4706_v23 = vadd.f32 %v4677_v28, %v16636_v36 }
0x23ee   :  { %v13554_v11 = vpack.c.bf16 %v4707_v19, %v4706_v23  ;;  %v12743_v53 = vpop.f32.mrb[86].mxu0  ;;  %v4844_v19 = vpop.permute.xlu1 %4843 }
0x23ef   :  { %v4709_v61 = vadd.f32 %v12743_v53, %v16639_v0  ;;  %v4687_v32 = vpop.f32.mrb[87].mxu0 }
0x23f0   :  { %v4708_v43 = vadd.f32 %v4687_v32, %v16642_v59  ;;  %13555 = vmatprep.subr.bf16.mxu1 %v13554_v11 }
0x23f1   :  { %13557 = vmatpush3.bf16.msra.mxu1 %v13554_v11 }
0x23f2   :  { %v13558_v39 = vpack.c.bf16 %v4709_v61, %v4708_v43  ;;  %v12746_v45 = vpop.f32.mrb[88].mxu0  ;;  %v4850_v61 = vpop.permute.xlu0 %4849 }
0x23f3   :  { %v4711_v37 = vadd.f32 %v12746_v45, %v16645_v29  ;;  %v4697_v30 = vpop.f32.mrb[89].mxu0  ;;  %v4848_v43 = vpop.permute.xlu1 %4847 }
0x23f4   :  { %v4710_v15 = vadd.f32 %v4697_v30, %v16648_v25  ;;  %13559 = vmatprep.subr.bf16.mxu1 %v13558_v39 }
0x23f5   :  { %13561 = vmatpush3.bf16.msra.mxu1 %v13558_v39 }
0x23f6   :  { %v13562_v40 = vpack.c.bf16 %v4711_v37, %v4710_v15 }
0x23f8   :  { %13563 = vmatprep.subr.bf16.mxu1 %v13562_v40 }
0x23f9   :  { %13565 = vmatpush3.bf16.msra.mxu1 %v13562_v40  ;;  %v4854_v40 = vpop.permute.xlu0 %4853 }
0x23fc   :  { %12760 = vmatmul.mubr.msk.f32.vlgmr.msra.gmra.mrb[84].mxu1 %vm578_vm1, %v16411_v44 }
0x23fd   :  { %12762 = vmatprep.mubr.msk.f32.mxu1 %vm578_vm1, %v16418_v47 }
0x2400   :  { %12763 = vmatmul.mubr.msk.f32.gmra.mrb[86].mxu1 %vm578_vm1, %v16425_v22 }
0x2401   :  { %12765 = vmatprep.mubr.msk.f32.mxu1 %vm578_vm1, %v16432_v55 }
0x2404   :  { %12766 = vmatmul.mubr.msk.f32.gmra.mrb[88].mxu1 %vm578_vm1, %v16439_v58 }
0x2405   :  { %12794 = vmatprep.mubr.msk.f32.mxu1 %vm578_vm1, %v16418_v47 }
0x24cf   :  { %v12761_v60 = vpop.f32.mrb[84].mxu1 }
0x24d0   :  { %v4784_v10 = vadd.f32 %v16453_v16, %v12761_v60  ;;  %v4778_v34 = vpop.f32.mrb[85].mxu1 }
0x24d1   :  { %v4779_v20 = vadd.f32 %v16453_v16, %v4778_v34 }
0x24d2   :  { %v11260_v18 = vmul.f32 -1.442695, %v4784_v10  ;;  %v4852_v10 = vpop.permute.xlu1 %4851 }
0x24d3   :  { %v11259_v21 = vmul.f32 -1.442695, %v4779_v20  ;;  %v12764_v5 = vpop.f32.mrb[86].mxu1 }
0x24d4   :  { %14363 = vpow2.f32 %v11260_v18  ;;  %v4794_v12 = vadd.f32 %v16453_v16, %v12764_v5  ;;  %v4788_v24 = vpop.f32.mrb[87].mxu1 }
0x24d5   :  { %14365 = vpow2.f32 %v11259_v21  ;;  %v4789_v9 = vadd.f32 %v16453_v16, %v4788_v24 }
0x24d6   :  { %v11262_v54 = vmul.f32 -1.442695, %v4794_v12 }
0x24d7   :  { %v11261_v52 = vmul.f32 -1.442695, %v4789_v9  ;;  %v12767_v48 = vpop.f32.mrb[88].mxu1 }
0x24d8   :  { %14367 = vpow2.f32 %v11262_v54  ;;  %v4804_v47 = vadd.f32 %v16453_v16, %v12767_v48  ;;  %v4798_v1 = vpop.f32.mrb[89].mxu1 }
0x24d9   :  { %14369 = vpow2.f32 %v11261_v52  ;;  %v4799_v41 = vadd.f32 %v16453_v16, %v4798_v1 }
0x24da   :  { %v11264_v26 = vmul.f32 -1.442695, %v4804_v47 }
0x24db   :  { %v11263_v51 = vmul.f32 -1.442695, %v4799_v41 }
0x24dc   :  { %14371 = vpow2.f32 %v11264_v26 }
0x24dd   :  { %14373 = vpow2.f32 %v11263_v51 }
0x24de   :  { %v14364_v35 = vpop.eup %14363 }
0x24df   :  { %v14366_v6 = vpop.eup %14365  ;;  %v4826_v50 = vadd.f32 1.0, %v14364_v35 }
0x24e0   :  { %v4825_v14 = vadd.f32 1.0, %v14366_v6 }
0x24e1   :  { %14375 = vrcp.f32 %v4826_v50 }
0x24e2   :  { %v14368_v13 = vpop.eup %14367  ;;  %14377 = vrcp.f32 %v4825_v14 }
0x24e3   :  { %v14370_v56 = vpop.eup %14369  ;;  %v4828_v31 = vadd.f32 1.0, %v14368_v13 }
0x24e4   :  { %v4827_v7 = vadd.f32 1.0, %v14370_v56 }
0x24e5   :  { %14379 = vrcp.f32 %v4828_v31 }
0x24e6   :  { %v14372_v46 = vpop.eup %14371  ;;  %14381 = vrcp.f32 %v4827_v7 }
0x24e7   :  { %v14374_v62 = vpop.eup %14373  ;;  %v4830_v16 = vadd.f32 1.0, %v14372_v46 }
0x24e8   :  { %v4829_v28 = vadd.f32 1.0, %v14374_v62 }
0x24e9   :  { %14383 = vrcp.f32 %v4830_v16 }
0x24ea   :  { %14385 = vrcp.f32 %v4829_v28 }
0x24eb   :  { %v16669_v23 = vpop.eup %14375 }
0x24ec   :  { %v16671_v11 = vpop.eup %14377  ;;  %v4862_v53 = vmul.f32 %v16669_v23, %v4846_v33 }
0x24ed   :  { %v4861_v32 = vmul.f32 %v16671_v11, %v4844_v19 }
0x24ee   :  { %4875 = vrot.lane.b32.xlu0 %v4862_v53, %s18755_s29 }
0x24ef   :  { %v16676_v39 = vpop.eup %14379  ;;  %4873 = vrot.lane.b32.xlu1 %v4861_v32, %s18755_s29 }
0x24f0   :  { %v16679_v45 = vpop.eup %14381  ;;  %v4864_v37 = vmul.f32 %v16676_v39, %v4850_v61 }
0x24f1   :  { %v4863_v30 = vmul.f32 %v16679_v45, %v4848_v43 }
0x24f2   :  { %4879 = vrot.lane.b32.xlu0 %v4864_v37, %s18755_s29 }
0x24f3   :  { %v16684_v15 = vpop.eup %14383  ;;  %4877 = vrot.lane.b32.xlu1 %v4863_v30, %s18755_s29  ;;  %v5225_v30 = vld [vmem:[%s18726_s7] sm:$0xf] }
0x24f4   :  { %v16687_v60 = vpop.eup %14385  ;;  %v4866_v34 = vmul.f32 %v16684_v15, %v4854_v40  ;;  %v16722_v40 = vld [vmem:[%s18727_s8] sm:$0xff] }
0x24f5   :  { %v4865_v20 = vmul.f32 %v16687_v60, %v4852_v10  ;;  %v5177_v10 = vld [vmem:[#allocation4] sm:$0xff] }
0x24f6   :  { %4883 = vrot.lane.b32.xlu0 %v4866_v34, %s18755_s29  ;;  %v5178_v34 = vld [vmem:[#allocation4 + $0x8] sm:$0xff] }
0x24f7   :  { %4881 = vrot.lane.b32.xlu1 %v4865_v20, %s18755_s29  ;;  %v5183_v20 = vld [vmem:[#allocation4 + $0x30] sm:$0xff] }
0x2560   :  { %v4876_v18 = vpop.permute.xlu0 %4875 }
0x2561   :  { %v4874_v21 = vpop.permute.xlu1 %4873 }
0x2562   :  { %12770 = vmatprep.mubr.msk.f32.mxu0 %vm463_vm3, %v4874_v21  ;;  %v5185_v21 = vld [vmem:[#allocation4 + $0x40] sm:$0xff] }
0x2563   :  { %12771 = vmatmul.mubr.msk.f32.vlgmr.msra.gmra.mrb[90].mxu0 %vm463_vm3, %v4876_v18  ;;  %v5184_v18 = vld [vmem:[#allocation4 + $0x38] sm:$0xff] }
0x2564   :  { %v4880_v5 = vpop.permute.xlu0 %4879 }
0x2565   :  { %v4878_v12 = vpop.permute.xlu1 %4877 }
0x2566   :  { %12773 = vmatprep.mubr.msk.f32.mxu0 %vm463_vm3, %v4878_v12  ;;  %v5187_v12 = vld [vmem:[#allocation4 + $0x50] sm:$0xff] }
0x2567   :  { %12774 = vmatmul.mubr.msk.f32.gmra.mrb[92].mxu0 %vm463_vm3, %v4880_v5  ;;  %v5186_v5 = vld [vmem:[#allocation4 + $0x48] sm:$0xff] }
0x2568   :  { %v4884_v9 = vpop.permute.xlu0 %4883 }
0x2569   :  { %v4882_v24 = vpop.permute.xlu1 %4881 }
0x256a   :  { %12776 = vmatprep.mubr.msk.f32.mxu0 %vm463_vm3, %v4882_v24  ;;  %v5188_v24 = vld [vmem:[#allocation4 + $0x58] sm:$0xff] }
0x256b   :  { %12777 = vmatmul.mubr.msk.f32.gmra.mrb[94].mxu0 %vm463_vm3, %v4884_v9  ;;  %v5189_v9 = vld [vmem:[#allocation4 + $0x60] sm:$0xff] }
0x256c   :  { %12791 = vmatprep.mubr.msk.f32.mxu0 %vm578_vm1, %v16446_v8 }
0x2636   :  { %v12772_v54 = vpop.f32.mrb[90].mxu0 }
0x2637   :  { %5000 = vrot.lane.b32.xlu0 %v12772_v54, %s18754_s1  ;;  %v4963_v52 = vpop.f32.mrb[91].mxu0  ;;  %v5190_v54 = vld [vmem:[#allocation4 + $0x68] sm:$0xff] }
0x2638   :  { %4998 = vrot.lane.b32.xlu1 %v4963_v52, %s18754_s1  ;;  %v5192_v52 = vld [vmem:[#allocation4 + $0x78] sm:$0xff] }
0x263a   :  { %v12775_v48 = vpop.f32.mrb[92].mxu0 }
0x263b   :  { %5004 = vrot.lane.b32.xlu0 %v12775_v48, %s18754_s1  ;;  %v4973_v47 = vpop.f32.mrb[93].mxu0  ;;  %v5194_v48 = vld [vmem:[#allocation4 + $0x88] sm:$0xff] }
0x263c   :  { %5002 = vrot.lane.b32.xlu1 %v4973_v47, %s18754_s1  ;;  %v5195_v47 = vld [vmem:[#allocation4 + $0x90] sm:$0xff] }
0x263e   :  { %v12778_v1 = vpop.f32.mrb[94].mxu0 }
0x263f   :  { %5008 = vrot.lane.b32.xlu0 %v12778_v1, %s18754_s1  ;;  %v4983_v41 = vpop.f32.mrb[95].mxu0  ;;  %v5196_v1 = vld [vmem:[#allocation4 + $0x98] sm:$0xff] }
0x2640   :  { %5006 = vrot.lane.b32.xlu1 %v4983_v41, %s18754_s1  ;;  %v5197_v41 = vld [vmem:[#allocation4 + $0xa0] sm:$0xff] }
0x26a9   :  { %v5001_v26 = vpop.permute.xlu0 %5000 }
0x26aa   :  { %v5017_v51 = vadd.f32 %v5001_v26, %v16633_v4  ;;  %v4999_v35 = vpop.permute.xlu1 %4998  ;;  %v5198_v26 = vld [vmem:[#allocation4 + $0xa8] sm:$0xff] }
0x26ab   :  { %v5016_v6 = vadd.f32 %v4999_v35, %v16636_v36  ;;  %v5200_v35 = vld [vmem:[#allocation4 + $0xb8] sm:$0xff] }
0x26ad   :  { %v13906_v50 = vpack.i.bf16 %v5017_v51, %v5016_v6  ;;  %v5005_v14 = vpop.permute.xlu0 %5004  ;;  %v5199_v51 = vld [vmem:[#allocation4 + $0xb0] sm:$0xff]  ;;  %v5201_v6 = vld [vmem:[#allocation4 + $0xc0] sm:$0xff] }
0x26ae   :  { %v5019_v13 = vadd.f32 %v5005_v14, %v16639_v0  ;;  %v5003_v56 = vpop.permute.xlu1 %5002  ;;  %v5203_v14 = vld [vmem:[#allocation4 + $0xd0] sm:$0xff] }
0x26af   :  { %v5018_v31 = vadd.f32 %v5003_v56, %v16642_v59  ;;  %13907 = vrot.lane.b32.xlu1 %v13906_v50, %s18753_s24  ;;  %v5202_v50 = vld [vmem:[#allocation4 + $0xc8] sm:$0xff]  ;;  %v5205_v56 = vld [vmem:[#allocation4 + $0xe0] sm:$0xff] }
0x26b1   :  { %v13911_v7 = vpack.i.bf16 %v5019_v13, %v5018_v31  ;;  %v5009_v46 = vpop.permute.xlu0 %5008  ;;  %v5204_v13 = vld [vmem:[#allocation4 + $0xd8] sm:$0xff]  ;;  %v5206_v31 = vld [vmem:[#allocation4 + $0xe8] sm:$0xff] }
0x26b2   :  { %v5021_v62 = vadd.f32 %v5009_v46, %v16645_v29  ;;  %v5007_v33 = vpop.permute.xlu1 %5006  ;;  %v5208_v46 = vld [vmem:[#allocation4 + $0xf8] sm:$0xff] }
0x26b3   :  { %v5020_v16 = vadd.f32 %v5007_v33, %v16648_v25  ;;  %13912 = vrot.lane.b32.xlu0 %v13911_v7, %s18753_s24  ;;  %v5207_v7 = vld [vmem:[#allocation4 + $0xf0] sm:$0xff]  ;;  %v5210_v33 = vld [vmem:[#allocation4 + $0x108] sm:$0xff] }
0x26b5   :  { %v13916_v4 = vpack.i.bf16 %v5021_v62, %v5020_v16  ;;  %v5209_v62 = vld [vmem:[#allocation4 + $0x100] sm:$0xff]  ;;  %v5211_v16 = vld [vmem:[#allocation4 + $0x110] sm:$0xff] }
0x26b7   :  { %13917 = vrot.lane.b32.xlu1 %v13916_v4, %s18753_s24  ;;  %v5212_v4 = vld [vmem:[#allocation4 + $0x118] sm:$0xff] }
0x2721   :  { %v13908_v36 = vpop.permute.xlu1 %13907 }
0x2722   :  { %v13910_v19 = vunpack.i.h.bf16 %v13908_v36  ;;  %v13909_v0 = vunpack.i.l.bf16 %v13908_v36  ;;  %v5213_v36 = vld [vmem:[#allocation4 + $0x120] sm:$0xff] }
0x2724   :  { %v13566_v28 = vpack.c.bf16 %v13910_v19, %v13909_v0  ;;  %v5214_v19 = vld [vmem:[#allocation4 + $0x128] sm:$0xff]  ;;  %v5215_v0 = vld [vmem:[#allocation4 + $0x130] sm:$0xff] }
0x2725   :  { %v13913_v53 = vpop.permute.xlu0 %13912 }
0x2726   :  { %v13915_v59 = vunpack.i.h.bf16 %v13913_v53  ;;  %v13914_v61 = vunpack.i.l.bf16 %v13913_v53  ;;  %13567 = vmatprep.subr.bf16.mxu0 %v13566_v28  ;;  %13770 = vmatprep.subr.bf16.mxu1 %v13566_v28  ;;  %v5217_v53 = vld [vmem:[#allocation4 + $0x140] sm:$0xff] }
0x2727   :  { %13569 = vmatpush3.bf16.msra.mxu0 %v13566_v28  ;;  %13773 = vmatpush3.bf16.msra.mxu1 %v13566_v28  ;;  %v5216_v28 = vld [vmem:[#allocation4 + $0x138] sm:$0xff] }
0x2728   :  { %v13570_v29 = vpack.c.bf16 %v13915_v59, %v13914_v61  ;;  %v5218_v59 = vld [vmem:[#allocation4 + $0x148] sm:$0xff] }
0x2729   :  { %v13918_v32 = vpop.permute.xlu1 %13917 }
0x272a   :  { %v13920_v43 = vunpack.i.h.bf16 %v13918_v32  ;;  %v13919_v25 = vunpack.i.l.bf16 %v13918_v32  ;;  %13571 = vmatprep.subr.bf16.mxu0 %v13570_v29  ;;  %13771 = vmatprep.subr.bf16.mxu1 %v13570_v29 }
0x272b   :  { %13573 = vmatpush3.bf16.msra.mxu0 %v13570_v29  ;;  %13774 = vmatpush3.bf16.msra.mxu1 %v13570_v29 }
0x272c   :  { %v13574_v37 = vpack.c.bf16 %v13920_v43, %v13919_v25 }
0x272e   :  { %13575 = vmatprep.subr.bf16.mxu0 %v13574_v37  ;;  %13772 = vmatprep.subr.bf16.mxu1 %v13574_v37 }
0x272f   :  { %13577 = vmatpush3.bf16.msra.mxu0 %v13574_v37  ;;  %13775 = vmatpush3.bf16.msra.mxu1 %v13574_v37 }
0x2730   :  { %12800 = vmatprep.subr.msk.mxu0 %vm467_vm0, %v5225_v30  ;;  %12874 = vmatprep.subr.mxu1 %v16722_v40 }
0x2732   :  { %12792 = vmatmul.mubr.msk.f32.vlgmr.msra.gmra.mrb[96].mxu0 %vm578_vm1, %v16411_v44  ;;  %12795 = vmatmul.mubr.msk.f32.vlgmr.msra.gmra.mrb[90].mxu1 %vm578_vm1, %v16425_v22  ;;  %v5179_v44 = vld [vmem:[#allocation4 + $0x10] sm:$0xff]  ;;  %v5180_v22 = vld [vmem:[#allocation4 + $0x18] sm:$0xff] }
0x2733   :  { %12801 = vmatpush3.msk.msra.mxu0 %vm467_vm0, %v5225_v30  ;;  %12802 = vmatprep.mubr.msk.f32.mxu0 %vm463_vm3, %v5177_v10 }
0x2734   :  { %12797 = vmatprep.mubr.msk.f32.mxu1 %vm578_vm1, %v16432_v55  ;;  %12875 = vmatpush3.msra.mxu1 %v16722_v40  ;;  %v5181_v55 = vld [vmem:[#allocation4 + $0x20] sm:$0xff] }
0x2735   :  { %13002 = vmatprep.subr.mxu0 %v16722_v40 }
0x2736   :  { %12798 = vmatmul.mubr.msk.f32.gmra.mrb[92].mxu1 %vm578_vm1, %v16439_v58  ;;  %12803 = vmatmul.mubr.msk.f32.vlgmr.msra.gmra.mrb[98].mxu0 %vm463_vm3, %v5178_v34  ;;  %v5182_v58 = vld [vmem:[#allocation4 + $0x28] sm:$0xff] }
0x2737   :  { %12805 = vmatprep.mubr.msk.f32.mxu0 %vm463_vm3, %v5179_v44  ;;  %12876 = vmatprep.mubr.f32.mxu1 %v14827_v2 }
0x2738   :  { %13003 = vmatpush3.msra.mxu0 %v16722_v40 }
0x273a   :  { %12806 = vmatmul.mubr.msk.f32.gmra.mrb[100].mxu0 %vm463_vm3, %v5180_v22  ;;  %12877 = vmatmul.mubr.f32.vlgmr.msra.gmra.mrb[94].mxu1 %v14827_v2 }
0x273b   :  { %12808 = vmatprep.mubr.msk.f32.mxu0 %vm463_vm3, %v5181_v55  ;;  %12879 = vmatprep.mubr.f32.mxu1 %v14827_v2 }
0x273e   :  { %12809 = vmatmul.mubr.msk.f32.gmra.mrb[102].mxu0 %vm463_vm3, %v5182_v58  ;;  %12880 = vmatmul.mubr.f32.gmra.mrb[96].mxu1 %v14827_v2 }
0x273f   :  { %12811 = vmatprep.mubr.msk.f32.mxu0 %vm463_vm3, %v5183_v20  ;;  %12882 = vmatprep.mubr.f32.mxu1 %v14827_v2 }
0x2742   :  { %12812 = vmatmul.mubr.msk.f32.gmra.mrb[104].mxu0 %vm463_vm3, %v5184_v18  ;;  %12883 = vmatmul.mubr.f32.gmra.mrb[98].mxu1 %v14827_v2  ;;  %v5191_v2 = vld [vmem:[#allocation4 + $0x70] sm:$0xff] }
0x2743   :  { %12814 = vmatprep.mubr.msk.f32.mxu0 %vm463_vm3, %v5185_v21  ;;  %12897 = vmatprep.mubr.msk.f32.mxu1 %vm578_vm1, %v16446_v8  ;;  %v5193_v8 = vld [vmem:[#allocation4 + $0x80] sm:$0xff] }
0x2746   :  { %12815 = vmatmul.mubr.msk.f32.gmra.mrb[106].mxu0 %vm463_vm3, %v5186_v5 }
0x2747   :  { %12817 = vmatprep.mubr.msk.f32.mxu0 %vm463_vm3, %v5187_v12 }
0x274a   :  { %12818 = vmatmul.mubr.msk.f32.gmra.mrb[108].mxu0 %vm463_vm3, %v5188_v24  ;;  %v5154_v24 = vsub.f32 1.0, %v16669_v23 }
0x274b   :  { %12820 = vmatprep.mubr.msk.f32.mxu0 %vm463_vm3, %v5189_v9 }
0x274e   :  { %12821 = vmatmul.mubr.msk.f32.gmra.mrb[110].mxu0 %vm463_vm3, %v5190_v54 }
0x274f   :  { %12823 = vmatprep.mubr.msk.f32.mxu0 %vm463_vm3, %v5191_v2 }
0x2752   :  { %12824 = vmatmul.mubr.msk.f32.gmra.mrb[112].mxu0 %vm463_vm3, %v5192_v52 }
0x2753   :  { %12826 = vmatprep.mubr.msk.f32.mxu0 %vm463_vm3, %v5193_v8  ;;  %v5156_v8 = vsub.f32 1.0, %v16676_v39 }
0x2756   :  { %12827 = vmatmul.mubr.msk.f32.gmra.mrb[114].mxu0 %vm463_vm3, %v5194_v48 }
0x2757   :  { %12829 = vmatprep.mubr.msk.f32.mxu0 %vm463_vm3, %v5195_v47 }
0x275a   :  { %12830 = vmatmul.mubr.msk.f32.gmra.mrb[116].mxu0 %vm463_vm3, %v5196_v1 }
0x275b   :  { %12832 = vmatprep.mubr.msk.f32.mxu0 %vm463_vm3, %v5197_v41 }
0x275e   :  { %12833 = vmatmul.mubr.msk.f32.gmra.mrb[118].mxu0 %vm463_vm3, %v5198_v26 }
0x275f   :  { %12835 = vmatprep.mubr.msk.f32.mxu0 %vm463_vm3, %v5199_v51 }
0x2762   :  { %12836 = vmatmul.mubr.msk.f32.gmra.mrb[120].mxu0 %vm463_vm3, %v5200_v35  ;;  %v5147_v35 = vmul.f32 %v16671_v11, %v16574_v63 }
0x2763   :  { %12838 = vmatprep.mubr.msk.f32.mxu0 %vm463_vm3, %v5201_v6  ;;  %v5153_v6 = vsub.f32 1.0, %v16671_v11  ;;  %v5158_v11 = vsub.f32 1.0, %v16684_v15 }
0x2766   :  { %12839 = vmatmul.mubr.msk.f32.gmra.mrb[122].mxu0 %vm463_vm3, %v5202_v50 }
0x2767   :  { %12841 = vmatprep.mubr.msk.f32.mxu0 %vm463_vm3, %v5203_v14 }
0x276a   :  { %12842 = vmatmul.mubr.msk.f32.gmra.mrb[124].mxu0 %vm463_vm3, %v5204_v13  ;;  %v5149_v13 = vmul.f32 %v16679_v45, %v16596_v27 }
0x276b   :  { %12844 = vmatprep.mubr.msk.f32.mxu0 %vm463_vm3, %v5205_v56  ;;  %v5155_v56 = vsub.f32 1.0, %v16679_v45 }
0x276e   :  { %12845 = vmatmul.mubr.msk.f32.gmra.mrb[126].mxu0 %vm463_vm3, %v5206_v31 }
0x276f   :  { %12847 = vmatprep.mubr.msk.f32.mxu0 %vm463_vm3, %v5207_v7 }
0x2772   :  { %12848 = vmatmul.mubr.msk.f32.gmra.mrb[128].mxu0 %vm463_vm3, %v5208_v46 }
0x2773   :  { %12850 = vmatprep.mubr.msk.f32.mxu0 %vm463_vm3, %v5209_v62 }
0x2776   :  { %12851 = vmatmul.mubr.msk.f32.gmra.mrb[130].mxu0 %vm463_vm3, %v5210_v33 }
0x2777   :  { %12853 = vmatprep.mubr.msk.f32.mxu0 %vm463_vm3, %v5211_v16 }
0x277a   :  { %12854 = vmatmul.mubr.msk.f32.gmra.mrb[132].mxu0 %vm463_vm3, %v5212_v4 }
0x277b   :  { %12856 = vmatprep.mubr.msk.f32.mxu0 %vm463_vm3, %v5213_v36 }
0x277e   :  { %12857 = vmatmul.mubr.msk.f32.gmra.mrb[134].mxu0 %vm463_vm3, %v5214_v19 }
0x277f   :  { %12859 = vmatprep.mubr.msk.f32.mxu0 %vm463_vm3, %v5215_v0 }
0x2782   :  { %12860 = vmatmul.mubr.msk.f32.gmra.mrb[136].mxu0 %vm463_vm3, %v5216_v28 }
0x2783   :  { %12862 = vmatprep.mubr.msk.f32.mxu0 %vm463_vm3, %v5217_v53 }
0x2786   :  { %12863 = vmatmul.mubr.msk.f32.gmra.mrb[138].mxu0 %vm463_vm3, %v5218_v59  ;;  %v5152_v59 = vmul.f32 %v16684_v15, %v16617_v38 }
0x2805   :  { %v12793_v61 = vpop.f32.mrb[96].mxu0  ;;  %v12796_v29 = vpop.f32.mrb[90].mxu1 }
0x2806   :  { %v5118_v32 = vadd.f32 %v16557_v49, %v12793_v61  ;;  %v5128_v43 = vadd.f32 %v16557_v49, %v12796_v29  ;;  %v5112_v25 = vpop.f32.mrb[97].mxu0  ;;  %v5122_v37 = vpop.f32.mrb[91].mxu1 }
0x2807   :  { %v5113_v30 = vadd.f32 %v16557_v49, %v5112_v25  ;;  %v5123_v10 = vadd.f32 %v16557_v49, %v5122_v37 }
0x2808   :  { %14387 = vtanh.f32 %v5118_v32 }
0x2809   :  { %14389 = vtanh.f32 %v5128_v43  ;;  %v12799_v34 = vpop.f32.mrb[92].mxu1  ;;  %v12804_v44 = vpop.f32.mrb[98].mxu0  ;;  %v5151_v43 = vmul.f32 %v16687_v60, %v16619_v42 }
0x280a   :  { %14391 = vtanh.f32 %v5113_v30  ;;  %v5138_v22 = vadd.f32 %v16557_v49, %v12799_v34  ;;  %5680 = vst.msk [vmem:[#allocation3 + $0x8] sm:$0xff] %vm5678_vm4, %v12804_v44  ;;  %v5132_v55 = vpop.f32.mrb[93].mxu1  ;;  %v5439_v58 = vpop.f32.mrb[99].mxu0 }
0x280b   :  { %14393 = vtanh.f32 %v5123_v10  ;;  %v5133_v20 = vadd.f32 %v16557_v49, %v5132_v55  ;;  %5679 = vst.msk [vmem:[#allocation3] sm:$0xff] %vm5678_vm4, %v5439_v58  ;;  %v5148_v49 = vmul.f32 %v16669_v23, %v16571_v17  ;;  %v5150_v23 = vmul.f32 %v16676_v39, %v16593_v57 }
0x280c   :  { %14395 = vtanh.f32 %v5138_v22  ;;  %v5157_v39 = vsub.f32 1.0, %v16687_v60 }
0x280d   :  { %14397 = vtanh.f32 %v5133_v20  ;;  %v12807_v18 = vpop.f32.mrb[100].mxu0  ;;  %v12878_v21 = vpop.f32.mrb[94].mxu1 }
0x280e   :  { %5682 = vst.msk [vmem:[#allocation3 + $0x18] sm:$0xff] %vm5678_vm4, %v12807_v18  ;;  %v5449_v5 = vpop.f32.mrb[101].mxu0  ;;  %v5806_v12 = vpop.f32.mrb[95].mxu1 }
0x280f   :  { %5681 = vst.msk [vmem:[#allocation3 + $0x10] sm:$0xff] %vm5678_vm4, %v5449_v5 }
0x2811   :  { %v16799_v9 = vld [vmem:[#allocation3 + $0x8] sm:$0xff]  ;;  %v12810_v54 = vpop.f32.mrb[102].mxu0  ;;  %v12881_v2 = vpop.f32.mrb[96].mxu1 }
0x2812   :  { %v14388_v52 = vpop.eup %14387  ;;  %v5836_v48 = vadd.f32 %v12878_v21, %v16799_v9  ;;  %5684 = vst.msk [vmem:[#allocation3 + $0x28] sm:$0xff] %vm5678_vm4, %v12810_v54  ;;  %v16806_v47 = vld [vmem:[#allocation3] sm:$0xff]  ;;  %v5459_v1 = vpop.f32.mrb[103].mxu0  ;;  %v16881_v54 = vld [vmem:[%s18752_s26 + $0x10] sm:$0xff] }
0x2813   :  { %v5816_v41 = vpop.f32.mrb[97].mxu1  ;;  %v14390_v26 = vpop.eup %14389  ;;  %v5160_v51 = vmul.f32 %v14388_v52, %v5154_v24  ;;  %v5835_v50 = vadd.f32 %v5806_v12, %v16806_v47  ;;  %5683 = vst.msk [vmem:[#allocation3 + $0x20] sm:$0xff] %vm5678_vm4, %v5459_v1  ;;  %v16874_v24 = vld [vmem:[%s18752_s26 + $0x8] sm:$0xff]  ;;  %v16899_v1 = vld [vmem:[%s18752_s26 + $0x20] sm:$0xff] }
0x2814   :  { %v14392_v17 = vpop.eup %14391  ;;  %v5162_v14 = vmul.f32 %v14390_v26, %v5156_v8 }
0x2815   :  { %v14394_v31 = vpop.eup %14393  ;;  %v16818_v7 = vadd.f32 %v5160_v51, %v5148_v49  ;;  %v5159_v63 = vmul.f32 %v14392_v17, %v5153_v6  ;;  %v13578_v46 = vpack.c.bf16 %v5836_v48, %v5835_v50  ;;  %v16821_v62 = vld [vmem:[#allocation3 + $0x18] sm:$0xff]  ;;  %v12813_v33 = vpop.f32.mrb[104].mxu0 }
0x2816   :  { %v12884_v16 = vpop.f32.mrb[98].mxu1  ;;  %v14396_v4 = vpop.eup %14395  ;;  %v16823_v36 = vadd.f32 %v5162_v14, %v5150_v23  ;;  %v5161_v57 = vmul.f32 %v14394_v31, %v5155_v56  ;;  %v5838_v27 = vadd.f32 %v12881_v2, %v16821_v62  ;;  %5686 = vst.msk [vmem:[#allocation3 + $0x38] sm:$0xff] %vm5678_vm4, %v12813_v33  ;;  %v16828_v45 = vld [vmem:[#allocation3 + $0x10] sm:$0xff]  ;;  %v16892_v48 = vld [vmem:[%s18752_s26 + $0x18] sm:$0xff] }
0x2817   :  { %v5469_v19 = vpop.f32.mrb[105].mxu0  ;;  %v5826_v0 = vpop.f32.mrb[99].mxu1  ;;  %5172 = vst.msk [vmem:[#allocation4 + $0x158] sm:$0xff] %vm463_vm3, %v16818_v7  ;;  %v16832_v53 = vadd.f32 %v5159_v63, %v5147_v35  ;;  %v5164_v61 = vmul.f32 %v14396_v4, %v5158_v11  ;;  %v5837_v29 = vadd.f32 %v5816_v41, %v16828_v45  ;;  %13579 = vmatprep.subr.bf16.mxu1 %v13578_v46  ;;  %v16909_v35 = vld [vmem:[%s18752_s26 + $0x28] sm:$0xff] }
0x2818   :  { %v14398_v28 = vpop.eup %14397  ;;  %5685 = vst.msk [vmem:[#allocation3 + $0x30] sm:$0xff] %vm5678_vm4, %v5469_v19  ;;  %v16840_v32 = vadd.f32 %v5161_v57, %v5149_v13  ;;  %13581 = vmatpush3.bf16.msra.mxu1 %v13578_v46 }
0x2819   :  { %5174 = vst.msk [vmem:[#allocation4 + $0x168] sm:$0xff] %vm463_vm3, %v16823_v36  ;;  %v5163_v25 = vmul.f32 %v14398_v28, %v5157_v39  ;;  %5171 = vst.msk [vmem:[#allocation4 + $0x150] sm:$0xff] %vm463_vm3, %v16832_v53  ;;  %v16846_v38 = vadd.f32 %v5164_v61, %v5152_v59  ;;  %v13582_v15 = vpack.c.bf16 %v5838_v27, %v5837_v29  ;;  %v16848_v37 = vld [vmem:[#allocation3 + $0x28] sm:$0xff]  ;;  %v12816_v30 = vpop.f32.mrb[106].mxu0 }
0x281a   :  { %5173 = vst.msk [vmem:[#allocation4 + $0x160] sm:$0xff] %vm463_vm3, %v16840_v32  ;;  %v5840_v34 = vadd.f32 %v12884_v16, %v16848_v37  ;;  %v16856_v42 = vld [vmem:[#allocation3 + $0x20] sm:$0xff]  ;;  %v5479_v60 = vpop.f32.mrb[107].mxu0 }
0x281b   :  { %v16852_v10 = vadd.f32 %v5163_v25, %v5151_v43  ;;  %5688 = vst.msk [vmem:[#allocation3 + $0x48] sm:$0xff] %vm5678_vm4, %v12816_v30  ;;  %v5839_v44 = vadd.f32 %v5826_v0, %v16856_v42  ;;  %5687 = vst.msk [vmem:[#allocation3 + $0x40] sm:$0xff] %vm5678_vm4, %v5479_v60  ;;  %13583 = vmatprep.subr.bf16.mxu1 %v13582_v15  ;;  %v16940_v25 = vld [vmem:[%s18728_s9] sm:$0xff] }
0x281c   :  { %5176 = vst.msk [vmem:[#allocation4 + $0x178] sm:$0xff] %vm463_vm3, %v16846_v38  ;;  %13585 = vmatpush3.bf16.msra.mxu1 %v13582_v15  ;;  %13034 = vmatprep.subr.mxu0 %v16940_v25  ;;  %v16948_v15 = vld [vmem:[%s18729_s10] ss:$0 sm:$0xff] }
0x281d   :  { %5175 = vst.msk [vmem:[#allocation4 + $0x170] sm:$0xff] %vm463_vm3, %v16852_v10  ;;  %v13586_v22 = vpack.c.bf16 %v5840_v34, %v5839_v44  ;;  %v12819_v55 = vpop.f32.mrb[108].mxu0 }
0x281e   :  { %5690 = vst.msk [vmem:[#allocation3 + $0x58] sm:$0xff] %vm5678_vm4, %v12819_v55  ;;  %v5489_v58 = vpop.f32.mrb[109].mxu0  ;;  %v5220_v21 = vld [vmem:[#allocation4 + $0x158] sm:$0xff] }
0x281f   :  { %5689 = vst.msk [vmem:[#allocation3 + $0x50] sm:$0xff] %vm5678_vm4, %v5489_v58  ;;  %13587 = vmatprep.subr.bf16.mxu1 %v13586_v22 }
0x2820   :  { %v5219_v20 = vld [vmem:[#allocation4 + $0x150] sm:$0xff]  ;;  %13589 = vmatpush3.bf16.msra.mxu1 %v13586_v22  ;;  %v5222_v52 = vld [vmem:[#allocation4 + $0x168] sm:$0xff] }
0x2821   :  { %12865 = vmatprep.mubr.msk.f32.mxu0 %vm463_vm3, %v5219_v20  ;;  %v12822_v18 = vpop.f32.mrb[110].mxu0  ;;  %v5221_v12 = vld [vmem:[#allocation4 + $0x160] sm:$0xff]  ;;  %12906 = vmatprep.subr.mxu1 %v16940_v25 }
0x2822   :  { %5692 = vst.msk [vmem:[#allocation3 + $0x68] sm:$0xff] %vm5678_vm4, %v12822_v18  ;;  %12866 = vmatmul.mubr.msk.f32.gmra.mrb[140].mxu0 %vm463_vm3, %v5220_v21  ;;  %v5499_v5 = vpop.f32.mrb[111].mxu0 }
0x2823   :  { %5691 = vst.msk [vmem:[#allocation3 + $0x60] sm:$0xff] %vm5678_vm4, %v5499_v5  ;;  %12868 = vmatprep.mubr.msk.f32.mxu0 %vm463_vm3, %v5221_v12  ;;  %12898 = vmatmul.mubr.msk.f32.vlgmr.msra.gmra.mrb[100].mxu1 %vm578_vm1, %v16874_v24  ;;  %v5224_v26 = vld [vmem:[#allocation4 + $0x178] sm:$0xff] }
0x2824   :  { %12900 = vmatprep.mubr.msk.f32.mxu1 %vm578_vm1, %v16881_v54  ;;  %v5223_v8 = vld [vmem:[#allocation4 + $0x170] sm:$0xff]  ;;  %12907 = vmatpush3.msra.mxu1 %v16940_v25 }
0x2825   :  { %v12825_v2 = vpop.f32.mrb[112].mxu0 }
0x2826   :  { %5694 = vst.msk [vmem:[#allocation3 + $0x78] sm:$0xff] %vm5678_vm4, %v12825_v2  ;;  %12869 = vmatmul.mubr.msk.f32.gmra.mrb[142].mxu0 %vm463_vm3, %v5222_v52  ;;  %v5509_v49 = vpop.f32.mrb[113].mxu0 }
0x2827   :  { %5693 = vst.msk [vmem:[#allocation3 + $0x70] sm:$0xff] %vm5678_vm4, %v5509_v49  ;;  %12871 = vmatprep.mubr.msk.f32.mxu0 %vm463_vm3, %v5223_v8  ;;  %12901 = vmatmul.mubr.msk.f32.gmra.mrb[102].mxu1 %vm578_vm1, %v16892_v48 }
0x2828   :  { %12903 = vmatprep.mubr.msk.f32.mxu1 %vm578_vm1, %v16899_v1 }
0x2829   :  { %v12828_v41 = vpop.f32.mrb[114].mxu0 }
0x282a   :  { %5696 = vst.msk [vmem:[#allocation3 + $0x88] sm:$0xff] %vm5678_vm4, %v12828_v41  ;;  %12872 = vmatmul.mubr.msk.f32.gmra.mrb[144].mxu0 %vm463_vm3, %v5224_v26  ;;  %v5519_v51 = vpop.f32.mrb[115].mxu0 }
0x282b   :  { %5695 = vst.msk [vmem:[#allocation3 + $0x80] sm:$0xff] %vm5678_vm4, %v5519_v51  ;;  %12904 = vmatmul.mubr.msk.f32.gmra.mrb[104].mxu1 %vm578_vm1, %v16909_v35 }
0x282d   :  { %v12831_v6 = vpop.f32.mrb[116].mxu0 }
0x282e   :  { %5698 = vst.msk [vmem:[#allocation3 + $0x98] sm:$0xff] %vm5678_vm4, %v12831_v6  ;;  %v5529_v50 = vpop.f32.mrb[117].mxu0 }
0x282f   :  { %5697 = vst.msk [vmem:[#allocation3 + $0x90] sm:$0xff] %vm5678_vm4, %v5529_v50 }
0x2831   :  { %v12834_v17 = vpop.f32.mrb[118].mxu0 }
0x2832   :  { %5700 = vst.msk [vmem:[#allocation3 + $0xa8] sm:$0xff] %vm5678_vm4, %v12834_v17  ;;  %v5539_v23 = vpop.f32.mrb[119].mxu0 }
0x2833   :  { %5699 = vst.msk [vmem:[#allocation3 + $0xa0] sm:$0xff] %vm5678_vm4, %v5539_v23 }
0x2835   :  { %v12837_v14 = vpop.f32.mrb[120].mxu0 }
0x2836   :  { %5702 = vst.msk [vmem:[#allocation3 + $0xb8] sm:$0xff] %vm5678_vm4, %v12837_v14  ;;  %v5549_v13 = vpop.f32.mrb[121].mxu0 }
0x2837   :  { %5701 = vst.msk [vmem:[#allocation3 + $0xb0] sm:$0xff] %vm5678_vm4, %v5549_v13 }
0x2839   :  { %v12840_v56 = vpop.f32.mrb[122].mxu0 }
0x283a   :  { %5704 = vst.msk [vmem:[#allocation3 + $0xc8] sm:$0xff] %vm5678_vm4, %v12840_v56  ;;  %v5559_v31 = vpop.f32.mrb[123].mxu0 }
0x283b   :  { %5703 = vst.msk [vmem:[#allocation3 + $0xc0] sm:$0xff] %vm5678_vm4, %v5559_v31 }
0x283d   :  { %v12843_v63 = vpop.f32.mrb[124].mxu0 }
0x283e   :  { %5706 = vst.msk [vmem:[#allocation3 + $0xd8] sm:$0xff] %vm5678_vm4, %v12843_v63  ;;  %v5569_v11 = vpop.f32.mrb[125].mxu0 }
0x283f   :  { %5705 = vst.msk [vmem:[#allocation3 + $0xd0] sm:$0xff] %vm5678_vm4, %v5569_v11 }
0x2841   :  { %v12846_v46 = vpop.f32.mrb[126].mxu0 }
0x2842   :  { %5708 = vst.msk [vmem:[#allocation3 + $0xe8] sm:$0xff] %vm5678_vm4, %v12846_v46  ;;  %v5579_v33 = vpop.f32.mrb[127].mxu0 }
0x2843   :  { %5707 = vst.msk [vmem:[#allocation3 + $0xe0] sm:$0xff] %vm5678_vm4, %v5579_v33 }
0x2845   :  { %v12849_v16 = vpop.f32.mrb[128].mxu0 }
0x2846   :  { %5710 = vst.msk [vmem:[#allocation3 + $0xf8] sm:$0xff] %vm5678_vm4, %v12849_v16  ;;  %v5589_v4 = vpop.f32.mrb[129].mxu0 }
0x2847   :  { %5709 = vst.msk [vmem:[#allocation3 + $0xf0] sm:$0xff] %vm5678_vm4, %v5589_v4 }
0x2849   :  { %v12852_v57 = vpop.f32.mrb[130].mxu0 }
0x284a   :  { %5712 = vst.msk [vmem:[#allocation3 + $0x108] sm:$0xff] %vm5678_vm4, %v12852_v57  ;;  %v5599_v39 = vpop.f32.mrb[131].mxu0 }
0x284b   :  { %5711 = vst.msk [vmem:[#allocation3 + $0x100] sm:$0xff] %vm5678_vm4, %v5599_v39 }
0x284d   :  { %v12855_v27 = vpop.f32.mrb[132].mxu0 }
0x284e   :  { %5714 = vst.msk [vmem:[#allocation3 + $0x118] sm:$0xff] %vm5678_vm4, %v12855_v27  ;;  %v5609_v19 = vpop.f32.mrb[133].mxu0 }
0x284f   :  { %5713 = vst.msk [vmem:[#allocation3 + $0x110] sm:$0xff] %vm5678_vm4, %v5609_v19 }
0x2851   :  { %v12858_v0 = vpop.f32.mrb[134].mxu0 }
0x2852   :  { %5716 = vst.msk [vmem:[#allocation3 + $0x128] sm:$0xff] %vm5678_vm4, %v12858_v0  ;;  %v5619_v28 = vpop.f32.mrb[135].mxu0 }
0x2853   :  { %5715 = vst.msk [vmem:[#allocation3 + $0x120] sm:$0xff] %vm5678_vm4, %v5619_v28 }
0x2855   :  { %v12861_v59 = vpop.f32.mrb[136].mxu0 }
0x2856   :  { %5718 = vst.msk [vmem:[#allocation3 + $0x138] sm:$0xff] %vm5678_vm4, %v12861_v59  ;;  %v5629_v61 = vpop.f32.mrb[137].mxu0 }
0x2857   :  { %5717 = vst.msk [vmem:[#allocation3 + $0x130] sm:$0xff] %vm5678_vm4, %v5629_v61 }
0x2859   :  { %v12864_v29 = vpop.f32.mrb[138].mxu0 }
0x285a   :  { %5720 = vst.msk [vmem:[#allocation3 + $0x148] sm:$0xff] %vm5678_vm4, %v12864_v29  ;;  %v5639_v43 = vpop.f32.mrb[139].mxu0 }
0x285b   :  { %5719 = vst.msk [vmem:[#allocation3 + $0x140] sm:$0xff] %vm5678_vm4, %v5639_v43 }
0x28f5   :  { %v12867_v30 = vpop.f32.mrb[140].mxu0 }
0x28f6   :  { %5722 = vst.msk [vmem:[#allocation3 + $0x158] sm:$0xff] %vm5678_vm4, %v12867_v30  ;;  %v5649_v34 = vpop.f32.mrb[141].mxu0  ;;  %v12899_v60 = vpop.f32.mrb[100].mxu1 }
0x28f7   :  { %5721 = vst.msk [vmem:[#allocation3 + $0x150] sm:$0xff] %vm5678_vm4, %v5649_v34  ;;  %v5919_v44 = vadd.f32 %v12899_v60, %v16948_v15  ;;  %v5913_v22 = vpop.f32.mrb[101].mxu1 }
0x28f8   :  { %v5914_v55 = vadd.f32 %v16948_v15, %v5913_v22 }
0x28f9   :  { %v11335_v58 = vmul.f32 -1.442695, %v5919_v44  ;;  %v12870_v20 = vpop.f32.mrb[142].mxu0 }
0x28fa   :  { %v11334_v18 = vmul.f32 -1.442695, %v5914_v55  ;;  %5724 = vst.msk [vmem:[#allocation3 + $0x168] sm:$0xff] %vm5678_vm4, %v12870_v20  ;;  %v5659_v21 = vpop.f32.mrb[143].mxu0  ;;  %v12902_v5 = vpop.f32.mrb[102].mxu1 }
0x28fb   :  { %14399 = vpow2.f32 %v11335_v58  ;;  %5723 = vst.msk [vmem:[#allocation3 + $0x160] sm:$0xff] %vm5678_vm4, %v5659_v21  ;;  %v5929_v12 = vadd.f32 %v12902_v5, %v16948_v15  ;;  %v5923_v2 = vpop.f32.mrb[103].mxu1 }
0x28fc   :  { %14401 = vpow2.f32 %v11334_v18  ;;  %v5924_v52 = vadd.f32 %v16948_v15, %v5923_v2 }
0x28fd   :  { %v11337_v49 = vmul.f32 -1.442695, %v5929_v12  ;;  %v12873_v8 = vpop.f32.mrb[144].mxu0  ;;  %v17013_v12 = vld [vmem:[%s18752_s26] sm:$0xff] }
0x28fe   :  { %v11336_v41 = vmul.f32 -1.442695, %v5924_v52  ;;  %5726 = vst.msk [vmem:[#allocation3 + $0x178] sm:$0xff] %vm5678_vm4, %v12873_v8  ;;  %v5669_v26 = vpop.f32.mrb[145].mxu0  ;;  %v12905_v51 = vpop.f32.mrb[104].mxu1 }
0x28ff   :  { %14403 = vpow2.f32 %v11337_v49  ;;  %5725 = vst.msk [vmem:[#allocation3 + $0x170] sm:$0xff] %vm5678_vm4, %v5669_v26  ;;  %v5939_v6 = vadd.f32 %v12905_v51, %v16948_v15  ;;  %v5933_v50 = vpop.f32.mrb[105].mxu1 }
0x2900   :  { %14405 = vpow2.f32 %v11336_v41  ;;  %v5934_v17 = vadd.f32 %v16948_v15, %v5933_v50 }
0x2901   :  { %v11339_v23 = vmul.f32 -1.442695, %v5939_v6 }
0x2902   :  { %v11338_v14 = vmul.f32 -1.442695, %v5934_v17 }
0x2903   :  { %14407 = vpow2.f32 %v11339_v23 }
0x2904   :  { %14409 = vpow2.f32 %v11338_v14 }
0x2905   :  { %v14400_v13 = vpop.eup %14399 }
0x2906   :  { %v14402_v56 = vpop.eup %14401  ;;  %v5961_v31 = vadd.f32 1.0, %v14400_v13 }
0x2907   :  { %v5960_v63 = vadd.f32 1.0, %v14402_v56 }
0x2908   :  { %14411 = vrcp.f32 %v5961_v31 }
0x2909   :  { %v14404_v11 = vpop.eup %14403  ;;  %14413 = vrcp.f32 %v5960_v63 }
0x290a   :  { %v14406_v46 = vpop.eup %14405  ;;  %v5963_v33 = vadd.f32 1.0, %v14404_v11 }
0x290b   :  { %v5962_v16 = vadd.f32 1.0, %v14406_v46 }
0x290c   :  { %14415 = vrcp.f32 %v5963_v33 }
0x290d   :  { %v14408_v4 = vpop.eup %14407  ;;  %14417 = vrcp.f32 %v5962_v16 }
0x290e   :  { %v14410_v57 = vpop.eup %14409  ;;  %v5965_v39 = vadd.f32 1.0, %v14408_v4 }
0x290f   :  { %v5964_v27 = vadd.f32 1.0, %v14410_v57 }
0x2910   :  { %14419 = vrcp.f32 %v5965_v39 }
0x2911   :  { %14421 = vrcp.f32 %v5964_v27 }
0x2912   :  { %v16962_v19 = vpop.eup %14411 }
0x2913   :  { %v16964_v0 = vpop.eup %14413  ;;  %v16967_v28 = vmul.f32 0.0, %v16962_v19 }
0x2914   :  { %v16970_v59 = vmul.f32 0.0, %v16964_v0 }
0x2915   :  { %5992 = vrot.lane.b32.xlu1 %v16967_v28, %s18753_s24 }
0x2916   :  { %v16974_v61 = vpop.eup %14415  ;;  %5990 = vrot.lane.b32.xlu0 %v16970_v59, %s18753_s24 }
0x2917   :  { %v16978_v29 = vpop.eup %14417  ;;  %v16981_v43 = vmul.f32 0.0, %v16974_v61 }
0x2918   :  { %v16984_v30 = vmul.f32 0.0, %v16978_v29 }
0x2919   :  { %5996 = vrot.lane.b32.xlu1 %v16981_v43, %s18753_s24 }
0x291a   :  { %v16988_v34 = vpop.eup %14419  ;;  %5994 = vrot.lane.b32.xlu0 %v16984_v30, %s18753_s24 }
0x291b   :  { %v16992_v60 = vpop.eup %14421  ;;  %v16995_v44 = vmul.f32 0.0, %v16988_v34 }
0x291c   :  { %v16998_v22 = vmul.f32 0.0, %v16992_v60 }
0x291d   :  { %6000 = vrot.lane.b32.xlu1 %v16995_v44, %s18753_s24 }
0x291e   :  { %5998 = vrot.lane.b32.xlu0 %v16998_v22, %s18753_s24 }
0x2987   :  { %v5993_v55 = vpop.permute.xlu1 %5992 }
0x2988   :  { %v5991_v58 = vpop.permute.xlu0 %5990 }
0x2989   :  { %12908 = vmatprep.mubr.msk.f32.mxu1 %vm5737_vm5, %v5991_v58 }
0x298a   :  { %12909 = vmatmul.mubr.msk.f32.vlgmr.msra.gmra.mrb[106].mxu1 %vm5737_vm5, %v5993_v55 }
0x298b   :  { %v5997_v20 = vpop.permute.xlu1 %5996 }
0x298c   :  { %v5995_v18 = vpop.permute.xlu0 %5994 }
0x298d   :  { %12911 = vmatprep.mubr.msk.f32.mxu1 %vm5737_vm5, %v5995_v18  ;;  %v17047_v18 = vld [vmem:[%s18730_s11] ss:$0 sm:$0xff] }
0x298e   :  { %12912 = vmatmul.mubr.msk.f32.gmra.mrb[108].mxu1 %vm5737_vm5, %v5997_v20 }
0x298f   :  { %v6001_v5 = vpop.permute.xlu1 %6000 }
0x2990   :  { %v5999_v21 = vpop.permute.xlu0 %5998 }
0x2991   :  { %12914 = vmatprep.mubr.msk.f32.mxu1 %vm5737_vm5, %v5999_v21 }
0x2992   :  { %12915 = vmatmul.mubr.msk.f32.gmra.mrb[110].mxu1 %vm5737_vm5, %v6001_v5 }
0x2993   :  { %12929 = vmatprep.mubr.msk.f32.mxu1 %vm578_vm1, %v17013_v12 }
0x2a5d   :  { %v12910_v2 = vpop.f32.mrb[106].mxu1 }
0x2a5e   :  { %6117 = vrot.lane.b32.xlu1 %v12910_v2, %s14833_s22  ;;  %v6080_v52 = vpop.f32.mrb[107].mxu1 }
0x2a5f   :  { %6115 = vrot.lane.b32.xlu0 %v6080_v52, %s14833_s22 }
0x2a61   :  { %v12913_v49 = vpop.f32.mrb[108].mxu1 }
0x2a62   :  { %6121 = vrot.lane.b32.xlu1 %v12913_v49, %s14833_s22  ;;  %v6090_v8 = vpop.f32.mrb[109].mxu1 }
0x2a63   :  { %6119 = vrot.lane.b32.xlu0 %v6090_v8, %s14833_s22 }
0x2a65   :  { %v12916_v41 = vpop.f32.mrb[110].mxu1 }
0x2a66   :  { %6125 = vrot.lane.b32.xlu1 %v12916_v41, %s14833_s22  ;;  %v6100_v26 = vpop.f32.mrb[111].mxu1 }
0x2a67   :  { %6123 = vrot.lane.b32.xlu0 %v6100_v26, %s14833_s22 }
0x2ad0   :  { %v6118_v51 = vpop.permute.xlu1 %6117 }
0x2ad1   :  { %v6134_v6 = vadd.f32 %v6118_v51, %v16799_v9  ;;  %v6116_v50 = vpop.permute.xlu0 %6115 }
0x2ad2   :  { %v6133_v17 = vadd.f32 %v6116_v50, %v16806_v47 }
0x2ad4   :  { %v13921_v23 = vpack.i.bf16 %v6134_v6, %v6133_v17  ;;  %v6122_v14 = vpop.permute.xlu1 %6121  ;;  %v6271_v17 = vsub.f32 1.0, %v16962_v19 }
0x2ad5   :  { %v6136_v13 = vadd.f32 %v6122_v14, %v16821_v62  ;;  %v6120_v56 = vpop.permute.xlu0 %6119  ;;  %v6270_v14 = vsub.f32 1.0, %v16964_v0 }
0x2ad6   :  { %v6135_v31 = vadd.f32 %v6120_v56, %v16828_v45  ;;  %13922 = vrot.lane.b32.xlu0 %v13921_v23, %s14834_s25 }
0x2ad8   :  { %v13926_v63 = vpack.i.bf16 %v6136_v13, %v6135_v31  ;;  %v6126_v11 = vpop.permute.xlu1 %6125 }
0x2ad9   :  { %v6138_v46 = vadd.f32 %v6126_v11, %v16848_v37  ;;  %v6124_v33 = vpop.permute.xlu0 %6123  ;;  %v6273_v11 = vsub.f32 1.0, %v16974_v61 }
0x2ada   :  { %v6137_v9 = vadd.f32 %v6124_v33, %v16856_v42  ;;  %13927 = vrot.lane.b32.xlu1 %v13926_v63, %s14834_s25 }
0x2adc   :  { %v13931_v47 = vpack.i.bf16 %v6138_v46, %v6137_v9  ;;  %v6272_v9 = vsub.f32 1.0, %v16978_v29 }
0x2ade   :  { %13932 = vrot.lane.b32.xlu0 %v13931_v47, %s14834_s25 }
0x2b48   :  { %v13923_v16 = vpop.permute.xlu0 %13922 }
0x2b49   :  { %v13925_v62 = vunpack.i.h.bf16 %v13923_v16  ;;  %v13924_v4 = vunpack.i.l.bf16 %v13923_v16  ;;  %v6274_v16 = vsub.f32 1.0, %v16992_v60  ;;  %v17105_v60 = vld [vmem:[#allocation3 + $0x38] sm:$0xff] }
0x2b4b   :  { %v13590_v57 = vpack.c.bf16 %v13925_v62, %v13924_v4 }
0x2b4c   :  { %v13928_v45 = vpop.permute.xlu1 %13927 }
0x2b4d   :  { %v13930_v39 = vunpack.i.h.bf16 %v13928_v45  ;;  %v13929_v27 = vunpack.i.l.bf16 %v13928_v45  ;;  %13591 = vmatprep.subr.bf16.mxu1 %v13590_v57 }
0x2b4e   :  { %13593 = vmatpush3.bf16.msra.mxu1 %v13590_v57  ;;  %v17108_v57 = vld [vmem:[#allocation3 + $0x30] sm:$0xff] }
0x2b4f   :  { %v13594_v55 = vpack.c.bf16 %v13930_v39, %v13929_v27 }
0x2b50   :  { %v13933_v58 = vpop.permute.xlu0 %13932 }
0x2b51   :  { %v13935_v37 = vunpack.i.h.bf16 %v13933_v58  ;;  %v13934_v20 = vunpack.i.l.bf16 %v13933_v58  ;;  %13595 = vmatprep.subr.bf16.mxu1 %v13594_v55 }
0x2b52   :  { %13597 = vmatpush3.bf16.msra.mxu1 %v13594_v55  ;;  %v17111_v55 = vld [vmem:[#allocation3 + $0x48] sm:$0xff] }
0x2b53   :  { %v13598_v42 = vpack.c.bf16 %v13935_v37, %v13934_v20  ;;  %v17114_v20 = vld [vmem:[#allocation3 + $0x40] sm:$0xff] }
0x2b55   :  { %13599 = vmatprep.subr.bf16.mxu1 %v13598_v42 }
0x2b56   :  { %13601 = vmatpush3.bf16.msra.mxu1 %v13598_v42 }
0x2b57   :  { %12938 = vmatprep.subr.mxu1 %v16722_v40 }
0x2b59   :  { %12930 = vmatmul.mubr.msk.f32.vlgmr.msra.gmra.mrb[112].mxu1 %vm578_vm1, %v16874_v24 }
0x2b5a   :  { %12932 = vmatprep.mubr.msk.f32.mxu1 %vm578_vm1, %v16881_v54  ;;  %12939 = vmatpush3.msra.mxu1 %v16722_v40 }
0x2b5d   :  { %12933 = vmatmul.mubr.msk.f32.gmra.mrb[114].mxu1 %vm578_vm1, %v16892_v48 }
0x2b5e   :  { %12935 = vmatprep.mubr.msk.f32.mxu1 %vm578_vm1, %v16899_v1 }
0x2b61   :  { %12936 = vmatmul.mubr.msk.f32.gmra.mrb[116].mxu1 %vm578_vm1, %v16909_v35 }
0x2c2c   :  { %v12931_v21 = vpop.f32.mrb[112].mxu1 }
0x2c2d   :  { %v6241_v5 = vadd.f32 %v12931_v21, %v17047_v18  ;;  %v6235_v2 = vpop.f32.mrb[113].mxu1 }
0x2c2e   :  { %v6236_v40 = vadd.f32 %v17047_v18, %v6235_v2  ;;  %v17117_v2 = vld [vmem:[#allocation3 + $0x58] sm:$0xff] }
0x2c2f   :  { %14423 = vtanh.f32 %v6241_v5 }
0x2c30   :  { %14425 = vtanh.f32 %v6236_v40  ;;  %v12934_v52 = vpop.f32.mrb[114].mxu1 }
0x2c31   :  { %v6251_v49 = vadd.f32 %v12934_v52, %v17047_v18  ;;  %v6245_v8 = vpop.f32.mrb[115].mxu1 }
0x2c32   :  { %v6246_v41 = vadd.f32 %v17047_v18, %v6245_v8 }
0x2c33   :  { %14427 = vtanh.f32 %v6251_v49  ;;  %v17120_v49 = vld [vmem:[#allocation3 + $0x50] sm:$0xff] }
0x2c34   :  { %14429 = vtanh.f32 %v6246_v41  ;;  %v12937_v26 = vpop.f32.mrb[116].mxu1 }
0x2c35   :  { %v6261_v51 = vadd.f32 %v12937_v26, %v17047_v18  ;;  %v6255_v6 = vpop.f32.mrb[117].mxu1 }
0x2c36   :  { %v6256_v50 = vadd.f32 %v17047_v18, %v6255_v6 }
0x2c37   :  { %14431 = vtanh.f32 %v6261_v51 }
0x2c38   :  { %14433 = vtanh.f32 %v6256_v50 }
0x2c39   :  { %v14424_v23 = vpop.eup %14423 }
0x2c3a   :  { %v14426_v13 = vpop.eup %14425  ;;  %v6277_v56 = vmul.f32 %v14424_v23, %v6271_v17 }
0x2c3b   :  { %v6276_v31 = vmul.f32 %v14426_v13, %v6270_v14 }
0x2c3c   :  { %v17058_v63 = vadd.f32 %v6277_v56, %v16967_v28 }
0x2c3d   :  { %v14428_v46 = vpop.eup %14427  ;;  %v17062_v33 = vadd.f32 %v6276_v31, %v16970_v59  ;;  %v6275_v59 = vsub.f32 1.0, %v16988_v34 }
0x2c3e   :  { %v14430_v47 = vpop.eup %14429  ;;  %6546 = vrot.lane.b32.xlu0 %v17058_v63, %s18754_s1  ;;  %v6279_v19 = vmul.f32 %v14428_v46, %v6273_v11 }
0x2c3f   :  { %6544 = vrot.lane.b32.xlu1 %v17062_v33, %s18754_s1  ;;  %12940 = vmatprep.mubr.msk.f32.mxu1 %vm5737_vm5, %v17062_v33  ;;  %v6278_v0 = vmul.f32 %v14430_v47, %v6272_v9 }
0x2c40   :  { %12941 = vmatmul.mubr.msk.f32.vlgmr.msra.gmra.mrb[118].mxu1 %vm5737_vm5, %v17058_v63  ;;  %v17074_v28 = vadd.f32 %v6279_v19, %v16981_v43 }
0x2c41   :  { %v14432_v61 = vpop.eup %14431  ;;  %v17078_v29 = vadd.f32 %v6278_v0, %v16984_v30 }
0x2c42   :  { %v14434_v62 = vpop.eup %14433  ;;  %6550 = vrot.lane.b32.xlu0 %v17074_v28, %s18754_s1  ;;  %v6281_v4 = vmul.f32 %v14432_v61, %v6275_v59 }
0x2c43   :  { %6548 = vrot.lane.b32.xlu1 %v17078_v29, %s18754_s1  ;;  %12943 = vmatprep.mubr.msk.f32.mxu1 %vm5737_vm5, %v17078_v29  ;;  %v6280_v43 = vmul.f32 %v14434_v62, %v6274_v16 }
0x2c44   :  { %12944 = vmatmul.mubr.msk.f32.gmra.mrb[120].mxu1 %vm5737_vm5, %v17074_v28  ;;  %v17090_v30 = vadd.f32 %v6281_v4, %v16995_v44 }
0x2c45   :  { %v17093_v34 = vadd.f32 %v6280_v43, %v16998_v22 }
0x2c46   :  { %6554 = vrot.lane.b32.xlu0 %v17090_v30, %s18754_s1 }
0x2c47   :  { %6552 = vrot.lane.b32.xlu1 %v17093_v34, %s18754_s1  ;;  %12946 = vmatprep.mubr.msk.f32.mxu1 %vm5737_vm5, %v17093_v34 }
0x2c48   :  { %12947 = vmatmul.mubr.msk.f32.gmra.mrb[122].mxu1 %vm5737_vm5, %v17090_v30 }
0x2c49   :  { %12961 = vmatprep.mubr.msk.f32.mxu1 %vm578_vm1, %v17013_v12 }
0x2d13   :  { %v12942_v44 = vpop.f32.mrb[118].mxu1 }
0x2d14   :  { %v6408_v22 = vadd.f32 %v12942_v44, %v17105_v60  ;;  %v6378_v45 = vpop.f32.mrb[119].mxu1 }
0x2d15   :  { %v6407_v39 = vadd.f32 %v6378_v45, %v17108_v57 }
0x2d17   :  { %v13602_v27 = vpack.c.bf16 %v6408_v22, %v6407_v39  ;;  %v12945_v58 = vpop.f32.mrb[120].mxu1 }
0x2d18   :  { %v6410_v37 = vadd.f32 %v12945_v58, %v17111_v55  ;;  %v6388_v42 = vpop.f32.mrb[121].mxu1 }
0x2d19   :  { %v6409_v21 = vadd.f32 %v6388_v42, %v17114_v20  ;;  %13603 = vmatprep.subr.bf16.mxu1 %v13602_v27  ;;  %v6547_v42 = vpop.permute.xlu0 %6546 }
0x2d1a   :  { %13605 = vmatpush3.bf16.msra.mxu1 %v13602_v27 }
0x2d1b   :  { %v13606_v5 = vpack.c.bf16 %v6410_v37, %v6409_v21  ;;  %v12948_v40 = vpop.f32.mrb[122].mxu1 }
0x2d1c   :  { %v6412_v52 = vadd.f32 %v12948_v40, %v17117_v2  ;;  %v6398_v8 = vpop.f32.mrb[123].mxu1 }
0x2d1d   :  { %v6411_v41 = vadd.f32 %v6398_v8, %v17120_v49  ;;  %13607 = vmatprep.subr.bf16.mxu1 %v13606_v5 }
0x2d1e   :  { %13609 = vmatpush3.bf16.msra.mxu1 %v13606_v5  ;;  %v6545_v5 = vpop.permute.xlu1 %6544 }
0x2d1f   :  { %v13610_v26 = vpack.c.bf16 %v6412_v52, %v6411_v41 }
0x2d21   :  { %13611 = vmatprep.subr.bf16.mxu1 %v13610_v26 }
0x2d22   :  { %13613 = vmatpush3.bf16.msra.mxu1 %v13610_v26  ;;  %v6551_v26 = vpop.permute.xlu0 %6550 }
0x2d23   :  { %12970 = vmatprep.subr.mxu1 %v16940_v25 }
0x2d25   :  { %12962 = vmatmul.mubr.msk.f32.vlgmr.msra.gmra.mrb[124].mxu1 %vm578_vm1, %v16874_v24 }
0x2d26   :  { %12964 = vmatprep.mubr.msk.f32.mxu1 %vm578_vm1, %v16881_v54  ;;  %12971 = vmatpush3.msra.mxu1 %v16940_v25 }
0x2d29   :  { %12965 = vmatmul.mubr.msk.f32.gmra.mrb[126].mxu1 %vm578_vm1, %v16892_v48 }
0x2d2a   :  { %12967 = vmatprep.mubr.msk.f32.mxu1 %vm578_vm1, %v16899_v1 }
0x2d2d   :  { %12968 = vmatmul.mubr.msk.f32.gmra.mrb[128].mxu1 %vm578_vm1, %v16909_v35 }
0x2df8   :  { %v12963_v51 = vpop.f32.mrb[124].mxu1 }
0x2df9   :  { %v6485_v6 = vadd.f32 %v12963_v51, %v16948_v15  ;;  %v6479_v50 = vpop.f32.mrb[125].mxu1 }
0x2dfa   :  { %v6480_v17 = vadd.f32 %v16948_v15, %v6479_v50 }
0x2dfb   :  { %v11366_v23 = vmul.f32 -1.442695, %v6485_v6  ;;  %v6549_v6 = vpop.permute.xlu1 %6548 }
0x2dfc   :  { %v11365_v14 = vmul.f32 -1.442695, %v6480_v17  ;;  %v12966_v13 = vpop.f32.mrb[126].mxu1 }
0x2dfd   :  { %14435 = vpow2.f32 %v11366_v23  ;;  %v6495_v56 = vadd.f32 %v12966_v13, %v16948_v15  ;;  %v6489_v31 = vpop.f32.mrb[127].mxu1 }
0x2dfe   :  { %14437 = vpow2.f32 %v11365_v14  ;;  %v6490_v11 = vadd.f32 %v16948_v15, %v6489_v31 }
0x2dff   :  { %v11368_v46 = vmul.f32 -1.442695, %v6495_v56  ;;  %v6555_v56 = vpop.permute.xlu0 %6554 }
0x2e00   :  { %v11367_v9 = vmul.f32 -1.442695, %v6490_v11  ;;  %v12969_v47 = vpop.f32.mrb[128].mxu1  ;;  %v6553_v11 = vpop.permute.xlu1 %6552 }
0x2e01   :  { %14439 = vpow2.f32 %v11368_v46  ;;  %v6505_v19 = vadd.f32 %v12969_v47, %v16948_v15  ;;  %v6499_v0 = vpop.f32.mrb[129].mxu1 }
0x2e02   :  { %14441 = vpow2.f32 %v11367_v9  ;;  %v6500_v59 = vadd.f32 %v16948_v15, %v6499_v0 }
0x2e03   :  { %v11370_v61 = vmul.f32 -1.442695, %v6505_v19 }
0x2e04   :  { %v11369_v16 = vmul.f32 -1.442695, %v6500_v59 }
0x2e05   :  { %14443 = vpow2.f32 %v11370_v61 }
0x2e06   :  { %14445 = vpow2.f32 %v11369_v16 }
0x2e07   :  { %v14436_v62 = vpop.eup %14435 }
0x2e08   :  { %v14438_v4 = vpop.eup %14437  ;;  %v6527_v43 = vadd.f32 1.0, %v14436_v62 }
0x2e09   :  { %v6526_v44 = vadd.f32 1.0, %v14438_v4 }
0x2e0a   :  { %14447 = vrcp.f32 %v6527_v43 }
0x2e0b   :  { %v14440_v22 = vpop.eup %14439  ;;  %14449 = vrcp.f32 %v6526_v44 }
0x2e0c   :  { %v14442_v45 = vpop.eup %14441  ;;  %v6529_v39 = vadd.f32 1.0, %v14440_v22 }
0x2e0d   :  { %v6528_v27 = vadd.f32 1.0, %v14442_v45 }
0x2e0e   :  { %14451 = vrcp.f32 %v6529_v39 }
0x2e0f   :  { %v14444_v58 = vpop.eup %14443  ;;  %14453 = vrcp.f32 %v6528_v27 }
0x2e10   :  { %v14446_v37 = vpop.eup %14445  ;;  %v6531_v21 = vadd.f32 1.0, %v14444_v58 }
0x2e11   :  { %v6530_v40 = vadd.f32 1.0, %v14446_v37 }
0x2e12   :  { %14455 = vrcp.f32 %v6531_v21 }
0x2e13   :  { %14457 = vrcp.f32 %v6530_v40 }
0x2e14   :  { %v17141_v52 = vpop.eup %14447 }
0x2e15   :  { %v17143_v8 = vpop.eup %14449  ;;  %v6563_v41 = vmul.f32 %v17141_v52, %v6547_v42 }
0x2e16   :  { %v6562_v51 = vmul.f32 %v17143_v8, %v6545_v5 }
0x2e17   :  { %6576 = vrot.lane.b32.xlu0 %v6563_v41, %s18753_s24 }
0x2e18   :  { %v17148_v50 = vpop.eup %14451  ;;  %6574 = vrot.lane.b32.xlu1 %v6562_v51, %s18753_s24 }
0x2e19   :  { %v17151_v17 = vpop.eup %14453  ;;  %v6565_v23 = vmul.f32 %v17148_v50, %v6551_v26 }
0x2e1a   :  { %v6564_v14 = vmul.f32 %v17151_v17, %v6549_v6 }
0x2e1b   :  { %6580 = vrot.lane.b32.xlu0 %v6565_v23, %s18753_s24 }
0x2e1c   :  { %v17156_v13 = vpop.eup %14455  ;;  %6578 = vrot.lane.b32.xlu1 %v6564_v14, %s18753_s24 }
0x2e1d   :  { %v17159_v31 = vpop.eup %14457  ;;  %v6567_v46 = vmul.f32 %v17156_v13, %v6555_v56 }
0x2e1e   :  { %v6566_v9 = vmul.f32 %v17159_v31, %v6553_v11 }
0x2e1f   :  { %6584 = vrot.lane.b32.xlu0 %v6567_v46, %s18753_s24 }
0x2e20   :  { %6582 = vrot.lane.b32.xlu1 %v6566_v9, %s18753_s24 }
0x2e89   :  { %v6577_v47 = vpop.permute.xlu0 %6576 }
0x2e8a   :  { %v6575_v19 = vpop.permute.xlu1 %6574 }
0x2e8b   :  { %12972 = vmatprep.mubr.msk.f32.mxu1 %vm5737_vm5, %v6575_v19 }
0x2e8c   :  { %12973 = vmatmul.mubr.msk.f32.vlgmr.msra.gmra.mrb[130].mxu1 %vm5737_vm5, %v6577_v47 }
0x2e8d   :  { %v6581_v0 = vpop.permute.xlu0 %6580 }
0x2e8e   :  { %v6579_v59 = vpop.permute.xlu1 %6578 }
0x2e8f   :  { %12975 = vmatprep.mubr.msk.f32.mxu1 %vm5737_vm5, %v6579_v59 }
0x2e90   :  { %12976 = vmatmul.mubr.msk.f32.gmra.mrb[132].mxu1 %vm5737_vm5, %v6581_v0 }
0x2e91   :  { %v6585_v16 = vpop.permute.xlu0 %6584 }
0x2e92   :  { %v6583_v61 = vpop.permute.xlu1 %6582 }
0x2e93   :  { %12978 = vmatprep.mubr.msk.f32.mxu1 %vm5737_vm5, %v6583_v61 }
0x2e94   :  { %12979 = vmatmul.mubr.msk.f32.gmra.mrb[134].mxu1 %vm5737_vm5, %v6585_v16 }
0x2e95   :  { %12993 = vmatprep.mubr.msk.f32.mxu1 %vm578_vm1, %v17013_v12 }
0x2f5f   :  { %v12974_v62 = vpop.f32.mrb[130].mxu1 }
0x2f60   :  { %6701 = vrot.lane.b32.xlu0 %v12974_v62, %s14833_s22  ;;  %v6664_v4 = vpop.f32.mrb[131].mxu1 }
0x2f61   :  { %6699 = vrot.lane.b32.xlu1 %v6664_v4, %s14833_s22 }
0x2f63   :  { %v12977_v43 = vpop.f32.mrb[132].mxu1 }
0x2f64   :  { %6705 = vrot.lane.b32.xlu0 %v12977_v43, %s14833_s22  ;;  %v6674_v44 = vpop.f32.mrb[133].mxu1 }
0x2f65   :  { %6703 = vrot.lane.b32.xlu1 %v6674_v44, %s14833_s22 }
0x2f67   :  { %v12980_v22 = vpop.f32.mrb[134].mxu1 }
0x2f68   :  { %6709 = vrot.lane.b32.xlu0 %v12980_v22, %s14833_s22  ;;  %v6684_v45 = vpop.f32.mrb[135].mxu1  ;;  %v6855_v22 = vsub.f32 1.0, %v17141_v52 }
0x2f69   :  { %6707 = vrot.lane.b32.xlu1 %v6684_v45, %s14833_s22 }
0x2fd2   :  { %v6702_v39 = vpop.permute.xlu0 %6701 }
0x2fd3   :  { %v6718_v27 = vadd.f32 %v6702_v39, %v17105_v60  ;;  %v6700_v58 = vpop.permute.xlu1 %6699  ;;  %v6854_v39 = vsub.f32 1.0, %v17143_v8 }
0x2fd4   :  { %v6717_v37 = vadd.f32 %v6700_v58, %v17108_v57  ;;  %v6849_v58 = vmul.f32 %v17141_v52, %v17058_v63  ;;  %v6851_v63 = vmul.f32 %v17148_v50, %v17074_v28 }
0x2fd6   :  { %v13936_v42 = vpack.i.bf16 %v6718_v27, %v6717_v37  ;;  %v6706_v21 = vpop.permute.xlu0 %6705 }
0x2fd7   :  { %v6720_v5 = vadd.f32 %v6706_v21, %v17111_v55  ;;  %v6704_v40 = vpop.permute.xlu1 %6703 }
0x2fd8   :  { %v6719_v41 = vadd.f32 %v6704_v40, %v17114_v20  ;;  %13937 = vrot.lane.b32.xlu1 %v13936_v42, %s14834_s25  ;;  %v6848_v42 = vmul.f32 %v17143_v8, %v17062_v33  ;;  %v6857_v40 = vsub.f32 1.0, %v17148_v50  ;;  %v6850_v33 = vmul.f32 %v17151_v17, %v17078_v29 }
0x2fd9   :  { %v6858_v50 = vsub.f32 1.0, %v17159_v31  ;;  %v6853_v29 = vmul.f32 %v17156_v13, %v17090_v30 }
0x2fda   :  { %v13941_v26 = vpack.i.bf16 %v6720_v5, %v6719_v41  ;;  %v6710_v51 = vpop.permute.xlu0 %6709 }
0x2fdb   :  { %v6722_v6 = vadd.f32 %v6710_v51, %v17117_v2  ;;  %v6708_v23 = vpop.permute.xlu1 %6707  ;;  %v6856_v51 = vsub.f32 1.0, %v17151_v17 }
0x2fdc   :  { %v6721_v14 = vadd.f32 %v6708_v23, %v17120_v49  ;;  %13942 = vrot.lane.b32.xlu0 %v13941_v26, %s14834_s25 }
0x2fde   :  { %v13946_v60 = vpack.i.bf16 %v6722_v6, %v6721_v14  ;;  %v6859_v14 = vsub.f32 1.0, %v17156_v13 }
0x2fe0   :  { %13947 = vrot.lane.b32.xlu1 %v13946_v60, %s14834_s25 }
0x304a   :  { %v13938_v57 = vpop.permute.xlu1 %13937 }
0x304b   :  { %v13940_v56 = vunpack.i.h.bf16 %v13938_v57  ;;  %v13939_v55 = vunpack.i.l.bf16 %v13938_v57 }
0x304d   :  { %v13614_v11 = vpack.c.bf16 %v13940_v56, %v13939_v55  ;;  %v17244_v56 = vld [vmem:[%s18727_s8] sm:$0xff] }
0x304e   :  { %v13943_v46 = vpop.permute.xlu0 %13942 }
0x304f   :  { %v13945_v20 = vunpack.i.h.bf16 %v13943_v46  ;;  %v13944_v9 = vunpack.i.l.bf16 %v13943_v46  ;;  %13615 = vmatprep.subr.bf16.mxu1 %v13614_v11  ;;  %v17270_v46 = vld [vmem:[#allocation3 + $0x60] sm:$0xff] }
0x3050   :  { %13617 = vmatpush3.bf16.msra.mxu1 %v13614_v11 }
0x3051   :  { %v13618_v47 = vpack.c.bf16 %v13945_v20, %v13944_v9 }
0x3052   :  { %v13948_v19 = vpop.permute.xlu1 %13947 }
0x3053   :  { %v13950_v2 = vunpack.i.h.bf16 %v13948_v19  ;;  %v13949_v0 = vunpack.i.l.bf16 %v13948_v19  ;;  %13619 = vmatprep.subr.bf16.mxu1 %v13618_v47  ;;  %v17273_v19 = vld [vmem:[#allocation3 + $0x78] sm:$0xff] }
0x3054   :  { %13621 = vmatpush3.bf16.msra.mxu1 %v13618_v47 }
0x3055   :  { %v13622_v49 = vpack.c.bf16 %v13950_v2, %v13949_v0 }
0x3057   :  { %13623 = vmatprep.subr.bf16.mxu1 %v13622_v49 }
0x3058   :  { %13625 = vmatpush3.bf16.msra.mxu1 %v13622_v49  ;;  %v17276_v49 = vld [vmem:[#allocation3 + $0x70] sm:$0xff] }
0x305b   :  { %12994 = vmatmul.mubr.msk.f32.vlgmr.msra.gmra.mrb[136].mxu1 %vm578_vm1, %v16874_v24 }
0x305c   :  { %12996 = vmatprep.mubr.msk.f32.mxu1 %vm578_vm1, %v16881_v54 }
0x305f   :  { %12997 = vmatmul.mubr.msk.f32.gmra.mrb[138].mxu1 %vm578_vm1, %v16892_v48 }
0x3060   :  { %12999 = vmatprep.mubr.msk.f32.mxu1 %vm578_vm1, %v16899_v1 }
0x3063   :  { %13000 = vmatmul.mubr.msk.f32.gmra.mrb[140].mxu1 %vm578_vm1, %v16909_v35 }
0x3064   :  { %13025 = vmatprep.mubr.msk.f32.mxu1 %vm578_vm1, %v17013_v12 }
0x312e   :  { %v12995_v59 = vpop.f32.mrb[136].mxu1 }
0x312f   :  { %v6819_v61 = vadd.f32 %v12995_v59, %v17047_v18  ;;  %v6813_v16 = vpop.f32.mrb[137].mxu1 }
0x3130   :  { %v6814_v24 = vadd.f32 %v17047_v18, %v6813_v16 }
0x3131   :  { %14459 = vtanh.f32 %v6819_v61 }
0x3132   :  { %14461 = vtanh.f32 %v6814_v24  ;;  %v12998_v54 = vpop.f32.mrb[138].mxu1  ;;  %v17279_v24 = vld [vmem:[#allocation3 + $0x88] sm:$0xff] }
0x3133   :  { %v6829_v48 = vadd.f32 %v12998_v54, %v17047_v18  ;;  %v6823_v62 = vpop.f32.mrb[139].mxu1 }
0x3134   :  { %v6824_v1 = vadd.f32 %v17047_v18, %v6823_v62  ;;  %v17282_v62 = vld [vmem:[#allocation3 + $0x80] sm:$0xff] }
0x3135   :  { %14463 = vtanh.f32 %v6829_v48 }
0x3136   :  { %14465 = vtanh.f32 %v6824_v1  ;;  %v13001_v35 = vpop.f32.mrb[140].mxu1 }
0x3137   :  { %v6839_v4 = vadd.f32 %v13001_v35, %v17047_v18  ;;  %v6833_v43 = vpop.f32.mrb[141].mxu1 }
0x3138   :  { %v6834_v44 = vadd.f32 %v17047_v18, %v6833_v43  ;;  %v17288_v43 = vld [vmem:[%s18752_s26 + $0x8] sm:$0xff] }
0x3139   :  { %14467 = vtanh.f32 %v6839_v4 }
0x313a   :  { %14469 = vtanh.f32 %v6834_v44  ;;  %v17295_v44 = vld [vmem:[%s18752_s26 + $0x10] sm:$0xff] }
0x313b   :  { %v14460_v45 = vpop.eup %14459 }
0x313c   :  { %v14462_v27 = vpop.eup %14461  ;;  %v6861_v37 = vmul.f32 %v14460_v45, %v6855_v22  ;;  %v17302_v22 = vld [vmem:[%s18752_s26 + $0x18] sm:$0xff]  ;;  %v17309_v45 = vld [vmem:[%s18752_s26 + $0x20] sm:$0xff] }
0x313d   :  { %v6860_v21 = vmul.f32 %v14462_v27, %v6854_v39  ;;  %v17316_v39 = vld [vmem:[%s18752_s26 + $0x28] sm:$0xff] }
0x313e   :  { %v17212_v5 = vadd.f32 %v6861_v37, %v6849_v58 }
0x313f   :  { %v14464_v41 = vpop.eup %14463  ;;  %v17215_v26 = vadd.f32 %v6860_v21, %v6848_v42 }
0x3140   :  { %v14466_v6 = vpop.eup %14465  ;;  %7130 = vrot.lane.b32.xlu1 %v17212_v5, %s18754_s1  ;;  %v6863_v52 = vmul.f32 %v14464_v41, %v6857_v40 }
0x3141   :  { %7128 = vrot.lane.b32.xlu0 %v17215_v26, %s18754_s1  ;;  %13004 = vmatprep.mubr.msk.f32.mxu0 %vm5737_vm5, %v17215_v26  ;;  %v6862_v8 = vmul.f32 %v14466_v6, %v6856_v51 }
0x3142   :  { %13005 = vmatmul.mubr.msk.f32.vlgmr.msra.gmra.mrb[146].mxu0 %vm5737_vm5, %v17212_v5  ;;  %v17230_v23 = vadd.f32 %v6863_v52, %v6851_v63 }
0x3143   :  { %v14468_v60 = vpop.eup %14467  ;;  %v17233_v28 = vadd.f32 %v6862_v8, %v6850_v33  ;;  %13035 = vmatpush3.msra.mxu0 %v16940_v25  ;;  %v6852_v25 = vmul.f32 %v17159_v31, %v17093_v34  ;;  %v17267_v34 = vld [vmem:[#allocation3 + $0x68] sm:$0xff] }
0x3144   :  { %v14470_v57 = vpop.eup %14469  ;;  %7134 = vrot.lane.b32.xlu1 %v17230_v23, %s18754_s1  ;;  %v6865_v17 = vmul.f32 %v14468_v60, %v6859_v14  ;;  %13066 = vmatprep.subr.mxu0 %v17244_v56 }
0x3145   :  { %7132 = vrot.lane.b32.xlu0 %v17233_v28, %s18754_s1  ;;  %13007 = vmatprep.mubr.msk.f32.mxu0 %vm5737_vm5, %v17233_v28  ;;  %v6864_v55 = vmul.f32 %v14470_v57, %v6858_v50 }
0x3146   :  { %13008 = vmatmul.mubr.msk.f32.gmra.mrb[148].mxu0 %vm5737_vm5, %v17230_v23  ;;  %v17255_v30 = vadd.f32 %v6865_v17, %v6853_v29 }
0x3147   :  { %v17257_v13 = vadd.f32 %v6864_v55, %v6852_v25 }
0x3148   :  { %7138 = vrot.lane.b32.xlu1 %v17255_v30, %s18754_s1 }
0x3149   :  { %7136 = vrot.lane.b32.xlu0 %v17257_v13, %s18754_s1  ;;  %13010 = vmatprep.mubr.msk.f32.mxu0 %vm5737_vm5, %v17257_v13 }
0x314a   :  { %13011 = vmatmul.mubr.msk.f32.gmra.mrb[150].mxu0 %vm5737_vm5, %v17255_v30 }
0x3215   :  { %v13006_v31 = vpop.f32.mrb[146].mxu0 }
0x3216   :  { %v6992_v11 = vadd.f32 %v13006_v31, %v17267_v34  ;;  %v6962_v20 = vpop.f32.mrb[147].mxu0 }
0x3217   :  { %v6991_v9 = vadd.f32 %v6962_v20, %v17270_v46 }
0x3219   :  { %v13626_v47 = vpack.c.bf16 %v6992_v11, %v6991_v9  ;;  %v13009_v2 = vpop.f32.mrb[148].mxu0 }
0x321a   :  { %v6994_v0 = vadd.f32 %v13009_v2, %v17273_v19  ;;  %v6972_v59 = vpop.f32.mrb[149].mxu0 }
0x321b   :  { %v6993_v61 = vadd.f32 %v6972_v59, %v17276_v49  ;;  %13627 = vmatprep.subr.bf16.mxu1 %v13626_v47  ;;  %v7131_v59 = vpop.permute.xlu1 %7130 }
0x321c   :  { %13629 = vmatpush3.bf16.msra.mxu1 %v13626_v47 }
0x321d   :  { %v13630_v16 = vpack.c.bf16 %v6994_v0, %v6993_v61  ;;  %v13012_v54 = vpop.f32.mrb[150].mxu0  ;;  %v7129_v61 = vpop.permute.xlu0 %7128 }
0x321e   :  { %v6996_v48 = vadd.f32 %v13012_v54, %v17279_v24  ;;  %v6982_v1 = vpop.f32.mrb[151].mxu0 }
0x321f   :  { %v6995_v35 = vadd.f32 %v6982_v1, %v17282_v62  ;;  %13631 = vmatprep.subr.bf16.mxu1 %v13630_v16 }
0x3220   :  { %13633 = vmatpush3.bf16.msra.mxu1 %v13630_v16 }
0x3221   :  { %v13634_v4 = vpack.c.bf16 %v6996_v48, %v6995_v35  ;;  %v7135_v35 = vpop.permute.xlu1 %7134 }
0x3223   :  { %13635 = vmatprep.subr.bf16.mxu1 %v13634_v4 }
0x3224   :  { %13637 = vmatpush3.bf16.msra.mxu1 %v13634_v4 }
0x3227   :  { %13026 = vmatmul.mubr.msk.f32.vlgmr.msra.gmra.mrb[142].mxu1 %vm578_vm1, %v17288_v43 }
0x3228   :  { %13028 = vmatprep.mubr.msk.f32.mxu1 %vm578_vm1, %v17295_v44 }
0x322b   :  { %13029 = vmatmul.mubr.msk.f32.gmra.mrb[144].mxu1 %vm578_vm1, %v17302_v22 }
0x322c   :  { %13031 = vmatprep.mubr.msk.f32.mxu1 %vm578_vm1, %v17309_v45 }
0x322f   :  { %13032 = vmatmul.mubr.msk.f32.gmra.mrb[146].mxu1 %vm578_vm1, %v17316_v39 }
0x3230   :  { %13057 = vmatprep.mubr.msk.f32.mxu1 %vm578_vm1, %v17013_v12 }
0x32fa   :  { %v13027_v27 = vpop.f32.mrb[142].mxu1 }
0x32fb   :  { %v7069_v58 = vadd.f32 %v13027_v27, %v16948_v15  ;;  %v7063_v37 = vpop.f32.mrb[143].mxu1  ;;  %v7133_v27 = vpop.permute.xlu0 %7132 }
0x32fc   :  { %v7064_v42 = vadd.f32 %v16948_v15, %v7063_v37 }
0x32fd   :  { %v11396_v21 = vmul.f32 -1.442695, %v7069_v58 }
0x32fe   :  { %v11395_v40 = vmul.f32 -1.442695, %v7064_v42  ;;  %v13030_v41 = vpop.f32.mrb[144].mxu1 }
0x32ff   :  { %14471 = vpow2.f32 %v11396_v21  ;;  %v7079_v51 = vadd.f32 %v13030_v41, %v16948_v15  ;;  %v7073_v6 = vpop.f32.mrb[145].mxu1  ;;  %v7139_v41 = vpop.permute.xlu1 %7138 }
0x3300   :  { %14473 = vpow2.f32 %v11395_v40  ;;  %v7074_v63 = vadd.f32 %v16948_v15, %v7073_v6  ;;  %v7137_v6 = vpop.permute.xlu0 %7136 }
0x3301   :  { %v11398_v52 = vmul.f32 -1.442695, %v7079_v51 }
0x3302   :  { %v11397_v33 = vmul.f32 -1.442695, %v7074_v63  ;;  %v13033_v8 = vpop.f32.mrb[146].mxu1 }
0x3303   :  { %14475 = vpow2.f32 %v11398_v52  ;;  %v7089_v14 = vadd.f32 %v13033_v8, %v16948_v15  ;;  %v7083_v60 = vpop.f32.mrb[147].mxu1 }
0x3304   :  { %14477 = vpow2.f32 %v11397_v33  ;;  %v7084_v50 = vadd.f32 %v16948_v15, %v7083_v60 }
0x3305   :  { %v11400_v57 = vmul.f32 -1.442695, %v7089_v14 }
0x3306   :  { %v11399_v29 = vmul.f32 -1.442695, %v7084_v50  ;;  %v17358_v50 = vld [vmem:[%s18728_s9] sm:$0xff] }
0x3307   :  { %14479 = vpow2.f32 %v11400_v57 }
0x3308   :  { %14481 = vpow2.f32 %v11399_v29 }
0x3309   :  { %v14472_v17 = vpop.eup %14471 }
0x330a   :  { %v14474_v25 = vpop.eup %14473  ;;  %v7111_v55 = vadd.f32 1.0, %v14472_v17 }
0x330b   :  { %v7110_v31 = vadd.f32 1.0, %v14474_v25 }
0x330c   :  { %14483 = vrcp.f32 %v7111_v55 }
0x330d   :  { %v14476_v11 = vpop.eup %14475  ;;  %14485 = vrcp.f32 %v7110_v31 }
0x330e   :  { %v14478_v20 = vpop.eup %14477  ;;  %v7113_v9 = vadd.f32 1.0, %v14476_v11 }
0x330f   :  { %v7112_v47 = vadd.f32 1.0, %v14478_v20 }
0x3310   :  { %14487 = vrcp.f32 %v7113_v9 }
0x3311   :  { %v14480_v2 = vpop.eup %14479  ;;  %14489 = vrcp.f32 %v7112_v47 }
0x3312   :  { %v14482_v0 = vpop.eup %14481  ;;  %v7115_v15 = vadd.f32 1.0, %v14480_v2 }
0x3313   :  { %v7114_v16 = vadd.f32 1.0, %v14482_v0 }
0x3314   :  { %14491 = vrcp.f32 %v7115_v15 }
0x3315   :  { %14493 = vrcp.f32 %v7114_v16 }
0x3316   :  { %v17328_v54 = vpop.eup %14483 }
0x3317   :  { %v17330_v48 = vpop.eup %14485  ;;  %v7147_v1 = vmul.f32 %v17328_v54, %v7131_v59 }
0x3318   :  { %v7146_v4 = vmul.f32 %v17330_v48, %v7129_v61 }
0x3319   :  { %7160 = vrot.lane.b32.xlu1 %v7147_v1, %s18753_s24 }
0x331a   :  { %v17335_v58 = vpop.eup %14487  ;;  %7158 = vrot.lane.b32.xlu0 %v7146_v4, %s18753_s24 }
0x331b   :  { %v17338_v37 = vpop.eup %14489  ;;  %v7149_v42 = vmul.f32 %v17335_v58, %v7135_v35 }
0x331c   :  { %v7148_v21 = vmul.f32 %v17338_v37, %v7133_v27 }
0x331d   :  { %7164 = vrot.lane.b32.xlu1 %v7149_v42, %s18753_s24 }
0x331e   :  { %v17343_v40 = vpop.eup %14491  ;;  %7162 = vrot.lane.b32.xlu0 %v7148_v21, %s18753_s24 }
0x331f   :  { %v17346_v51 = vpop.eup %14493  ;;  %v7151_v63 = vmul.f32 %v17343_v40, %v7139_v41 }
0x3320   :  { %v7150_v52 = vmul.f32 %v17346_v51, %v7137_v6 }
0x3321   :  { %7168 = vrot.lane.b32.xlu1 %v7151_v63, %s18753_s24 }
0x3322   :  { %7166 = vrot.lane.b32.xlu0 %v7150_v52, %s18753_s24 }
0x338b   :  { %v7161_v33 = vpop.permute.xlu1 %7160 }
0x338c   :  { %v7159_v8 = vpop.permute.xlu0 %7158 }
0x338d   :  { %13036 = vmatprep.mubr.msk.f32.mxu0 %vm5737_vm5, %v7159_v8 }
0x338e   :  { %13037 = vmatmul.mubr.msk.f32.vlgmr.msra.gmra.mrb[152].mxu0 %vm5737_vm5, %v7161_v33 }
0x338f   :  { %v7165_v14 = vpop.permute.xlu1 %7164  ;;  %13067 = vmatpush3.msra.mxu0 %v17244_v56 }
0x3390   :  { %v7163_v60 = vpop.permute.xlu0 %7162  ;;  %13098 = vmatprep.subr.mxu0 %v17358_v50 }
0x3391   :  { %13039 = vmatprep.mubr.msk.f32.mxu0 %vm5737_vm5, %v7163_v60 }
0x3392   :  { %13040 = vmatmul.mubr.msk.f32.gmra.mrb[154].mxu0 %vm5737_vm5, %v7165_v14 }
0x3393   :  { %v7169_v29 = vpop.permute.xlu1 %7168 }
0x3394   :  { %v7167_v57 = vpop.permute.xlu0 %7166 }
0x3395   :  { %13042 = vmatprep.mubr.msk.f32.mxu0 %vm5737_vm5, %v7167_v57 }
0x3396   :  { %13043 = vmatmul.mubr.msk.f32.gmra.mrb[156].mxu0 %vm5737_vm5, %v7169_v29 }
0x3461   :  { %v13038_v17 = vpop.f32.mrb[152].mxu0 }
0x3462   :  { %7285 = vrot.lane.b32.xlu1 %v13038_v17, %s14833_s22  ;;  %v7248_v25 = vpop.f32.mrb[153].mxu0 }
0x3463   :  { %7283 = vrot.lane.b32.xlu0 %v7248_v25, %s14833_s22 }
0x3465   :  { %v13041_v55 = vpop.f32.mrb[154].mxu0 }
0x3466   :  { %7289 = vrot.lane.b32.xlu1 %v13041_v55, %s14833_s22  ;;  %v7258_v31 = vpop.f32.mrb[155].mxu0 }
0x3467   :  { %7287 = vrot.lane.b32.xlu0 %v7258_v31, %s14833_s22 }
0x3469   :  { %v13044_v11 = vpop.f32.mrb[156].mxu0 }
0x346a   :  { %7293 = vrot.lane.b32.xlu1 %v13044_v11, %s14833_s22  ;;  %v7268_v20 = vpop.f32.mrb[157].mxu0 }
0x346b   :  { %7291 = vrot.lane.b32.xlu0 %v7268_v20, %s14833_s22 }
0x34d4   :  { %v7286_v9 = vpop.permute.xlu1 %7285 }
0x34d5   :  { %v7302_v47 = vadd.f32 %v7286_v9, %v17267_v34  ;;  %v7284_v2 = vpop.permute.xlu0 %7283 }
0x34d6   :  { %v7301_v0 = vadd.f32 %v7284_v2, %v17270_v46  ;;  %v7439_v2 = vsub.f32 1.0, %v17328_v54 }
0x34d8   :  { %v13951_v59 = vpack.i.bf16 %v7302_v47, %v7301_v0  ;;  %v7290_v15 = vpop.permute.xlu1 %7289 }
0x34d9   :  { %v7304_v61 = vadd.f32 %v7290_v15, %v17273_v19  ;;  %v7288_v16 = vpop.permute.xlu0 %7287 }
0x34da   :  { %v7303_v1 = vadd.f32 %v7288_v16, %v17276_v49  ;;  %13952 = vrot.lane.b32.xlu0 %v13951_v59, %s14834_s25  ;;  %v7438_v59 = vsub.f32 1.0, %v17330_v48 }
0x34dc   :  { %v13956_v35 = vpack.i.bf16 %v7304_v61, %v7303_v1  ;;  %v7294_v4 = vpop.permute.xlu1 %7293  ;;  %v7433_v61 = vmul.f32 %v17328_v54, %v17212_v5  ;;  %v7432_v1 = vmul.f32 %v17330_v48, %v17215_v26  ;;  %v7435_v5 = vmul.f32 %v17335_v58, %v17230_v23 }
0x34dd   :  { %v7306_v27 = vadd.f32 %v7294_v4, %v17279_v24  ;;  %v7292_v42 = vpop.permute.xlu0 %7291  ;;  %v7434_v26 = vmul.f32 %v17338_v37, %v17233_v28  ;;  %v7437_v28 = vmul.f32 %v17343_v40, %v17255_v30  ;;  %v17454_v30 = vld [vmem:[#allocation3 + $0x98] sm:$0xff] }
0x34de   :  { %v7305_v21 = vadd.f32 %v7292_v42, %v17282_v62  ;;  %13957 = vrot.lane.b32.xlu1 %v13956_v35, %s14834_s25 }
0x34e0   :  { %v13961_v34 = vpack.i.bf16 %v7306_v27, %v7305_v21  ;;  %v7440_v21 = vsub.f32 1.0, %v17338_v37 }
0x34e2   :  { %13962 = vrot.lane.b32.xlu0 %v13961_v34, %s14834_s25 }
0x354c   :  { %v13953_v46 = vpop.permute.xlu0 %13952 }
0x354d   :  { %v13955_v41 = vunpack.i.h.bf16 %v13953_v46  ;;  %v13954_v19 = vunpack.i.l.bf16 %v13953_v46 }
0x354f   :  { %v13638_v6 = vpack.c.bf16 %v13955_v41, %v13954_v19  ;;  %v7443_v41 = vsub.f32 1.0, %v17343_v40 }
0x3550   :  { %v13958_v63 = vpop.permute.xlu1 %13957 }
0x3551   :  { %v13960_v49 = vunpack.i.h.bf16 %v13958_v63  ;;  %v13959_v52 = vunpack.i.l.bf16 %v13958_v63  ;;  %13639 = vmatprep.subr.bf16.mxu1 %v13638_v6  ;;  %v7436_v63 = vmul.f32 %v17346_v51, %v17257_v13 }
0x3552   :  { %13641 = vmatpush3.bf16.msra.mxu1 %v13638_v6 }
0x3553   :  { %v13642_v33 = vpack.c.bf16 %v13960_v49, %v13959_v52 }
0x3554   :  { %v13963_v8 = vpop.permute.xlu0 %13962 }
0x3555   :  { %v13965_v24 = vunpack.i.h.bf16 %v13963_v8  ;;  %v13964_v14 = vunpack.i.l.bf16 %v13963_v8  ;;  %13643 = vmatprep.subr.bf16.mxu1 %v13642_v33 }
0x3556   :  { %13645 = vmatpush3.bf16.msra.mxu1 %v13642_v33 }
0x3557   :  { %v13646_v62 = vpack.c.bf16 %v13965_v24, %v13964_v14 }
0x3559   :  { %13647 = vmatprep.subr.bf16.mxu1 %v13646_v62 }
0x355a   :  { %13649 = vmatpush3.bf16.msra.mxu1 %v13646_v62  ;;  %v17460_v62 = vld [vmem:[#allocation3 + $0xa8] sm:$0xff] }
0x355d   :  { %13058 = vmatmul.mubr.msk.f32.vlgmr.msra.gmra.mrb[148].mxu1 %vm578_vm1, %v17288_v43 }
0x355e   :  { %13060 = vmatprep.mubr.msk.f32.mxu1 %vm578_vm1, %v17295_v44 }
0x3561   :  { %13061 = vmatmul.mubr.msk.f32.gmra.mrb[150].mxu1 %vm578_vm1, %v17302_v22 }
0x3562   :  { %13063 = vmatprep.mubr.msk.f32.mxu1 %vm578_vm1, %v17309_v45 }
0x3565   :  { %13064 = vmatmul.mubr.msk.f32.gmra.mrb[152].mxu1 %vm578_vm1, %v17316_v39 }
0x3566   :  { %13089 = vmatprep.mubr.msk.f32.mxu1 %vm578_vm1, %v17013_v12 }
0x3630   :  { %v13059_v60 = vpop.f32.mrb[148].mxu1 }
0x3631   :  { %v7403_v57 = vadd.f32 %v13059_v60, %v17047_v18  ;;  %v7397_v29 = vpop.f32.mrb[149].mxu1 }
0x3632   :  { %v7398_v17 = vadd.f32 %v17047_v18, %v7397_v29  ;;  %v17463_v29 = vld [vmem:[#allocation3 + $0xa0] sm:$0xff] }
0x3633   :  { %14495 = vtanh.f32 %v7403_v57 }
0x3634   :  { %14497 = vtanh.f32 %v7398_v17  ;;  %v13062_v25 = vpop.f32.mrb[150].mxu1 }
0x3635   :  { %v7413_v55 = vadd.f32 %v13062_v25, %v17047_v18  ;;  %v7407_v31 = vpop.f32.mrb[151].mxu1 }
0x3636   :  { %v7408_v11 = vadd.f32 %v17047_v18, %v7407_v31  ;;  %v17466_v31 = vld [vmem:[#allocation3 + $0xb8] sm:$0xff] }
0x3637   :  { %14499 = vtanh.f32 %v7413_v55 }
0x3638   :  { %14501 = vtanh.f32 %v7408_v11  ;;  %v13065_v20 = vpop.f32.mrb[152].mxu1 }
0x3639   :  { %v7423_v9 = vadd.f32 %v13065_v20, %v17047_v18  ;;  %v7417_v12 = vpop.f32.mrb[153].mxu1 }
0x363a   :  { %v7418_v47 = vadd.f32 %v17047_v18, %v7417_v12  ;;  %v7441_v18 = vsub.f32 1.0, %v17335_v58  ;;  %v7442_v58 = vsub.f32 1.0, %v17346_v51  ;;  %v17457_v51 = vld [vmem:[#allocation3 + $0x90] sm:$0xff] }
0x363b   :  { %14503 = vtanh.f32 %v7423_v9  ;;  %v17469_v9 = vld [vmem:[#allocation3 + $0xb0] sm:$0xff] }
0x363c   :  { %14505 = vtanh.f32 %v7418_v47 }
0x363d   :  { %v14496_v0 = vpop.eup %14495 }
0x363e   :  { %v14498_v15 = vpop.eup %14497  ;;  %v7445_v16 = vmul.f32 %v14496_v0, %v7439_v2  ;;  %v17485_v0 = vld [vmem:[%s18752_s26] sm:$0xff] }
0x363f   :  { %v7444_v35 = vmul.f32 %v14498_v15, %v7438_v59  ;;  %v17492_v15 = vld [vmem:[%s18729_s10] ss:$0 sm:$0xff] }
0x3640   :  { %v17404_v4 = vadd.f32 %v7445_v16, %v7433_v61 }
0x3641   :  { %v14500_v27 = vpop.eup %14499  ;;  %v17407_v42 = vadd.f32 %v7444_v35, %v7432_v1 }
0x3642   :  { %v14502_v34 = vpop.eup %14501  ;;  %7714 = vrot.lane.b32.xlu0 %v17404_v4, %s18754_s1  ;;  %v7447_v54 = vmul.f32 %v14500_v27, %v7441_v18 }
0x3643   :  { %7712 = vrot.lane.b32.xlu1 %v17407_v42, %s18754_s1  ;;  %13068 = vmatprep.mubr.msk.f32.mxu0 %vm5737_vm5, %v17407_v42  ;;  %v7446_v48 = vmul.f32 %v14502_v34, %v7440_v21 }
0x3644   :  { %13069 = vmatmul.mubr.msk.f32.vlgmr.msra.gmra.mrb[158].mxu0 %vm5737_vm5, %v17404_v4  ;;  %v17422_v46 = vadd.f32 %v7447_v54, %v7435_v5 }
0x3645   :  { %v14504_v19 = vpop.eup %14503  ;;  %v17425_v23 = vadd.f32 %v7446_v48, %v7434_v26  ;;  %13099 = vmatpush3.msra.mxu0 %v17358_v50 }
0x3646   :  { %v14506_v6 = vpop.eup %14505  ;;  %7718 = vrot.lane.b32.xlu0 %v17422_v46, %s18754_s1  ;;  %v7449_v37 = vmul.f32 %v14504_v19, %v7443_v41  ;;  %13130 = vmatprep.subr.mxu0 %v17244_v56 }
0x3647   :  { %7716 = vrot.lane.b32.xlu1 %v17425_v23, %s18754_s1  ;;  %13071 = vmatprep.mubr.msk.f32.mxu0 %vm5737_vm5, %v17425_v23  ;;  %v7448_v49 = vmul.f32 %v14506_v6, %v7442_v58 }
0x3648   :  { %13072 = vmatmul.mubr.msk.f32.gmra.mrb[160].mxu0 %vm5737_vm5, %v17422_v46  ;;  %v17442_v52 = vadd.f32 %v7449_v37, %v7437_v28 }
0x3649   :  { %v17444_v33 = vadd.f32 %v7448_v49, %v7436_v63 }
0x364a   :  { %7722 = vrot.lane.b32.xlu0 %v17442_v52, %s18754_s1 }
0x364b   :  { %7720 = vrot.lane.b32.xlu1 %v17444_v33, %s18754_s1  ;;  %13074 = vmatprep.mubr.msk.f32.mxu0 %vm5737_vm5, %v17444_v33 }
0x364c   :  { %13075 = vmatmul.mubr.msk.f32.gmra.mrb[162].mxu0 %vm5737_vm5, %v17442_v52 }
0x3717   :  { %v13070_v13 = vpop.f32.mrb[158].mxu0 }
0x3718   :  { %v7576_v40 = vadd.f32 %v13070_v13, %v17454_v30  ;;  %v7546_v8 = vpop.f32.mrb[159].mxu0 }
0x3719   :  { %v7575_v24 = vadd.f32 %v7546_v8, %v17457_v51 }
0x371b   :  { %v13650_v14 = vpack.c.bf16 %v7576_v40, %v7575_v24  ;;  %v13073_v60 = vpop.f32.mrb[160].mxu0 }
0x371c   :  { %v7578_v57 = vadd.f32 %v13073_v60, %v17460_v62  ;;  %v7556_v17 = vpop.f32.mrb[161].mxu0 }
0x371d   :  { %v7577_v25 = vadd.f32 %v7556_v17, %v17463_v29  ;;  %13651 = vmatprep.subr.bf16.mxu1 %v13650_v14  ;;  %v7715_v17 = vpop.permute.xlu0 %7714 }
0x371e   :  { %13653 = vmatpush3.bf16.msra.mxu1 %v13650_v14 }
0x371f   :  { %v13654_v55 = vpack.c.bf16 %v7578_v57, %v7577_v25  ;;  %v13076_v11 = vpop.f32.mrb[162].mxu0 }
0x3720   :  { %v7580_v20 = vadd.f32 %v13076_v11, %v17466_v31  ;;  %v7566_v12 = vpop.f32.mrb[163].mxu0 }
0x3721   :  { %v7579_v47 = vadd.f32 %v7566_v12, %v17469_v9  ;;  %13655 = vmatprep.subr.bf16.mxu1 %v13654_v55 }
0x3722   :  { %13657 = vmatpush3.bf16.msra.mxu1 %v13654_v55  ;;  %v7713_v55 = vpop.permute.xlu1 %7712 }
0x3723   :  { %v13658_v2 = vpack.c.bf16 %v7580_v20, %v7579_v47 }
0x3725   :  { %13659 = vmatprep.subr.bf16.mxu1 %v13658_v2 }
0x3726   :  { %13661 = vmatpush3.bf16.msra.mxu1 %v13658_v2  ;;  %v7719_v2 = vpop.permute.xlu0 %7718 }
0x3729   :  { %13090 = vmatmul.mubr.msk.f32.vlgmr.msra.gmra.mrb[154].mxu1 %vm578_vm1, %v17288_v43 }
0x372a   :  { %13092 = vmatprep.mubr.msk.f32.mxu1 %vm578_vm1, %v17295_v44 }
0x372d   :  { %13093 = vmatmul.mubr.msk.f32.gmra.mrb[156].mxu1 %vm578_vm1, %v17302_v22 }
0x372e   :  { %13095 = vmatprep.mubr.msk.f32.mxu1 %vm578_vm1, %v17309_v45 }
0x3731   :  { %13096 = vmatmul.mubr.msk.f32.gmra.mrb[158].mxu1 %vm578_vm1, %v17316_v39 }
0x3732   :  { %13121 = vmatprep.mubr.msk.f32.mxu1 %vm578_vm1, %v17485_v0 }
0x37fc   :  { %v13091_v59 = vpop.f32.mrb[154].mxu1 }
0x37fd   :  { %v7653_v61 = vadd.f32 %v17492_v15, %v13091_v59  ;;  %v7647_v16 = vpop.f32.mrb[155].mxu1 }
0x37fe   :  { %v7648_v1 = vadd.f32 %v17492_v15, %v7647_v16 }
0x37ff   :  { %v11426_v35 = vmul.f32 -1.442695, %v7653_v61  ;;  %v7717_v61 = vpop.permute.xlu1 %7716 }
0x3800   :  { %v11425_v18 = vmul.f32 -1.442695, %v7648_v1  ;;  %v13094_v27 = vpop.f32.mrb[156].mxu1 }
0x3801   :  { %14507 = vpow2.f32 %v11426_v35  ;;  %v7663_v21 = vadd.f32 %v17492_v15, %v13094_v27  ;;  %v7657_v34 = vpop.f32.mrb[157].mxu1 }
0x3802   :  { %14509 = vpow2.f32 %v11425_v18  ;;  %v7658_v5 = vadd.f32 %v17492_v15, %v7657_v34 }
0x3803   :  { %v11428_v54 = vmul.f32 -1.442695, %v7663_v21  ;;  %v7723_v21 = vpop.permute.xlu0 %7722 }
0x3804   :  { %v11427_v26 = vmul.f32 -1.442695, %v7658_v5  ;;  %v13097_v48 = vpop.f32.mrb[158].mxu1  ;;  %v7721_v5 = vpop.permute.xlu1 %7720 }
0x3805   :  { %14511 = vpow2.f32 %v11428_v54  ;;  %v7673_v41 = vadd.f32 %v17492_v15, %v13097_v48  ;;  %v7667_v19 = vpop.f32.mrb[159].mxu1 }
0x3806   :  { %14513 = vpow2.f32 %v11427_v26  ;;  %v7668_v58 = vadd.f32 %v17492_v15, %v7667_v19 }
0x3807   :  { %v11430_v6 = vmul.f32 -1.442695, %v7673_v41 }
0x3808   :  { %v11429_v28 = vmul.f32 -1.442695, %v7668_v58 }
0x3809   :  { %14515 = vpow2.f32 %v11430_v6 }
0x380a   :  { %14517 = vpow2.f32 %v11429_v28 }
0x380b   :  { %v14508_v37 = vpop.eup %14507 }
0x380c   :  { %v14510_v63 = vpop.eup %14509  ;;  %v7695_v49 = vadd.f32 1.0, %v14508_v37 }
0x380d   :  { %v7694_v13 = vadd.f32 1.0, %v14510_v63 }
0x380e   :  { %14519 = vrcp.f32 %v7695_v49 }
0x380f   :  { %v14512_v40 = vpop.eup %14511  ;;  %14521 = vrcp.f32 %v7694_v13 }
0x3810   :  { %v14514_v8 = vpop.eup %14513  ;;  %v7697_v24 = vadd.f32 1.0, %v14512_v40 }
0x3811   :  { %v7696_v14 = vadd.f32 1.0, %v14514_v8 }
0x3812   :  { %14523 = vrcp.f32 %v7697_v24 }
0x3813   :  { %v14516_v60 = vpop.eup %14515  ;;  %14525 = vrcp.f32 %v7696_v14 }
0x3814   :  { %v14518_v57 = vpop.eup %14517  ;;  %v7699_v25 = vadd.f32 1.0, %v14516_v60 }
0x3815   :  { %v7698_v11 = vadd.f32 1.0, %v14518_v57 }
0x3816   :  { %14527 = vrcp.f32 %v7699_v25 }
0x3817   :  { %14529 = vrcp.f32 %v7698_v11 }
0x3818   :  { %v17500_v20 = vpop.eup %14519 }
0x3819   :  { %v17502_v12 = vpop.eup %14521  ;;  %v7731_v47 = vmul.f32 %v17500_v20, %v7715_v17 }
0x381a   :  { %v7730_v59 = vmul.f32 %v17502_v12, %v7713_v55 }
0x381b   :  { %7744 = vrot.lane.b32.xlu0 %v7731_v47, %s18753_s24 }
0x381c   :  { %v17507_v16 = vpop.eup %14523  ;;  %7742 = vrot.lane.b32.xlu1 %v7730_v59, %s18753_s24 }
0x381d   :  { %v17510_v1 = vpop.eup %14525  ;;  %v7733_v35 = vmul.f32 %v17507_v16, %v7719_v2 }
0x381e   :  { %v7732_v18 = vmul.f32 %v17510_v1, %v7717_v61 }
0x381f   :  { %7748 = vrot.lane.b32.xlu0 %v7733_v35, %s18753_s24 }
0x3820   :  { %v17515_v27 = vpop.eup %14527  ;;  %7746 = vrot.lane.b32.xlu1 %v7732_v18, %s18753_s24 }
0x3821   :  { %v17518_v34 = vpop.eup %14529  ;;  %v7735_v54 = vmul.f32 %v17515_v27, %v7723_v21 }
0x3822   :  { %v7734_v26 = vmul.f32 %v17518_v34, %v7721_v5 }
0x3823   :  { %7752 = vrot.lane.b32.xlu0 %v7735_v54, %s18753_s24 }
0x3824   :  { %7750 = vrot.lane.b32.xlu1 %v7734_v26, %s18753_s24 }
0x388d   :  { %v7745_v48 = vpop.permute.xlu0 %7744 }
0x388e   :  { %v7743_v41 = vpop.permute.xlu1 %7742 }
0x388f   :  { %13100 = vmatprep.mubr.msk.f32.mxu0 %vm5737_vm5, %v7743_v41 }
0x3890   :  { %13101 = vmatmul.mubr.msk.f32.vlgmr.msra.gmra.mrb[164].mxu0 %vm5737_vm5, %v7745_v48 }
0x3891   :  { %v7749_v19 = vpop.permute.xlu0 %7748  ;;  %13131 = vmatpush3.msra.mxu0 %v17244_v56 }
0x3892   :  { %v7747_v58 = vpop.permute.xlu1 %7746  ;;  %13162 = vmatprep.subr.mxu0 %v17358_v50 }
0x3893   :  { %13103 = vmatprep.mubr.msk.f32.mxu0 %vm5737_vm5, %v7747_v58 }
0x3894   :  { %13104 = vmatmul.mubr.msk.f32.gmra.mrb[166].mxu0 %vm5737_vm5, %v7749_v19 }
0x3895   :  { %v7753_v28 = vpop.permute.xlu0 %7752 }
0x3896   :  { %v7751_v6 = vpop.permute.xlu1 %7750 }
0x3897   :  { %13106 = vmatprep.mubr.msk.f32.mxu0 %vm5737_vm5, %v7751_v6  ;;  %v17562_v6 = vld [vmem:[%s18730_s11] ss:$0 sm:$0xff] }
0x3898   :  { %13107 = vmatmul.mubr.msk.f32.gmra.mrb[168].mxu0 %vm5737_vm5, %v7753_v28 }
0x3963   :  { %v13102_v37 = vpop.f32.mrb[164].mxu0 }
0x3964   :  { %7869 = vrot.lane.b32.xlu0 %v13102_v37, %s14833_s22  ;;  %v7832_v63 = vpop.f32.mrb[165].mxu0 }
0x3965   :  { %7867 = vrot.lane.b32.xlu1 %v7832_v63, %s14833_s22 }
0x3967   :  { %v13105_v49 = vpop.f32.mrb[166].mxu0 }
0x3968   :  { %7873 = vrot.lane.b32.xlu0 %v13105_v49, %s14833_s22  ;;  %v7842_v13 = vpop.f32.mrb[167].mxu0 }
0x3969   :  { %7871 = vrot.lane.b32.xlu1 %v7842_v13, %s14833_s22 }
0x396b   :  { %v13108_v40 = vpop.f32.mrb[168].mxu0 }
0x396c   :  { %7877 = vrot.lane.b32.xlu0 %v13108_v40, %s14833_s22  ;;  %v7852_v8 = vpop.f32.mrb[169].mxu0 }
0x396d   :  { %7875 = vrot.lane.b32.xlu1 %v7852_v8, %s14833_s22 }
0x39d6   :  { %v7870_v24 = vpop.permute.xlu0 %7869 }
0x39d7   :  { %v7886_v14 = vadd.f32 %v7870_v24, %v17454_v30  ;;  %v7868_v60 = vpop.permute.xlu1 %7867 }
0x39d8   :  { %v7885_v57 = vadd.f32 %v7868_v60, %v17457_v51 }
0x39da   :  { %v13966_v17 = vpack.i.bf16 %v7886_v14, %v7885_v57  ;;  %v7874_v25 = vpop.permute.xlu0 %7873 }
0x39db   :  { %v7888_v55 = vadd.f32 %v7874_v25, %v17460_v62  ;;  %v7872_v11 = vpop.permute.xlu1 %7871 }
0x39dc   :  { %v7887_v47 = vadd.f32 %v7872_v11, %v17463_v29  ;;  %13967 = vrot.lane.b32.xlu1 %v13966_v17, %s14834_s25  ;;  %v8023_v17 = vsub.f32 1.0, %v17500_v20 }
0x39de   :  { %v13971_v2 = vpack.i.bf16 %v7888_v55, %v7887_v47  ;;  %v7878_v59 = vpop.permute.xlu0 %7877  ;;  %v8022_v55 = vsub.f32 1.0, %v17502_v12  ;;  %v8017_v47 = vmul.f32 %v17500_v20, %v17404_v4  ;;  %v8019_v4 = vmul.f32 %v17507_v16, %v17422_v46 }
0x39df   :  { %v7890_v61 = vadd.f32 %v7878_v59, %v17466_v31  ;;  %v7876_v35 = vpop.permute.xlu1 %7875  ;;  %v8016_v59 = vmul.f32 %v17502_v12, %v17407_v42  ;;  %v8018_v42 = vmul.f32 %v17510_v1, %v17425_v23  ;;  %v8021_v23 = vmul.f32 %v17515_v27, %v17442_v52 }
0x39e0   :  { %v7889_v18 = vadd.f32 %v7876_v35, %v17469_v9  ;;  %13972 = vrot.lane.b32.xlu0 %v13971_v2, %s14834_s25 }
0x39e2   :  { %v13976_v30 = vpack.i.bf16 %v7890_v61, %v7889_v18  ;;  %v8025_v18 = vsub.f32 1.0, %v17507_v16  ;;  %v8026_v16 = vsub.f32 1.0, %v17518_v34 }
0x39e4   :  { %13977 = vrot.lane.b32.xlu1 %v13976_v30, %s14834_s25 }
0x3a4e   :  { %v13968_v51 = vpop.permute.xlu1 %13967 }
0x3a4f   :  { %v13970_v21 = vunpack.i.h.bf16 %v13968_v51  ;;  %v13969_v62 = vunpack.i.l.bf16 %v13968_v51 }
0x3a51   :  { %v13662_v5 = vpack.c.bf16 %v13970_v21, %v13969_v62  ;;  %v8024_v21 = vsub.f32 1.0, %v17510_v1 }
0x3a52   :  { %v13973_v54 = vpop.permute.xlu0 %13972 }
0x3a53   :  { %v13975_v29 = vunpack.i.h.bf16 %v13973_v54  ;;  %v13974_v26 = vunpack.i.l.bf16 %v13973_v54  ;;  %13663 = vmatprep.subr.bf16.mxu1 %v13662_v5  ;;  %v8027_v54 = vsub.f32 1.0, %v17515_v27  ;;  %v17629_v27 = vld [vmem:[#allocation3 + $0xc0] sm:$0xff] }
0x3a54   :  { %13665 = vmatpush3.bf16.msra.mxu1 %v13662_v5 }
0x3a55   :  { %v13666_v48 = vpack.c.bf16 %v13975_v29, %v13974_v26 }
0x3a56   :  { %v13978_v41 = vpop.permute.xlu1 %13977 }
0x3a57   :  { %v13980_v31 = vunpack.i.h.bf16 %v13978_v41  ;;  %v13979_v19 = vunpack.i.l.bf16 %v13978_v41  ;;  %13667 = vmatprep.subr.bf16.mxu1 %v13666_v48 }
0x3a58   :  { %13669 = vmatpush3.bf16.msra.mxu1 %v13666_v48  ;;  %v8020_v48 = vmul.f32 %v17518_v34, %v17444_v33 }
0x3a59   :  { %v13670_v9 = vpack.c.bf16 %v13980_v31, %v13979_v19 }
0x3a5b   :  { %13671 = vmatprep.subr.bf16.mxu1 %v13670_v9 }
0x3a5c   :  { %13673 = vmatpush3.bf16.msra.mxu1 %v13670_v9 }
0x3a5f   :  { %13122 = vmatmul.mubr.msk.f32.vlgmr.msra.gmra.mrb[160].mxu1 %vm578_vm1, %v17288_v43 }
0x3a60   :  { %13124 = vmatprep.mubr.msk.f32.mxu1 %vm578_vm1, %v17295_v44 }
0x3a63   :  { %13125 = vmatmul.mubr.msk.f32.gmra.mrb[162].mxu1 %vm578_vm1, %v17302_v22 }
0x3a64   :  { %13127 = vmatprep.mubr.msk.f32.mxu1 %vm578_vm1, %v17309_v45 }
0x3a67   :  { %13128 = vmatmul.mubr.msk.f32.gmra.mrb[164].mxu1 %vm578_vm1, %v17316_v39 }
0x3a68   :  { %13153 = vmatprep.mubr.msk.f32.mxu1 %vm578_vm1, %v17485_v0 }
0x3b32   :  { %v13123_v58 = vpop.f32.mrb[160].mxu1 }
0x3b33   :  { %v7987_v28 = vadd.f32 %v17562_v6, %v13123_v58  ;;  %v7981_v37 = vpop.f32.mrb[161].mxu1 }
0x3b34   :  { %v7982_v63 = vadd.f32 %v17562_v6, %v7981_v37 }
0x3b35   :  { %14531 = vtanh.f32 %v7987_v28  ;;  %v17632_v28 = vld [vmem:[#allocation3 + $0xd8] sm:$0xff] }
0x3b36   :  { %14533 = vtanh.f32 %v7982_v63  ;;  %v13126_v49 = vpop.f32.mrb[162].mxu1 }
0x3b37   :  { %v7997_v13 = vadd.f32 %v17562_v6, %v13126_v49  ;;  %v7991_v40 = vpop.f32.mrb[163].mxu1  ;;  %v17635_v49 = vld [vmem:[#allocation3 + $0xd0] sm:$0xff] }
0x3b38   :  { %v7992_v8 = vadd.f32 %v17562_v6, %v7991_v40 }
0x3b39   :  { %14535 = vtanh.f32 %v7997_v13 }
0x3b3a   :  { %14537 = vtanh.f32 %v7992_v8  ;;  %v13129_v24 = vpop.f32.mrb[164].mxu1 }
0x3b3b   :  { %v8007_v14 = vadd.f32 %v17562_v6, %v13129_v24  ;;  %v8001_v60 = vpop.f32.mrb[165].mxu1  ;;  %v17638_v24 = vld [vmem:[#allocation3 + $0xe8] sm:$0xff] }
0x3b3c   :  { %v8002_v57 = vadd.f32 %v17562_v6, %v8001_v60 }
0x3b3d   :  { %14539 = vtanh.f32 %v8007_v14 }
0x3b3e   :  { %14541 = vtanh.f32 %v8002_v57  ;;  %v17641_v57 = vld [vmem:[#allocation3 + $0xe0] sm:$0xff] }
0x3b3f   :  { %v14532_v25 = vpop.eup %14531 }
0x3b40   :  { %v14534_v11 = vpop.eup %14533  ;;  %v8029_v2 = vmul.f32 %v14532_v25, %v8023_v17 }
0x3b41   :  { %v8028_v61 = vmul.f32 %v14534_v11, %v8022_v55 }
0x3b42   :  { %v17576_v35 = vadd.f32 %v8029_v2, %v8017_v47 }
0x3b43   :  { %v14536_v30 = vpop.eup %14535  ;;  %v17579_v51 = vadd.f32 %v8028_v61, %v8016_v59 }
0x3b44   :  { %v14538_v62 = vpop.eup %14537  ;;  %8298 = vrot.lane.b32.xlu1 %v17576_v35, %s18754_s1  ;;  %v8031_v20 = vmul.f32 %v14536_v30, %v8025_v18 }
0x3b45   :  { %8296 = vrot.lane.b32.xlu0 %v17579_v51, %s18754_s1  ;;  %13132 = vmatprep.mubr.msk.f32.mxu0 %vm5737_vm5, %v17579_v51  ;;  %v8030_v12 = vmul.f32 %v14538_v62, %v8024_v21 }
0x3b46   :  { %13133 = vmatmul.mubr.msk.f32.vlgmr.msra.gmra.mrb[170].mxu0 %vm5737_vm5, %v17576_v35  ;;  %v17594_v5 = vadd.f32 %v8031_v20, %v8019_v4 }
0x3b47   :  { %v14540_v29 = vpop.eup %14539  ;;  %v17597_v46 = vadd.f32 %v8030_v12, %v8018_v42  ;;  %13163 = vmatpush3.msra.mxu0 %v17358_v50 }
0x3b48   :  { %v14542_v26 = vpop.eup %14541  ;;  %8302 = vrot.lane.b32.xlu1 %v17594_v5, %s18754_s1  ;;  %v8033_v1 = vmul.f32 %v14540_v29, %v8027_v54  ;;  %13194 = vmatprep.subr.mxu0 %v17244_v56  ;;  %v17626_v56 = vld [vmem:[#allocation3 + $0xc8] sm:$0xff] }
0x3b49   :  { %8300 = vrot.lane.b32.xlu0 %v17597_v46, %s18754_s1  ;;  %13135 = vmatprep.mubr.msk.f32.mxu0 %vm5737_vm5, %v17597_v46  ;;  %v8032_v41 = vmul.f32 %v14542_v26, %v8026_v16 }
0x3b4a   :  { %13136 = vmatmul.mubr.msk.f32.gmra.mrb[172].mxu0 %vm5737_vm5, %v17594_v5  ;;  %v17614_v31 = vadd.f32 %v8033_v1, %v8021_v23 }
0x3b4b   :  { %v17616_v19 = vadd.f32 %v8032_v41, %v8020_v48 }
0x3b4c   :  { %8306 = vrot.lane.b32.xlu1 %v17614_v31, %s18754_s1 }
0x3b4d   :  { %8304 = vrot.lane.b32.xlu0 %v17616_v19, %s18754_s1  ;;  %13138 = vmatprep.mubr.msk.f32.mxu0 %vm5737_vm5, %v17616_v19 }
0x3b4e   :  { %13139 = vmatmul.mubr.msk.f32.gmra.mrb[174].mxu0 %vm5737_vm5, %v17614_v31 }
0x3c19   :  { %v13134_v52 = vpop.f32.mrb[170].mxu0 }
0x3c1a   :  { %v8160_v33 = vadd.f32 %v13134_v52, %v17626_v56  ;;  %v8130_v34 = vpop.f32.mrb[171].mxu0 }
0x3c1b   :  { %v8159_v9 = vadd.f32 %v8130_v34, %v17629_v27  ;;  %v8299_v34 = vpop.permute.xlu1 %8298 }
0x3c1d   :  { %v13674_v58 = vpack.c.bf16 %v8160_v33, %v8159_v9  ;;  %v13137_v37 = vpop.f32.mrb[172].mxu0 }
0x3c1e   :  { %v8162_v63 = vadd.f32 %v13137_v37, %v17632_v28  ;;  %v8140_v13 = vpop.f32.mrb[173].mxu0 }
0x3c1f   :  { %v8161_v40 = vadd.f32 %v8140_v13, %v17635_v49  ;;  %13675 = vmatprep.subr.bf16.mxu1 %v13674_v58 }
0x3c20   :  { %13677 = vmatpush3.bf16.msra.mxu1 %v13674_v58  ;;  %v8297_v58 = vpop.permute.xlu0 %8296 }
0x3c21   :  { %v13678_v8 = vpack.c.bf16 %v8162_v63, %v8161_v40  ;;  %v13140_v14 = vpop.f32.mrb[174].mxu0 }
0x3c22   :  { %v8164_v60 = vadd.f32 %v13140_v14, %v17638_v24  ;;  %v8150_v17 = vpop.f32.mrb[175].mxu0 }
0x3c23   :  { %v8163_v25 = vadd.f32 %v8150_v17, %v17641_v57  ;;  %13679 = vmatprep.subr.bf16.mxu1 %v13678_v8 }
0x3c24   :  { %13681 = vmatpush3.bf16.msra.mxu1 %v13678_v8  ;;  %v8303_v8 = vpop.permute.xlu1 %8302 }
0x3c25   :  { %v13682_v55 = vpack.c.bf16 %v8164_v60, %v8163_v25  ;;  %v8301_v60 = vpop.permute.xlu0 %8300 }
0x3c27   :  { %13683 = vmatprep.subr.bf16.mxu1 %v13682_v55 }
0x3c28   :  { %13685 = vmatpush3.bf16.msra.mxu1 %v13682_v55 }
0x3c2b   :  { %13154 = vmatmul.mubr.msk.f32.vlgmr.msra.gmra.mrb[166].mxu1 %vm578_vm1, %v17288_v43 }
0x3c2c   :  { %13156 = vmatprep.mubr.msk.f32.mxu1 %vm578_vm1, %v17295_v44 }
0x3c2f   :  { %13157 = vmatmul.mubr.msk.f32.gmra.mrb[168].mxu1 %vm578_vm1, %v17302_v22 }
0x3c30   :  { %13159 = vmatprep.mubr.msk.f32.mxu1 %vm578_vm1, %v17309_v45 }
0x3c33   :  { %13160 = vmatmul.mubr.msk.f32.gmra.mrb[170].mxu1 %vm578_vm1, %v17316_v39 }
0x3c34   :  { %13185 = vmatprep.mubr.msk.f32.mxu1 %vm578_vm1, %v17485_v0 }
0x3cfe   :  { %v13155_v11 = vpop.f32.mrb[166].mxu1 }
0x3cff   :  { %v8237_v47 = vadd.f32 %v17492_v15, %v13155_v11  ;;  %v8231_v2 = vpop.f32.mrb[167].mxu1 }
0x3d00   :  { %v8232_v43 = vadd.f32 %v17492_v15, %v8231_v2  ;;  %v8307_v2 = vpop.permute.xlu1 %8306 }
0x3d01   :  { %v11456_v59 = vmul.f32 -1.442695, %v8237_v47 }
0x3d02   :  { %v11455_v44 = vmul.f32 -1.442695, %v8232_v43  ;;  %v13158_v61 = vpop.f32.mrb[168].mxu1 }
0x3d03   :  { %14543 = vpow2.f32 %v11456_v59  ;;  %v8247_v22 = vadd.f32 %v17492_v15, %v13158_v61  ;;  %v8241_v18 = vpop.f32.mrb[169].mxu1  ;;  %v8305_v59 = vpop.permute.xlu0 %8304 }
0x3d04   :  { %14545 = vpow2.f32 %v11455_v44  ;;  %v8242_v45 = vadd.f32 %v17492_v15, %v8241_v18 }
0x3d05   :  { %v11458_v39 = vmul.f32 -1.442695, %v8247_v22 }
0x3d06   :  { %v11457_v30 = vmul.f32 -1.442695, %v8242_v45  ;;  %v13161_v21 = vpop.f32.mrb[170].mxu1 }
0x3d07   :  { %14547 = vpow2.f32 %v11458_v39  ;;  %v8257_v62 = vadd.f32 %v17492_v15, %v13161_v21  ;;  %v8251_v4 = vpop.f32.mrb[171].mxu1  ;;  %v17691_v39 = vld [vmem:[%s18727_s8] sm:$0xff] }
0x3d08   :  { %14549 = vpow2.f32 %v11457_v30  ;;  %v8252_v20 = vadd.f32 %v17492_v15, %v8251_v4 }
0x3d09   :  { %v11460_v42 = vmul.f32 -1.442695, %v8257_v62 }
0x3d0a   :  { %v11459_v12 = vmul.f32 -1.442695, %v8252_v20 }
0x3d0b   :  { %14551 = vpow2.f32 %v11460_v42 }
0x3d0c   :  { %14553 = vpow2.f32 %v11459_v12 }
0x3d0d   :  { %v14544_v54 = vpop.eup %14543 }
0x3d0e   :  { %v14546_v29 = vpop.eup %14545  ;;  %v8279_v16 = vadd.f32 1.0, %v14544_v54 }
0x3d0f   :  { %v8278_v26 = vadd.f32 1.0, %v14546_v29 }
0x3d10   :  { %14555 = vrcp.f32 %v8279_v16 }
0x3d11   :  { %v14548_v23 = vpop.eup %14547  ;;  %14557 = vrcp.f32 %v8278_v26 }
0x3d12   :  { %v14550_v1 = vpop.eup %14549  ;;  %v8281_v48 = vadd.f32 1.0, %v14548_v23 }
0x3d13   :  { %v8280_v41 = vadd.f32 1.0, %v14550_v1 }
0x3d14   :  { %14559 = vrcp.f32 %v8281_v48 }
0x3d15   :  { %v14552_v52 = vpop.eup %14551  ;;  %14561 = vrcp.f32 %v8280_v41 }
0x3d16   :  { %v14554_v33 = vpop.eup %14553  ;;  %v8283_v9 = vadd.f32 1.0, %v14552_v52 }
0x3d17   :  { %v8282_v37 = vadd.f32 1.0, %v14554_v33 }
0x3d18   :  { %14563 = vrcp.f32 %v8283_v9 }
0x3d19   :  { %14565 = vrcp.f32 %v8282_v37 }
0x3d1a   :  { %v17662_v63 = vpop.eup %14555 }
0x3d1b   :  { %v17664_v13 = vpop.eup %14557  ;;  %v8315_v40 = vmul.f32 %v17662_v63, %v8299_v34 }
0x3d1c   :  { %v8314_v14 = vmul.f32 %v17664_v13, %v8297_v58 }
0x3d1d   :  { %8328 = vrot.lane.b32.xlu1 %v8315_v40, %s18753_s24 }
0x3d1e   :  { %v17669_v17 = vpop.eup %14559  ;;  %8326 = vrot.lane.b32.xlu0 %v8314_v14, %s18753_s24 }
0x3d1f   :  { %v17672_v25 = vpop.eup %14561  ;;  %v8317_v55 = vmul.f32 %v17669_v17, %v8303_v8 }
0x3d20   :  { %v8316_v11 = vmul.f32 %v17672_v25, %v8301_v60 }
0x3d21   :  { %8332 = vrot.lane.b32.xlu1 %v8317_v55, %s18753_s24 }
0x3d22   :  { %v17677_v47 = vpop.eup %14563  ;;  %8330 = vrot.lane.b32.xlu0 %v8316_v11, %s18753_s24 }
0x3d23   :  { %v17680_v43 = vpop.eup %14565  ;;  %v8319_v44 = vmul.f32 %v17677_v47, %v8307_v2 }
0x3d24   :  { %v8318_v61 = vmul.f32 %v17680_v43, %v8305_v59 }
0x3d25   :  { %8336 = vrot.lane.b32.xlu1 %v8319_v44, %s18753_s24  ;;  %v17717_v44 = vld [vmem:[%s18752_s26 + $0x8] sm:$0xff] }
0x3d26   :  { %8334 = vrot.lane.b32.xlu0 %v8318_v61, %s18753_s24  ;;  %v17724_v61 = vld [vmem:[%s18752_s26 + $0x10] sm:$0xff] }
0x3d8f   :  { %v8329_v22 = vpop.permute.xlu1 %8328 }
0x3d90   :  { %v8327_v18 = vpop.permute.xlu0 %8326 }
0x3d91   :  { %13164 = vmatprep.mubr.msk.f32.mxu0 %vm5737_vm5, %v8327_v18  ;;  %v17738_v18 = vld [vmem:[%s18752_s26 + $0x20] sm:$0xff] }
0x3d92   :  { %13165 = vmatmul.mubr.msk.f32.vlgmr.msra.gmra.mrb[176].mxu0 %vm5737_vm5, %v8329_v22  ;;  %v17731_v22 = vld [vmem:[%s18752_s26 + $0x18] sm:$0xff] }
0x3d93   :  { %v8333_v45 = vpop.permute.xlu1 %8332  ;;  %13195 = vmatpush3.msra.mxu0 %v17691_v39 }
0x3d94   :  { %v8331_v30 = vpop.permute.xlu0 %8330  ;;  %13226 = vmatprep.subr.mxu0 %v17358_v50 }
0x3d95   :  { %13167 = vmatprep.mubr.msk.f32.mxu0 %vm5737_vm5, %v8331_v30 }
0x3d96   :  { %13168 = vmatmul.mubr.msk.f32.gmra.mrb[178].mxu0 %vm5737_vm5, %v8333_v45  ;;  %v17745_v45 = vld [vmem:[%s18752_s26 + $0x28] sm:$0xff] }
0x3d97   :  { %v8337_v62 = vpop.permute.xlu1 %8336 }
0x3d98   :  { %v8335_v21 = vpop.permute.xlu0 %8334 }
0x3d99   :  { %13170 = vmatprep.mubr.msk.f32.mxu0 %vm5737_vm5, %v8335_v21 }
0x3d9a   :  { %13171 = vmatmul.mubr.msk.f32.gmra.mrb[180].mxu0 %vm5737_vm5, %v8337_v62 }
0x3e65   :  { %v13166_v4 = vpop.f32.mrb[176].mxu0 }
0x3e66   :  { %8453 = vrot.lane.b32.xlu1 %v13166_v4, %s14833_s22  ;;  %v8416_v20 = vpop.f32.mrb[177].mxu0 }
0x3e67   :  { %8451 = vrot.lane.b32.xlu0 %v8416_v20, %s14833_s22 }
0x3e69   :  { %v13169_v42 = vpop.f32.mrb[178].mxu0 }
0x3e6a   :  { %8457 = vrot.lane.b32.xlu1 %v13169_v42, %s14833_s22  ;;  %v8426_v50 = vpop.f32.mrb[179].mxu0 }
0x3e6b   :  { %8455 = vrot.lane.b32.xlu0 %v8426_v50, %s14833_s22 }
0x3e6d   :  { %v13172_v12 = vpop.f32.mrb[180].mxu0 }
0x3e6e   :  { %8461 = vrot.lane.b32.xlu1 %v13172_v12, %s14833_s22  ;;  %v8436_v54 = vpop.f32.mrb[181].mxu0 }
0x3e6f   :  { %8459 = vrot.lane.b32.xlu0 %v8436_v54, %s14833_s22 }
0x3ed8   :  { %v8454_v29 = vpop.permute.xlu1 %8453 }
0x3ed9   :  { %v8470_v16 = vadd.f32 %v8454_v29, %v17626_v56  ;;  %v8452_v26 = vpop.permute.xlu0 %8451 }
0x3eda   :  { %v8469_v23 = vadd.f32 %v8452_v26, %v17629_v27 }
0x3edc   :  { %v13981_v1 = vpack.i.bf16 %v8470_v16, %v8469_v23  ;;  %v8458_v48 = vpop.permute.xlu1 %8457  ;;  %v8607_v23 = vsub.f32 1.0, %v17662_v63 }
0x3edd   :  { %v8472_v41 = vadd.f32 %v8458_v48, %v17632_v28  ;;  %v8456_v52 = vpop.permute.xlu0 %8455  ;;  %v8606_v48 = vsub.f32 1.0, %v17664_v13 }
0x3ede   :  { %v8471_v33 = vadd.f32 %v8456_v52, %v17635_v49  ;;  %13982 = vrot.lane.b32.xlu0 %v13981_v1, %s14834_s25  ;;  %v8601_v52 = vmul.f32 %v17662_v63, %v17576_v35  ;;  %v8603_v35 = vmul.f32 %v17669_v17, %v17594_v5 }
0x3ee0   :  { %v13986_v34 = vpack.i.bf16 %v8472_v41, %v8471_v33  ;;  %v8462_v9 = vpop.permute.xlu1 %8461 }
0x3ee1   :  { %v8474_v58 = vadd.f32 %v8462_v9, %v17638_v24  ;;  %v8460_v37 = vpop.permute.xlu0 %8459 }
0x3ee2   :  { %v8473_v40 = vadd.f32 %v8460_v37, %v17641_v57  ;;  %13987 = vrot.lane.b32.xlu1 %v13986_v34, %s14834_s25  ;;  %v8600_v34 = vmul.f32 %v17664_v13, %v17579_v51  ;;  %v8609_v37 = vsub.f32 1.0, %v17669_v17  ;;  %v8602_v51 = vmul.f32 %v17672_v25, %v17597_v46 }
0x3ee3   :  { %v8610_v17 = vsub.f32 1.0, %v17680_v43 }
0x3ee4   :  { %v13991_v56 = vpack.i.bf16 %v8474_v58, %v8473_v40 }
0x3ee6   :  { %13992 = vrot.lane.b32.xlu0 %v13991_v56, %s14834_s25 }
0x3f50   :  { %v13983_v27 = vpop.permute.xlu0 %13982 }
0x3f51   :  { %v13985_v8 = vunpack.i.h.bf16 %v13983_v27  ;;  %v13984_v28 = vunpack.i.l.bf16 %v13983_v27  ;;  %v8608_v27 = vsub.f32 1.0, %v17672_v25  ;;  %v8605_v25 = vmul.f32 %v17677_v47, %v17614_v31  ;;  %v17818_v31 = vld [vmem:[#allocation3 + $0xf8] sm:$0xff] }
0x3f53   :  { %v13686_v14 = vpack.c.bf16 %v13985_v8, %v13984_v28 }
0x3f54   :  { %v13988_v60 = vpop.permute.xlu1 %13987 }
0x3f55   :  { %v13990_v49 = vunpack.i.h.bf16 %v13988_v60  ;;  %v13989_v55 = vunpack.i.l.bf16 %v13988_v60  ;;  %13687 = vmatprep.subr.bf16.mxu1 %v13686_v14 }
0x3f56   :  { %13689 = vmatpush3.bf16.msra.mxu1 %v13686_v14  ;;  %v8611_v14 = vsub.f32 1.0, %v17677_v47 }
0x3f57   :  { %v13690_v11 = vpack.c.bf16 %v13990_v49, %v13989_v55  ;;  %v17790_v49 = vld [vmem:[%s18728_s9] sm:$0xff] }
0x3f58   :  { %v13993_v2 = vpop.permute.xlu0 %13992 }
0x3f59   :  { %v13995_v24 = vunpack.i.h.bf16 %v13993_v2  ;;  %v13994_v59 = vunpack.i.l.bf16 %v13993_v2  ;;  %13691 = vmatprep.subr.bf16.mxu1 %v13690_v11 }
0x3f5a   :  { %13693 = vmatpush3.bf16.msra.mxu1 %v13690_v11  ;;  %v8604_v11 = vmul.f32 %v17680_v43, %v17616_v19  ;;  %v17821_v43 = vld [vmem:[#allocation3 + $0xf0] sm:$0xff] }
0x3f5b   :  { %v13694_v57 = vpack.c.bf16 %v13995_v24, %v13994_v59 }
0x3f5d   :  { %13695 = vmatprep.subr.bf16.mxu1 %v13694_v57 }
0x3f5e   :  { %13697 = vmatpush3.bf16.msra.mxu1 %v13694_v57 }
0x3f61   :  { %13186 = vmatmul.mubr.msk.f32.vlgmr.msra.gmra.mrb[172].mxu1 %vm578_vm1, %v17717_v44 }
0x3f62   :  { %13188 = vmatprep.mubr.msk.f32.mxu1 %vm578_vm1, %v17724_v61 }
0x3f65   :  { %13189 = vmatmul.mubr.msk.f32.gmra.mrb[174].mxu1 %vm578_vm1, %v17731_v22 }
0x3f66   :  { %13191 = vmatprep.mubr.msk.f32.mxu1 %vm578_vm1, %v17738_v18 }
0x3f69   :  { %13192 = vmatmul.mubr.msk.f32.gmra.mrb[176].mxu1 %vm578_vm1, %v17745_v45 }
0x3f6a   :  { %13217 = vmatprep.mubr.msk.f32.mxu1 %vm578_vm1, %v17485_v0 }
0x4034   :  { %v13187_v30 = vpop.f32.mrb[172].mxu1 }
0x4035   :  { %v8571_v21 = vadd.f32 %v17562_v6, %v13187_v30  ;;  %v8565_v62 = vpop.f32.mrb[173].mxu1 }
0x4036   :  { %v8566_v4 = vadd.f32 %v17562_v6, %v8565_v62  ;;  %v17824_v62 = vld [vmem:[#allocation3 + $0x108] sm:$0xff] }
0x4037   :  { %14567 = vtanh.f32 %v8571_v21 }
0x4038   :  { %14569 = vtanh.f32 %v8566_v4  ;;  %v13190_v20 = vpop.f32.mrb[174].mxu1 }
0x4039   :  { %v8581_v42 = vadd.f32 %v17562_v6, %v13190_v20  ;;  %v8575_v50 = vpop.f32.mrb[175].mxu1 }
0x403a   :  { %v8576_v12 = vadd.f32 %v17562_v6, %v8575_v50 }
0x403b   :  { %14571 = vtanh.f32 %v8581_v42  ;;  %v17827_v42 = vld [vmem:[#allocation3 + $0x100] sm:$0xff] }
0x403c   :  { %14573 = vtanh.f32 %v8576_v12  ;;  %v13193_v54 = vpop.f32.mrb[176].mxu1 }
0x403d   :  { %v8591_v29 = vadd.f32 %v17562_v6, %v13193_v54  ;;  %v8585_v16 = vpop.f32.mrb[177].mxu1 }
0x403e   :  { %v8586_v26 = vadd.f32 %v17562_v6, %v8585_v16 }
0x403f   :  { %14575 = vtanh.f32 %v8591_v29  ;;  %v17830_v29 = vld [vmem:[#allocation3 + $0x118] sm:$0xff] }
0x4040   :  { %14577 = vtanh.f32 %v8586_v26 }
0x4041   :  { %v14568_v1 = vpop.eup %14567 }
0x4042   :  { %v14570_v41 = vpop.eup %14569  ;;  %v8613_v33 = vmul.f32 %v14568_v1, %v8607_v23  ;;  %v17833_v23 = vld [vmem:[#allocation3 + $0x110] sm:$0xff] }
0x4043   :  { %v8612_v9 = vmul.f32 %v14570_v41, %v8606_v48 }
0x4044   :  { %v17763_v58 = vadd.f32 %v8613_v33, %v8601_v52 }
0x4045   :  { %v14572_v40 = vpop.eup %14571  ;;  %v17766_v56 = vadd.f32 %v8612_v9, %v8600_v34 }
0x4046   :  { %v14574_v8 = vpop.eup %14573  ;;  %8882 = vrot.lane.b32.xlu0 %v17763_v58, %s18754_s1  ;;  %v8615_v63 = vmul.f32 %v14572_v40, %v8609_v37 }
0x4047   :  { %8880 = vrot.lane.b32.xlu1 %v17766_v56, %s18754_s1  ;;  %13196 = vmatprep.mubr.msk.f32.mxu0 %vm5737_vm5, %v17766_v56  ;;  %v8614_v13 = vmul.f32 %v14574_v8, %v8608_v27 }
0x4048   :  { %13197 = vmatmul.mubr.msk.f32.vlgmr.msra.gmra.mrb[182].mxu0 %vm5737_vm5, %v17763_v58  ;;  %v17781_v28 = vadd.f32 %v8615_v63, %v8603_v35 }
0x4049   :  { %v14576_v60 = vpop.eup %14575  ;;  %v17784_v5 = vadd.f32 %v8614_v13, %v8602_v51  ;;  %13227 = vmatpush3.msra.mxu0 %v17790_v49 }
0x404a   :  { %v14578_v46 = vpop.eup %14577  ;;  %8886 = vrot.lane.b32.xlu0 %v17781_v28, %s18754_s1  ;;  %v8617_v55 = vmul.f32 %v14576_v60, %v8611_v14  ;;  %13258 = vmatprep.subr.mxu0 %v17691_v39 }
0x404b   :  { %8884 = vrot.lane.b32.xlu1 %v17784_v5, %s18754_s1  ;;  %13199 = vmatprep.mubr.msk.f32.mxu0 %vm5737_vm5, %v17784_v5  ;;  %v8616_v2 = vmul.f32 %v14578_v46, %v8610_v17 }
0x404c   :  { %13200 = vmatmul.mubr.msk.f32.gmra.mrb[184].mxu0 %vm5737_vm5, %v17781_v28  ;;  %v17806_v24 = vadd.f32 %v8617_v55, %v8605_v25 }
0x404d   :  { %v17808_v59 = vadd.f32 %v8616_v2, %v8604_v11 }
0x404e   :  { %8890 = vrot.lane.b32.xlu0 %v17806_v24, %s18754_s1 }
0x404f   :  { %8888 = vrot.lane.b32.xlu1 %v17808_v59, %s18754_s1  ;;  %13202 = vmatprep.mubr.msk.f32.mxu0 %vm5737_vm5, %v17808_v59 }
0x4050   :  { %13203 = vmatmul.mubr.msk.f32.gmra.mrb[186].mxu0 %vm5737_vm5, %v17806_v24 }
0x411b   :  { %v13198_v19 = vpop.f32.mrb[182].mxu0 }
0x411c   :  { %v8744_v47 = vadd.f32 %v13198_v19, %v17818_v31  ;;  %v8714_v57 = vpop.f32.mrb[183].mxu0 }
0x411d   :  { %v8743_v30 = vadd.f32 %v8714_v57, %v17821_v43 }
0x411f   :  { %v13698_v21 = vpack.c.bf16 %v8744_v47, %v8743_v30  ;;  %v13201_v4 = vpop.f32.mrb[184].mxu0 }
0x4120   :  { %v8746_v20 = vadd.f32 %v13201_v4, %v17824_v62  ;;  %v8724_v50 = vpop.f32.mrb[185].mxu0 }
0x4121   :  { %v8745_v12 = vadd.f32 %v8724_v50, %v17827_v42  ;;  %13699 = vmatprep.subr.bf16.mxu1 %v13698_v21  ;;  %v8883_v50 = vpop.permute.xlu0 %8882 }
0x4122   :  { %13701 = vmatpush3.bf16.msra.mxu1 %v13698_v21 }
0x4123   :  { %v13702_v54 = vpack.c.bf16 %v8746_v20, %v8745_v12  ;;  %v13204_v16 = vpop.f32.mrb[186].mxu0  ;;  %v8881_v12 = vpop.permute.xlu1 %8880 }
0x4124   :  { %v8748_v26 = vadd.f32 %v13204_v16, %v17830_v29  ;;  %v8734_v1 = vpop.f32.mrb[187].mxu0 }
0x4125   :  { %v8747_v48 = vadd.f32 %v8734_v1, %v17833_v23  ;;  %13703 = vmatprep.subr.bf16.mxu1 %v13702_v54 }
0x4126   :  { %13705 = vmatpush3.bf16.msra.mxu1 %v13702_v54 }
0x4127   :  { %v13706_v41 = vpack.c.bf16 %v8748_v26, %v8747_v48  ;;  %v8887_v48 = vpop.permute.xlu0 %8886 }
0x4129   :  { %13707 = vmatprep.subr.bf16.mxu1 %v13706_v41 }
0x412a   :  { %13709 = vmatpush3.bf16.msra.mxu1 %v13706_v41 }
0x412d   :  { %13218 = vmatmul.mubr.msk.f32.vlgmr.msra.gmra.mrb[178].mxu1 %vm578_vm1, %v17717_v44 }
0x412e   :  { %13220 = vmatprep.mubr.msk.f32.mxu1 %vm578_vm1, %v17724_v61 }
0x4131   :  { %13221 = vmatmul.mubr.msk.f32.gmra.mrb[180].mxu1 %vm578_vm1, %v17731_v22 }
0x4132   :  { %13223 = vmatprep.mubr.msk.f32.mxu1 %vm578_vm1, %v17738_v18 }
0x4135   :  { %13224 = vmatmul.mubr.msk.f32.gmra.mrb[182].mxu1 %vm578_vm1, %v17745_v45 }
0x4136   :  { %13249 = vmatprep.mubr.msk.f32.mxu1 %vm578_vm1, %v17485_v0 }
0x4200   :  { %v13219_v52 = vpop.f32.mrb[178].mxu1 }
0x4201   :  { %v8821_v33 = vadd.f32 %v17492_v15, %v13219_v52  ;;  %v8815_v34 = vpop.f32.mrb[179].mxu1  ;;  %v8885_v52 = vpop.permute.xlu1 %8884 }
0x4202   :  { %v8816_v9 = vadd.f32 %v17492_v15, %v8815_v34 }
0x4203   :  { %v11486_v37 = vmul.f32 -1.442695, %v8821_v33 }
0x4204   :  { %v11485_v40 = vmul.f32 -1.442695, %v8816_v9  ;;  %v13222_v27 = vpop.f32.mrb[180].mxu1 }
0x4205   :  { %14579 = vpow2.f32 %v11486_v37  ;;  %v8831_v8 = vadd.f32 %v17492_v15, %v13222_v27  ;;  %v8825_v35 = vpop.f32.mrb[181].mxu1  ;;  %v8891_v27 = vpop.permute.xlu0 %8890 }
0x4206   :  { %14581 = vpow2.f32 %v11485_v40  ;;  %v8826_v63 = vadd.f32 %v17492_v15, %v8825_v35  ;;  %v8889_v35 = vpop.permute.xlu1 %8888 }
0x4207   :  { %v11488_v51 = vmul.f32 -1.442695, %v8831_v8 }
0x4208   :  { %v11487_v13 = vmul.f32 -1.442695, %v8826_v63  ;;  %v13225_v14 = vpop.f32.mrb[182].mxu1 }
0x4209   :  { %14583 = vpow2.f32 %v11488_v51  ;;  %v8841_v0 = vadd.f32 %v17492_v15, %v13225_v14  ;;  %v8835_v60 = vpop.f32.mrb[183].mxu1 }
0x420a   :  { %14585 = vpow2.f32 %v11487_v13  ;;  %v8836_v17 = vadd.f32 %v17492_v15, %v8835_v60 }
0x420b   :  { %v11490_v46 = vmul.f32 -1.442695, %v8841_v0 }
0x420c   :  { %v11489_v25 = vmul.f32 -1.442695, %v8836_v17 }
0x420d   :  { %14587 = vpow2.f32 %v11490_v46 }
0x420e   :  { %14589 = vpow2.f32 %v11489_v25 }
0x420f   :  { %v14580_v55 = vpop.eup %14579 }
0x4210   :  { %v14582_v11 = vpop.eup %14581  ;;  %v8863_v2 = vadd.f32 1.0, %v14580_v55 }
0x4211   :  { %v8862_v19 = vadd.f32 1.0, %v14582_v11 }
0x4212   :  { %14591 = vrcp.f32 %v8863_v2 }
0x4213   :  { %v14584_v47 = vpop.eup %14583  ;;  %14593 = vrcp.f32 %v8862_v19 }
0x4214   :  { %v14586_v57 = vpop.eup %14585  ;;  %v8865_v30 = vadd.f32 1.0, %v14584_v47 }
0x4215   :  { %v8864_v21 = vadd.f32 1.0, %v14586_v57 }
0x4216   :  { %14595 = vrcp.f32 %v8865_v30 }
0x4217   :  { %v14588_v4 = vpop.eup %14587  ;;  %14597 = vrcp.f32 %v8864_v21 }
0x4218   :  { %v14590_v20 = vpop.eup %14589  ;;  %v8867_v15 = vadd.f32 1.0, %v14588_v4 }
0x4219   :  { %v8866_v54 = vadd.f32 1.0, %v14590_v20 }
0x421a   :  { %14599 = vrcp.f32 %v8867_v15 }
0x421b   :  { %14601 = vrcp.f32 %v8866_v54 }
0x421c   :  { %v17854_v16 = vpop.eup %14591 }
0x421d   :  { %v17856_v26 = vpop.eup %14593  ;;  %v8899_v1 = vmul.f32 %v17854_v16, %v8883_v50 }
0x421e   :  { %v8898_v41 = vmul.f32 %v17856_v26, %v8881_v12 }
0x421f   :  { %8912 = vrot.lane.b32.xlu0 %v8899_v1, %s18753_s24 }
0x4220   :  { %v17861_v33 = vpop.eup %14595  ;;  %8910 = vrot.lane.b32.xlu1 %v8898_v41, %s18753_s24 }
0x4221   :  { %v17864_v34 = vpop.eup %14597  ;;  %v8901_v9 = vmul.f32 %v17861_v33, %v8887_v48 }
0x4222   :  { %v8900_v37 = vmul.f32 %v17864_v34, %v8885_v52 }
0x4223   :  { %8916 = vrot.lane.b32.xlu0 %v8901_v9, %s18753_s24 }
0x4224   :  { %v17869_v40 = vpop.eup %14599  ;;  %8914 = vrot.lane.b32.xlu1 %v8900_v37, %s18753_s24 }
0x4225   :  { %v17872_v8 = vpop.eup %14601  ;;  %v8903_v63 = vmul.f32 %v17869_v40, %v8891_v27 }
0x4226   :  { %v8902_v51 = vmul.f32 %v17872_v8, %v8889_v35 }
0x4227   :  { %8920 = vrot.lane.b32.xlu0 %v8903_v63, %s18753_s24 }
0x4228   :  { %8918 = vrot.lane.b32.xlu1 %v8902_v51, %s18753_s24 }
0x4291   :  { %v8913_v13 = vpop.permute.xlu0 %8912 }
0x4292   :  { %v8911_v14 = vpop.permute.xlu1 %8910 }
0x4293   :  { %13228 = vmatprep.mubr.msk.f32.mxu0 %vm5737_vm5, %v8911_v14 }
0x4294   :  { %13229 = vmatmul.mubr.msk.f32.vlgmr.msra.gmra.mrb[188].mxu0 %vm5737_vm5, %v8913_v13 }
0x4295   :  { %v8917_v0 = vpop.permute.xlu0 %8916  ;;  %13259 = vmatpush3.msra.mxu0 %v17691_v39 }
0x4296   :  { %v8915_v60 = vpop.permute.xlu1 %8914  ;;  %13290 = vmatprep.subr.mxu0 %v17790_v49 }
0x4297   :  { %13231 = vmatprep.mubr.msk.f32.mxu0 %vm5737_vm5, %v8915_v60 }
0x4298   :  { %13232 = vmatmul.mubr.msk.f32.gmra.mrb[190].mxu0 %vm5737_vm5, %v8917_v0  ;;  %v17914_v0 = vld [vmem:[%s18752_s26] sm:$0xff] }
0x4299   :  { %v8921_v46 = vpop.permute.xlu0 %8920 }
0x429a   :  { %v8919_v17 = vpop.permute.xlu1 %8918 }
0x429b   :  { %13234 = vmatprep.mubr.msk.f32.mxu0 %vm5737_vm5, %v8919_v17 }
0x429c   :  { %13235 = vmatmul.mubr.msk.f32.gmra.mrb[192].mxu0 %vm5737_vm5, %v8921_v46 }
0x4367   :  { %v13230_v25 = vpop.f32.mrb[188].mxu0 }
0x4368   :  { %9037 = vrot.lane.b32.xlu0 %v13230_v25, %s14833_s22  ;;  %v9000_v55 = vpop.f32.mrb[189].mxu0 }
0x4369   :  { %9035 = vrot.lane.b32.xlu1 %v9000_v55, %s14833_s22 }
0x436b   :  { %v13233_v11 = vpop.f32.mrb[190].mxu0 }
0x436c   :  { %9041 = vrot.lane.b32.xlu0 %v13233_v11, %s14833_s22  ;;  %v9010_v2 = vpop.f32.mrb[191].mxu0 }
0x436d   :  { %9039 = vrot.lane.b32.xlu1 %v9010_v2, %s14833_s22 }
0x436f   :  { %v13236_v19 = vpop.f32.mrb[192].mxu0 }
0x4370   :  { %9045 = vrot.lane.b32.xlu0 %v13236_v19, %s14833_s22  ;;  %v9020_v47 = vpop.f32.mrb[193].mxu0 }
0x4371   :  { %9043 = vrot.lane.b32.xlu1 %v9020_v47, %s14833_s22 }
0x43da   :  { %v9038_v57 = vpop.permute.xlu0 %9037 }
0x43db   :  { %v9054_v30 = vadd.f32 %v9038_v57, %v17818_v31  ;;  %v9036_v21 = vpop.permute.xlu1 %9035 }
0x43dc   :  { %v9053_v4 = vadd.f32 %v9036_v21, %v17821_v43 }
0x43de   :  { %v13996_v20 = vpack.i.bf16 %v9054_v30, %v9053_v4  ;;  %v9042_v50 = vpop.permute.xlu0 %9041  ;;  %v9191_v4 = vsub.f32 1.0, %v17854_v16 }
0x43df   :  { %v9056_v15 = vadd.f32 %v9042_v50, %v17824_v62  ;;  %v9040_v12 = vpop.permute.xlu1 %9039  ;;  %v9190_v50 = vsub.f32 1.0, %v17856_v26 }
0x43e0   :  { %v9055_v54 = vadd.f32 %v9040_v12, %v17827_v42  ;;  %13997 = vrot.lane.b32.xlu1 %v13996_v20, %s14834_s25  ;;  %v9185_v12 = vmul.f32 %v17854_v16, %v17763_v58  ;;  %v9187_v58 = vmul.f32 %v17861_v33, %v17781_v28 }
0x43e2   :  { %v14001_v1 = vpack.i.bf16 %v9056_v15, %v9055_v54  ;;  %v9046_v48 = vpop.permute.xlu0 %9045 }
0x43e3   :  { %v9058_v41 = vadd.f32 %v9046_v48, %v17830_v29  ;;  %v9044_v52 = vpop.permute.xlu1 %9043 }
0x43e4   :  { %v9057_v9 = vadd.f32 %v9044_v52, %v17833_v23  ;;  %14002 = vrot.lane.b32.xlu0 %v14001_v1, %s14834_s25  ;;  %v9184_v1 = vmul.f32 %v17856_v26, %v17766_v56  ;;  %v9186_v56 = vmul.f32 %v17864_v34, %v17784_v5  ;;  %v9189_v5 = vmul.f32 %v17869_v40, %v17806_v24  ;;  %v17980_v24 = vld [vmem:[#allocation3 + $0x128] sm:$0xff] }
0x43e6   :  { %v14006_v31 = vpack.i.bf16 %v9058_v41, %v9057_v9 }
0x43e8   :  { %14007 = vrot.lane.b32.xlu1 %v14006_v31, %s14834_s25  ;;  %v9192_v31 = vsub.f32 1.0, %v17864_v34 }
0x4452   :  { %v13998_v43 = vpop.permute.xlu1 %13997 }
0x4453   :  { %v14000_v37 = vunpack.i.h.bf16 %v13998_v43  ;;  %v13999_v62 = vunpack.i.l.bf16 %v13998_v43 }
0x4455   :  { %v13710_v27 = vpack.c.bf16 %v14000_v37, %v13999_v62  ;;  %v9195_v62 = vsub.f32 1.0, %v17869_v40 }
0x4456   :  { %v14003_v35 = vpop.permute.xlu0 %14002 }
0x4457   :  { %v14005_v42 = vunpack.i.h.bf16 %v14003_v35  ;;  %v14004_v63 = vunpack.i.l.bf16 %v14003_v35  ;;  %13711 = vmatprep.subr.bf16.mxu1 %v13710_v27 }
0x4458   :  { %13713 = vmatpush3.bf16.msra.mxu1 %v13710_v27 }
0x4459   :  { %v13714_v51 = vpack.c.bf16 %v14005_v42, %v14004_v63  ;;  %v9188_v42 = vmul.f32 %v17872_v8, %v17808_v59 }
0x445a   :  { %v14008_v13 = vpop.permute.xlu1 %14007 }
0x445b   :  { %v14010_v29 = vunpack.i.h.bf16 %v14008_v13  ;;  %v14009_v14 = vunpack.i.l.bf16 %v14008_v13  ;;  %13715 = vmatprep.subr.bf16.mxu1 %v13714_v51 }
0x445c   :  { %13717 = vmatpush3.bf16.msra.mxu1 %v13714_v51 }
0x445d   :  { %v13718_v23 = vpack.c.bf16 %v14010_v29, %v14009_v14 }
0x445f   :  { %13719 = vmatprep.subr.bf16.mxu1 %v13718_v23 }
0x4460   :  { %13721 = vmatpush3.bf16.msra.mxu1 %v13718_v23 }
0x4463   :  { %13250 = vmatmul.mubr.msk.f32.vlgmr.msra.gmra.mrb[184].mxu1 %vm578_vm1, %v17717_v44 }
0x4464   :  { %13252 = vmatprep.mubr.msk.f32.mxu1 %vm578_vm1, %v17724_v61 }
0x4467   :  { %13253 = vmatmul.mubr.msk.f32.gmra.mrb[186].mxu1 %vm578_vm1, %v17731_v22 }
0x4468   :  { %13255 = vmatprep.mubr.msk.f32.mxu1 %vm578_vm1, %v17738_v18 }
0x446b   :  { %13256 = vmatmul.mubr.msk.f32.gmra.mrb[188].mxu1 %vm578_vm1, %v17745_v45 }
0x446c   :  { %13281 = vmatprep.mubr.msk.f32.mxu1 %vm578_vm1, %v17914_v0 }
0x4536   :  { %v13251_v60 = vpop.f32.mrb[184].mxu1 }
0x4537   :  { %v9155_v17 = vadd.f32 %v17562_v6, %v13251_v60  ;;  %v9149_v46 = vpop.f32.mrb[185].mxu1  ;;  %v17986_v60 = vld [vmem:[#allocation3 + $0x138] sm:$0xff] }
0x4538   :  { %v9150_v25 = vadd.f32 %v17562_v6, %v9149_v46 }
0x4539   :  { %14603 = vtanh.f32 %v9155_v17 }
0x453a   :  { %14605 = vtanh.f32 %v9150_v25  ;;  %v13254_v55 = vpop.f32.mrb[186].mxu1  ;;  %v17989_v25 = vld [vmem:[#allocation3 + $0x130] sm:$0xff] }
0x453b   :  { %v9165_v11 = vadd.f32 %v17562_v6, %v13254_v55  ;;  %v9159_v2 = vpop.f32.mrb[187].mxu1 }
0x453c   :  { %v9160_v19 = vadd.f32 %v17562_v6, %v9159_v2 }
0x453d   :  { %14607 = vtanh.f32 %v9165_v11 }
0x453e   :  { %14609 = vtanh.f32 %v9160_v19  ;;  %v13257_v47 = vpop.f32.mrb[188].mxu1  ;;  %v17992_v19 = vld [vmem:[#allocation3 + $0x148] sm:$0xff] }
0x453f   :  { %v9175_v57 = vadd.f32 %v17562_v6, %v13257_v47  ;;  %v9169_v30 = vpop.f32.mrb[189].mxu1 }
0x4540   :  { %v9170_v21 = vadd.f32 %v17562_v6, %v9169_v30  ;;  %v9193_v6 = vsub.f32 1.0, %v17861_v33  ;;  %v9194_v33 = vsub.f32 1.0, %v17872_v8  ;;  %v17983_v8 = vld [vmem:[#allocation3 + $0x120] sm:$0xff] }
0x4541   :  { %14611 = vtanh.f32 %v9175_v57  ;;  %v17995_v30 = vld [vmem:[#allocation3 + $0x140] sm:$0xff] }
0x4542   :  { %14613 = vtanh.f32 %v9170_v21 }
0x4543   :  { %v14604_v20 = vpop.eup %14603 }
0x4544   :  { %v14606_v15 = vpop.eup %14605  ;;  %v9197_v54 = vmul.f32 %v14604_v20, %v9191_v4 }
0x4545   :  { %v9196_v48 = vmul.f32 %v14606_v15, %v9190_v50  ;;  %v18013_v15 = vld [vmem:[%s18729_s10] ss:$0 sm:$0xff] }
0x4546   :  { %v17930_v41 = vadd.f32 %v9197_v54, %v9185_v12 }
0x4547   :  { %v14608_v52 = vpop.eup %14607  ;;  %v17933_v9 = vadd.f32 %v9196_v48, %v9184_v1 }
0x4548   :  { %v14610_v43 = vpop.eup %14609  ;;  %9466 = vrot.lane.b32.xlu1 %v17930_v41, %s18754_s1  ;;  %v9199_v16 = vmul.f32 %v14608_v52, %v9193_v6 }
0x4549   :  { %9464 = vrot.lane.b32.xlu0 %v17933_v9, %s18754_s1  ;;  %13260 = vmatprep.mubr.msk.f32.mxu0 %vm5737_vm5, %v17933_v9  ;;  %v9198_v26 = vmul.f32 %v14610_v43, %v9192_v31 }
0x454a   :  { %13261 = vmatmul.mubr.msk.f32.vlgmr.msra.gmra.mrb[194].mxu0 %vm5737_vm5, %v17930_v41  ;;  %v17948_v37 = vadd.f32 %v9199_v16, %v9187_v58 }
0x454b   :  { %v14612_v27 = vpop.eup %14611  ;;  %v17951_v28 = vadd.f32 %v9198_v26, %v9186_v56  ;;  %13291 = vmatpush3.msra.mxu0 %v17790_v49 }
0x454c   :  { %v14614_v35 = vpop.eup %14613  ;;  %9470 = vrot.lane.b32.xlu1 %v17948_v37, %s18754_s1  ;;  %v9201_v34 = vmul.f32 %v14612_v27, %v9195_v62  ;;  %13322 = vmatprep.subr.mxu0 %v17691_v39 }
0x454d   :  { %9468 = vrot.lane.b32.xlu0 %v17951_v28, %s18754_s1  ;;  %13263 = vmatprep.mubr.msk.f32.mxu0 %vm5737_vm5, %v17951_v28  ;;  %v9200_v63 = vmul.f32 %v14614_v35, %v9194_v33 }
0x454e   :  { %13264 = vmatmul.mubr.msk.f32.gmra.mrb[196].mxu0 %vm5737_vm5, %v17948_v37  ;;  %v17968_v51 = vadd.f32 %v9201_v34, %v9189_v5 }
0x454f   :  { %v17970_v13 = vadd.f32 %v9200_v63, %v9188_v42 }
0x4550   :  { %9474 = vrot.lane.b32.xlu1 %v17968_v51, %s18754_s1 }
0x4551   :  { %9472 = vrot.lane.b32.xlu0 %v17970_v13, %s18754_s1  ;;  %13266 = vmatprep.mubr.msk.f32.mxu0 %vm5737_vm5, %v17970_v13 }
0x4552   :  { %13267 = vmatmul.mubr.msk.f32.gmra.mrb[198].mxu0 %vm5737_vm5, %v17968_v51 }
0x461d   :  { %v13262_v59 = vpop.f32.mrb[194].mxu0 }
0x461e   :  { %v9328_v40 = vadd.f32 %v13262_v59, %v17980_v24  ;;  %v9298_v29 = vpop.f32.mrb[195].mxu0 }
0x461f   :  { %v9327_v14 = vadd.f32 %v9298_v29, %v17983_v8 }
0x4621   :  { %v13722_v23 = vpack.c.bf16 %v9328_v40, %v9327_v14  ;;  %v13265_v17 = vpop.f32.mrb[196].mxu0 }
0x4622   :  { %v9330_v46 = vadd.f32 %v13265_v17, %v17986_v60  ;;  %v9308_v55 = vpop.f32.mrb[197].mxu0 }
0x4623   :  { %v9329_v11 = vadd.f32 %v9308_v55, %v17989_v25  ;;  %13723 = vmatprep.subr.bf16.mxu1 %v13722_v23  ;;  %v9467_v55 = vpop.permute.xlu1 %9466 }
0x4624   :  { %13725 = vmatpush3.bf16.msra.mxu1 %v13722_v23 }
0x4625   :  { %v13726_v2 = vpack.c.bf16 %v9330_v46, %v9329_v11  ;;  %v13268_v47 = vpop.f32.mrb[198].mxu0 }
0x4626   :  { %v9332_v57 = vadd.f32 %v13268_v47, %v17992_v19  ;;  %v9318_v21 = vpop.f32.mrb[199].mxu0 }
0x4627   :  { %v9331_v4 = vadd.f32 %v9318_v21, %v17995_v30  ;;  %13727 = vmatprep.subr.bf16.mxu1 %v13726_v2 }
0x4628   :  { %13729 = vmatpush3.bf16.msra.mxu1 %v13726_v2  ;;  %v9465_v2 = vpop.permute.xlu0 %9464 }
0x4629   :  { %v13730_v20 = vpack.c.bf16 %v9332_v57, %v9331_v4 }
0x462b   :  { %13731 = vmatprep.subr.bf16.mxu1 %v13730_v20 }
0x462c   :  { %13733 = vmatpush3.bf16.msra.mxu1 %v13730_v20  ;;  %v9471_v20 = vpop.permute.xlu1 %9470 }
0x462f   :  { %13282 = vmatmul.mubr.msk.f32.vlgmr.msra.gmra.mrb[190].mxu1 %vm578_vm1, %v17717_v44 }
0x4630   :  { %13284 = vmatprep.mubr.msk.f32.mxu1 %vm578_vm1, %v17724_v61 }
0x4633   :  { %13285 = vmatmul.mubr.msk.f32.gmra.mrb[192].mxu1 %vm578_vm1, %v17731_v22 }
0x4634   :  { %13287 = vmatprep.mubr.msk.f32.mxu1 %vm578_vm1, %v17738_v18 }
0x4637   :  { %13288 = vmatmul.mubr.msk.f32.gmra.mrb[194].mxu1 %vm578_vm1, %v17745_v45 }
0x4638   :  { %13313 = vmatprep.mubr.msk.f32.mxu1 %vm578_vm1, %v17914_v0 }
0x4702   :  { %v13283_v50 = vpop.f32.mrb[190].mxu1 }
0x4703   :  { %v9405_v12 = vadd.f32 %v18013_v15, %v13283_v50  ;;  %v9399_v54 = vpop.f32.mrb[191].mxu1 }
0x4704   :  { %v9400_v1 = vadd.f32 %v18013_v15, %v9399_v54 }
0x4705   :  { %v11516_v48 = vmul.f32 -1.442695, %v9405_v12  ;;  %v9469_v12 = vpop.permute.xlu0 %9468 }
0x4706   :  { %v11515_v6 = vmul.f32 -1.442695, %v9400_v1  ;;  %v13286_v52 = vpop.f32.mrb[192].mxu1 }
0x4707   :  { %14615 = vpow2.f32 %v11516_v48  ;;  %v9415_v31 = vadd.f32 %v18013_v15, %v13286_v52  ;;  %v9409_v43 = vpop.f32.mrb[193].mxu1 }
0x4708   :  { %14617 = vpow2.f32 %v11515_v6  ;;  %v9410_v58 = vadd.f32 %v18013_v15, %v9409_v43 }
0x4709   :  { %v11518_v16 = vmul.f32 -1.442695, %v9415_v31  ;;  %v9475_v31 = vpop.permute.xlu1 %9474 }
0x470a   :  { %v11517_v56 = vmul.f32 -1.442695, %v9410_v58  ;;  %v13289_v26 = vpop.f32.mrb[194].mxu1  ;;  %v9473_v58 = vpop.permute.xlu0 %9472 }
0x470b   :  { %14619 = vpow2.f32 %v11518_v16  ;;  %v9425_v62 = vadd.f32 %v18013_v15, %v13289_v26  ;;  %v9419_v27 = vpop.f32.mrb[195].mxu1 }
0x470c   :  { %14621 = vpow2.f32 %v11517_v56  ;;  %v9420_v33 = vadd.f32 %v18013_v15, %v9419_v27 }
0x470d   :  { %v11520_v35 = vmul.f32 -1.442695, %v9425_v62 }
0x470e   :  { %v11519_v5 = vmul.f32 -1.442695, %v9420_v33 }
0x470f   :  { %14623 = vpow2.f32 %v11520_v35 }
0x4710   :  { %14625 = vpow2.f32 %v11519_v5 }
0x4711   :  { %v14616_v34 = vpop.eup %14615 }
0x4712   :  { %v14618_v42 = vpop.eup %14617  ;;  %v9447_v63 = vadd.f32 1.0, %v14616_v34 }
0x4713   :  { %v9446_v59 = vadd.f32 1.0, %v14618_v42 }
0x4714   :  { %14627 = vrcp.f32 %v9447_v63 }
0x4715   :  { %v14620_v40 = vpop.eup %14619  ;;  %14629 = vrcp.f32 %v9446_v59 }
0x4716   :  { %v14622_v29 = vpop.eup %14621  ;;  %v9449_v14 = vadd.f32 1.0, %v14620_v40 }
0x4717   :  { %v9448_v23 = vadd.f32 1.0, %v14622_v29 }
0x4718   :  { %14631 = vrcp.f32 %v9449_v14 }
0x4719   :  { %v14624_v17 = vpop.eup %14623  ;;  %14633 = vrcp.f32 %v9448_v23 }
0x471a   :  { %v14626_v46 = vpop.eup %14625  ;;  %v9451_v11 = vadd.f32 1.0, %v14624_v17 }
0x471b   :  { %v9450_v47 = vadd.f32 1.0, %v14626_v46 }
0x471c   :  { %14635 = vrcp.f32 %v9451_v11 }
0x471d   :  { %14637 = vrcp.f32 %v9450_v47 }
0x471e   :  { %v18021_v57 = vpop.eup %14627 }
0x471f   :  { %v18023_v21 = vpop.eup %14629  ;;  %v9483_v4 = vmul.f32 %v18021_v57, %v9467_v55 }
0x4720   :  { %v9482_v50 = vmul.f32 %v18023_v21, %v9465_v2 }
0x4721   :  { %9496 = vrot.lane.b32.xlu1 %v9483_v4, %s18753_s24 }
0x4722   :  { %v18028_v54 = vpop.eup %14631  ;;  %9494 = vrot.lane.b32.xlu0 %v9482_v50, %s18753_s24 }
0x4723   :  { %v18031_v1 = vpop.eup %14633  ;;  %v9485_v48 = vmul.f32 %v18028_v54, %v9471_v20 }
0x4724   :  { %v9484_v6 = vmul.f32 %v18031_v1, %v9469_v12 }
0x4725   :  { %9500 = vrot.lane.b32.xlu1 %v9485_v48, %s18753_s24 }
0x4726   :  { %v18036_v52 = vpop.eup %14635  ;;  %9498 = vrot.lane.b32.xlu0 %v9484_v6, %s18753_s24 }
0x4727   :  { %v18039_v43 = vpop.eup %14637  ;;  %v9487_v16 = vmul.f32 %v18036_v52, %v9475_v31 }
0x4728   :  { %v9486_v56 = vmul.f32 %v18039_v43, %v9473_v58 }
0x4729   :  { %9504 = vrot.lane.b32.xlu1 %v9487_v16, %s18753_s24 }
0x472a   :  { %9502 = vrot.lane.b32.xlu0 %v9486_v56, %s18753_s24 }
0x4793   :  { %v9497_v26 = vpop.permute.xlu1 %9496 }
0x4794   :  { %v9495_v62 = vpop.permute.xlu0 %9494 }
0x4795   :  { %13292 = vmatprep.mubr.msk.f32.mxu0 %vm5737_vm5, %v9495_v62 }
0x4796   :  { %13293 = vmatmul.mubr.msk.f32.vlgmr.msra.gmra.mrb[200].mxu0 %vm5737_vm5, %v9497_v26 }
0x4797   :  { %v9501_v27 = vpop.permute.xlu1 %9500  ;;  %13323 = vmatpush3.msra.mxu0 %v17691_v39 }
0x4798   :  { %v9499_v33 = vpop.permute.xlu0 %9498  ;;  %13354 = vmatprep.subr.mxu0 %v17790_v49 }
0x4799   :  { %13295 = vmatprep.mubr.msk.f32.mxu0 %vm5737_vm5, %v9499_v33 }
0x479a   :  { %13296 = vmatmul.mubr.msk.f32.gmra.mrb[202].mxu0 %vm5737_vm5, %v9501_v27 }
0x479b   :  { %v9505_v5 = vpop.permute.xlu1 %9504 }
0x479c   :  { %v9503_v35 = vpop.permute.xlu0 %9502 }
0x479d   :  { %13298 = vmatprep.mubr.msk.f32.mxu0 %vm5737_vm5, %v9503_v35 }
0x479e   :  { %13299 = vmatmul.mubr.msk.f32.gmra.mrb[204].mxu0 %vm5737_vm5, %v9505_v5 }
0x4869   :  { %v13294_v34 = vpop.f32.mrb[200].mxu0 }
0x486a   :  { %9621 = vrot.lane.b32.xlu1 %v13294_v34, %s14833_s22  ;;  %v9584_v42 = vpop.f32.mrb[201].mxu0 }
0x486b   :  { %9619 = vrot.lane.b32.xlu0 %v9584_v42, %s14833_s22 }
0x486d   :  { %v13297_v39 = vpop.f32.mrb[202].mxu0 }
0x486e   :  { %9625 = vrot.lane.b32.xlu1 %v13297_v39, %s14833_s22  ;;  %v9594_v63 = vpop.f32.mrb[203].mxu0 }
0x486f   :  { %9623 = vrot.lane.b32.xlu0 %v9594_v63, %s14833_s22 }
0x4871   :  { %v13300_v59 = vpop.f32.mrb[204].mxu0 }
0x4872   :  { %9629 = vrot.lane.b32.xlu1 %v13300_v59, %s14833_s22  ;;  %v9604_v40 = vpop.f32.mrb[205].mxu0  ;;  %v9775_v59 = vsub.f32 1.0, %v18021_v57 }
0x4873   :  { %9627 = vrot.lane.b32.xlu0 %v9604_v40, %s14833_s22 }
0x48dc   :  { %v9622_v29 = vpop.permute.xlu1 %9621 }
0x48dd   :  { %v9638_v14 = vadd.f32 %v9622_v29, %v17980_v24  ;;  %v9620_v23 = vpop.permute.xlu0 %9619  ;;  %v9774_v29 = vsub.f32 1.0, %v18023_v21 }
0x48de   :  { %v9637_v17 = vadd.f32 %v9620_v23, %v17983_v8  ;;  %v9769_v23 = vmul.f32 %v18021_v57, %v17930_v41  ;;  %v9771_v41 = vmul.f32 %v18028_v54, %v17948_v37 }
0x48e0   :  { %v14011_v46 = vpack.i.bf16 %v9638_v14, %v9637_v17  ;;  %v9626_v55 = vpop.permute.xlu1 %9625 }
0x48e1   :  { %v9640_v11 = vadd.f32 %v9626_v55, %v17986_v60  ;;  %v9624_v2 = vpop.permute.xlu0 %9623 }
0x48e2   :  { %v9639_v47 = vadd.f32 %v9624_v2, %v17989_v25  ;;  %14012 = vrot.lane.b32.xlu0 %v14011_v46, %s14834_s25  ;;  %v9768_v46 = vmul.f32 %v18023_v21, %v17933_v9  ;;  %v9777_v2 = vsub.f32 1.0, %v18028_v54  ;;  %v9770_v9 = vmul.f32 %v18031_v1, %v17951_v28 }
0x48e3   :  { %v9778_v54 = vsub.f32 1.0, %v18039_v43  ;;  %v9773_v28 = vmul.f32 %v18036_v52, %v17968_v51  ;;  %v18146_v51 = vld [vmem:[#allocation3 + $0x158] sm:$0xff] }
0x48e4   :  { %v14016_v4 = vpack.i.bf16 %v9640_v11, %v9639_v47  ;;  %v9630_v20 = vpop.permute.xlu1 %9629 }
0x48e5   :  { %v9642_v50 = vadd.f32 %v9630_v20, %v17992_v19  ;;  %v9628_v12 = vpop.permute.xlu0 %9627  ;;  %v9776_v20 = vsub.f32 1.0, %v18031_v1 }
0x48e6   :  { %v9641_v48 = vadd.f32 %v9628_v12, %v17995_v30  ;;  %14017 = vrot.lane.b32.xlu1 %v14016_v4, %s14834_s25 }
0x48e8   :  { %v14021_v24 = vpack.i.bf16 %v9642_v50, %v9641_v48  ;;  %v9779_v48 = vsub.f32 1.0, %v18036_v52 }
0x48ea   :  { %14022 = vrot.lane.b32.xlu0 %v14021_v24, %s14834_s25 }
0x4954   :  { %v14013_v8 = vpop.permute.xlu0 %14012 }
0x4955   :  { %v14015_v6 = vunpack.i.h.bf16 %v14013_v8  ;;  %v14014_v60 = vunpack.i.l.bf16 %v14013_v8 }
0x4957   :  { %v13734_v31 = vpack.c.bf16 %v14015_v6, %v14014_v60  ;;  %v9772_v6 = vmul.f32 %v18039_v43, %v17970_v13  ;;  %v18149_v43 = vld [vmem:[#allocation3 + $0x150] sm:$0xff] }
0x4958   :  { %v14018_v58 = vpop.permute.xlu1 %14017 }
0x4959   :  { %v14020_v25 = vunpack.i.h.bf16 %v14018_v58  ;;  %v14019_v16 = vunpack.i.l.bf16 %v14018_v58  ;;  %13735 = vmatprep.subr.bf16.mxu1 %v13734_v31 }
0x495a   :  { %13737 = vmatpush3.bf16.msra.mxu1 %v13734_v31 }
0x495b   :  { %v13738_v56 = vpack.c.bf16 %v14020_v25, %v14019_v16 }
0x495c   :  { %v14023_v26 = vpop.permute.xlu0 %14022 }
0x495d   :  { %v14025_v19 = vunpack.i.h.bf16 %v14023_v26  ;;  %v14024_v62 = vunpack.i.l.bf16 %v14023_v26  ;;  %13739 = vmatprep.subr.bf16.mxu1 %v13738_v56 }
0x495e   :  { %13741 = vmatpush3.bf16.msra.mxu1 %v13738_v56  ;;  %v18152_v56 = vld [vmem:[#allocation3 + $0x168] sm:$0xff] }
0x495f   :  { %v13742_v30 = vpack.c.bf16 %v14025_v19, %v14024_v62  ;;  %v18155_v62 = vld [vmem:[#allocation3 + $0x160] sm:$0xff] }
0x4961   :  { %13743 = vmatprep.subr.bf16.mxu1 %v13742_v30 }
0x4962   :  { %13745 = vmatpush3.bf16.msra.mxu1 %v13742_v30 }
0x4965   :  { %13314 = vmatmul.mubr.msk.f32.vlgmr.msra.gmra.mrb[196].mxu1 %vm578_vm1, %v17717_v44  ;;  %v18083_v44 = vld [vmem:[%s18730_s11] ss:$0 sm:$0xff]  ;;  %s14847_s11 = smov [#allocation7]  }
0x4966   :  { %13316 = vmatprep.mubr.msk.f32.mxu1 %vm578_vm1, %v17724_v61 }
0x4969   :  { %13317 = vmatmul.mubr.msk.f32.gmra.mrb[198].mxu1 %vm578_vm1, %v17731_v22 }
0x496a   :  { %13319 = vmatprep.mubr.msk.f32.mxu1 %vm578_vm1, %v17738_v18 }
0x496d   :  { %13320 = vmatmul.mubr.msk.f32.gmra.mrb[200].mxu1 %vm578_vm1, %v17745_v45 }
0x496e   :  { %13345 = vmatprep.mubr.msk.f32.mxu1 %vm578_vm1, %v17914_v0 }
0x4a38   :  { %v13315_v27 = vpop.f32.mrb[196].mxu1 }
0x4a39   :  { %v9739_v61 = vadd.f32 %v18083_v44, %v13315_v27  ;;  %v9733_v33 = vpop.f32.mrb[197].mxu1 }
0x4a3a   :  { %v9734_v22 = vadd.f32 %v18083_v44, %v9733_v33  ;;  %v18158_v33 = vld [vmem:[#allocation3 + $0x178] sm:$0xff] }
0x4a3b   :  { %14639 = vtanh.f32 %v9739_v61 }
0x4a3c   :  { %14641 = vtanh.f32 %v9734_v22  ;;  %v13318_v18 = vpop.f32.mrb[198].mxu1 }
0x4a3d   :  { %v9749_v35 = vadd.f32 %v18083_v44, %v13318_v18  ;;  %v9743_v45 = vpop.f32.mrb[199].mxu1 }
0x4a3e   :  { %v9744_v5 = vadd.f32 %v18083_v44, %v9743_v45 }
0x4a3f   :  { %14643 = vtanh.f32 %v9749_v35  ;;  %v18161_v35 = vld [vmem:[#allocation3 + $0x170] sm:$0xff] }
0x4a40   :  { %14645 = vtanh.f32 %v9744_v5  ;;  %v13321_v34 = vpop.f32.mrb[200].mxu1 }
0x4a41   :  { %v9759_v42 = vadd.f32 %v18083_v44, %v13321_v34  ;;  %v9753_v39 = vpop.f32.mrb[201].mxu1 }
0x4a42   :  { %v9754_v63 = vadd.f32 %v18083_v44, %v9753_v39  ;;  %v18174_v39 = vld [vmem:[%s18752_s26 + $0x10] sm:$0xff] }
0x4a43   :  { %14647 = vtanh.f32 %v9759_v42  ;;  %v18167_v42 = vld [vmem:[%s18752_s26 + $0x8] sm:$0xff] }
0x4a44   :  { %14649 = vtanh.f32 %v9754_v63  ;;  %v18181_v63 = vld [vmem:[%s18752_s26 + $0x18] sm:$0xff] }
0x4a45   :  { %v14640_v40 = vpop.eup %14639 }
0x4a46   :  { %v14642_v14 = vpop.eup %14641  ;;  %v9781_v17 = vmul.f32 %v14640_v40, %v9775_v59  ;;  %v18188_v59 = vld [vmem:[%s18752_s26 + $0x20] sm:$0xff]  ;;  %v18195_v40 = vld [vmem:[%s18752_s26 + $0x28] sm:$0xff] }
0x4a47   :  { %v9780_v55 = vmul.f32 %v14642_v14, %v9774_v29 }
0x4a48   :  { %v18097_v11 = vadd.f32 %v9781_v17, %v9769_v23 }
0x4a49   :  { %v14644_v47 = vpop.eup %14643  ;;  %v18100_v4 = vadd.f32 %v9780_v55, %v9768_v46 }
0x4a4a   :  { %v14646_v50 = vpop.eup %14645  ;;  %10050 = vrot.lane.b32.xlu0 %v18097_v11, %s18754_s1  ;;  %v9783_v57 = vmul.f32 %v14644_v47, %v9777_v2 }
0x4a4b   :  { %10048 = vrot.lane.b32.xlu1 %v18100_v4, %s18754_s1  ;;  %13324 = vmatprep.mubr.msk.f32.mxu0 %vm5737_vm5, %v18100_v4  ;;  %v9782_v21 = vmul.f32 %v14646_v50, %v9776_v20 }
0x4a4c   :  { %13325 = vmatmul.mubr.msk.f32.vlgmr.msra.gmra.mrb[206].mxu0 %vm5737_vm5, %v18097_v11  ;;  %v18115_v12 = vadd.f32 %v9783_v57, %v9771_v41 }
0x4a4d   :  { %v14648_v24 = vpop.eup %14647  ;;  %v18118_v37 = vadd.f32 %v9782_v21, %v9770_v9  ;;  %13355 = vmatpush3.msra.mxu0 %v17790_v49 }
0x4a4e   :  { %v14650_v8 = vpop.eup %14649  ;;  %10054 = vrot.lane.b32.xlu0 %v18115_v12, %s18754_s1  ;;  %v9785_v1 = vmul.f32 %v14648_v24, %v9779_v48 }
0x4a4f   :  { %10052 = vrot.lane.b32.xlu1 %v18118_v37, %s18754_s1  ;;  %13327 = vmatprep.mubr.msk.f32.mxu0 %vm5737_vm5, %v18118_v37  ;;  %v9784_v60 = vmul.f32 %v14650_v8, %v9778_v54 }
0x4a50   :  { %13328 = vmatmul.mubr.msk.f32.gmra.mrb[208].mxu0 %vm5737_vm5, %v18115_v12  ;;  %v18134_v49 = vadd.f32 %v9785_v1, %v9773_v28 }
0x4a51   :  { %v18136_v31 = vadd.f32 %v9784_v60, %v9772_v6 }
0x4a52   :  { %10058 = vrot.lane.b32.xlu0 %v18134_v49, %s18754_s1 }
0x4a53   :  { %10056 = vrot.lane.b32.xlu1 %v18136_v31, %s18754_s1  ;;  %13330 = vmatprep.mubr.msk.f32.mxu0 %vm5737_vm5, %v18136_v31  ;;  %s11000_s1 = sshll.u32 %s14847_s11, 4  ;;  %s11001_s1 = int_to_ptr.vmem [resolvable:$true] %s11000_s1 }
0x4a54   :  { %13331 = vmatmul.mubr.msk.f32.gmra.mrb[210].mxu0 %vm5737_vm5, %v18134_v49  ;;  %p14762_p1 = scmp.lt.s32.totalorder %s11001_s1, %s11001_s1 }
0x4b1f   :  { %v13326_v13 = vpop.f32.mrb[206].mxu0 }
0x4b20   :  { %v9912_v52 = vadd.f32 %v13326_v13, %v18146_v51  ;;  %v9882_v58 = vpop.f32.mrb[207].mxu0 }
0x4b21   :  { %v9911_v25 = vadd.f32 %v9882_v58, %v18149_v43 }
0x4b23   :  { %v13746_v16 = vpack.c.bf16 %v9912_v52, %v9911_v25  ;;  %v13329_v26 = vpop.f32.mrb[208].mxu0 }
0x4b24   :  { %v9914_v19 = vadd.f32 %v13329_v26, %v18152_v56  ;;  %v9892_v30 = vpop.f32.mrb[209].mxu0  ;;  %v10051_v26 = vpop.permute.xlu0 %10050 }
0x4b25   :  { %v9913_v27 = vadd.f32 %v9892_v30, %v18155_v62  ;;  %13747 = vmatprep.subr.bf16.mxu1 %v13746_v16 }
0x4b26   :  { %13749 = vmatpush3.bf16.msra.mxu1 %v13746_v16 }
0x4b27   :  { %v13750_v61 = vpack.c.bf16 %v9914_v19, %v9913_v27  ;;  %v13332_v22 = vpop.f32.mrb[210].mxu0  ;;  %v10049_v19 = vpop.permute.xlu1 %10048 }
0x4b28   :  { %v9916_v18 = vadd.f32 %v13332_v22, %v18158_v33  ;;  %v9902_v45 = vpop.f32.mrb[211].mxu0 }
0x4b29   :  { %v9915_v5 = vadd.f32 %v9902_v45, %v18161_v35  ;;  %13751 = vmatprep.subr.bf16.mxu1 %v13750_v61 }
0x4b2a   :  { %13753 = vmatpush3.bf16.msra.mxu1 %v13750_v61 }
0x4b2b   :  { %v13754_v34 = vpack.c.bf16 %v9916_v18, %v9915_v5  ;;  %v10055_v18 = vpop.permute.xlu0 %10054  ;;  %v10053_v5 = vpop.permute.xlu1 %10052 }
0x4b2d   :  { %13755 = vmatprep.subr.bf16.mxu1 %v13754_v34 }
0x4b2e   :  { %13757 = vmatpush3.bf16.msra.mxu1 %v13754_v34 }
0x4b31   :  { %13346 = vmatmul.mubr.msk.f32.vlgmr.msra.gmra.mrb[202].mxu1 %vm578_vm1, %v18167_v42 }
0x4b32   :  { %13348 = vmatprep.mubr.msk.f32.mxu1 %vm578_vm1, %v18174_v39 }
0x4b35   :  { %13349 = vmatmul.mubr.msk.f32.gmra.mrb[204].mxu1 %vm578_vm1, %v18181_v63 }
0x4b36   :  { %13351 = vmatprep.mubr.msk.f32.mxu1 %vm578_vm1, %v18188_v59 }
0x4b39   :  { %13352 = vmatmul.mubr.msk.f32.gmra.mrb[206].mxu1 %vm578_vm1, %v18195_v40 }
0x4b3a   :  { %13377 = vmatprep.mubr.msk.f32.mxu1 %vm578_vm1, %v17914_v0 }
0x4c04   :  { %v13347_v29 = vpop.f32.mrb[202].mxu1 }
0x4c05   :  { %v9989_v14 = vadd.f32 %v18013_v15, %v13347_v29  ;;  %v9983_v23 = vpop.f32.mrb[203].mxu1 }
0x4c06   :  { %v9984_v17 = vadd.f32 %v18013_v15, %v9983_v23 }
0x4c07   :  { %v11546_v46 = vmul.f32 -1.442695, %v9989_v14 }
0x4c08   :  { %v11545_v55 = vmul.f32 -1.442695, %v9984_v17  ;;  %v13350_v2 = vpop.f32.mrb[204].mxu1 }
0x4c09   :  { %14651 = vpow2.f32 %v11546_v46  ;;  %v9999_v47 = vadd.f32 %v18013_v15, %v13350_v2  ;;  %v9993_v20 = vpop.f32.mrb[205].mxu1  ;;  %v10059_v46 = vpop.permute.xlu0 %10058 }
0x4c0a   :  { %14653 = vpow2.f32 %v11545_v55  ;;  %v9994_v50 = vadd.f32 %v18013_v15, %v9993_v20  ;;  %v10057_v2 = vpop.permute.xlu1 %10056 }
0x4c0b   :  { %v11548_v41 = vmul.f32 -1.442695, %v9999_v47 }
0x4c0c   :  { %v11547_v57 = vmul.f32 -1.442695, %v9994_v50  ;;  %v13353_v9 = vpop.f32.mrb[206].mxu1 }
0x4c0d   :  { %14655 = vpow2.f32 %v11548_v41  ;;  %v10009_v0 = vadd.f32 %v18013_v15, %v13353_v9  ;;  %v10003_v21 = vpop.f32.mrb[207].mxu1 }
0x4c0e   :  { %14657 = vpow2.f32 %v11547_v57  ;;  %v10004_v48 = vadd.f32 %v18013_v15, %v10003_v21 }
0x4c0f   :  { %v11550_v24 = vmul.f32 -1.442695, %v10009_v0 }
0x4c10   :  { %v11549_v54 = vmul.f32 -1.442695, %v10004_v48 }
0x4c11   :  { %14659 = vpow2.f32 %v11550_v24 }
0x4c12   :  { %14661 = vpow2.f32 %v11549_v54 }
0x4c13   :  { %v14652_v8 = vpop.eup %14651 }
0x4c14   :  { %v14654_v28 = vpop.eup %14653  ;;  %v10031_v1 = vadd.f32 1.0, %v14652_v8 }
0x4c15   :  { %v10030_v6 = vadd.f32 1.0, %v14654_v28 }
0x4c16   :  { %14663 = vrcp.f32 %v10031_v1 }
0x4c17   :  { %v14656_v60 = vpop.eup %14655  ;;  %14665 = vrcp.f32 %v10030_v6 }
0x4c18   :  { %v14658_v13 = vpop.eup %14657  ;;  %v10033_v52 = vadd.f32 1.0, %v14656_v60 }
0x4c19   :  { %v10032_v58 = vadd.f32 1.0, %v14658_v13 }
0x4c1a   :  { %14667 = vrcp.f32 %v10033_v52 }
0x4c1b   :  { %v14660_v25 = vpop.eup %14659  ;;  %14669 = vrcp.f32 %v10032_v58 }
0x4c1c   :  { %v14662_v16 = vpop.eup %14661  ;;  %v10035_v15 = vadd.f32 1.0, %v14660_v25 }
0x4c1d   :  { %v10034_v30 = vadd.f32 1.0, %v14662_v16 }
0x4c1e   :  { %14671 = vrcp.f32 %v10035_v15 }
0x4c1f   :  { %14673 = vrcp.f32 %v10034_v30 }
0x4c20   :  { %v18207_v27 = vpop.eup %14663 }
0x4c21   :  { %v18209_v61 = vpop.eup %14665  ;;  %v10067_v22 = vmul.f32 %v18207_v27, %v10051_v26 }
0x4c22   :  { %v10066_v45 = vmul.f32 %v18209_v61, %v10049_v19 }
0x4c23   :  { %10080 = vrot.lane.b32.xlu0 %v10067_v22, %s18753_s24 }
0x4c24   :  { %v18214_v34 = vpop.eup %14667  ;;  %10078 = vrot.lane.b32.xlu1 %v10066_v45, %s18753_s24 }
0x4c25   :  { %v18217_v29 = vpop.eup %14669  ;;  %v10069_v14 = vmul.f32 %v18214_v34, %v10055_v18 }
0x4c26   :  { %v10068_v23 = vmul.f32 %v18217_v29, %v10053_v5 }
0x4c27   :  { %10084 = vrot.lane.b32.xlu0 %v10069_v14, %s18753_s24 }
0x4c28   :  { %v18222_v17 = vpop.eup %14671  ;;  %10082 = vrot.lane.b32.xlu1 %v10068_v23, %s18753_s24 }
0x4c29   :  { %v18225_v55 = vpop.eup %14673  ;;  %v10071_v47 = vmul.f32 %v18222_v17, %v10059_v46 }
0x4c2a   :  { %v10070_v20 = vmul.f32 %v18225_v55, %v10057_v2 }
0x4c2b   :  { %10088 = vrot.lane.b32.xlu0 %v10071_v47, %s18753_s24 }
0x4c2c   :  { %10086 = vrot.lane.b32.xlu1 %v10070_v20, %s18753_s24 }
0x4c95   :  { %v10081_v50 = vpop.permute.xlu0 %10080 }
0x4c96   :  { %v10079_v41 = vpop.permute.xlu1 %10078 }
0x4c97   :  { %13356 = vmatprep.mubr.msk.f32.mxu0 %vm5737_vm5, %v10079_v41 }
0x4c98   :  { %13357 = vmatmul.mubr.msk.f32.vlgmr.msra.gmra.mrb[212].mxu0 %vm5737_vm5, %v10081_v50 }
0x4c99   :  { %v10085_v57 = vpop.permute.xlu0 %10084 }
0x4c9a   :  { %v10083_v9 = vpop.permute.xlu1 %10082 }
0x4c9b   :  { %13359 = vmatprep.mubr.msk.f32.mxu0 %vm5737_vm5, %v10083_v9 }
0x4c9c   :  { %13360 = vmatmul.mubr.msk.f32.gmra.mrb[214].mxu0 %vm5737_vm5, %v10085_v57 }
0x4c9d   :  { %v10089_v21 = vpop.permute.xlu0 %10088 }
0x4c9e   :  { %v10087_v0 = vpop.permute.xlu1 %10086 }
0x4c9f   :  { %13362 = vmatprep.mubr.msk.f32.mxu0 %vm5737_vm5, %v10087_v0 }
0x4ca0   :  { %13363 = vmatmul.mubr.msk.f32.gmra.mrb[216].mxu0 %vm5737_vm5, %v10089_v21  ;;  %v14835_v21 = vmov 2  }
0x4ca1   :  { %14042 = vset.pattern.permute.xlu0 %v14835_v21 }
0x4d6b   :  { %v13358_v48 = vpop.f32.mrb[212].mxu0 }
0x4d6c   :  { %10205 = vrot.lane.b32.xlu0 %v13358_v48, %s14833_s22  ;;  %v10168_v24 = vpop.f32.mrb[213].mxu0 }
0x4d6d   :  { %10203 = vrot.lane.b32.xlu1 %v10168_v24, %s14833_s22 }
0x4d6f   :  { %v13361_v54 = vpop.f32.mrb[214].mxu0 }
0x4d70   :  { %10209 = vrot.lane.b32.xlu0 %v13361_v54, %s14833_s22  ;;  %v10178_v8 = vpop.f32.mrb[215].mxu0  ;;  %v10359_v54 = vsub.f32 1.0, %v18207_v27 }
0x4d71   :  { %10207 = vrot.lane.b32.xlu1 %v10178_v8, %s14833_s22 }
0x4d73   :  { %v13364_v28 = vpop.f32.mrb[216].mxu0 }
0x4d74   :  { %10213 = vrot.lane.b32.xlu0 %v13364_v28, %s14833_s22  ;;  %v10188_v1 = vpop.f32.mrb[217].mxu0  ;;  %v10358_v28 = vsub.f32 1.0, %v18209_v61 }
0x4d75   :  { %10211 = vrot.lane.b32.xlu1 %v10188_v1, %s14833_s22 }
0x4dde   :  { %v10206_v6 = vpop.permute.xlu0 %10205 }
0x4ddf   :  { %v10222_v60 = vadd.f32 %v10206_v6, %v18146_v51  ;;  %v10204_v13 = vpop.permute.xlu1 %10203  ;;  %v10353_v6 = vmul.f32 %v18207_v27, %v18097_v11  ;;  %v10354_v11 = vmul.f32 %v18217_v29, %v18118_v37  ;;  %v10356_v37 = vmul.f32 %v18225_v55, %v18136_v31 }
0x4de0   :  { %v10221_v52 = vadd.f32 %v10204_v13, %v18149_v43  ;;  %v10352_v13 = vmul.f32 %v18209_v61, %v18100_v4  ;;  %v10363_v61 = vsub.f32 1.0, %v18222_v17  ;;  %v14838_v31 = vmov 3  }
0x4de2   :  { %v14026_v58 = vpack.i.bf16 %v10222_v60, %v10221_v52  ;;  %v10210_v25 = vpop.permute.xlu0 %10209 }
0x4de3   :  { %v10224_v16 = vadd.f32 %v10210_v25, %v18152_v56  ;;  %v10208_v26 = vpop.permute.xlu1 %10207  ;;  %v10361_v25 = vsub.f32 1.0, %v18214_v34 }
0x4de4   :  { %v10223_v15 = vadd.f32 %v10208_v26, %v18155_v62  ;;  %14027 = vrot.lane.b32.xlu1 %v14026_v58, %s14834_s25  ;;  %v10360_v26 = vsub.f32 1.0, %v18217_v29 }
0x4de6   :  { %v14031_v19 = vpack.i.bf16 %v10224_v16, %v10223_v15  ;;  %v10214_v30 = vpop.permute.xlu0 %10213 }
0x4de7   :  { %v10226_v22 = vadd.f32 %v10214_v30, %v18158_v33  ;;  %v10212_v18 = vpop.permute.xlu1 %10211 }
0x4de8   :  { %v10225_v45 = vadd.f32 %v10212_v18, %v18161_v35  ;;  %14032 = vrot.lane.b32.xlu0 %v14031_v19, %s14834_s25  ;;  %v10355_v19 = vmul.f32 %v18214_v34, %v18115_v12  ;;  %v10357_v12 = vmul.f32 %v18222_v17, %v18134_v49  ;;  %v14836_v49 = vmov 1  }
0x4de9   :  { %v14837_v17 = vmov 4  }
0x4dea   :  { %v14036_v51 = vpack.i.bf16 %v10226_v22, %v10225_v45  ;;  %v10362_v45 = vsub.f32 1.0, %v18225_v55  ;;  %v14839_v55 = vmov 6  }
0x4dec   :  { %14037 = vrot.lane.b32.xlu1 %v14036_v51, %s14834_s25 }
0x4e56   :  { %v14028_v43 = vpop.permute.xlu1 %14027 }
0x4e57   :  { %v14030_v5 = vunpack.i.h.bf16 %v14028_v43  ;;  %v14029_v56 = vunpack.i.l.bf16 %v14028_v43 }
0x4e59   :  { %v13758_v14 = vpack.c.bf16 %v14030_v5, %v14029_v56 }
0x4e5a   :  { %v14033_v23 = vpop.permute.xlu0 %14032 }
0x4e5b   :  { %v14035_v62 = vunpack.i.h.bf16 %v14033_v23  ;;  %v14034_v46 = vunpack.i.l.bf16 %v14033_v23  ;;  %13759 = vmatprep.subr.bf16.mxu1 %v13758_v14  ;;  %v14840_v23 = vmov 5  }
0x4e5c   :  { %13761 = vmatpush3.bf16.msra.mxu1 %v13758_v14 }
0x4e5d   :  { %v13762_v2 = vpack.c.bf16 %v14035_v62, %v14034_v46  ;;  %v14842_v62 = vmov 7   ;;  %v14843_v46 = vmov 10  }
0x4e5e   :  { %v14038_v47 = vpop.permute.xlu1 %14037 }
0x4e5f   :  { %v14040_v33 = vunpack.i.h.bf16 %v14038_v47  ;;  %v14039_v20 = vunpack.i.l.bf16 %v14038_v47  ;;  %13763 = vmatprep.subr.bf16.mxu1 %v13762_v2 }
0x4e60   :  { %13765 = vmatpush3.bf16.msra.mxu1 %v13762_v2 }
0x4e61   :  { %v13766_v35 = vpack.c.bf16 %v14040_v33, %v14039_v20  ;;  %v14844_v33 = vmov 9   ;;  %v14845_v20 = vmov 11  }
0x4e63   :  { %13767 = vmatprep.subr.bf16.mxu1 %v13766_v35 }
0x4e64   :  { %13769 = vmatpush3.bf16.msra.mxu1 %v13766_v35 }
0x4e67   :  { %13378 = vmatmul.mubr.msk.f32.vlgmr.msra.gmra.mrb[208].mxu1 %vm578_vm1, %v18167_v42 }
0x4e68   :  { %13380 = vmatprep.mubr.msk.f32.mxu1 %vm578_vm1, %v18174_v39 }
0x4e6b   :  { %13381 = vmatmul.mubr.msk.f32.gmra.mrb[210].mxu1 %vm578_vm1, %v18181_v63 }
0x4e6c   :  { %13383 = vmatprep.mubr.msk.f32.mxu1 %vm578_vm1, %v18188_v59 }
0x4e6f   :  { %13384 = vmatmul.mubr.msk.f32.gmra.mrb[212].mxu1 %vm578_vm1, %v18195_v40 }
0x4f3a   :  { %v13379_v50 = vpop.f32.mrb[208].mxu1 }
0x4f3b   :  { %v10323_v41 = vadd.f32 %v18083_v44, %v13379_v50  ;;  %v10317_v57 = vpop.f32.mrb[209].mxu1 }
0x4f3c   :  { %v10318_v9 = vadd.f32 %v18083_v44, %v10317_v57 }
0x4f3d   :  { %14675 = vtanh.f32 %v10323_v41 }
0x4f3e   :  { %14677 = vtanh.f32 %v10318_v9  ;;  %v13382_v42 = vpop.f32.mrb[210].mxu1 }
0x4f3f   :  { %v10333_v39 = vadd.f32 %v18083_v44, %v13382_v42  ;;  %v10327_v0 = vpop.f32.mrb[211].mxu1 }
0x4f40   :  { %v10328_v63 = vadd.f32 %v18083_v44, %v10327_v0  ;;  %v11570_v0 = vld [vmem:[%s18731_s12 + $0x68] sm:$0xff] }
0x4f41   :  { %14679 = vtanh.f32 %v10333_v39  ;;  %v11564_v39 = vld [vmem:[%s18731_s12 + $0x38] sm:$0xff] }
0x4f42   :  { %14681 = vtanh.f32 %v10328_v63  ;;  %v13385_v59 = vpop.f32.mrb[212].mxu1 }
0x4f43   :  { %v10343_v40 = vadd.f32 %v18083_v44, %v13385_v59  ;;  %v10337_v48 = vpop.f32.mrb[213].mxu1 }
0x4f44   :  { %v10338_v24 = vadd.f32 %v18083_v44, %v10337_v48 }
0x4f45   :  { %14683 = vtanh.f32 %v10343_v40 }
0x4f46   :  { %14685 = vtanh.f32 %v10338_v24 }
0x4f47   :  { %v14676_v8 = vpop.eup %14675 }
0x4f48   :  { %v14678_v1 = vpop.eup %14677  ;;  %v10365_v60 = vmul.f32 %v14676_v8, %v10359_v54  ;;  %v11576_v8 = vld [vmem:[%s18731_s12 + $0x98] sm:$0xff] }
0x4f49   :  { %v10364_v52 = vmul.f32 %v14678_v1, %v10358_v28  ;;  %v11582_v28 = vld [vmem:[%s18731_s12 + $0xc8] sm:$0xff] }
0x4f4a   :  { %v10371_v58 = vadd.f32 %v10365_v60, %v10353_v6 }
0x4f4b   :  { %v14680_v44 = vpop.eup %14679  ;;  %v10370_v16 = vadd.f32 %v10364_v52, %v10352_v13 }
0x4f4c   :  { %v14682_v15 = vpop.eup %14681  ;;  %10384 = vrot.lane.b32.xlu1 %v10371_v58, %s18756_s18  ;;  %v10367_v30 = vmul.f32 %v14680_v44, %v10361_v25  ;;  %v11588_v25 = vld [vmem:[%s18731_s12 + $0xf8] sm:$0xff]  ;;  %v11594_v44 = vld [vmem:[%s18731_s12 + $0x128] sm:$0xff] }
0x4f4d   :  { %10382 = vrot.lane.b32.xlu0 %v10370_v16, %s18756_s18  ;;  %v10366_v4 = vmul.f32 %v14682_v15, %v10360_v26 }
0x4f4e   :  { %v10373_v27 = vadd.f32 %v10367_v30, %v10355_v19 }
0x4f4f   :  { %v14684_v22 = vpop.eup %14683  ;;  %v10372_v18 = vadd.f32 %v10366_v4, %v10354_v11  ;;  %v11600_v11 = vld [vmem:[%s18731_s12 + $0x158] sm:$0xff]  ;;  %v11606_v4 = vld [vmem:[%s18731_s12 + $0x188] sm:$0xff] }
0x4f50   :  { %v14686_v51 = vpop.eup %14685  ;;  %10388 = vrot.lane.b32.xlu1 %v10373_v27, %s18756_s18  ;;  %v10369_v34 = vmul.f32 %v14684_v22, %v10363_v61 }
0x4f51   :  { %10386 = vrot.lane.b32.xlu0 %v10372_v18, %s18756_s18  ;;  %v10368_v29 = vmul.f32 %v14686_v51, %v10362_v45  ;;  %v11612_v51 = vld [vmem:[%s18731_s12 + $0x1b8] sm:$0xff] }
0x4f52   :  { %v10375_v43 = vadd.f32 %v10369_v34, %v10357_v12  ;;  %v11618_v12 = vld [vmem:[%s18731_s12 + $0x1e8] sm:$0xff] }
0x4f53   :  { %v10374_v5 = vadd.f32 %v10368_v29, %v10356_v37 }
0x4f54   :  { %10392 = vrot.lane.b32.xlu1 %v10375_v43, %s18756_s18 }
0x4f55   :  { %10390 = vrot.lane.b32.xlu0 %v10374_v5, %s18756_s18 }
0x4fbe   :  { %v10385_v56 = vpop.permute.xlu1 %10384 }
0x4fbf   :  { %v10401_v14 = vsel %vm463_vm3, %v16818_v7, %v10385_v56  ;;  %v14841_v7 = vmov 8   ;;  %v10383_v2 = vpop.permute.xlu0 %10382 }
0x4fc0   :  { %10419 = vperm.xlu1 %13800, %v10401_v14   ;;  %10509 = vperm.xlu0 %14042, %v10401_v14   ;;  %v10400_v47 = vsel %vm463_vm3, %v16832_v53, %v10383_v2 }
0x4fc2   :  { %v10389_v53 = vpop.permute.xlu1 %10388 }
0x4fc3   :  { %v10403_v35 = vsel %vm463_vm3, %v16823_v36, %v10389_v53  ;;  %v10387_v50 = vpop.permute.xlu0 %10386 }
0x4fc4   :  { %14041 = vset.pattern.permute.xlu1 %v14836_v49  ;;  %14044 = vset.pattern.permute.xlu0 %v14837_v17  ;;  %v18327_v41 = vsel %vm463_vm3, %v16840_v32, %v10387_v50 }
0x4fc5   :  { %10466 = vperm.xlu1 %14041, %v10401_v14   ;;  %10595 = vperm.xlu0 %14044, %v10401_v14  }
0x4fc6   :  { %v10393_v36 = vpop.permute.xlu1 %10392 }
0x4fc7   :  { %v18346_v32 = vsel %vm463_vm3, %v16846_v38, %v10393_v36  ;;  %v10391_v38 = vpop.permute.xlu0 %10390 }
0x4fc8   :  { %v18367_v57 = vsel %vm463_vm3, %v16852_v10, %v10391_v38  ;;  %v10407_v10 = vld [vmem:[%s18731_s12 + $0x8] sm:$0xff] }
0x4fc9   :  { %14043 = vset.pattern.permute.xlu1 %v14838_v31  ;;  %14046 = vset.pattern.permute.xlu0 %v14839_v55 }
0x4fca   :  { %10552 = vperm.xlu1 %14043, %v10401_v14   ;;  %10681 = vperm.xlu0 %14046, %v10401_v14  }
0x4fce   :  { %14045 = vset.pattern.permute.xlu1 %v14840_v23  ;;  %14048 = vset.pattern.permute.xlu0 %v14841_v7 }
0x4fcf   :  { %10638 = vperm.xlu1 %14045, %v10401_v14   ;;  %10767 = vperm.xlu0 %14048, %v10401_v14  }
0x4fd3   :  { %14047 = vset.pattern.permute.xlu1 %v14842_v62  ;;  %14050 = vset.pattern.permute.xlu0 %v14843_v46 }
0x4fd4   :  { %10724 = vperm.xlu1 %14047, %v10401_v14   ;;  %10853 = vperm.xlu0 %14050, %v10401_v14  }
0x4fd8   :  { %14049 = vset.pattern.permute.xlu1 %v14844_v33  ;;  %14052 = vset.pattern.permute.xlu0 %v14828_v3 }
0x4fd9   :  { %10810 = vperm.xlu1 %14049, %v10401_v14   ;;  %10414 = vperm.xlu0 %14052, %v10400_v47  }
0x4fdd   :  { %14051 = vset.pattern.permute.xlu1 %v14845_v20  ;;  %14053 = vset.pattern.permute.xlu0 %v14836_v49 }
0x4fde   :  { %10896 = vperm.xlu1 %14051, %v10401_v14   ;;  %10462 = vperm.xlu0 %14053, %v10400_v47   ;;  %v10406_v14 = vld [vmem:[%s18731_s12] sm:$0xff] }
0x4fe2   :  { %14054 = vset.pattern.permute.xlu1 %v14835_v21  ;;  %14055 = vset.pattern.permute.xlu0 %v14838_v31 }
0x4fe3   :  { %10505 = vperm.xlu1 %14054, %v10400_v47   ;;  %10548 = vperm.xlu0 %14055, %v10400_v47  }
0x4fe7   :  { %14056 = vset.pattern.permute.xlu1 %v14837_v17  ;;  %14057 = vset.pattern.permute.xlu0 %v14840_v23 }
0x4fe8   :  { %10591 = vperm.xlu1 %14056, %v10400_v47   ;;  %10634 = vperm.xlu0 %14057, %v10400_v47  }
0x4fec   :  { %14058 = vset.pattern.permute.xlu1 %v14839_v55  ;;  %14059 = vset.pattern.permute.xlu0 %v14842_v62 }
0x4fed   :  { %10677 = vperm.xlu1 %14058, %v10400_v47   ;;  %10720 = vperm.xlu0 %14059, %v10400_v47  }
0x4ff1   :  { %14060 = vset.pattern.permute.xlu1 %v14841_v7  ;;  %14061 = vset.pattern.permute.xlu0 %v14844_v33 }
0x4ff2   :  { %10763 = vperm.xlu1 %14060, %v10400_v47   ;;  %10806 = vperm.xlu0 %14061, %v10400_v47  }
0x4ff6   :  { %14062 = vset.pattern.permute.xlu1 %v14843_v46  ;;  %14063 = vset.pattern.permute.xlu0 %v14845_v20 }
0x4ff7   :  { %10849 = vperm.xlu1 %14062, %v10400_v47   ;;  %10892 = vperm.xlu0 %14063, %v10400_v47  }
0x4ffb   :  { %14064 = vset.pattern.permute.xlu1 %v14828_v3  ;;  %14065 = vset.pattern.permute.xlu0 %v14836_v49 }
0x4ffc   :  { %10429 = vperm.xlu1 %14064, %v10403_v35   ;;  %10474 = vperm.xlu0 %14065, %v10403_v35  }
0x5000   :  { %14066 = vset.pattern.permute.xlu1 %v14835_v21  ;;  %14067 = vset.pattern.permute.xlu0 %v14838_v31 }
0x5001   :  { %10517 = vperm.xlu1 %14066, %v10403_v35   ;;  %10560 = vperm.xlu0 %14067, %v10403_v35  }
0x5005   :  { %14068 = vset.pattern.permute.xlu1 %v14837_v17  ;;  %14076 = vset.pattern.permute.xlu0 %v14828_v3 }
0x5006   :  { %10603 = vperm.xlu1 %14068, %v10403_v35   ;;  %10424 = vperm.xlu0 %14076, %v18327_v41  }
0x500a   :  { %14069 = vset.pattern.permute.xlu1 %v14840_v23  ;;  %14080 = vset.pattern.permute.xlu0 %v14837_v17 }
0x500b   :  { %10646 = vperm.xlu1 %14069, %v10403_v35   ;;  %10599 = vperm.xlu0 %14080, %v18327_v41  }
0x500f   :  { %14070 = vset.pattern.permute.xlu1 %v14839_v55  ;;  %14082 = vset.pattern.permute.xlu0 %v14839_v55 }
0x5010   :  { %10689 = vperm.xlu1 %14070, %v10403_v35   ;;  %10685 = vperm.xlu0 %14082, %v18327_v41  }
0x5014   :  { %14071 = vset.pattern.permute.xlu1 %v14842_v62  ;;  %14084 = vset.pattern.permute.xlu0 %v14841_v7 }
0x5015   :  { %10732 = vperm.xlu1 %14071, %v10403_v35   ;;  %10771 = vperm.xlu0 %14084, %v18327_v41  }
0x5019   :  { %14072 = vset.pattern.permute.xlu1 %v14841_v7  ;;  %14086 = vset.pattern.permute.xlu0 %v14843_v46 }
0x501a   :  { %10775 = vperm.xlu1 %14072, %v10403_v35   ;;  %10857 = vperm.xlu0 %14086, %v18327_v41  }
0x501e   :  { %14073 = vset.pattern.permute.xlu1 %v14844_v33  ;;  %14088 = vset.pattern.permute.xlu0 %v14836_v49 }
0x501f   :  { %10818 = vperm.xlu1 %14073, %v10403_v35   ;;  %10482 = vperm.xlu0 %14088, %v18346_v32  }
0x5023   :  { %14074 = vset.pattern.permute.xlu1 %v14843_v46  ;;  %14090 = vset.pattern.permute.xlu0 %v14838_v31 }
0x5024   :  { %10861 = vperm.xlu1 %14074, %v10403_v35   ;;  %10568 = vperm.xlu0 %14090, %v18346_v32  }
0x5028   :  { %14075 = vset.pattern.permute.xlu1 %v14845_v20  ;;  %14092 = vset.pattern.permute.xlu0 %v14840_v23 }
0x5029   :  { %10904 = vperm.xlu1 %14075, %v10403_v35   ;;  %10654 = vperm.xlu0 %14092, %v18346_v32  }
0x502d   :  { %14077 = vset.pattern.permute.xlu1 %v14836_v49  ;;  %14094 = vset.pattern.permute.xlu0 %v14842_v62 }
0x502e   :  { %10470 = vperm.xlu1 %14077, %v18327_v41   ;;  %10740 = vperm.xlu0 %14094, %v18346_v32  }
0x5032   :  { %14078 = vset.pattern.permute.xlu1 %v14835_v21  ;;  %14096 = vset.pattern.permute.xlu0 %v14844_v33 }
0x5033   :  { %10513 = vperm.xlu1 %14078, %v18327_v41   ;;  %10826 = vperm.xlu0 %14096, %v18346_v32  }
0x5037   :  { %14079 = vset.pattern.permute.xlu1 %v14838_v31  ;;  %14098 = vset.pattern.permute.xlu0 %v14828_v3 }
0x5038   :  { %10556 = vperm.xlu1 %14079, %v18327_v41   ;;  %10434 = vperm.xlu0 %14098, %v18367_v57  }
0x503c   :  { %14081 = vset.pattern.permute.xlu1 %v14840_v23  ;;  %14100 = vset.pattern.permute.xlu0 %v14835_v21 }
0x503d   :  { %10642 = vperm.xlu1 %14081, %v18327_v41   ;;  %10521 = vperm.xlu0 %14100, %v18367_v57  }
0x503f   :  { %v10420_v9 = vpop.permute.xlu1 %10419  ;;  %v10510_v42 = vpop.permute.xlu0 %10509 }
0x5040   :  { %v10443_v40 = vmul.f32 %v10420_v9, %v10407_v10  ;;  %v10529_v24 = vmul.f32 %v11570_v0, %v10510_v42  ;;  %v11569_v9 = vld [vmem:[%s18731_s12 + $0x60] sm:$0xff]  ;;  %v11575_v10 = vld [vmem:[%s18731_s12 + $0x90] sm:$0xff] }
0x5041   :  { %14083 = vset.pattern.permute.xlu1 %v14842_v62  ;;  %14103 = vset.pattern.permute.xlu0 %v14840_v23  ;;  %v11624_v23 = vld [vmem:[%s18731_s12 + $0x218] sm:$0xff] }
0x5042   :  { %10728 = vperm.xlu1 %14083, %v18327_v41   ;;  %10650 = vperm.xlu0 %14103, %v18367_v57  }
0x5044   :  { %v10467_v63 = vpop.permute.xlu1 %10466  ;;  %v10596_v59 = vpop.permute.xlu0 %10595 }
0x5045   :  { %v10486_v48 = vmul.f32 %v11564_v39, %v10467_v63  ;;  %v10615_v52 = vmul.f32 %v11582_v28, %v10596_v59 }
0x5046   :  { %14085 = vset.pattern.permute.xlu1 %v14844_v33  ;;  %14105 = vset.pattern.permute.xlu0 %v14842_v62  ;;  %v11563_v62 = vld [vmem:[%s18731_s12 + $0x30] sm:$0xff] }
0x5047   :  { %v10492_v54 = vadd.f32 %v10486_v48, %v10443_v40  ;;  %10814 = vperm.xlu1 %14085, %v18327_v41   ;;  %10736 = vperm.xlu0 %14105, %v18367_v57   ;;  %v11581_v40 = vld [vmem:[%s18731_s12 + $0xc0] sm:$0xff] }
0x5049   :  { %v10553_v1 = vpop.permute.xlu1 %10552  ;;  %v10535_v6 = vadd.f32 %v10529_v24, %v10492_v54  ;;  %v10682_v60 = vpop.permute.xlu0 %10681  ;;  %v11587_v54 = vld [vmem:[%s18731_s12 + $0xf0] sm:$0xff] }
0x504a   :  { %v10572_v13 = vmul.f32 %v11576_v8, %v10553_v1  ;;  %v10701_v19 = vmul.f32 %v11594_v44, %v10682_v60 }
0x504b   :  { %14087 = vset.pattern.permute.xlu1 %v14828_v3  ;;  %14107 = vset.pattern.permute.xlu0 %v14844_v33 }
0x504c   :  { %v10578_v58 = vadd.f32 %v10572_v13, %v10535_v6  ;;  %10439 = vperm.xlu1 %14087, %v18346_v32   ;;  %10822 = vperm.xlu0 %14107, %v18367_v57  }
0x504e   :  { %v10639_v16 = vpop.permute.xlu1 %10638  ;;  %v10621_v26 = vadd.f32 %v10615_v52, %v10578_v58  ;;  %v10768_v15 = vpop.permute.xlu0 %10767  ;;  %v11599_v52 = vld [vmem:[%s18731_s12 + $0x150] sm:$0xff] }
0x504f   :  { %v10658_v3 = vmul.f32 %v11588_v25, %v10639_v16  ;;  %v10787_v18 = vmul.f32 %v11606_v4, %v10768_v15  ;;  %v11605_v16 = vld [vmem:[%s18731_s12 + $0x180] sm:$0xff] }
0x5050   :  { %14089 = vset.pattern.permute.xlu1 %v14835_v21  ;;  %14110 = vset.pattern.permute.xlu0 %v14845_v20  ;;  %v11617_v4 = vld [vmem:[%s18731_s12 + $0x1e0] sm:$0xff] }
0x5051   :  { %v10664_v30 = vadd.f32 %v10658_v3, %v10621_v26  ;;  %10525 = vperm.xlu1 %14089, %v18346_v32   ;;  %10908 = vperm.xlu0 %14110, %v18367_v57   ;;  %v11611_v3 = vld [vmem:[%s18731_s12 + $0x1b0] sm:$0xff] }
0x5053   :  { %v10725_v27 = vpop.permute.xlu1 %10724  ;;  %v10707_v61 = vadd.f32 %v10701_v19, %v10664_v30  ;;  %v10854_v22 = vpop.permute.xlu0 %10853 }
0x5054   :  { %v10744_v21 = vmul.f32 %v11600_v11, %v10725_v27  ;;  %v10873_v5 = vmul.f32 %v11618_v12, %v10854_v22  ;;  %v11623_v22 = vld [vmem:[%s18731_s12 + $0x210] sm:$0xff]  ;;  %v11566_v12 = vld [vmem:[%s18731_s12 + $0x48] sm:$0xff] }
0x5055   :  { %14091 = vset.pattern.permute.xlu1 %v14837_v17  ;;  %10912 = vperm.xlu0 %14110, %v18346_v32  }
0x5056   :  { %v10750_v45 = vadd.f32 %v10744_v21, %v10707_v61  ;;  %10611 = vperm.xlu1 %14091, %v18346_v32  }
0x5058   :  { %v10811_v34 = vpop.permute.xlu1 %10810  ;;  %v10793_v37 = vadd.f32 %v10787_v18, %v10750_v45  ;;  %v10415_v29 = vpop.permute.xlu0 %10414 }
0x5059   :  { %v10830_v43 = vmul.f32 %v11612_v51, %v10811_v34  ;;  %v10442_v53 = vmul.f32 %v10415_v29, %v10406_v14  ;;  %v10409_v51 = vld [vmem:[%s18731_s12 + $0x18] sm:$0xff] }
0x505a   :  { %14093 = vset.pattern.permute.xlu1 %v14839_v55 }
0x505b   :  { %v10836_v56 = vadd.f32 %v10830_v43, %v10793_v37  ;;  %10697 = vperm.xlu1 %14093, %v18346_v32  }
0x505d   :  { %v10897_v2 = vpop.permute.xlu1 %10896  ;;  %v10879_v47 = vadd.f32 %v10873_v5, %v10836_v56  ;;  %v10463_v33 = vpop.permute.xlu0 %10462 }
0x505e   :  { %v10916_v35 = vmul.f32 %v11624_v23, %v10897_v2  ;;  %v10485_v50 = vmul.f32 %v11563_v62, %v10463_v33  ;;  %v11572_v23 = vld [vmem:[%s18731_s12 + $0x78] sm:$0xff]  ;;  %v11578_v2 = vld [vmem:[%s18731_s12 + $0xa8] sm:$0xff] }
0x505f   :  { %14095 = vset.pattern.permute.xlu1 %v14841_v7 }
0x5060   :  { %v10922_v36 = vadd.f32 %v10916_v35, %v10879_v47  ;;  %v10491_v38 = vadd.f32 %v10485_v50, %v10442_v53  ;;  %10783 = vperm.xlu1 %14095, %v18346_v32   ;;  %v11584_v50 = vld [vmem:[%s18731_s12 + $0xd8] sm:$0xff] }
0x5062   :  { %v10506_v42 = vpop.permute.xlu1 %10505  ;;  %v10549_v39 = vpop.permute.xlu0 %10548  ;;  %v10929_v43 = vsel %vm10927_vm6, %v10922_v36, 0.0 }
0x5063   :  { %v10528_v0 = vmul.f32 %v11569_v9, %v10506_v42  ;;  %v10571_v59 = vmul.f32 %v11575_v10, %v10549_v39 }
0x5064   :  { %14097 = vset.pattern.permute.xlu1 %v14843_v46 }
0x5065   :  { %v10534_v63 = vadd.f32 %v10528_v0, %v10491_v38  ;;  %10869 = vperm.xlu1 %14097, %v18346_v32   ;;  %v11593_v32 = vld [vmem:[%s18731_s12 + $0x120] sm:$0xff] }
0x5067   :  { %v10577_v48 = vadd.f32 %v10571_v59, %v10534_v63  ;;  %v10592_v24 = vpop.permute.xlu1 %10591  ;;  %v10635_v8 = vpop.permute.xlu0 %10634 }
0x5068   :  { %v10614_v28 = vmul.f32 %v11581_v40, %v10592_v24  ;;  %v10657_v6 = vmul.f32 %v11587_v54, %v10635_v8  ;;  %v11608_v54 = vld [vmem:[%s18731_s12 + $0x198] sm:$0xff] }
0x5069   :  { %14099 = vset.pattern.permute.xlu1 %v14836_v49 }
0x506a   :  { %v10620_v1 = vadd.f32 %v10614_v28, %v10577_v48  ;;  %10478 = vperm.xlu1 %14099, %v18367_v57  }
0x506c   :  { %v10663_v60 = vadd.f32 %v10657_v6, %v10620_v1  ;;  %v10678_v13 = vpop.permute.xlu1 %10677  ;;  %v10721_v58 = vpop.permute.xlu0 %10720  ;;  %v11614_v6 = vld [vmem:[%s18731_s12 + $0x1c8] sm:$0xff] }
0x506d   :  { %v10700_v25 = vmul.f32 %v11593_v32, %v10678_v13  ;;  %v10743_v49 = vmul.f32 %v11599_v52, %v10721_v58  ;;  %v11620_v52 = vld [vmem:[%s18731_s12 + $0x1f8] sm:$0xff] }
0x506e   :  { %14101 = vset.pattern.permute.xlu1 %v14838_v31 }
0x506f   :  { %v10706_v44 = vadd.f32 %v10700_v25, %v10663_v60  ;;  %10564 = vperm.xlu1 %14101, %v18367_v57  }
0x5071   :  { %v10749_v26 = vadd.f32 %v10743_v49, %v10706_v44  ;;  %v10764_v15 = vpop.permute.xlu1 %10763  ;;  %v10807_v19 = vpop.permute.xlu0 %10806 }
0x5072   :  { %v10786_v30 = vmul.f32 %v11605_v16, %v10764_v15  ;;  %v10829_v31 = vmul.f32 %v11611_v3, %v10807_v19  ;;  %v11626_v16 = vld [vmem:[%s18731_s12 + $0x228] sm:$0xff] }
0x5073   :  { %14102 = vset.pattern.permute.xlu1 %v14837_v17 }
0x5074   :  { %v10792_v11 = vadd.f32 %v10786_v30, %v10749_v26  ;;  %10607 = vperm.xlu1 %14102, %v18367_v57  }
0x5076   :  { %v10835_v27 = vadd.f32 %v10829_v31, %v10792_v11  ;;  %v10850_v61 = vpop.permute.xlu1 %10849  ;;  %v10893_v21 = vpop.permute.xlu0 %10892 }
0x5077   :  { %v10872_v18 = vmul.f32 %v11617_v4, %v10850_v61  ;;  %v10915_v17 = vmul.f32 %v11623_v22, %v10893_v21 }
0x5078   :  { %14104 = vset.pattern.permute.xlu1 %v14839_v55 }
0x5079   :  { %v10878_v45 = vadd.f32 %v10872_v18, %v10835_v27  ;;  %10693 = vperm.xlu1 %14104, %v18367_v57  }
0x507b   :  { %v10921_v34 = vadd.f32 %v10915_v17, %v10878_v45  ;;  %v10430_v37 = vpop.permute.xlu1 %10429  ;;  %v10475_v29 = vpop.permute.xlu0 %10474 }
0x507c   :  { %v10445_v5 = vmul.f32 %v10430_v37, %v10409_v51  ;;  %v10488_v56 = vmul.f32 %v11566_v12, %v10475_v29 }
0x507d   :  { %v10928_v55 = vsel %vm10927_vm6, %v10921_v34, 0.0  ;;  %14106 = vset.pattern.permute.xlu1 %v14841_v7 }
0x507e   :  { %v18491_v14 = vadd.f32 %v10929_v43, %v10928_v55  ;;  %10779 = vperm.xlu1 %14106, %v18367_v57   ;;  %v10494_v33 = vadd.f32 %v10488_v56, %v10445_v5  ;;  %v10411_v55 = vld [vmem:[%s18731_s12 + $0x28] sm:$0xff]  ;;  %v11568_v56 = vld [vmem:[%s18731_s12 + $0x58] sm:$0xff] }
0x5080   :  { %v10518_v62 = vpop.permute.xlu1 %10517  ;;  %v10561_v47 = vpop.permute.xlu0 %10560 }
0x5081   :  { %v10531_v53 = vmul.f32 %v11572_v23, %v10518_v62  ;;  %v10574_v7 = vmul.f32 %v11578_v2, %v10561_v47  ;;  %v11574_v23 = vld [vmem:[%s18731_s12 + $0x88] sm:$0xff] }
0x5082   :  { %14108 = vset.pattern.permute.xlu1 %v14843_v46  ;;  %v11590_v46 = vld [vmem:[%s18731_s12 + $0x108] sm:$0xff] }
0x5083   :  { %v10537_v35 = vadd.f32 %v10531_v53, %v10494_v33  ;;  %10865 = vperm.xlu1 %14108, %v18367_v57   ;;  %v11596_v57 = vld [vmem:[%s18731_s12 + $0x138] sm:$0xff] }
0x5085   :  { %v10580_v36 = vadd.f32 %v10574_v7, %v10537_v35  ;;  %v10604_v38 = vpop.permute.xlu1 %10603  ;;  %v10425_v58 = vpop.permute.xlu0 %10424  ;;  %v11565_v35 = vld [vmem:[%s18731_s12 + $0x40] sm:$0xff] }
0x5086   :  { %v10617_v9 = vmul.f32 %v11584_v50, %v10604_v38  ;;  %v11580_v50 = vld [vmem:[%s18731_s12 + $0xb8] sm:$0xff]  ;;  %v11571_v38 = vld [vmem:[%s18731_s12 + $0x70] sm:$0xff] }
0x5087   :  { %14109 = vset.pattern.permute.xlu1 %v14845_v20  ;;  %v11602_v20 = vld [vmem:[%s18731_s12 + $0x168] sm:$0xff] }
0x5088   :  { %v10623_v42 = vadd.f32 %v10617_v9, %v10580_v36  ;;  %10900 = vperm.xlu1 %14109, %v18327_v41   ;;  %v10408_v36 = vld [vmem:[%s18731_s12 + $0x10] sm:$0xff] }
0x508a   :  { %v10647_v10 = vpop.permute.xlu1 %10646  ;;  %v18528_v26 = vpop.permute.xlu0 %10599 }
0x508b   :  { %v10660_v39 = vmul.f32 %v11590_v46, %v10647_v10  ;;  %v11586_v10 = vld [vmem:[%s18731_s12 + $0xe8] sm:$0xff] }
0x508d   :  { %v10666_v0 = vadd.f32 %v10660_v39, %v10623_v42 }
0x508f   :  { %v10690_v63 = vpop.permute.xlu1 %10689  ;;  %v18532_v11 = vpop.permute.xlu0 %10685 }
0x5090   :  { %v10703_v59 = vmul.f32 %v11596_v57, %v10690_v63  ;;  %v11577_v57 = vld [vmem:[%s18731_s12 + $0xa0] sm:$0xff]  ;;  %v10444_v63 = vmul.f32 %v10425_v58, %v10408_v36 }
0x5092   :  { %v10709_v40 = vadd.f32 %v10703_v59, %v10666_v0 }
0x5094   :  { %v10733_v48 = vpop.permute.xlu1 %10732  ;;  %v18534_v4 = vpop.permute.xlu0 %10771 }
0x5095   :  { %v10746_v41 = vmul.f32 %v11602_v20, %v10733_v48 }
0x5097   :  { %v10752_v24 = vadd.f32 %v10746_v41, %v10709_v40  ;;  %v10410_v40 = vld [vmem:[%s18731_s12 + $0x20] sm:$0xff]  ;;  %v11567_v41 = vld [vmem:[%s18731_s12 + $0x50] sm:$0xff] }
0x5099   :  { %v10776_v8 = vpop.permute.xlu1 %10775  ;;  %v18536_v61 = vpop.permute.xlu0 %10857 }
0x509a   :  { %v10789_v28 = vmul.f32 %v11608_v54, %v10776_v8 }
0x509c   :  { %v10795_v1 = vadd.f32 %v10789_v28, %v10752_v24  ;;  %v11592_v28 = vld [vmem:[%s18731_s12 + $0x118] sm:$0xff] }
0x509e   :  { %v10819_v32 = vpop.permute.xlu1 %10818  ;;  %v10483_v21 = vpop.permute.xlu0 %10482 }
0x509f   :  { %v10832_v60 = vmul.f32 %v11614_v6, %v10819_v32  ;;  %v10490_v47 = vmul.f32 %v11568_v56, %v10483_v21 }
0x50a1   :  { %v10838_v13 = vadd.f32 %v10832_v60, %v10795_v1 }
0x50a3   :  { %v10862_v25 = vpop.permute.xlu1 %10861  ;;  %v10569_v45 = vpop.permute.xlu0 %10568 }
0x50a4   :  { %v10875_v44 = vmul.f32 %v11620_v52, %v10862_v25  ;;  %v10576_v0 = vmul.f32 %v11580_v50, %v10569_v45  ;;  %v11573_v52 = vld [vmem:[%s18731_s12 + $0x80] sm:$0xff] }
0x50a5   :  { %v11601_v50 = vld [vmem:[%s18731_s12 + $0x160] sm:$0xff] }
0x50a6   :  { %v10881_v49 = vadd.f32 %v10875_v44, %v10838_v13  ;;  %v11583_v13 = vld [vmem:[%s18731_s12 + $0xd0] sm:$0xff]  ;;  %v11598_v44 = vld [vmem:[%s18731_s12 + $0x148] sm:$0xff] }
0x50a8   :  { %v10905_v15 = vpop.permute.xlu1 %10904  ;;  %v10655_v12 = vpop.permute.xlu0 %10654 }
0x50a9   :  { %v10918_v3 = vmul.f32 %v11626_v16, %v10905_v15  ;;  %v10662_v16 = vmul.f32 %v11592_v28, %v10655_v12  ;;  %v11589_v15 = vld [vmem:[%s18731_s12 + $0x100] sm:$0xff]  ;;  %v11622_v28 = vld [vmem:[%s18731_s12 + $0x208] sm:$0xff] }
0x50aa   :  { %v11585_v12 = vld [vmem:[%s18731_s12 + $0xe0] sm:$0xff] }
0x50ab   :  { %v18530_v19 = vadd.f32 %v10918_v3, %v10881_v49  ;;  %v11579_v3 = vld [vmem:[%s18731_s12 + $0xb0] sm:$0xff] }
0x50ad   :  { %v10471_v30 = vpop.permute.xlu1 %10470  ;;  %v18542_v37 = vpop.permute.xlu0 %10740 }
0x50ae   :  { %v10487_v42 = vmul.f32 %v11565_v35, %v10471_v30  ;;  %v10616_v30 = vmul.f32 %v11583_v13, %v18528_v26  ;;  %v11595_v26 = vld [vmem:[%s18731_s12 + $0x130] sm:$0xff] }
0x50af   :  { %v10702_v36 = vmul.f32 %v11595_v26, %v18532_v11 }
0x50b0   :  { %v10493_v24 = vadd.f32 %v10487_v42, %v10444_v63 }
0x50b2   :  { %v10514_v31 = vpop.permute.xlu1 %10513  ;;  %v18544_v43 = vpop.permute.xlu0 %10826 }
0x50b3   :  { %v10530_v59 = vmul.f32 %v11571_v38, %v10514_v31 }
0x50b5   :  { %v10536_v1 = vadd.f32 %v10530_v59, %v10493_v24 }
0x50b7   :  { %v10557_v27 = vpop.permute.xlu1 %10556  ;;  %v10435_v2 = vpop.permute.xlu0 %10434 }
0x50b8   :  { %v10573_v54 = vmul.f32 %v11577_v57, %v10557_v27  ;;  %v10446_v6 = vmul.f32 %v10435_v2, %v10410_v40 }
0x50ba   :  { %v10579_v25 = vadd.f32 %v10573_v54, %v10536_v1 }
0x50bc   :  { %v10643_v22 = vpop.permute.xlu1 %10642  ;;  %v10522_v46 = vpop.permute.xlu0 %10521 }
0x50bd   :  { %v10532_v31 = vmul.f32 %v11573_v52, %v10522_v46  ;;  %v11597_v46 = vld [vmem:[%s18731_s12 + $0x140] sm:$0xff] }
0x50c1   :  { %v18538_v18 = vpop.permute.xlu1 %10728  ;;  %v10651_v32 = vpop.permute.xlu0 %10650 }
0x50c2   :  { %v10745_v63 = vmul.f32 %v11601_v50, %v18538_v18  ;;  %v11609_v18 = vld [vmem:[%s18731_s12 + $0x1a0] sm:$0xff] }
0x50c6   :  { %v18540_v17 = vpop.permute.xlu1 %10814 }
0x50cb   :  { %v10440_v51 = vpop.permute.xlu1 %10439 }
0x50cc   :  { %v10447_v62 = vmul.f32 %v10440_v51, %v10411_v55  ;;  %v10622_v51 = vadd.f32 %v10616_v30, %v10579_v25  ;;  %v11627_v30 = vld [vmem:[%s18731_s12 + $0x230] sm:$0xff] }
0x50ce   :  { %v10496_v7 = vadd.f32 %v10490_v47, %v10447_v62  ;;  %v11610_v47 = vld [vmem:[%s18731_s12 + $0x1a8] sm:$0xff] }
0x50d0   :  { %v10526_v34 = vpop.permute.xlu1 %10525 }
0x50d1   :  { %v10533_v33 = vmul.f32 %v11574_v23, %v10526_v34  ;;  %v10659_v34 = vmul.f32 %v11589_v15, %v10643_v22  ;;  %v11604_v23 = vld [vmem:[%s18731_s12 + $0x178] sm:$0xff] }
0x50d3   :  { %v10539_v9 = vadd.f32 %v10533_v33, %v10496_v7  ;;  %v10665_v2 = vadd.f32 %v10659_v34, %v10622_v51  ;;  %v10748_v7 = vmul.f32 %v11604_v23, %v18542_v37  ;;  %v11603_v37 = vld [vmem:[%s18731_s12 + $0x170] sm:$0xff] }
0x50d5   :  { %v10612_v29 = vpop.permute.xlu1 %10611  ;;  %v10582_v20 = vadd.f32 %v10576_v0, %v10539_v9  ;;  %v10708_v57 = vadd.f32 %v10702_v36, %v10665_v2  ;;  %v10939_v2 = vsel %vm10927_vm6, %v18530_v19, 0.0 }
0x50d6   :  { %v10619_v48 = vmul.f32 %v11586_v10, %v10612_v29  ;;  %v10737_v29 = vpop.permute.xlu0 %10736 }
0x50d7   :  { %v10751_v54 = vadd.f32 %v10745_v63, %v10708_v57 }
0x50d8   :  { %v10625_v58 = vadd.f32 %v10619_v48, %v10582_v20  ;;  %v11616_v20 = vld [vmem:[%s18731_s12 + $0x1d8] sm:$0xff]  ;;  %v11607_v48 = vld [vmem:[%s18731_s12 + $0x190] sm:$0xff] }
0x50d9   :  { %v10834_v1 = vmul.f32 %v11616_v20, %v18544_v43  ;;  %v10788_v52 = vmul.f32 %v11607_v48, %v18534_v4  ;;  %v11628_v4 = vld [vmem:[%s18731_s12 + $0x238] sm:$0xff] }
0x50da   :  { %v10698_v5 = vpop.permute.xlu1 %10697  ;;  %v10668_v21 = vadd.f32 %v10662_v16, %v10625_v58  ;;  %v10823_v9 = vpop.permute.xlu0 %10822 }
0x50db   :  { %v10705_v45 = vmul.f32 %v11598_v44, %v10698_v5  ;;  %v11591_v5 = vld [vmem:[%s18731_s12 + $0x110] sm:$0xff] }
0x50dc   :  { %v10661_v38 = vmul.f32 %v11591_v5, %v10651_v32  ;;  %v11615_v32 = vld [vmem:[%s18731_s12 + $0x1d0] sm:$0xff] }
0x50dd   :  { %v10711_v22 = vadd.f32 %v10705_v45, %v10668_v21  ;;  %v10833_v43 = vmul.f32 %v11615_v32, %v10823_v9 }
0x50df   :  { %v18555_v53 = vpop.permute.xlu1 %10783  ;;  %v10754_v10 = vadd.f32 %v10748_v7, %v10711_v22 }
0x50e0   :  { %v10791_v0 = vmul.f32 %v11610_v47, %v18555_v53 }
0x50e2   :  { %v10797_v53 = vadd.f32 %v10791_v0, %v10754_v10 }
0x50e4   :  { %v18572_v39 = vpop.permute.xlu1 %10869  ;;  %v10840_v25 = vadd.f32 %v10834_v1, %v10797_v53 }
0x50e5   :  { %v10877_v44 = vmul.f32 %v11622_v28, %v18572_v39 }
0x50e7   :  { %v10883_v21 = vadd.f32 %v10877_v44, %v10840_v25 }
0x50e9   :  { %v10479_v8 = vpop.permute.xlu1 %10478 }
0x50ea   :  { %v10489_v60 = vmul.f32 %v11567_v41, %v10479_v8  ;;  %v10747_v41 = vmul.f32 %v11603_v37, %v10737_v29  ;;  %v10909_v8 = vpop.permute.xlu0 %10908 }
0x50eb   :  { %v10919_v34 = vmul.f32 %v11627_v30, %v10909_v8 }
0x50ec   :  { %v10495_v49 = vadd.f32 %v10489_v60, %v10446_v6  ;;  %v11613_v6 = vld [vmem:[%s18731_s12 + $0x1c0] sm:$0xff] }
0x50ed   :  { %v10831_v16 = vmul.f32 %v11613_v6, %v18540_v17  ;;  %v11619_v17 = vld [vmem:[%s18731_s12 + $0x1f0] sm:$0xff] }
0x50ee   :  { %v10565_v27 = vpop.permute.xlu1 %10564  ;;  %v10538_v55 = vadd.f32 %v10532_v31, %v10495_v49  ;;  %v10794_v49 = vadd.f32 %v10788_v52, %v10751_v54  ;;  %v10913_v31 = vpop.permute.xlu0 %10912 }
0x50ef   :  { %v10575_v56 = vmul.f32 %v11579_v3, %v10565_v27  ;;  %v11621_v3 = vld [vmem:[%s18731_s12 + $0x200] sm:$0xff]  ;;  %v10920_v29 = vmul.f32 %v11628_v4, %v10913_v31 }
0x50f0   :  { %v10837_v51 = vadd.f32 %v10831_v16, %v10794_v49 }
0x50f1   :  { %v10581_v33 = vadd.f32 %v10575_v56, %v10538_v55  ;;  %v11625_v56 = vld [vmem:[%s18731_s12 + $0x220] sm:$0xff]  ;;  %v10926_v23 = vadd.f32 %v10920_v29, %v10883_v21 }
0x50f3   :  { %v10608_v62 = vpop.permute.xlu1 %10607  ;;  %v10942_v7 = vsel %vm10927_vm6, %v10926_v23, 0.0 }
0x50f4   :  { %v10618_v35 = vmul.f32 %v11585_v12, %v10608_v62  ;;  %v10874_v12 = vmul.f32 %v11619_v17, %v18536_v61 }
0x50f6   :  { %v10624_v42 = vadd.f32 %v10618_v35, %v10581_v33  ;;  %v10880_v22 = vadd.f32 %v10874_v12, %v10837_v51 }
0x50f8   :  { %v10694_v59 = vpop.permute.xlu1 %10693  ;;  %v10667_v40 = vadd.f32 %v10661_v38, %v10624_v42 }
0x50f9   :  { %v10704_v11 = vmul.f32 %v11597_v46, %v10694_v59 }
0x50fb   :  { %v10710_v24 = vadd.f32 %v10704_v11, %v10667_v40  ;;  %v11629_v40 = vld [vmem:[%s18732_s13] ss:$0 sm:$0xff]  ;;  %s14757_s13 = scalar_lea.vmem %s11001_s1, 32 }
0x50fc   :  { %p14758_p0 = scmp.ne.s32.totalorder %s11001_s1, %s14757_s13  ;;  %p14763_p2 = scmp.lt.s32.totalorder %s14757_s13, %s14757_s13 }
0x50fd   :  { %v10780_v60 = vpop.permute.xlu1 %10779  ;;  %v10753_v13 = vadd.f32 %v10747_v41, %v10710_v24 }
0x50fe   :  { %v10790_v58 = vmul.f32 %v11609_v18, %v10780_v60  ;;  %p14764_p3 = por %p14763_p2, %p14762_p1 }
0x5100   :  { %v10796_v15 = vadd.f32 %v10790_v58, %v10753_v13  ;;  %p14765_p4 = pnand %p14764_p3, %p14758_p0 }
0x5102   :  { %v10866_v27 = vpop.permute.xlu1 %10865  ;;  %v10839_v39 = vadd.f32 %v10833_v43, %v10796_v15 }
0x5103   :  { %v10876_v45 = vmul.f32 %v11621_v3, %v10866_v27 }
0x5105   :  { %v10882_v55 = vadd.f32 %v10876_v45, %v10839_v39 }
0x5107   :  { %v10925_v26 = vadd.f32 %v10919_v34, %v10882_v55  ;;  %v10901_v5 = vpop.permute.xlu1 %10900 }
0x5108   :  { %v10917_v62 = vmul.f32 %v11625_v56, %v10901_v5 }
0x5109   :  { %v10940_v47 = vsel %vm10927_vm6, %v10925_v26, 0.0 }
0x510a   :  { %v10941_v33 = vadd.f32 %v10940_v47, %v10939_v2  ;;  %v10923_v35 = vadd.f32 %v10917_v62, %v10880_v22 }
0x510c   :  { %v10943_v50 = vadd.f32 %v10942_v7, %v10941_v33  ;;  %v10931_v36 = vsel %vm10927_vm6, %v10923_v35, 0.0 }
0x510d   :  { %v10932_v38 = vadd.f32 %v10931_v36, %v18491_v14 }
0x510e   :  { %v10944_v61 = vrot.slane %v10943_v50, 4 }
0x510f   :  { %v10933_v9 = vrot.slane %v10932_v38, 4 }
0x5110   :  { %v10945_v42 = vadd.f32 %v10944_v61, %v10943_v50 }
0x5111   :  { %v10934_v46 = vadd.f32 %v10933_v9, %v10932_v38 }
0x5112   :  { %v10946_v10 = vrot.slane %v10945_v42, 2 }
0x5113   :  { %v10935_v0 = vrot.slane %v10934_v46, 2 }
0x5114   :  { %v10947_v57 = vadd.f32 %v10946_v10, %v10945_v42 }
0x5115   :  { %v10936_v63 = vadd.f32 %v10935_v0, %v10934_v46 }
0x5116   :  { %v10948_v19 = vrot.slane %v10947_v57, 1 }
0x5117   :  { %v10937_v37 = vrot.slane %v10936_v63, 1 }
0x5118   :  { %v10949_v59 = vadd.f32 %v10948_v19, %v10947_v57 }
0x5119   :  { %v10938_v11 = vadd.f32 %v10937_v37, %v10936_v63 }
0x511b   :  { %v10951_v20 = vsel %vm10950_vm7, %v10938_v11, %v10949_v59 }
0x511c   :  { %v10959_v48 = vadd.f32 %v11629_v40, %v10951_v20 }
0x511e   :  { %v11630_v14 = vmul.f32 -1.442695, %v10959_v48 }
0x5120   :  { %14687 = vpow2.f32 %v11630_v14 }
0x512a   :  { %v14688_v41 = vpop.eup %14687 }
0x512b   :  { %v10963_v53 = vadd.f32 1.0, %v14688_v41 }
0x512d   :  { %14689 = vrcp.f32 %v10963_v53 }
0x5137   :  { %v14690_v24 = vpop.eup %14689 }
0x5138   :  { %10980 = vrot.lane.b32.xlu0 %v14690_v24, %s14846_s3  ;;  %v10966_v18 = vmul.f32 0.5, %v14690_v24  ;;  %10978 = vst.msk [vmem:[#allocation7] sm:$0x3] %vm10976_vm8, %v14690_v24 }
0x513a   :  { %v10967_v54 = vmul.f32 1.442695, %v10966_v18 }
0x513c   :  { %14691 = vpow2.f32 %v10967_v54 }
0x513d   :  { %14768 = shalt.err (!%p14765_p4)
}
0x513e   :  { %s14769_s30 = scalar_lea.hbm %s18735_s16, 32 }
0x513f   :  { %p14770_p5 = scmp.ne.s32.totalorder %s18735_s16, %s14769_s30  ;;  %p14773_p6 = scmp.lt.u32.totalorder %s14769_s30, %s18735_s16 }
0x5141   :  { %p14775_p7 = pnand %p14773_p6, %p14770_p5 }
0x5143   :  { %14778 = shalt.err (!%p14775_p7)
}
0x5144   :  { %11003 = dma.vmem_to_hbm [thread:$0]  %s11001_s1, 32, %s18735_s16, [#allocation8]  }
0x5145   :  { %s14848_s24 = smov [#allocation9]  }
0x5146   :  { %v14692_v8 = vpop.eup %14691  ;;  %s11010_s18 = sshll.u32 %s14848_s24, 4  ;;  %s11011_s18 = int_to_ptr.vmem [resolvable:$true] %s11010_s18 }
0x5147   :  { %10971 = vrot.lane.b32.xlu1 %v14692_v8, %s14846_s3  ;;  %s14779_s22 = scalar_lea.vmem %s11011_s18, 32  ;;  %p14784_p9 = scmp.lt.s32.totalorder %s11011_s18, %s11011_s18 }
0x5148   :  { %p14780_p8 = scmp.ne.s32.totalorder %s11011_s18, %s14779_s22  ;;  %p14785_p10 = scmp.lt.s32.totalorder %s14779_s22, %s14779_s22 }
0x514a   :  { %p14786_p11 = por %p14785_p10, %p14784_p9 }
0x514c   :  { %p14787_p12 = pnand %p14786_p11, %p14780_p8 }
0x51aa   :  { %v10981_v28 = vpop.permute.xlu0 %10980 }
0x51ab   :  { %10983 = vst.msk [vmem:[#allocation9] sm:$0x3] %vm10976_vm8, %v10981_v28 }
0x51ac   :  { %14790 = shalt.err (!%p14787_p12)
}
0x51ad   :  { %s14791_s29 = scalar_lea.hbm %s18736_s17, 32 }
0x51ae   :  { %p14792_p13 = scmp.ne.s32.totalorder %s18736_s17, %s14791_s29  ;;  %p14795_p0 = scmp.lt.u32.totalorder %s14791_s29, %s18736_s17 }
0x51b0   :  { %p14797_p1 = pnand %p14795_p0, %p14792_p13 }
0x51b2   :  { %14800 = shalt.err (!%p14797_p1)
}
0x51b3   :  { %11013 = dma.vmem_to_hbm [thread:$0]  %s11011_s18, 32, %s18736_s17, [#allocation8]   ;;  %v10969_v1 = vld [vmem:[%s18733_s14] sm:$0x3] }
0x51b4   :  { %s14849_s12 = smov [#allocation5]  }
0x51b5   :  { %s10990_s10 = sshll.u32 %s14849_s12, 4  ;;  %s10991_s10 = int_to_ptr.vmem [resolvable:$true] %s10990_s10 }
0x51b6   :  { %s14801_s3 = scalar_lea.vmem %s10991_s10, 32  ;;  %p14806_p3 = scmp.lt.s32.totalorder %s10991_s10, %s10991_s10 }
0x51b7   :  { %p14802_p2 = scmp.ne.s32.totalorder %s10991_s10, %s14801_s3  ;;  %p14807_p4 = scmp.lt.s32.totalorder %s14801_s3, %s14801_s3 }
0x51b9   :  { %v10972_v6 = vpop.permute.xlu1 %10971  ;;  %p14808_p5 = por %p14807_p4, %p14806_p3 }
0x51ba   :  { %v10974_v32 = vmul.f32 %v10972_v6, %v10969_v1 }
0x51bb   :  { %p14809_p6 = pnand %p14808_p5, %p14802_p2 }
0x51bc   :  { %v10975_v60 = vadd.f32 %v14690_v24, %v10974_v32 }
0x51be   :  { %10977 = vst.msk [vmem:[#allocation5] sm:$0x3] %vm10976_vm8, %v10975_v60 }
0x51bf   :  { %14812 = shalt.err (!%p14809_p6)
}
0x51c0   :  { %s18757_s1 = sld [smem:[#allocation14_spill]] }
0x51c6   :  { %s14813_s13 = scalar_lea.hbm %s18757_s1, 32 }
0x51c7   :  { %p14814_p7 = scmp.ne.s32.totalorder %s18757_s1, %s14813_s13  ;;  %p14817_p8 = scmp.lt.u32.totalorder %s14813_s13, %s18757_s1 }
0x51c9   :  { %p14819_p9 = pnand %p14817_p8, %p14814_p7 }
0x51cb   :  { %14822 = shalt.err (!%p14819_p9)
}
0x51cc   :  { %10993 = dma.vmem_to_hbm [thread:$0]  %s10991_s10, 32, %s18757_s1, [#allocation6]  }
0x51cd   :  { %14823 = dma.done.wait [#allocation6], 32  }
0x51ce   :  { %14824 = vsyncadd [#allocation6], 4294967264 }
0x51cf   :  { %14825 = dma.done.wait [#allocation8], 64  }
0x51d0   :  { %14826 = vsyncadd [#allocation8], 4294967232 }
0x51d1   :  { %11023 = vsyncpa [#allocation6], 1 }
0x51d2   :  { %11024 = vsyncpa [#allocation8], 1 }

</bundles_post_ra>
